<compile_context>
chip_gen: v7x
topology: tpu7x:2x2x1
jax: 0.10.0
libtpu: 0.0.40
codegen_flags: <defaults>
</compile_context>

<pallas_src>
import functools

import jax
import jax.numpy as jnp
from jax.experimental import pallas as pl
from jax.experimental.pallas import tpu as pltpu


def _round_up(x, m):
    return ((x + m - 1) // m) * m


# ----------------------------------------------------------------------------
# Pallas kernels: tiled matmul + bias (+ optional ReLU)
# ----------------------------------------------------------------------------
def _matmul_bias_act_single_k_kernel(x_ref, w_ref, b_ref, o_ref, *, apply_relu):
    # Single K tile: no accumulator, no zero-init, direct (possibly bf16) store.
    out = jnp.dot(x_ref[...], w_ref[...],
                  preferred_element_type=jnp.float32) + b_ref[...]
    if apply_relu:
        out = jnp.maximum(out, 0.0)
    o_ref[...] = out.astype(o_ref.dtype)


def _matmul_bias_act_multi_k_kernel(x_ref, w_ref, b_ref, o_ref, acc_ref, *,
                                    apply_relu):
    # General path: f32 VMEM scratch accumulator, cast once on the last step.
    k = pl.program_id(2)

    @pl.when(k == 0)
    def _():
        acc_ref[...] = jnp.zeros_like(acc_ref)

    acc_ref[...] += jnp.dot(x_ref[...], w_ref[...],
                            preferred_element_type=jnp.float32)

    @pl.when(k == pl.num_programs(2) - 1)
    def _():
        out = acc_ref[...] + b_ref[...]
        if apply_relu:
            out = jnp.maximum(out, 0.0)
        o_ref[...] = out.astype(o_ref.dtype)


def _pick_tm(M, Kp):
    """M tile: aim for 2 M-tiles (keeps both v7x TensorCores busy, only 2
    grid steps on single-TC v5e/v6e) with minimal row padding; cap the bf16
    x tile at ~2 MiB so large batches still pipeline (double-buffered ~4 MiB,
    well within v7x's 64 MiB VMEM)."""
    M8 = _round_up(M, 8)
    if M8 <= 8:
        return M8, M8
    half = _round_up(-(-M // 2), 8)
    cap = max(128, ((2 << 20) // (Kp * 2)) // 8 * 8)
    tm = min(half, cap)
    return tm, _round_up(M, tm)


def matmul_bias_act(x, w_p, b_p, *, apply_relu, out_dtype=jnp.float32):
    """y = act(x @ w_p + b_p).

    x:   (M, K) activations (cast to bf16 here; only activation padding is
         done per call, weights are pre-padded once).
    w_p: (Kp, Np) bfloat16, pre-padded at param-prep time (zero rows/cols).
    b_p: (1, Np) float32, pre-padded at param-prep time.
    Returns (M, Np) `out_dtype` (padded output columns are inert).
    """
    M, K = x.shape
    Kp, Np = w_p.shape
    assert K <= Kp and b_p.shape == (1, Np)

    tm, Mp = _pick_tm(M, Kp)
    tn = Np if Np <= 512 else 512
    # Single K tile whenever the bf16 weight tile stays small in VMEM
    # (true for every layer of this network, incl. fc1 at tk=4096 -> 4 MiB).
    if Kp * tn * 2 <= 6 * (1 << 20):
        tk = Kp
    elif Kp % 2048 == 0:
        tk = 2048
    elif Kp % 1024 == 0:
        tk = 1024
    elif Kp % 512 == 0:
        tk = 512
    else:
        tk = 128
    n_k = Kp // tk

    xp = x.astype(jnp.bfloat16)
    if (Mp, Kp) != (M, K):
        xp = jnp.pad(xp, ((0, Mp - M), (0, Kp - K)))

    grid = (Mp // tm, Np // tn, n_k)
    if n_k == 1:
        kernel = functools.partial(_matmul_bias_act_single_k_kernel,
                                   apply_relu=apply_relu)
        scratch = []
    else:
        kernel = functools.partial(_matmul_bias_act_multi_k_kernel,
                                   apply_relu=apply_relu)
        scratch = [pltpu.VMEM((tm, tn), jnp.float32)]

    out_isz = jnp.dtype(out_dtype).itemsize
    out = pl.pallas_call(
        kernel,
        out_shape=jax.ShapeDtypeStruct((Mp, Np), out_dtype),
        grid_spec=pltpu.PrefetchScalarGridSpec(
            num_scalar_prefetch=0,
            grid=grid,
            in_specs=[
                pl.BlockSpec((tm, tk), lambda i, j, k: (i, k)),
                pl.BlockSpec((tk, tn), lambda i, j, k: (k, j)),
                pl.BlockSpec((1, tn), lambda i, j, k: (0, j)),
            ],
            out_specs=pl.BlockSpec((tm, tn), lambda i, j, k: (i, j)),
            scratch_shapes=scratch,
        ),
        compiler_params=pltpu.CompilerParams(
            dimension_semantics=("parallel", "parallel", "arbitrary")),
        cost_estimate=pl.CostEstimate(
            flops=2 * Mp * Kp * Np,
            transcendentals=0,
            bytes_accessed=Mp * Kp * 2 + Kp * Np * 2 + Np * 4 + Mp * Np * out_isz),
    )(xp, w_p, b_p)

    return out[:M] if Mp != M else out


# ----------------------------------------------------------------------------
# Fused fc1+fc2: flatten -> Linear(4096,512)+ReLU -> Linear(512,Np)
# Both weight slabs (~4.1 MiB bf16) sit in VMEM for a single pallas_call.
# ----------------------------------------------------------------------------
def _fc_fused_kernel(x_ref, w1_ref, b1_ref, w2_ref, b2_ref, o_ref):
    h = jnp.dot(x_ref[...], w1_ref[...],
                preferred_element_type=jnp.float32) + b1_ref[...]
    h = jnp.maximum(h, 0.0).astype(jnp.bfloat16)
    o_ref[...] = (jnp.dot(h, w2_ref[...],
                          preferred_element_type=jnp.float32) + b2_ref[...])


def fc_fused(x, w1_p, b1_p, w2_p, b2_p):
    M, K1 = x.shape
    K1w, N1 = w1_p.shape
    K2, N2 = w2_p.shape
    assert K1 == K1w and N1 == K2

    Mp = _round_up(max(M, 8), 8)
    xp = x.astype(jnp.bfloat16)
    if Mp != M:
        xp = jnp.pad(xp, ((0, Mp - M), (0, 0)))

    # TODO(synk): at large batch, split the M axis into a "parallel" grid so
    # both v7x TensorCores share the FC work; at agent batch sizes this call
    # is launch-latency bound and a single program is the right choice.
    out = pl.pallas_call(
        _fc_fused_kernel,
        out_shape=jax.ShapeDtypeStruct((Mp, N2), jnp.float32),
        grid_spec=pltpu.PrefetchScalarGridSpec(
            num_scalar_prefetch=0,
            grid=(1,),
            in_specs=[
                pl.BlockSpec((Mp, K1), lambda i: (0, 0)),
                pl.BlockSpec((K1, N1), lambda i: (0, 0)),
                pl.BlockSpec((1, N1), lambda i: (0, 0)),
                pl.BlockSpec((K2, N2), lambda i: (0, 0)),
                pl.BlockSpec((1, N2), lambda i: (0, 0)),
            ],
            out_specs=pl.BlockSpec((Mp, N2), lambda i: (0, 0)),
        ),
        compiler_params=pltpu.CompilerParams(
            dimension_semantics=("arbitrary",)),
        cost_estimate=pl.CostEstimate(
            flops=2 * Mp * (K1 * N1 + K2 * N2),
            transcendentals=0,
            bytes_accessed=(Mp * K1 + K1 * N1 + K2 * N2) * 2
            + (N1 + N2 + Mp * N2) * 4),
    )(xp, w1_p, b1_p, w2_p, b2_p)

    return out[:M] if Mp != M else out


# ----------------------------------------------------------------------------
# Conv layer = NHWC im2col (cheap XLA glue) + Pallas matmul kernel
# ----------------------------------------------------------------------------
def _im2col_nhwc(x, k, s):
    """x:(N,H,W,C) -> patches (N*OH*OW, k*k*C); feature order (kh, kw, c).

    The k*k offsets are stacked on a NEW non-minor axis so C stays lane-minor
    in every slice (no minor-dim concatenation relayout)."""
    N, H, W, C = x.shape
    OH = (H - k) // s + 1
    OW = (W - k) // s + 1
    cols = []
    for i in range(k):
        for j in range(k):
            cols.append(x[:, i:i + s * (OH - 1) + 1:s,
                          j:j + s * (OW - 1) + 1:s, :])       # (N,OH,OW,C)
    patches = jnp.stack(cols, axis=3)                         # (N,OH,OW,k*k,C)
    return patches.reshape(N * OH * OW, k * k * C), OH, OW


def conv2d_relu(x, w_p, b_p, *, k, s, c_out):
    """x:(N,H,W,Cin_real) -> (N,OH,OW,c_out) bf16, ReLU applied.

    Only the real output channels are kept (the 128-lane store pad is sliced
    off here) so the next layer's K dimension carries no dead columns."""
    N = x.shape[0]
    cols, OH, OW = _im2col_nhwc(x, k, s)
    y = matmul_bias_act(cols, w_p, b_p, apply_relu=True, out_dtype=jnp.bfloat16)
    return y[:, :c_out].reshape(N, OH, OW, c_out)


# ----------------------------------------------------------------------------
# DQN forward
# ----------------------------------------------------------------------------
def dqn_forward(params, x, *, n_actions):
    # x is NCHW float32 (N, 3, 96, 96) — same interface as PyTorch.
    x = jnp.transpose(x, (0, 2, 3, 1)).astype(jnp.bfloat16)   # -> NHWC, bf16 once
    x = conv2d_relu(x, params["conv1_w"], params["conv1_b"], k=8, s=4, c_out=32)
    x = conv2d_relu(x, params["conv2_w"], params["conv2_b"], k=4, s=2, c_out=64)
    x = conv2d_relu(x, params["conv3_w"], params["conv3_b"], k=3, s=1, c_out=64)
    # Flatten in (h, w, c) order; fc1_w rows were permuted once at prep to
    # absorb PyTorch's NCHW (c, h, w) flatten order.
    x = x.reshape(x.shape[0], -1)                              # (N, 4096) bf16
    q = fc_fused(x, params["fc1_w"], params["fc1_b"],
                 params["fc2_w"], params["fc2_b"])
    return q[:, :n_actions]


# ----------------------------------------------------------------------------
# Parameter init (PyTorch layout) + one-time kernel-ready prep
# ----------------------------------------------------------------------------
def init_params(key, n_actions):
    """Deterministic init; PyTorch-style uniform(-1/sqrt(fan_in), 1/sqrt(fan_in))."""
    def u(k, shape, fan_in):
        bound = 1.0 / jnp.sqrt(jnp.float32(fan_in))
        return jax.random.uniform(k, shape, jnp.float32, -bound, bound)

    ks = jax.random.split(key, 10)
    fc_in = 64 * 8 * 8  # = 4096, matches _get_conv_output() for 96x96 input
    return {
        "conv1_w": u(ks[0], (32, 3, 8, 8), 3 * 8 * 8),
        "conv1_b": u(ks[1], (32,), 3 * 8 * 8),
        "conv2_w": u(ks[2], (64, 32, 4, 4), 32 * 4 * 4),
        "conv2_b": u(ks[3], (64,), 32 * 4 * 4),
        "conv3_w": u(ks[4], (64, 64, 3, 3), 64 * 3 * 3),
        "conv3_b": u(ks[5], (64,), 64 * 3 * 3),
        "fc1_w": u(ks[6], (fc_in, 512), fc_in),   # (in, out), NCHW flatten order
        "fc1_b": u(ks[7], (512,), fc_in),
        "fc2_w": u(ks[8], (512, n_actions), 512),
        "fc2_b": u(ks[9], (n_actions,), 512),
    }


def prepare_params(raw):
    """One-time conversion of PyTorch-layout params into pre-padded bf16
    matmul weights / f32 biases (no per-forward weight padding).

    Conv weights use the REAL input channel count (no 128-lane K slab):
    conv1 K=192->256, conv2 K=512, conv3 K=576->640."""
    def conv_pack(w, b):
        O, C, kh, kw = w.shape
        wk = jnp.transpose(w, (2, 3, 1, 0)).reshape(kh * kw * C, O)  # (kh,kw,c) rows
        Kp = _round_up(wk.shape[0], 128)
        Op = _round_up(O, 128)
        wk = jnp.pad(wk, ((0, Kp - wk.shape[0]), (0, Op - O)))
        bp = jnp.pad(b, (0, Op - O)).reshape(1, Op)
        return wk.astype(jnp.bfloat16), bp.astype(jnp.float32)

    p = {}
    p["conv1_w"], p["conv1_b"] = conv_pack(raw["conv1_w"], raw["conv1_b"])
    p["conv2_w"], p["conv2_b"] = conv_pack(raw["conv2_w"], raw["conv2_b"])
    p["conv3_w"], p["conv3_b"] = conv_pack(raw["conv3_w"], raw["conv3_b"])

    # fc1: permute rows from PyTorch NCHW flatten (c,h,w) to our NHWC flatten
    # (h,w,c) order — done once here instead of transposing activations.
    fc1_w = raw["fc1_w"].reshape(64, 8, 8, 512).transpose(1, 2, 0, 3)
    p["fc1_w"] = fc1_w.reshape(64 * 8 * 8, 512).astype(jnp.bfloat16)
    p["fc1_b"] = raw["fc1_b"].reshape(1, 512).astype(jnp.float32)

    n_act = raw["fc2_w"].shape[1]
    Np = _round_up(n_act, 128)
    p["fc2_w"] = jnp.pad(raw["fc2_w"], ((0, 0), (0, Np - n_act))).astype(jnp.bfloat16)
    p["fc2_b"] = jnp.pad(raw["fc2_b"], (0, Np - n_act)).reshape(1, Np).astype(jnp.float32)
    return p


if __name__ == "__main__":
    n_actions = 5
    batch = 2
    # TODO(synk): batching more states per call remains the single biggest
    # lever — at M=2 the FC tiles occupy 8 of 256 MXU rows; no in-kernel
    # change recovers the idle M dimension.

    key = jax.random.PRNGKey(0)
    k_param, k_x = jax.random.split(key)
    raw_params = init_params(k_param, n_actions)
    params = prepare_params(raw_params)          # one-time, kernel-ready form

    # 96x96 spatial is required: fc_input_dim is hard-wired to a 96x96 input.
    x = jax.random.normal(k_x, (batch, 3, 96, 96), jnp.float32)

    fwd = jax.jit(functools.partial(dqn_forward, n_actions=n_actions))
    q_values = jax.block_until_ready(fwd(params, x))
    assert q_values.shape == (batch, n_actions), q_values.shape
    assert bool(jnp.all(jnp.isfinite(q_values)))
    print("KERNEL_OK")
</pallas_src>

<mosaic_0001>
module attributes {stable_mosaic.version = 11 : i64} {
  func.func @_matmul_bias_act_single_k_kernel(%arg0: i32, %arg1: i32, %arg2: i32, %arg3: memref<536x256xbf16, #tpu.memory_space<vmem>>, %arg4: memref<256x128xbf16, #tpu.memory_space<vmem>>, %arg5: memref<1x128xf32, #tpu.memory_space<vmem>>, %arg6: memref<536x128xbf16, #tpu.memory_space<vmem>>) attributes {dimension_semantics = [#tpu.dimension_semantics<parallel>, #tpu.dimension_semantics<parallel>, #tpu.dimension_semantics<arbitrary>], iteration_bounds = array<i64: 2, 1, 1>, scalar_prefetch = 0 : i64, scratch_operands = 0 : i64, tpu.core_type = #tpu.core_type<tc>, window_params = [{transform_indices = @transform_0, window_bounds = array<i64: 536, 256>}, {transform_indices = @transform_1, window_bounds = array<i64: 256, 128>}, {transform_indices = @transform_2, window_bounds = array<i64: 1, 128>}, {transform_indices = @transform_3, window_bounds = array<i64: 536, 128>}]} {
    %c0 = arith.constant 0 : index
    %c0_0 = arith.constant 0 : index
    %0 = vector.load %arg3[%c0, %c0_0] : memref<536x256xbf16, #tpu.memory_space<vmem>>, vector<536x256xbf16>
    %c0_1 = arith.constant 0 : index
    %c0_2 = arith.constant 0 : index
    %1 = vector.load %arg4[%c0_1, %c0_2] : memref<256x128xbf16, #tpu.memory_space<vmem>>, vector<256x128xbf16>
    %cst = arith.constant dense<0.000000e+00> : vector<536x128xf32>
    %2 = tpu.matmul %0, %1, %cst {dimension_numbers = #tpu.dot_dimension_numbers<[1], [0], [0], [1], [0, 0, 1, 1], [], []>} : vector<536x256xbf16>, vector<256x128xbf16>, vector<536x128xf32> -> vector<536x128xf32>
    %c0_3 = arith.constant 0 : index
    %c0_4 = arith.constant 0 : index
    %3 = vector.load %arg5[%c0_3, %c0_4] : memref<1x128xf32, #tpu.memory_space<vmem>>, vector<1x128xf32>
    %4 = vector.broadcast %3 : vector<1x128xf32> to vector<536x128xf32>
    %5 = arith.addf %2, %4 : vector<536x128xf32>
    %cst_5 = arith.constant 0.000000e+00 : f32
    %6 = vector.broadcast %cst_5 : f32 to vector<536x128xf32>
    %7 = arith.maximumf %5, %6 : vector<536x128xf32>
    %8 = arith.truncf %7 : vector<536x128xf32> to vector<536x128xbf16>
    %c0_6 = arith.constant 0 : index
    %c0_7 = arith.constant 0 : index
    %9 = vector.load %arg6[%c0_6, %c0_7] : memref<536x128xbf16, #tpu.memory_space<vmem>>, vector<536x128xbf16>
    tpu.vector_store %arg6[%c0_6, %c0_7], %8 {strides = array<i32>} : memref<536x128xbf16, #tpu.memory_space<vmem>>, vector<536x128xbf16>,
    return
  }
  func.func @transform_0(%arg0: i32, %arg1: i32, %arg2: i32) -> (i32, i32) {
    %c0_i32 = arith.constant 0 : i32
    return %arg0, %arg2 : i32, i32
  }
  func.func @transform_1(%arg0: i32, %arg1: i32, %arg2: i32) -> (i32, i32) {
    %c0_i32 = arith.constant 0 : i32
    return %arg2, %arg1 : i32, i32
  }
  func.func @transform_2(%arg0: i32, %arg1: i32, %arg2: i32) -> (i32, i32) {
    %c0_i32 = arith.constant 0 : i32
    %c0_i32_0 = arith.constant 0 : i32
    return %c0_i32, %arg1 : i32, i32
  }
  func.func @transform_3(%arg0: i32, %arg1: i32, %arg2: i32) -> (i32, i32) {
    %c0_i32 = arith.constant 0 : i32
    return %arg0, %arg1 : i32, i32
  }
}

module attributes {stable_mosaic.version = 11 : i64} {
  func.func @_matmul_bias_act_single_k_kernel(%arg0: i32, %arg1: i32, %arg2: i32, %arg3: memref<104x512xbf16, #tpu.memory_space<vmem>>, %arg4: memref<512x128xbf16, #tpu.memory_space<vmem>>, %arg5: memref<1x128xf32, #tpu.memory_space<vmem>>, %arg6: memref<104x128xbf16, #tpu.memory_space<vmem>>) attributes {dimension_semantics = [#tpu.dimension_semantics<parallel>, #tpu.dimension_semantics<parallel>, #tpu.dimension_semantics<arbitrary>], iteration_bounds = array<i64: 2, 1, 1>, scalar_prefetch = 0 : i64, scratch_operands = 0 : i64, tpu.core_type = #tpu.core_type<tc>, window_params = [{transform_indices = @transform_0, window_bounds = array<i64: 104, 512>}, {transform_indices = @transform_1, window_bounds = array<i64: 512, 128>}, {transform_indices = @transform_2, window_bounds = array<i64: 1, 128>}, {transform_indices = @transform_3, window_bounds = array<i64: 104, 128>}]} {
    %c0 = arith.constant 0 : index
    %c0_0 = arith.constant 0 : index
    %0 = vector.load %arg3[%c0, %c0_0] : memref<104x512xbf16, #tpu.memory_space<vmem>>, vector<104x512xbf16>
    %c0_1 = arith.constant 0 : index
    %c0_2 = arith.constant 0 : index
    %1 = vector.load %arg4[%c0_1, %c0_2] : memref<512x128xbf16, #tpu.memory_space<vmem>>, vector<512x128xbf16>
    %cst = arith.constant dense<0.000000e+00> : vector<104x128xf32>
    %2 = tpu.matmul %0, %1, %cst {dimension_numbers = #tpu.dot_dimension_numbers<[1], [0], [0], [1], [0, 0, 1, 1], [], []>} : vector<104x512xbf16>, vector<512x128xbf16>, vector<104x128xf32> -> vector<104x128xf32>
    %c0_3 = arith.constant 0 : index
    %c0_4 = arith.constant 0 : index
    %3 = vector.load %arg5[%c0_3, %c0_4] : memref<1x128xf32, #tpu.memory_space<vmem>>, vector<1x128xf32>
    %4 = vector.broadcast %3 : vector<1x128xf32> to vector<104x128xf32>
    %5 = arith.addf %2, %4 : vector<104x128xf32>
    %cst_5 = arith.constant 0.000000e+00 : f32
    %6 = vector.broadcast %cst_5 : f32 to vector<104x128xf32>
    %7 = arith.maximumf %5, %6 : vector<104x128xf32>
    %8 = arith.truncf %7 : vector<104x128xf32> to vector<104x128xbf16>
    %c0_6 = arith.constant 0 : index
    %c0_7 = arith.constant 0 : index
    %9 = vector.load %arg6[%c0_6, %c0_7] : memref<104x128xbf16, #tpu.memory_space<vmem>>, vector<104x128xbf16>
    tpu.vector_store %arg6[%c0_6, %c0_7], %8 {strides = array<i32>} : memref<104x128xbf16, #tpu.memory_space<vmem>>, vector<104x128xbf16>,
    return
  }
  func.func @transform_0(%arg0: i32, %arg1: i32, %arg2: i32) -> (i32, i32) {
    %c0_i32 = arith.constant 0 : i32
    return %arg0, %arg2 : i32, i32
  }
  func.func @transform_1(%arg0: i32, %arg1: i32, %arg2: i32) -> (i32, i32) {
    %c0_i32 = arith.constant 0 : i32
    return %arg2, %arg1 : i32, i32
  }
  func.func @transform_2(%arg0: i32, %arg1: i32, %arg2: i32) -> (i32, i32) {
    %c0_i32 = arith.constant 0 : i32
    %c0_i32_0 = arith.constant 0 : i32
    return %c0_i32, %arg1 : i32, i32
  }
  func.func @transform_3(%arg0: i32, %arg1: i32, %arg2: i32) -> (i32, i32) {
    %c0_i32 = arith.constant 0 : i32
    return %arg0, %arg1 : i32, i32
  }
}

module attributes {stable_mosaic.version = 11 : i64} {
  func.func @_matmul_bias_act_single_k_kernel(%arg0: i32, %arg1: i32, %arg2: i32, %arg3: memref<64x640xbf16, #tpu.memory_space<vmem>>, %arg4: memref<640x128xbf16, #tpu.memory_space<vmem>>, %arg5: memref<1x128xf32, #tpu.memory_space<vmem>>, %arg6: memref<64x128xbf16, #tpu.memory_space<vmem>>) attributes {dimension_semantics = [#tpu.dimension_semantics<parallel>, #tpu.dimension_semantics<parallel>, #tpu.dimension_semantics<arbitrary>], iteration_bounds = array<i64: 2, 1, 1>, scalar_prefetch = 0 : i64, scratch_operands = 0 : i64, tpu.core_type = #tpu.core_type<tc>, window_params = [{transform_indices = @transform_0, window_bounds = array<i64: 64, 640>}, {transform_indices = @transform_1, window_bounds = array<i64: 640, 128>}, {transform_indices = @transform_2, window_bounds = array<i64: 1, 128>}, {transform_indices = @transform_3, window_bounds = array<i64: 64, 128>}]} {
    %c0 = arith.constant 0 : index
    %c0_0 = arith.constant 0 : index
    %0 = vector.load %arg3[%c0, %c0_0] : memref<64x640xbf16, #tpu.memory_space<vmem>>, vector<64x640xbf16>
    %c0_1 = arith.constant 0 : index
    %c0_2 = arith.constant 0 : index
    %1 = vector.load %arg4[%c0_1, %c0_2] : memref<640x128xbf16, #tpu.memory_space<vmem>>, vector<640x128xbf16>
    %cst = arith.constant dense<0.000000e+00> : vector<64x128xf32>
    %2 = tpu.matmul %0, %1, %cst {dimension_numbers = #tpu.dot_dimension_numbers<[1], [0], [0], [1], [0, 0, 1, 1], [], []>} : vector<64x640xbf16>, vector<640x128xbf16>, vector<64x128xf32> -> vector<64x128xf32>
    %c0_3 = arith.constant 0 : index
    %c0_4 = arith.constant 0 : index
    %3 = vector.load %arg5[%c0_3, %c0_4] : memref<1x128xf32, #tpu.memory_space<vmem>>, vector<1x128xf32>
    %4 = vector.broadcast %3 : vector<1x128xf32> to vector<64x128xf32>
    %5 = arith.addf %2, %4 : vector<64x128xf32>
    %cst_5 = arith.constant 0.000000e+00 : f32
    %6 = vector.broadcast %cst_5 : f32 to vector<64x128xf32>
    %7 = arith.maximumf %5, %6 : vector<64x128xf32>
    %8 = arith.truncf %7 : vector<64x128xf32> to vector<64x128xbf16>
    %c0_6 = arith.constant 0 : index
    %c0_7 = arith.constant 0 : index
    %9 = vector.load %arg6[%c0_6, %c0_7] : memref<64x128xbf16, #tpu.memory_space<vmem>>, vector<64x128xbf16>
    tpu.vector_store %arg6[%c0_6, %c0_7], %8 {strides = array<i32>} : memref<64x128xbf16, #tpu.memory_space<vmem>>, vector<64x128xbf16>,
    return
  }
  func.func @transform_0(%arg0: i32, %arg1: i32, %arg2: i32) -> (i32, i32) {
    %c0_i32 = arith.constant 0 : i32
    return %arg0, %arg2 : i32, i32
  }
  func.func @transform_1(%arg0: i32, %arg1: i32, %arg2: i32) -> (i32, i32) {
    %c0_i32 = arith.constant 0 : i32
    return %arg2, %arg1 : i32, i32
  }
  func.func @transform_2(%arg0: i32, %arg1: i32, %arg2: i32) -> (i32, i32) {
    %c0_i32 = arith.constant 0 : i32
    %c0_i32_0 = arith.constant 0 : i32
    return %c0_i32, %arg1 : i32, i32
  }
  func.func @transform_3(%arg0: i32, %arg1: i32, %arg2: i32) -> (i32, i32) {
    %c0_i32 = arith.constant 0 : i32
    return %arg0, %arg1 : i32, i32
  }
}

module attributes {stable_mosaic.version = 11 : i64} {
  func.func @_fc_fused_kernel(%arg0: i32, %arg1: memref<8x4096xbf16, #tpu.memory_space<vmem>>, %arg2: memref<4096x512xbf16, #tpu.memory_space<vmem>>, %arg3: memref<1x512xf32, #tpu.memory_space<vmem>>, %arg4: memref<512x128xbf16, #tpu.memory_space<vmem>>, %arg5: memref<1x128xf32, #tpu.memory_space<vmem>>, %arg6: memref<8x128xf32, #tpu.memory_space<vmem>>) attributes {dimension_semantics = [#tpu.dimension_semantics<arbitrary>], iteration_bounds = array<i64: 1>, scalar_prefetch = 0 : i64, scratch_operands = 0 : i64, tpu.core_type = #tpu.core_type<tc>, window_params = [{pipeline_mode = #tpu.pipeline_mode<synchronous>, transform_indices = @transform_0, window_bounds = array<i64: 8, 4096>}, {pipeline_mode = #tpu.pipeline_mode<synchronous>, transform_indices = @transform_1, window_bounds = array<i64: 4096, 512>}, {pipeline_mode = #tpu.pipeline_mode<synchronous>, transform_indices = @transform_2, window_bounds = array<i64: 1, 512>}, {pipeline_mode = #tpu.pipeline_mode<synchronous>, transform_indices = @transform_3, window_bounds = array<i64: 512, 128>}, {pipeline_mode = #tpu.pipeline_mode<synchronous>, transform_indices = @transform_4, window_bounds = array<i64: 1, 128>}, {pipeline_mode = #tpu.pipeline_mode<synchronous>, transform_indices = @transform_5, window_bounds = array<i64: 8, 128>}]} {
    %c0 = arith.constant 0 : index
    %c0_0 = arith.constant 0 : index
    %0 = vector.load %arg1[%c0, %c0_0] : memref<8x4096xbf16, #tpu.memory_space<vmem>>, vector<8x4096xbf16>
    %c0_1 = arith.constant 0 : index
    %c0_2 = arith.constant 0 : index
    %1 = vector.load %arg2[%c0_1, %c0_2] : memref<4096x512xbf16, #tpu.memory_space<vmem>>, vector<4096x512xbf16>
    %cst = arith.constant dense<0.000000e+00> : vector<8x512xf32>
    %2 = tpu.matmul %0, %1, %cst {dimension_numbers = #tpu.dot_dimension_numbers<[1], [0], [0], [1], [0, 0, 1, 1], [], []>} : vector<8x4096xbf16>, vector<4096x512xbf16>, vector<8x512xf32> -> vector<8x512xf32>
    %c0_3 = arith.constant 0 : index
    %c0_4 = arith.constant 0 : index
    %3 = vector.load %arg3[%c0_3, %c0_4] : memref<1x512xf32, #tpu.memory_space<vmem>>, vector<1x512xf32>
    %4 = vector.broadcast %3 : vector<1x512xf32> to vector<8x512xf32>
    %5 = arith.addf %2, %4 : vector<8x512xf32>
    %cst_5 = arith.constant 0.000000e+00 : f32
    %6 = vector.broadcast %cst_5 : f32 to vector<8x512xf32>
    %7 = arith.maximumf %5, %6 : vector<8x512xf32>
    %8 = arith.truncf %7 : vector<8x512xf32> to vector<8x512xbf16>
    %c0_6 = arith.constant 0 : index
    %c0_7 = arith.constant 0 : index
    %9 = vector.load %arg4[%c0_6, %c0_7] : memref<512x128xbf16, #tpu.memory_space<vmem>>, vector<512x128xbf16>
    %cst_8 = arith.constant dense<0.000000e+00> : vector<8x128xf32>
    %10 = tpu.matmul %8, %9, %cst_8 {dimension_numbers = #tpu.dot_dimension_numbers<[1], [0], [0], [1], [0, 0, 1, 1], [], []>} : vector<8x512xbf16>, vector<512x128xbf16>, vector<8x128xf32> -> vector<8x128xf32>
    %c0_9 = arith.constant 0 : index
    %c0_10 = arith.constant 0 : index
    %11 = vector.load %arg5[%c0_9, %c0_10] : memref<1x128xf32, #tpu.memory_space<vmem>>, vector<1x128xf32>
    %12 = vector.broadcast %11 : vector<1x128xf32> to vector<8x128xf32>
    %13 = arith.addf %10, %12 : vector<8x128xf32>
    %c0_11 = arith.constant 0 : index
    %c0_12 = arith.constant 0 : index
    %14 = vector.load %arg6[%c0_11, %c0_12] : memref<8x128xf32, #tpu.memory_space<vmem>>, vector<8x128xf32>
    tpu.vector_store %arg6[%c0_11, %c0_12], %13 {strides = array<i32>} : memref<8x128xf32, #tpu.memory_space<vmem>>, vector<8x128xf32>,
    return
  }
  func.func @transform_0(%arg0: i32) -> (i32, i32) {
    %c0_i32 = arith.constant 0 : i32
    %c0_i32_0 = arith.constant 0 : i32
    %c0_i32_1 = arith.constant 0 : i32
    return %c0_i32, %c0_i32_0 : i32, i32
  }
  func.func @transform_1(%arg0: i32) -> (i32, i32) {
    %c0_i32 = arith.constant 0 : i32
    %c0_i32_0 = arith.constant 0 : i32
    %c0_i32_1 = arith.constant 0 : i32
    return %c0_i32, %c0_i32_0 : i32, i32
  }
  func.func @transform_2(%arg0: i32) -> (i32, i32) {
    %c0_i32 = arith.constant 0 : i32
    %c0_i32_0 = arith.constant 0 : i32
    %c0_i32_1 = arith.constant 0 : i32
    return %c0_i32, %c0_i32_0 : i32, i32
  }
  func.func @transform_3(%arg0: i32) -> (i32, i32) {
    %c0_i32 = arith.constant 0 : i32
    %c0_i32_0 = arith.constant 0 : i32
    %c0_i32_1 = arith.constant 0 : i32
    return %c0_i32, %c0_i32_0 : i32, i32
  }
  func.func @transform_4(%arg0: i32) -> (i32, i32) {
    %c0_i32 = arith.constant 0 : i32
    %c0_i32_0 = arith.constant 0 : i32
    %c0_i32_1 = arith.constant 0 : i32
    return %c0_i32, %c0_i32_0 : i32, i32
  }
  func.func @transform_5(%arg0: i32) -> (i32, i32) {
    %c0_i32 = arith.constant 0 : i32
    %c0_i32_0 = arith.constant 0 : i32
    %c0_i32_1 = arith.constant 0 : i32
    return %c0_i32, %c0_i32_0 : i32, i32
  }
}

</mosaic_0001>

<bundles_post_ra>
// kernel: dqn_forward.4
= control target key start
LH: loop header
LB: loop body
LE: loop exit
PB: predicated region body
PF: predicated region fallthrough
CT: control target
= control target key end

     0   :  { %s2276_s12 = smov 0   ;;  %s2278_s13 = smov 0   ;;  %s2570_s0 = inlined_call_operand.vmem [shape: bf16[1072,256], index: 0, kind: input, shape index: {}]   ;;  %s2571_s1 = inlined_call_operand.vmem [shape: bf16[256,128], index: 1, kind: input, shape index: {}]   ;;  %s2572_s2 = inlined_call_operand.vmem [shape: f32[1,128], index: 2, kind: input, shape index: {}]   ;;  %s2573_s3 = inlined_call_operand.vmem [shape: bf16[1072,128], index: 3, kind: output, shape index: {}]  }
   0x1   :  { %s2280_s14 = smov 0  }
   0x2 LB: > { %s32_s15 = sadd.s32 1, %s2249_s13  ;;  %p1634_p0 = scmp.ge.s32.totalorder %s2253_s14, 1  ;;  %s2253_s14 = sphi %s2280_s14, %s13_s14   ;;  %s2249_s13 = sphi %s2278_s13, %s2575_s13   ;;  %s2245_s12 = sphi %s2276_s12, %s2574_s12  }
   0x3   : > { %p34_p1 = scmp.ge.s32.totalorder %s32_s15, 2  ;;  %p191_p2 = scmp.lt.s32.totalorder %s2253_s14, 3 }
   0x5   : > { %s2577_s15 = smov (%p34_p1, %s32_s15), 0  ;;  %p192_p3 = pnand %p1634_p0, %p191_p2 }
   0x6   : > { %v2114_v0 = vld [vmem:[%s2571_s1] sm:$0xff] (!%p192_p3)   ;;  %v2255_v1 = vmov (!%p192_p3), 0   ;;  %s234_s18 = smul.u32 (!%p192_p3), 67, %s2245_s12  ;;  %v2115_v2 = vld [vmem:[%s2571_s1 + $0x8] sm:$0xff] (!%p192_p3)   ;;  %v2116_v3 = vld [vmem:[%s2571_s1 + $0x10] sm:$0xff] (!%p192_p3)  }
   0x7   : > { %195 = sbr.rel (%p192_p3) target bundleno = 420 (0x1a4), region = 32  ;;  %807 = vmatprep.subr.bf16.mxu0 (!%p192_p3), %v2255_v1  ;;  %2057 = vmatprep.subr.bf16.mxu1 (!%p192_p3), %v2255_v1  ;;  %v2117_v4 = vld [vmem:[%s2571_s1 + $0x18] sm:$0xff] (!%p192_p3)   ;;  %v2118_v5 = vld [vmem:[%s2571_s1 + $0x20] sm:$0xff] (!%p192_p3)   ;;  %v2119_v7 = vld [vmem:[%s2571_s1 + $0x28] sm:$0xff] (!%p192_p3)  }
   0x8   : > { %808 = vmatpush1.bf16.msra.mxu0 (!%p192_p3), %v2114_v0  ;;  %2073 = vmatpush1.bf16.msra.mxu1 (!%p192_p3), %v2114_v0  ;;  %p236_p4 = scmp.lt.s32.totalorder (!%p192_p3), %s234_s18, 133  ;;  %v2120_v9 = vld [vmem:[%s2571_s1 + $0x30] sm:$0xff] (!%p192_p3)   ;;  %v2121_v10 = vld [vmem:[%s2571_s1 + $0x38] sm:$0xff] (!%p192_p3)   ;;  %v2122_v11 = vld [vmem:[%s2571_s1 + $0x40] sm:$0xff] (!%p192_p3)  }
   0x9   : > { %809 = vmatprep.subr.bf16.mxu0 (!%p192_p3), %v2255_v1  ;;  %2058 = vmatprep.subr.bf16.mxu1 (!%p192_p3), %v2255_v1  ;;  %v2123_v12 = vld [vmem:[%s2571_s1 + $0x48] sm:$0xff] (!%p192_p3)   ;;  %v2124_v13 = vld [vmem:[%s2571_s1 + $0x50] sm:$0xff] (!%p192_p3)   ;;  %v2125_v14 = vld [vmem:[%s2571_s1 + $0x58] sm:$0xff] (!%p192_p3)  }
   0xa   : > { %v2126_v15 = vld [vmem:[%s2571_s1 + $0x60] sm:$0xff] (!%p192_p3)   ;;  %v2127_v16 = vld [vmem:[%s2571_s1 + $0x68] sm:$0xff] (!%p192_p3)   ;;  %v2128_v17 = vld [vmem:[%s2571_s1 + $0x70] sm:$0xff] (!%p192_p3)  }
   0xb   : > { %v2129_v18 = vld [vmem:[%s2571_s1 + $0x78] sm:$0xff] (!%p192_p3)  }
   0xc   : > { %810 = vmatpush1.bf16.msra.mxu0 (!%p192_p3), %v2115_v2  ;;  %2074 = vmatpush1.bf16.msra.mxu1 (!%p192_p3), %v2115_v2 }
   0xd   : > { %811 = vmatprep.subr.bf16.mxu0 (!%p192_p3), %v2255_v1  ;;  %2059 = vmatprep.subr.bf16.mxu1 (!%p192_p3), %v2255_v1 }
   0xe   : > { %s2579_s18 = smov (!%p236_p4, %s234_s18), 133 }
   0xf   : > { %s1792_s25 = sshll.u32 %s2579_s18, 3 }
  0x10   : > { %812 = vmatpush1.bf16.msra.mxu0 %v2116_v3  ;;  %2075 = vmatpush1.bf16.msra.mxu1 %v2116_v3  ;;  %s2323_s30 = scalar_lea.vmem %s2570_s0, %s1792_s25 }
  0x11   : > { %813 = vmatprep.subr.bf16.mxu0 %v2255_v1  ;;  %2060 = vmatprep.subr.bf16.mxu1 %v2255_v1  ;;  %v2132_v6 = vld [vmem:[%s2323_s30 + $0x4] ss:$8 sps:$4 sm:$0xff]   ;;  %v2135_v8 = vld [vmem:[%s2323_s30 + $0x114] ss:$8 sps:$4 sm:$0xff]   ;;  %v2130_v19 = vld [vmem:[%s2323_s30] ss:$8 sps:$4 sm:$0xff]  }
  0x12   : > { %839 = vmatprep.mubr.bf16.mxu0 %v2132_v6  ;;  %975 = vmatprep.mubr.bf16.mxu1 %v2135_v8  ;;  %v2133_v20 = vld [vmem:[%s2323_s30 + $0x110] ss:$8 sps:$4 sm:$0xff]   ;;  %v2136_v21 = vld [vmem:[%s2323_s30 + $0x14] ss:$8 sps:$4 sm:$0xff]   ;;  %v2138_v22 = vld [vmem:[%s2323_s30 + $0x124] ss:$8 sps:$4 sm:$0xff]  }
  0x13   : > { %v2140_v23 = vld [vmem:[%s2323_s30 + $0x10] ss:$8 sps:$4 sm:$0xff]   ;;  %v2141_v24 = vld [vmem:[%s2323_s30 + $0x120] ss:$8 sps:$4 sm:$0xff]   ;;  %v2142_v25 = vld [vmem:[%s2323_s30 + $0x24] ss:$8 sps:$4 sm:$0xff]  }
  0x14   : > { %814 = vmatpush1.bf16.msra.mxu0 %v2117_v4  ;;  %2076 = vmatpush1.bf16.msra.mxu1 %v2117_v4  ;;  %v2144_v26 = vld [vmem:[%s2323_s30 + $0x134] ss:$8 sps:$4 sm:$0xff]   ;;  %v2146_v27 = vld [vmem:[%s2323_s30 + $0x20] ss:$8 sps:$4 sm:$0xff]   ;;  %v2147_v28 = vld [vmem:[%s2323_s30 + $0x130] ss:$8 sps:$4 sm:$0xff]  }
  0x15   : > { %815 = vmatprep.subr.bf16.mxu0 %v2255_v1  ;;  %2061 = vmatprep.subr.bf16.mxu1 %v2255_v1  ;;  %v2148_v29 = vld [vmem:[%s2323_s30 + $0x34] ss:$8 sps:$4 sm:$0xff]   ;;  %v2150_v30 = vld [vmem:[%s2323_s30 + $0x144] ss:$8 sps:$4 sm:$0xff]   ;;  %v2152_v31 = vld [vmem:[%s2323_s30 + $0x30] ss:$8 sps:$4 sm:$0xff]  }
  0x16   : > { %v2153_v32 = vld [vmem:[%s2323_s30 + $0x140] ss:$8 sps:$4 sm:$0xff]   ;;  %v2154_v33 = vld [vmem:[%s2323_s30 + $0x44] ss:$8 sps:$4 sm:$0xff]   ;;  %v2156_v34 = vld [vmem:[%s2323_s30 + $0x154] ss:$8 sps:$4 sm:$0xff]  }
  0x17   : > { %v2158_v35 = vld [vmem:[%s2323_s30 + $0x40] ss:$8 sps:$4 sm:$0xff]   ;;  %v2159_v36 = vld [vmem:[%s2323_s30 + $0x150] ss:$8 sps:$4 sm:$0xff]   ;;  %v2160_v37 = vld [vmem:[%s2323_s30 + $0x54] ss:$8 sps:$4 sm:$0xff]  }
  0x18   : > { %816 = vmatpush1.bf16.msra.mxu0 %v2118_v5  ;;  %2077 = vmatpush1.bf16.msra.mxu1 %v2118_v5  ;;  %v2162_v38 = vld [vmem:[%s2323_s30 + $0x164] ss:$8 sps:$4 sm:$0xff]   ;;  %v2164_v39 = vld [vmem:[%s2323_s30 + $0x50] ss:$8 sps:$4 sm:$0xff]   ;;  %v2165_v40 = vld [vmem:[%s2323_s30 + $0x160] ss:$8 sps:$4 sm:$0xff]  }
  0x19   : > { %817 = vmatprep.subr.bf16.mxu0 %v2255_v1  ;;  %2062 = vmatprep.subr.bf16.mxu1 %v2255_v1  ;;  %v2166_v41 = vld [vmem:[%s2323_s30 + $0x64] ss:$8 sps:$4 sm:$0xff]   ;;  %v2168_v42 = vld [vmem:[%s2323_s30 + $0x174] ss:$8 sps:$4 sm:$0xff]   ;;  %v2170_v43 = vld [vmem:[%s2323_s30 + $0x60] ss:$8 sps:$4 sm:$0xff]  }
  0x1a   : > { %v2171_v44 = vld [vmem:[%s2323_s30 + $0x170] ss:$8 sps:$4 sm:$0xff]   ;;  %v2172_v45 = vld [vmem:[%s2323_s30 + $0x74] ss:$8 sps:$4 sm:$0xff]   ;;  %v2174_v46 = vld [vmem:[%s2323_s30 + $0x184] ss:$8 sps:$4 sm:$0xff]  }
  0x1b   : > { %v2176_v47 = vld [vmem:[%s2323_s30 + $0x70] ss:$8 sps:$4 sm:$0xff]   ;;  %v2177_v48 = vld [vmem:[%s2323_s30 + $0x180] ss:$8 sps:$4 sm:$0xff]   ;;  %v2178_v49 = vld [vmem:[%s2323_s30 + $0x84] ss:$8 sps:$4 sm:$0xff]  }
  0x1c   : > { %818 = vmatpush1.bf16.msra.mxu0 %v2119_v7  ;;  %2078 = vmatpush1.bf16.msra.mxu1 %v2119_v7  ;;  %v2180_v50 = vld [vmem:[%s2323_s30 + $0x194] ss:$8 sps:$4 sm:$0xff]   ;;  %v2182_v51 = vld [vmem:[%s2323_s30 + $0x80] ss:$8 sps:$4 sm:$0xff]   ;;  %v2183_v52 = vld [vmem:[%s2323_s30 + $0x190] ss:$8 sps:$4 sm:$0xff]  }
  0x1d   : > { %819 = vmatprep.subr.bf16.mxu0 %v2255_v1  ;;  %2063 = vmatprep.subr.bf16.mxu1 %v2255_v1  ;;  %v2184_v53 = vld [vmem:[%s2323_s30 + $0x94] ss:$8 sps:$4 sm:$0xff]   ;;  %v2186_v54 = vld [vmem:[%s2323_s30 + $0x1a4] ss:$8 sps:$4 sm:$0xff]   ;;  %v2188_v55 = vld [vmem:[%s2323_s30 + $0x90] ss:$8 sps:$4 sm:$0xff]  }
  0x1e   : > { %v2189_v56 = vld [vmem:[%s2323_s30 + $0x1a0] ss:$8 sps:$4 sm:$0xff]   ;;  %v2190_v57 = vld [vmem:[%s2323_s30 + $0xa4] ss:$8 sps:$4 sm:$0xff]   ;;  %v2192_v58 = vld [vmem:[%s2323_s30 + $0x1b4] ss:$8 sps:$4 sm:$0xff]  }
  0x1f   : > { %v2194_v59 = vld [vmem:[%s2323_s30 + $0xa0] ss:$8 sps:$4 sm:$0xff]   ;;  %v2195_v60 = vld [vmem:[%s2323_s30 + $0x1b0] ss:$8 sps:$4 sm:$0xff]   ;;  %v2196_v61 = vld [vmem:[%s2323_s30 + $0xb4] ss:$8 sps:$4 sm:$0xff]  }
  0x20   : > { %820 = vmatpush1.bf16.msra.mxu0 %v2120_v9  ;;  %2079 = vmatpush1.bf16.msra.mxu1 %v2120_v9  ;;  %v2198_v62 = vld [vmem:[%s2323_s30 + $0x1c4] ss:$8 sps:$4 sm:$0xff]   ;;  %v2200_v63 = vld [vmem:[%s2323_s30 + $0xb0] ss:$8 sps:$4 sm:$0xff]   ;;  %v2201_v0 = vld [vmem:[%s2323_s30 + $0x1c0] ss:$8 sps:$4 sm:$0xff]  }
  0x21   : > { %821 = vmatprep.subr.bf16.mxu0 %v2255_v1  ;;  %2064 = vmatprep.subr.bf16.mxu1 %v2255_v1  ;;  %v2204_v2 = vld [vmem:[%s2323_s30 + $0x1d4] ss:$8 sps:$4 sm:$0xff]   ;;  %v2206_v3 = vld [vmem:[%s2323_s30 + $0xc0] ss:$8 sps:$4 sm:$0xff]   ;;  %v2207_v4 = vld [vmem:[%s2323_s30 + $0x1d0] ss:$8 sps:$4 sm:$0xff]  }
  0x22   : > { %v2208_v5 = vld [vmem:[%s2323_s30 + $0xd4] ss:$8 sps:$4 sm:$0xff]   ;;  %v2210_v6 = vld [vmem:[%s2323_s30 + $0x1e4] ss:$8 sps:$4 sm:$0xff]   ;;  %v2212_v7 = vld [vmem:[%s2323_s30 + $0xd0] ss:$8 sps:$4 sm:$0xff]  }
  0x23   : > { %v2213_v8 = vld [vmem:[%s2323_s30 + $0x1e0] ss:$8 sps:$4 sm:$0xff]   ;;  %v2214_v9 = vld [vmem:[%s2323_s30 + $0xe4] ss:$8 sps:$4 sm:$0xff]  }
  0x24   : > { %822 = vmatpush1.bf16.msra.mxu0 %v2121_v10  ;;  %2080 = vmatpush1.bf16.msra.mxu1 %v2121_v10  ;;  %v2216_v10 = vld [vmem:[%s2323_s30 + $0x1f4] ss:$8 sps:$4 sm:$0xff]  }
  0x25   : > { %823 = vmatprep.subr.bf16.mxu0 %v2255_v1  ;;  %2065 = vmatprep.subr.bf16.mxu1 %v2255_v1 }
  0x28   : > { %824 = vmatpush1.bf16.msra.mxu0 %v2122_v11  ;;  %2081 = vmatpush1.bf16.msra.mxu1 %v2122_v11  ;;  %v2218_v11 = vld [vmem:[%s2323_s30 + $0xe0] ss:$8 sps:$4 sm:$0xff]  }
  0x29   : > { %825 = vmatprep.subr.bf16.mxu0 %v2255_v1  ;;  %2066 = vmatprep.subr.bf16.mxu1 %v2255_v1 }
  0x2c   : > { %826 = vmatpush1.bf16.msra.mxu0 %v2123_v12  ;;  %2082 = vmatpush1.bf16.msra.mxu1 %v2123_v12  ;;  %v2219_v12 = vld [vmem:[%s2323_s30 + $0x1f0] ss:$8 sps:$4 sm:$0xff]  }
  0x2d   : > { %827 = vmatprep.subr.bf16.mxu0 %v2255_v1  ;;  %2067 = vmatprep.subr.bf16.mxu1 %v2255_v1 }
  0x30   : > { %828 = vmatpush1.bf16.msra.mxu0 %v2124_v13  ;;  %2083 = vmatpush1.bf16.msra.mxu1 %v2124_v13  ;;  %v2220_v13 = vld [vmem:[%s2323_s30 + $0xf4] ss:$8 sps:$4 sm:$0xff]  }
  0x31   : > { %829 = vmatprep.subr.bf16.mxu0 %v2255_v1  ;;  %2068 = vmatprep.subr.bf16.mxu1 %v2255_v1 }
  0x34   : > { %830 = vmatpush1.bf16.msra.mxu0 %v2125_v14  ;;  %2084 = vmatpush1.bf16.msra.mxu1 %v2125_v14  ;;  %v2222_v14 = vld [vmem:[%s2323_s30 + $0x204] ss:$8 sps:$4 sm:$0xff]  }
  0x35   : > { %831 = vmatprep.subr.bf16.mxu0 %v2255_v1  ;;  %2069 = vmatprep.subr.bf16.mxu1 %v2255_v1 }
  0x38   : > { %832 = vmatpush1.bf16.msra.mxu0 %v2126_v15  ;;  %2085 = vmatpush1.bf16.msra.mxu1 %v2126_v15  ;;  %v334_v15 = vld [vmem:[%s2323_s30 + $0x210] sm:$0xff] }
  0x39   : > { %833 = vmatprep.subr.bf16.mxu0 %v2255_v1  ;;  %2070 = vmatprep.subr.bf16.mxu1 %v2255_v1 }
  0x3c   : > { %834 = vmatpush1.bf16.msra.mxu0 %v2127_v16  ;;  %2086 = vmatpush1.bf16.msra.mxu1 %v2127_v16  ;;  %v2224_v16 = vld [vmem:[%s2323_s30 + $0xf0] ss:$8 sps:$4 sm:$0xff]  }
  0x3d   : > { %835 = vmatprep.subr.bf16.mxu0 %v2255_v1  ;;  %2071 = vmatprep.subr.bf16.mxu1 %v2255_v1 }
  0x40   : > { %836 = vmatpush1.bf16.msra.mxu0 %v2128_v17  ;;  %2087 = vmatpush1.bf16.msra.mxu1 %v2128_v17  ;;  %v2225_v17 = vld [vmem:[%s2323_s30 + $0x200] ss:$8 sps:$4 sm:$0xff]  }
  0x41   : > { %837 = vmatprep.subr.bf16.mxu0 %v2255_v1  ;;  %2072 = vmatprep.subr.bf16.mxu1 %v2255_v1  ;;  %v2202_v1 = vld [vmem:[%s2323_s30 + $0xc4] ss:$8 sps:$4 sm:$0xff]  }
  0x44   : > { %838 = vmatpush1.bf16.msra.mxu0 %v2129_v18  ;;  %2088 = vmatpush1.bf16.msra.mxu1 %v2129_v18  ;;  %v2226_v18 = vld [vmem:[%s2323_s30 + $0x104] ss:$8 sps:$4 sm:$0xff]  }
  0x47   : > { %840 = vmatmul.mubr.bf16.vlgmr.msra.gmra.mrb[0].mxu0 %v2130_v19  ;;  %976 = vmatmul.mubr.bf16.vlgmr.msra.gmra.mrb[0].mxu1 %v2133_v20  ;;  %v1706_v19 = vcombine.high %v334_v15, %v334_v15  ;;  %v2229_v20 = vld [vmem:[%s2323_s30 + $0x100] ss:$8 sps:$4 sm:$0xff]   ;;  %s1637_s30 = sshll.u32 %s2579_s18, 2 }
  0x48   : > { %847 = vmatprep.mubr.bf16.mxu0 %v2136_v21  ;;  %983 = vmatprep.mubr.bf16.mxu1 %v2138_v22  ;;  %v1705_v21 = vcombine.low %v334_v15, %v334_v15  ;;  %v2452_v22 = vld [vmem:[%s2572_s2] ss:$0 sm:$0xff]  ;;  %s2462_s8 = scalar_lea.vmem %s2573_s3, %s1637_s30 }
  0x4f   : > { %848 = vmatmul.mubr.bf16.gmra.mrb[4].mxu0 %v2140_v23  ;;  %984 = vmatmul.mubr.bf16.gmra.mrb[4].mxu1 %v2141_v24 }
  0x50   : > { %855 = vmatprep.mubr.bf16.mxu0 %v2142_v25  ;;  %991 = vmatprep.mubr.bf16.mxu1 %v2144_v26 }
  0x57   : > { %856 = vmatmul.mubr.bf16.gmra.mrb[8].mxu0 %v2146_v27  ;;  %992 = vmatmul.mubr.bf16.gmra.mrb[8].mxu1 %v2147_v28 }
  0x58   : > { %863 = vmatprep.mubr.bf16.mxu0 %v2148_v29  ;;  %999 = vmatprep.mubr.bf16.mxu1 %v2150_v30 }
  0x5f   : > { %864 = vmatmul.mubr.bf16.gmra.mrb[12].mxu0 %v2152_v31  ;;  %1000 = vmatmul.mubr.bf16.gmra.mrb[12].mxu1 %v2153_v32 }
  0x60   : > { %871 = vmatprep.mubr.bf16.mxu0 %v2154_v33  ;;  %1007 = vmatprep.mubr.bf16.mxu1 %v2156_v34 }
  0x67   : > { %872 = vmatmul.mubr.bf16.gmra.mrb[16].mxu0 %v2158_v35  ;;  %1008 = vmatmul.mubr.bf16.gmra.mrb[16].mxu1 %v2159_v36 }
  0x68   : > { %879 = vmatprep.mubr.bf16.mxu0 %v2160_v37  ;;  %1015 = vmatprep.mubr.bf16.mxu1 %v2162_v38 }
  0x6f   : > { %880 = vmatmul.mubr.bf16.gmra.mrb[20].mxu0 %v2164_v39  ;;  %1016 = vmatmul.mubr.bf16.gmra.mrb[20].mxu1 %v2165_v40 }
  0x70   : > { %887 = vmatprep.mubr.bf16.mxu0 %v2166_v41  ;;  %1023 = vmatprep.mubr.bf16.mxu1 %v2168_v42 }
  0x77   : > { %888 = vmatmul.mubr.bf16.gmra.mrb[24].mxu0 %v2170_v43  ;;  %1024 = vmatmul.mubr.bf16.gmra.mrb[24].mxu1 %v2171_v44 }
  0x78   : > { %895 = vmatprep.mubr.bf16.mxu0 %v2172_v45  ;;  %1031 = vmatprep.mubr.bf16.mxu1 %v2174_v46 }
  0x7f   : > { %896 = vmatmul.mubr.bf16.gmra.mrb[28].mxu0 %v2176_v47  ;;  %1032 = vmatmul.mubr.bf16.gmra.mrb[28].mxu1 %v2177_v48 }
  0x80   : > { %903 = vmatprep.mubr.bf16.mxu0 %v2178_v49  ;;  %1039 = vmatprep.mubr.bf16.mxu1 %v2180_v50 }
  0x87   : > { %904 = vmatmul.mubr.bf16.gmra.mrb[32].mxu0 %v2182_v51  ;;  %1040 = vmatmul.mubr.bf16.gmra.mrb[32].mxu1 %v2183_v52 }
  0x88   : > { %911 = vmatprep.mubr.bf16.mxu0 %v2184_v53  ;;  %1047 = vmatprep.mubr.bf16.mxu1 %v2186_v54 }
  0x8f   : > { %912 = vmatmul.mubr.bf16.gmra.mrb[36].mxu0 %v2188_v55  ;;  %1048 = vmatmul.mubr.bf16.gmra.mrb[36].mxu1 %v2189_v56 }
  0x90   : > { %919 = vmatprep.mubr.bf16.mxu0 %v2190_v57  ;;  %1055 = vmatprep.mubr.bf16.mxu1 %v2192_v58 }
  0x97   : > { %920 = vmatmul.mubr.bf16.gmra.mrb[40].mxu0 %v2194_v59  ;;  %1056 = vmatmul.mubr.bf16.gmra.mrb[40].mxu1 %v2195_v60 }
  0x98   : > { %927 = vmatprep.mubr.bf16.mxu0 %v2196_v61  ;;  %1063 = vmatprep.mubr.bf16.mxu1 %v2198_v62 }
  0x9f   : > { %928 = vmatmul.mubr.bf16.gmra.mrb[44].mxu0 %v2200_v63  ;;  %1064 = vmatmul.mubr.bf16.gmra.mrb[44].mxu1 %v2201_v0 }
  0xa0   : > { %935 = vmatprep.mubr.bf16.mxu0 %v2202_v1  ;;  %1071 = vmatprep.mubr.bf16.mxu1 %v2204_v2 }
  0xa7   : > { %936 = vmatmul.mubr.bf16.gmra.mrb[48].mxu0 %v2206_v3  ;;  %1072 = vmatmul.mubr.bf16.gmra.mrb[48].mxu1 %v2207_v4 }
  0xa8   : > { %943 = vmatprep.mubr.bf16.mxu0 %v2208_v5  ;;  %1079 = vmatprep.mubr.bf16.mxu1 %v2210_v6 }
  0xaf   : > { %944 = vmatmul.mubr.bf16.gmra.mrb[52].mxu0 %v2212_v7  ;;  %1080 = vmatmul.mubr.bf16.gmra.mrb[52].mxu1 %v2213_v8 }
  0xb0   : > { %951 = vmatprep.mubr.bf16.mxu0 %v2214_v9  ;;  %1087 = vmatprep.mubr.bf16.mxu1 %v2216_v10 }
  0xb7   : > { %952 = vmatmul.mubr.bf16.gmra.mrb[56].mxu0 %v2218_v11  ;;  %1088 = vmatmul.mubr.bf16.gmra.mrb[56].mxu1 %v2219_v12 }
  0xb8   : > { %959 = vmatprep.mubr.bf16.mxu0 %v2220_v13  ;;  %1095 = vmatprep.mubr.bf16.mxu1 %v2222_v14 }
  0xbf   : > { %960 = vmatmul.mubr.bf16.gmra.mrb[60].mxu0 %v2224_v16  ;;  %1096 = vmatmul.mubr.bf16.gmra.mrb[60].mxu1 %v2225_v17 }
  0xc0   : > { %967 = vmatprep.mubr.bf16.mxu0 %v2226_v18  ;;  %1103 = vmatprep.mubr.bf16.mxu1 %v1706_v19 }
  0xc7   : > { %968 = vmatmul.mubr.bf16.gmra.mrb[64].mxu0 %v2229_v20  ;;  %1104 = vmatmul.mubr.bf16.gmra.mrb[64].mxu1 %v1705_v21 }
 0x11a   : > { %v841_v23 = vpop.f32.mrb[0].mxu0  ;;  %v977_v24 = vpop.f32.mrb[0].mxu1 }
 0x11b   : > { %v842_v25 = vadd.f32 %v2452_v22, %v841_v23  ;;  %v978_v26 = vadd.f32 %v2452_v22, %v977_v24  ;;  %v843_v27 = vpop.f32.mrb[1].mxu0  ;;  %v979_v28 = vpop.f32.mrb[1].mxu1 }
 0x11c   : > { %v844_v29 = vpop.f32.mrb[2].mxu0  ;;  %v980_v30 = vpop.f32.mrb[2].mxu1 }
 0x11d   : > { %v1145_v31 = vmax.f32 %v978_v26, 0.0  ;;  %v845_v32 = vadd.f32 %v2452_v22, %v844_v29  ;;  %v981_v33 = vadd.f32 %v2452_v22, %v980_v30  ;;  %v846_v34 = vpop.f32.mrb[3].mxu0  ;;  %v982_v35 = vpop.f32.mrb[3].mxu1  ;;  %v1111_v36 = vmax.f32 %v842_v25, 0.0 }
 0x11f   : > { %v1112_v37 = vmax.f32 %v845_v32, 0.0  ;;  %v1146_v38 = vmax.f32 %v981_v33, 0.0 }
 0x121   : > { %v1863_v39 = vpack.c.bf16 %v1112_v37, %v1111_v36  ;;  %v1948_v40 = vpack.c.bf16 %v1146_v38, %v1145_v31 }
 0x122   : > { %v849_v41 = vpop.f32.mrb[4].mxu0  ;;  %v985_v42 = vpop.f32.mrb[4].mxu1 }
 0x123   : > { %1864 = vst [vmem:[%s2462_s8] sm:$0xff] %v1863_v39   ;;  %2041 = vst [vmem:[%s2462_s8 + $0x88] sm:$0xff] %v1948_v40   ;;  %v850_v43 = vadd.f32 %v2452_v22, %v849_v41  ;;  %v986_v44 = vadd.f32 %v2452_v22, %v985_v42  ;;  %v851_v45 = vpop.f32.mrb[5].mxu0  ;;  %v987_v46 = vpop.f32.mrb[5].mxu1 }
 0x124   : > { %v852_v47 = vpop.f32.mrb[6].mxu0  ;;  %v988_v48 = vpop.f32.mrb[6].mxu1 }
 0x125   : > { %v1147_v49 = vmax.f32 %v986_v44, 0.0  ;;  %v853_v50 = vadd.f32 %v2452_v22, %v852_v47  ;;  %v989_v51 = vadd.f32 %v2452_v22, %v988_v48  ;;  %v854_v52 = vpop.f32.mrb[7].mxu0  ;;  %v990_v53 = vpop.f32.mrb[7].mxu1  ;;  %v1113_v54 = vmax.f32 %v850_v43, 0.0 }
 0x127   : > { %v1114_v55 = vmax.f32 %v853_v50, 0.0  ;;  %v1148_v56 = vmax.f32 %v989_v51, 0.0 }
 0x129   : > { %v1868_v57 = vpack.c.bf16 %v1114_v55, %v1113_v54  ;;  %v1953_v58 = vpack.c.bf16 %v1148_v56, %v1147_v49 }
 0x12a   : > { %v857_v59 = vpop.f32.mrb[8].mxu0  ;;  %v993_v60 = vpop.f32.mrb[8].mxu1 }
 0x12b   : > { %2025 = vst [vmem:[%s2462_s8 + $0x8] sm:$0xff] %v1868_v57   ;;  %2042 = vst [vmem:[%s2462_s8 + $0x90] sm:$0xff] %v1953_v58   ;;  %v858_v61 = vadd.f32 %v2452_v22, %v857_v59  ;;  %v994_v62 = vadd.f32 %v2452_v22, %v993_v60  ;;  %v859_v63 = vpop.f32.mrb[9].mxu0  ;;  %v995_v0 = vpop.f32.mrb[9].mxu1 }
 0x12c   : > { %v860_v1 = vpop.f32.mrb[10].mxu0  ;;  %v996_v2 = vpop.f32.mrb[10].mxu1 }
 0x12d   : > { %v1149_v3 = vmax.f32 %v994_v62, 0.0  ;;  %v861_v4 = vadd.f32 %v2452_v22, %v860_v1  ;;  %v997_v5 = vadd.f32 %v2452_v22, %v996_v2  ;;  %v862_v6 = vpop.f32.mrb[11].mxu0  ;;  %v998_v7 = vpop.f32.mrb[11].mxu1  ;;  %v1115_v8 = vmax.f32 %v858_v61, 0.0 }
 0x12f   : > { %v1116_v9 = vmax.f32 %v861_v4, 0.0  ;;  %v1150_v10 = vmax.f32 %v997_v5, 0.0 }
 0x131   : > { %v1873_v11 = vpack.c.bf16 %v1116_v9, %v1115_v8  ;;  %v1958_v12 = vpack.c.bf16 %v1150_v10, %v1149_v3 }
 0x132   : > { %v865_v13 = vpop.f32.mrb[12].mxu0  ;;  %v1001_v14 = vpop.f32.mrb[12].mxu1 }
 0x133   : > { %2026 = vst [vmem:[%s2462_s8 + $0x10] sm:$0xff] %v1873_v11   ;;  %2043 = vst [vmem:[%s2462_s8 + $0x98] sm:$0xff] %v1958_v12   ;;  %v866_v15 = vadd.f32 %v2452_v22, %v865_v13  ;;  %v1002_v16 = vadd.f32 %v2452_v22, %v1001_v14  ;;  %v867_v17 = vpop.f32.mrb[13].mxu0  ;;  %v1003_v18 = vpop.f32.mrb[13].mxu1 }
 0x134   : > { %v868_v19 = vpop.f32.mrb[14].mxu0  ;;  %v1004_v20 = vpop.f32.mrb[14].mxu1 }
 0x135   : > { %v1151_v21 = vmax.f32 %v1002_v16, 0.0  ;;  %v869_v23 = vadd.f32 %v2452_v22, %v868_v19  ;;  %v1005_v24 = vadd.f32 %v2452_v22, %v1004_v20  ;;  %v870_v25 = vpop.f32.mrb[15].mxu0  ;;  %v1006_v26 = vpop.f32.mrb[15].mxu1  ;;  %v1117_v27 = vmax.f32 %v866_v15, 0.0 }
 0x137   : > { %v1118_v28 = vmax.f32 %v869_v23, 0.0  ;;  %v1152_v29 = vmax.f32 %v1005_v24, 0.0 }
 0x139   : > { %v1878_v30 = vpack.c.bf16 %v1118_v28, %v1117_v27  ;;  %v1963_v31 = vpack.c.bf16 %v1152_v29, %v1151_v21 }
 0x13a   : > { %v873_v32 = vpop.f32.mrb[16].mxu0  ;;  %v1009_v33 = vpop.f32.mrb[16].mxu1 }
 0x13b   : > { %2027 = vst [vmem:[%s2462_s8 + $0x18] sm:$0xff] %v1878_v30   ;;  %2044 = vst [vmem:[%s2462_s8 + $0xa0] sm:$0xff] %v1963_v31   ;;  %v874_v34 = vadd.f32 %v2452_v22, %v873_v32  ;;  %v1010_v35 = vadd.f32 %v2452_v22, %v1009_v33  ;;  %v875_v36 = vpop.f32.mrb[17].mxu0  ;;  %v1011_v37 = vpop.f32.mrb[17].mxu1 }
 0x13c   : > { %v876_v38 = vpop.f32.mrb[18].mxu0  ;;  %v1012_v39 = vpop.f32.mrb[18].mxu1 }
 0x13d   : > { %v1153_v40 = vmax.f32 %v1010_v35, 0.0  ;;  %v877_v41 = vadd.f32 %v2452_v22, %v876_v38  ;;  %v1013_v42 = vadd.f32 %v2452_v22, %v1012_v39  ;;  %v878_v43 = vpop.f32.mrb[19].mxu0  ;;  %v1014_v44 = vpop.f32.mrb[19].mxu1  ;;  %v1119_v45 = vmax.f32 %v874_v34, 0.0 }
 0x13f   : > { %v1120_v46 = vmax.f32 %v877_v41, 0.0  ;;  %v1154_v47 = vmax.f32 %v1013_v42, 0.0 }
 0x141   : > { %v1883_v48 = vpack.c.bf16 %v1120_v46, %v1119_v45  ;;  %v1968_v49 = vpack.c.bf16 %v1154_v47, %v1153_v40 }
 0x142   : > { %v881_v50 = vpop.f32.mrb[20].mxu0  ;;  %v1017_v51 = vpop.f32.mrb[20].mxu1 }
 0x143   : > { %2028 = vst [vmem:[%s2462_s8 + $0x20] sm:$0xff] %v1883_v48   ;;  %2045 = vst [vmem:[%s2462_s8 + $0xa8] sm:$0xff] %v1968_v49   ;;  %v882_v52 = vadd.f32 %v2452_v22, %v881_v50  ;;  %v1018_v53 = vadd.f32 %v2452_v22, %v1017_v51  ;;  %v883_v54 = vpop.f32.mrb[21].mxu0  ;;  %v1019_v55 = vpop.f32.mrb[21].mxu1 }
 0x144   : > { %v884_v56 = vpop.f32.mrb[22].mxu0  ;;  %v1020_v57 = vpop.f32.mrb[22].mxu1 }
 0x145   : > { %v1155_v58 = vmax.f32 %v1018_v53, 0.0  ;;  %v885_v59 = vadd.f32 %v2452_v22, %v884_v56  ;;  %v1021_v60 = vadd.f32 %v2452_v22, %v1020_v57  ;;  %v886_v61 = vpop.f32.mrb[23].mxu0  ;;  %v1022_v62 = vpop.f32.mrb[23].mxu1  ;;  %v1121_v63 = vmax.f32 %v882_v52, 0.0 }
 0x147   : > { %v1122_v0 = vmax.f32 %v885_v59, 0.0  ;;  %v1156_v1 = vmax.f32 %v1021_v60, 0.0 }
 0x149   : > { %v1888_v2 = vpack.c.bf16 %v1122_v0, %v1121_v63  ;;  %v1973_v3 = vpack.c.bf16 %v1156_v1, %v1155_v58 }
 0x14a   : > { %v889_v4 = vpop.f32.mrb[24].mxu0  ;;  %v1025_v5 = vpop.f32.mrb[24].mxu1 }
 0x14b   : > { %2029 = vst [vmem:[%s2462_s8 + $0x28] sm:$0xff] %v1888_v2   ;;  %2046 = vst [vmem:[%s2462_s8 + $0xb0] sm:$0xff] %v1973_v3   ;;  %v890_v6 = vadd.f32 %v2452_v22, %v889_v4  ;;  %v1026_v7 = vadd.f32 %v2452_v22, %v1025_v5  ;;  %v891_v8 = vpop.f32.mrb[25].mxu0  ;;  %v1027_v9 = vpop.f32.mrb[25].mxu1 }
 0x14c   : > { %v892_v10 = vpop.f32.mrb[26].mxu0  ;;  %v1028_v11 = vpop.f32.mrb[26].mxu1 }
 0x14d   : > { %v1157_v12 = vmax.f32 %v1026_v7, 0.0  ;;  %v893_v13 = vadd.f32 %v2452_v22, %v892_v10  ;;  %v1029_v14 = vadd.f32 %v2452_v22, %v1028_v11  ;;  %v894_v15 = vpop.f32.mrb[27].mxu0  ;;  %v1030_v16 = vpop.f32.mrb[27].mxu1  ;;  %v1123_v17 = vmax.f32 %v890_v6, 0.0 }
 0x14f   : > { %v1124_v18 = vmax.f32 %v893_v13, 0.0  ;;  %v1158_v19 = vmax.f32 %v1029_v14, 0.0 }
 0x151   : > { %v1893_v20 = vpack.c.bf16 %v1124_v18, %v1123_v17  ;;  %v1978_v21 = vpack.c.bf16 %v1158_v19, %v1157_v12 }
 0x152   : > { %v897_v23 = vpop.f32.mrb[28].mxu0  ;;  %v1033_v24 = vpop.f32.mrb[28].mxu1 }
 0x153   : > { %2030 = vst [vmem:[%s2462_s8 + $0x30] sm:$0xff] %v1893_v20   ;;  %2047 = vst [vmem:[%s2462_s8 + $0xb8] sm:$0xff] %v1978_v21   ;;  %v898_v25 = vadd.f32 %v2452_v22, %v897_v23  ;;  %v1034_v26 = vadd.f32 %v2452_v22, %v1033_v24  ;;  %v899_v27 = vpop.f32.mrb[29].mxu0  ;;  %v1035_v28 = vpop.f32.mrb[29].mxu1 }
 0x154   : > { %v900_v29 = vpop.f32.mrb[30].mxu0  ;;  %v1036_v30 = vpop.f32.mrb[30].mxu1 }
 0x155   : > { %v1159_v31 = vmax.f32 %v1034_v26, 0.0  ;;  %v901_v32 = vadd.f32 %v2452_v22, %v900_v29  ;;  %v1037_v33 = vadd.f32 %v2452_v22, %v1036_v30  ;;  %v902_v34 = vpop.f32.mrb[31].mxu0  ;;  %v1038_v35 = vpop.f32.mrb[31].mxu1  ;;  %v1125_v36 = vmax.f32 %v898_v25, 0.0 }
 0x157   : > { %v1126_v37 = vmax.f32 %v901_v32, 0.0  ;;  %v1160_v38 = vmax.f32 %v1037_v33, 0.0 }
 0x159   : > { %v1898_v39 = vpack.c.bf16 %v1126_v37, %v1125_v36  ;;  %v1983_v40 = vpack.c.bf16 %v1160_v38, %v1159_v31 }
 0x15a   : > { %v905_v41 = vpop.f32.mrb[32].mxu0  ;;  %v1041_v42 = vpop.f32.mrb[32].mxu1 }
 0x15b   : > { %2031 = vst [vmem:[%s2462_s8 + $0x38] sm:$0xff] %v1898_v39   ;;  %2048 = vst [vmem:[%s2462_s8 + $0xc0] sm:$0xff] %v1983_v40   ;;  %v906_v43 = vadd.f32 %v2452_v22, %v905_v41  ;;  %v1042_v44 = vadd.f32 %v2452_v22, %v1041_v42  ;;  %v907_v45 = vpop.f32.mrb[33].mxu0  ;;  %v1043_v46 = vpop.f32.mrb[33].mxu1 }
 0x15c   : > { %v908_v47 = vpop.f32.mrb[34].mxu0  ;;  %v1044_v48 = vpop.f32.mrb[34].mxu1 }
 0x15d   : > { %v1161_v49 = vmax.f32 %v1042_v44, 0.0  ;;  %v909_v50 = vadd.f32 %v2452_v22, %v908_v47  ;;  %v1045_v51 = vadd.f32 %v2452_v22, %v1044_v48  ;;  %v910_v52 = vpop.f32.mrb[35].mxu0  ;;  %v1046_v53 = vpop.f32.mrb[35].mxu1  ;;  %v1127_v54 = vmax.f32 %v906_v43, 0.0 }
 0x15f   : > { %v1128_v55 = vmax.f32 %v909_v50, 0.0  ;;  %v1162_v56 = vmax.f32 %v1045_v51, 0.0 }
 0x161   : > { %v1903_v57 = vpack.c.bf16 %v1128_v55, %v1127_v54  ;;  %v1988_v58 = vpack.c.bf16 %v1162_v56, %v1161_v49 }
 0x162   : > { %v913_v59 = vpop.f32.mrb[36].mxu0  ;;  %v1049_v60 = vpop.f32.mrb[36].mxu1 }
 0x163   : > { %2032 = vst [vmem:[%s2462_s8 + $0x40] sm:$0xff] %v1903_v57   ;;  %2049 = vst [vmem:[%s2462_s8 + $0xc8] sm:$0xff] %v1988_v58   ;;  %v914_v61 = vadd.f32 %v2452_v22, %v913_v59  ;;  %v1050_v62 = vadd.f32 %v2452_v22, %v1049_v60  ;;  %v915_v63 = vpop.f32.mrb[37].mxu0  ;;  %v1051_v0 = vpop.f32.mrb[37].mxu1 }
 0x164   : > { %v916_v1 = vpop.f32.mrb[38].mxu0  ;;  %v1052_v2 = vpop.f32.mrb[38].mxu1 }
 0x165   : > { %v1163_v3 = vmax.f32 %v1050_v62, 0.0  ;;  %v917_v4 = vadd.f32 %v2452_v22, %v916_v1  ;;  %v1053_v5 = vadd.f32 %v2452_v22, %v1052_v2  ;;  %v918_v6 = vpop.f32.mrb[39].mxu0  ;;  %v1054_v7 = vpop.f32.mrb[39].mxu1  ;;  %v1129_v8 = vmax.f32 %v914_v61, 0.0 }
 0x167   : > { %v1130_v9 = vmax.f32 %v917_v4, 0.0  ;;  %v1164_v10 = vmax.f32 %v1053_v5, 0.0 }
 0x169   : > { %v1908_v11 = vpack.c.bf16 %v1130_v9, %v1129_v8  ;;  %v1993_v12 = vpack.c.bf16 %v1164_v10, %v1163_v3 }
 0x16a   : > { %v921_v13 = vpop.f32.mrb[40].mxu0  ;;  %v1057_v14 = vpop.f32.mrb[40].mxu1 }
 0x16b   : > { %2033 = vst [vmem:[%s2462_s8 + $0x48] sm:$0xff] %v1908_v11   ;;  %2050 = vst [vmem:[%s2462_s8 + $0xd0] sm:$0xff] %v1993_v12   ;;  %v922_v15 = vadd.f32 %v2452_v22, %v921_v13  ;;  %v1058_v16 = vadd.f32 %v2452_v22, %v1057_v14  ;;  %v923_v17 = vpop.f32.mrb[41].mxu0  ;;  %v1059_v18 = vpop.f32.mrb[41].mxu1 }
 0x16c   : > { %v924_v19 = vpop.f32.mrb[42].mxu0  ;;  %v1060_v20 = vpop.f32.mrb[42].mxu1 }
 0x16d   : > { %v1165_v21 = vmax.f32 %v1058_v16, 0.0  ;;  %v925_v23 = vadd.f32 %v2452_v22, %v924_v19  ;;  %v1061_v24 = vadd.f32 %v2452_v22, %v1060_v20  ;;  %v926_v25 = vpop.f32.mrb[43].mxu0  ;;  %v1062_v26 = vpop.f32.mrb[43].mxu1  ;;  %v1131_v27 = vmax.f32 %v922_v15, 0.0 }
 0x16f   : > { %v1132_v28 = vmax.f32 %v925_v23, 0.0  ;;  %v1166_v29 = vmax.f32 %v1061_v24, 0.0 }
 0x171   : > { %v1913_v30 = vpack.c.bf16 %v1132_v28, %v1131_v27  ;;  %v1998_v31 = vpack.c.bf16 %v1166_v29, %v1165_v21 }
 0x172   : > { %v929_v32 = vpop.f32.mrb[44].mxu0  ;;  %v1065_v33 = vpop.f32.mrb[44].mxu1 }
 0x173   : > { %2034 = vst [vmem:[%s2462_s8 + $0x50] sm:$0xff] %v1913_v30   ;;  %2051 = vst [vmem:[%s2462_s8 + $0xd8] sm:$0xff] %v1998_v31   ;;  %v930_v34 = vadd.f32 %v2452_v22, %v929_v32  ;;  %v1066_v35 = vadd.f32 %v2452_v22, %v1065_v33  ;;  %v931_v36 = vpop.f32.mrb[45].mxu0  ;;  %v1067_v37 = vpop.f32.mrb[45].mxu1 }
 0x174   : > { %v932_v38 = vpop.f32.mrb[46].mxu0  ;;  %v1068_v39 = vpop.f32.mrb[46].mxu1 }
 0x175   : > { %v1167_v40 = vmax.f32 %v1066_v35, 0.0  ;;  %v933_v41 = vadd.f32 %v2452_v22, %v932_v38  ;;  %v1069_v42 = vadd.f32 %v2452_v22, %v1068_v39  ;;  %v934_v43 = vpop.f32.mrb[47].mxu0  ;;  %v1070_v44 = vpop.f32.mrb[47].mxu1  ;;  %v1133_v45 = vmax.f32 %v930_v34, 0.0 }
 0x177   : > { %v1134_v46 = vmax.f32 %v933_v41, 0.0  ;;  %v1168_v47 = vmax.f32 %v1069_v42, 0.0 }
 0x179   : > { %v1918_v48 = vpack.c.bf16 %v1134_v46, %v1133_v45  ;;  %v2003_v49 = vpack.c.bf16 %v1168_v47, %v1167_v40 }
 0x17a   : > { %v937_v50 = vpop.f32.mrb[48].mxu0  ;;  %v1073_v51 = vpop.f32.mrb[48].mxu1 }
 0x17b   : > { %2035 = vst [vmem:[%s2462_s8 + $0x58] sm:$0xff] %v1918_v48   ;;  %2052 = vst [vmem:[%s2462_s8 + $0xe0] sm:$0xff] %v2003_v49   ;;  %v938_v52 = vadd.f32 %v2452_v22, %v937_v50  ;;  %v1074_v53 = vadd.f32 %v2452_v22, %v1073_v51  ;;  %v939_v54 = vpop.f32.mrb[49].mxu0  ;;  %v1075_v55 = vpop.f32.mrb[49].mxu1 }
 0x17c   : > { %v940_v56 = vpop.f32.mrb[50].mxu0  ;;  %v1076_v57 = vpop.f32.mrb[50].mxu1 }
 0x17d   : > { %v1169_v58 = vmax.f32 %v1074_v53, 0.0  ;;  %v941_v59 = vadd.f32 %v2452_v22, %v940_v56  ;;  %v1077_v60 = vadd.f32 %v2452_v22, %v1076_v57  ;;  %v942_v61 = vpop.f32.mrb[51].mxu0  ;;  %v1078_v62 = vpop.f32.mrb[51].mxu1  ;;  %v1135_v63 = vmax.f32 %v938_v52, 0.0 }
 0x17f   : > { %v1136_v0 = vmax.f32 %v941_v59, 0.0  ;;  %v1170_v1 = vmax.f32 %v1077_v60, 0.0 }
 0x181   : > { %v1923_v2 = vpack.c.bf16 %v1136_v0, %v1135_v63  ;;  %v2008_v3 = vpack.c.bf16 %v1170_v1, %v1169_v58 }
 0x182   : > { %v945_v4 = vpop.f32.mrb[52].mxu0  ;;  %v1081_v5 = vpop.f32.mrb[52].mxu1 }
 0x183   : > { %2036 = vst [vmem:[%s2462_s8 + $0x60] sm:$0xff] %v1923_v2   ;;  %2053 = vst [vmem:[%s2462_s8 + $0xe8] sm:$0xff] %v2008_v3   ;;  %v946_v6 = vadd.f32 %v2452_v22, %v945_v4  ;;  %v1082_v7 = vadd.f32 %v2452_v22, %v1081_v5  ;;  %v947_v8 = vpop.f32.mrb[53].mxu0  ;;  %v1083_v9 = vpop.f32.mrb[53].mxu1 }
 0x184   : > { %v948_v10 = vpop.f32.mrb[54].mxu0  ;;  %v1084_v11 = vpop.f32.mrb[54].mxu1 }
 0x185   : > { %v1171_v12 = vmax.f32 %v1082_v7, 0.0  ;;  %v949_v13 = vadd.f32 %v2452_v22, %v948_v10  ;;  %v1085_v14 = vadd.f32 %v2452_v22, %v1084_v11  ;;  %v950_v15 = vpop.f32.mrb[55].mxu0  ;;  %v1086_v16 = vpop.f32.mrb[55].mxu1  ;;  %v1137_v17 = vmax.f32 %v946_v6, 0.0 }
 0x187   : > { %v1138_v18 = vmax.f32 %v949_v13, 0.0  ;;  %v1172_v19 = vmax.f32 %v1085_v14, 0.0 }
 0x189   : > { %v1928_v20 = vpack.c.bf16 %v1138_v18, %v1137_v17  ;;  %v2013_v21 = vpack.c.bf16 %v1172_v19, %v1171_v12 }
 0x18a   : > { %v953_v23 = vpop.f32.mrb[56].mxu0  ;;  %v1089_v24 = vpop.f32.mrb[56].mxu1 }
 0x18b   : > { %2037 = vst [vmem:[%s2462_s8 + $0x68] sm:$0xff] %v1928_v20   ;;  %2054 = vst [vmem:[%s2462_s8 + $0xf0] sm:$0xff] %v2013_v21   ;;  %v954_v25 = vadd.f32 %v2452_v22, %v953_v23  ;;  %v1090_v26 = vadd.f32 %v2452_v22, %v1089_v24  ;;  %v955_v27 = vpop.f32.mrb[57].mxu0  ;;  %v1091_v28 = vpop.f32.mrb[57].mxu1 }
 0x18c   : > { %v956_v29 = vpop.f32.mrb[58].mxu0  ;;  %v1092_v30 = vpop.f32.mrb[58].mxu1 }
 0x18d   : > { %v1173_v31 = vmax.f32 %v1090_v26, 0.0  ;;  %v957_v32 = vadd.f32 %v2452_v22, %v956_v29  ;;  %v1093_v33 = vadd.f32 %v2452_v22, %v1092_v30  ;;  %v958_v34 = vpop.f32.mrb[59].mxu0  ;;  %v1094_v35 = vpop.f32.mrb[59].mxu1  ;;  %v1139_v36 = vmax.f32 %v954_v25, 0.0 }
 0x18f   : > { %v1140_v37 = vmax.f32 %v957_v32, 0.0  ;;  %v1174_v38 = vmax.f32 %v1093_v33, 0.0 }
 0x191   : > { %v1933_v39 = vpack.c.bf16 %v1140_v37, %v1139_v36  ;;  %v2018_v40 = vpack.c.bf16 %v1174_v38, %v1173_v31 }
 0x192   : > { %v961_v41 = vpop.f32.mrb[60].mxu0  ;;  %v1097_v42 = vpop.f32.mrb[60].mxu1 }
 0x193   : > { %2038 = vst [vmem:[%s2462_s8 + $0x70] sm:$0xff] %v1933_v39   ;;  %2055 = vst [vmem:[%s2462_s8 + $0xf8] sm:$0xff] %v2018_v40   ;;  %v962_v43 = vadd.f32 %v2452_v22, %v961_v41  ;;  %v1098_v44 = vadd.f32 %v2452_v22, %v1097_v42  ;;  %v963_v45 = vpop.f32.mrb[61].mxu0  ;;  %v1099_v46 = vpop.f32.mrb[61].mxu1 }
 0x194   : > { %v964_v47 = vpop.f32.mrb[62].mxu0  ;;  %v1100_v48 = vpop.f32.mrb[62].mxu1 }
 0x195   : > { %v1175_v49 = vmax.f32 %v1098_v44, 0.0  ;;  %v965_v50 = vadd.f32 %v2452_v22, %v964_v47  ;;  %v1101_v51 = vadd.f32 %v2452_v22, %v1100_v48  ;;  %v966_v52 = vpop.f32.mrb[63].mxu0  ;;  %v1102_v53 = vpop.f32.mrb[63].mxu1  ;;  %v1141_v54 = vmax.f32 %v962_v43, 0.0 }
 0x197   : > { %v1142_v55 = vmax.f32 %v965_v50, 0.0  ;;  %v1176_v56 = vmax.f32 %v1101_v51, 0.0 }
 0x199   : > { %v1938_v57 = vpack.c.bf16 %v1142_v55, %v1141_v54  ;;  %v2023_v58 = vpack.c.bf16 %v1176_v56, %v1175_v49 }
 0x19a   : > { %v969_v59 = vpop.f32.mrb[64].mxu0  ;;  %v1105_v60 = vpop.f32.mrb[64].mxu1 }
 0x19b   : > { %2039 = vst [vmem:[%s2462_s8 + $0x78] sm:$0xff] %v1938_v57   ;;  %2056 = vst [vmem:[%s2462_s8 + $0x100] sm:$0xff] %v2023_v58   ;;  %v970_v61 = vadd.f32 %v2452_v22, %v969_v59  ;;  %v1106_v62 = vadd.f32 %v2452_v22, %v1105_v60  ;;  %v971_v63 = vpop.f32.mrb[65].mxu0  ;;  %v1107_v0 = vpop.f32.mrb[65].mxu1 }
 0x19c   : > { %v972_v1 = vpop.f32.mrb[66].mxu0  ;;  %v1108_v2 = vpop.f32.mrb[66].mxu1 }
 0x19d   : > { %v1177_v3 = vmax.f32 %v1106_v62, 0.0  ;;  %v973_v4 = vadd.f32 %v2452_v22, %v972_v1  ;;  %v974_v5 = vpop.f32.mrb[67].mxu0  ;;  %v1109_v6 = vpop.f32.mrb[67].mxu1  ;;  %v1143_v7 = vmax.f32 %v970_v61, 0.0 }
 0x19f   : > { %v1859_v8 = vpack.c.bf16 %v1177_v3, %v1177_v3  ;;  %v1144_v9 = vmax.f32 %v973_v4, 0.0 }
 0x1a1   : > { %1513 = vst [vmem:[%s2462_s8 + $0x108] sm:$0xf] %v1859_v8  ;;  %v1943_v10 = vpack.c.bf16 %v1144_v9, %v1143_v7 }
 0x1a3   : > { %2040 = vst [vmem:[%s2462_s8 + $0x80] sm:$0xff] %v1943_v10  }
 0x1a4 PF: > { %s13_s14 = sadd.s32 1, %s2253_s14   ;;  %s2574_s12 = smov %s2249_s13 }
 0x1a5   : > { %p10_p5 = scmp.ge.s32.totalorder %s13_s14, 4   ;;  %s2575_s13 = smov %s2577_s15 }
 0x1a7   :  { %12 = sbr.rel (!%p10_p5) target bundleno = 2 (0x2), region = 68 }

// kernel: dqn_forward.5
= control target key start
LH: loop header
LB: loop body
LE: loop exit
PB: predicated region body
PF: predicated region fallthrough
CT: control target
= control target key end

     0   :  { %s1451_s12 = smov 0   ;;  %s1453_s13 = smov 0   ;;  %s1642_s0 = inlined_call_operand.vmem [shape: bf16[208,512], index: 0, kind: input, shape index: {}]   ;;  %s1643_s1 = inlined_call_operand.vmem [shape: bf16[512,128], index: 1, kind: input, shape index: {}]   ;;  %s1644_s2 = inlined_call_operand.vmem [shape: f32[1,128], index: 2, kind: input, shape index: {}]   ;;  %s1645_s3 = inlined_call_operand.vmem [shape: bf16[208,128], index: 3, kind: output, shape index: {}]  }
   0x1   :  { %s1455_s14 = smov 0  }
   0x2 LB: > { %s32_s15 = sadd.s32 1, %s1425_s13  ;;  %p1066_p0 = scmp.ge.s32.totalorder %s1429_s14, 1  ;;  %s1429_s14 = sphi %s1455_s14, %s13_s14   ;;  %s1425_s13 = sphi %s1453_s13, %s1647_s13   ;;  %s1421_s12 = sphi %s1451_s12, %s1646_s12  }
   0x3   : > { %p34_p1 = scmp.ge.s32.totalorder %s32_s15, 2  ;;  %p191_p2 = scmp.lt.s32.totalorder %s1429_s14, 3 }
   0x5   : > { %s1649_s15 = smov (%p34_p1, %s32_s15), 0  ;;  %p192_p3 = pnand %p1066_p0, %p191_p2 }
   0x6   : > { %v1335_v0 = vld [vmem:[%s1643_s1 + $0x40] sm:$0xff] (!%p192_p3)   ;;  %v1339_v4 = vld [vmem:[%s1643_s1 + $0x48] sm:$0xff] (!%p192_p3)   ;;  %v1343_v8 = vld [vmem:[%s1643_s1 + $0x50] sm:$0xff] (!%p192_p3)   ;;  %s234_s23 = smul.u32 (!%p192_p3), 13, %s1421_s12 }
   0x7   : > { %195 = sbr.rel (%p192_p3) target bundleno = 312 (0x138), region = 32  ;;  %v1336_v1 = vld [vmem:[%s1643_s1 + $0xc0] sm:$0xff] (!%p192_p3)   ;;  %1195 = vmatprep.subr.bf16.mxu0 (!%p192_p3), %v1335_v0  ;;  %v1340_v5 = vld [vmem:[%s1643_s1 + $0xc8] sm:$0xff] (!%p192_p3)   ;;  %v1344_v9 = vld [vmem:[%s1643_s1 + $0xd0] sm:$0xff] (!%p192_p3)  }
   0x8   : > { %v1337_v2 = vld [vmem:[%s1643_s1] sm:$0xff] (!%p192_p3)   ;;  %1253 = vmatprep.subr.bf16.mxu1 (!%p192_p3), %v1336_v1  ;;  %v1341_v6 = vld [vmem:[%s1643_s1 + $0x8] sm:$0xff] (!%p192_p3)   ;;  %v1345_v10 = vld [vmem:[%s1643_s1 + $0x10] sm:$0xff] (!%p192_p3)   ;;  %p236_p4 = scmp.lt.s32.totalorder (!%p192_p3), %s234_s23, 25 }
   0x9   : > { %v1338_v3 = vld [vmem:[%s1643_s1 + $0x80] sm:$0xff] (!%p192_p3)   ;;  %1196 = vmatpush3.bf16.msra.mxu0 (!%p192_p3), %v1337_v2  ;;  %v1342_v7 = vld [vmem:[%s1643_s1 + $0x88] sm:$0xff] (!%p192_p3)   ;;  %v1346_v11 = vld [vmem:[%s1643_s1 + $0x90] sm:$0xff] (!%p192_p3)  }
   0xa   : > { %1254 = vmatpush3.bf16.msra.mxu1 (!%p192_p3), %v1338_v3  ;;  %1197 = vmatprep.subr.bf16.mxu0 (!%p192_p3), %v1339_v4  ;;  %v1347_v12 = vld [vmem:[%s1643_s1 + $0x58] sm:$0xff] (!%p192_p3)   ;;  %v1351_v16 = vld [vmem:[%s1643_s1 + $0x60] sm:$0xff] (!%p192_p3)   ;;  %v1355_v20 = vld [vmem:[%s1643_s1 + $0x68] sm:$0xff] (!%p192_p3)  }
   0xb   : > { %1255 = vmatprep.subr.bf16.mxu1 (!%p192_p3), %v1340_v5  ;;  %v1348_v13 = vld [vmem:[%s1643_s1 + $0xd8] sm:$0xff] (!%p192_p3)   ;;  %v1352_v17 = vld [vmem:[%s1643_s1 + $0xe0] sm:$0xff] (!%p192_p3)   ;;  %v1356_v21 = vld [vmem:[%s1643_s1 + $0xe8] sm:$0xff] (!%p192_p3)  }
   0xc   : > { %v1349_v14 = vld [vmem:[%s1643_s1 + $0x18] sm:$0xff] (!%p192_p3)   ;;  %v1353_v18 = vld [vmem:[%s1643_s1 + $0x20] sm:$0xff] (!%p192_p3)   ;;  %v1357_v22 = vld [vmem:[%s1643_s1 + $0x28] sm:$0xff] (!%p192_p3)  }
   0xd   : > { %1198 = vmatpush3.bf16.msra.mxu0 (!%p192_p3), %v1341_v6  ;;  %v1350_v15 = vld [vmem:[%s1643_s1 + $0x98] sm:$0xff] (!%p192_p3)   ;;  %v1354_v19 = vld [vmem:[%s1643_s1 + $0xa0] sm:$0xff] (!%p192_p3)   ;;  %v1358_v23 = vld [vmem:[%s1643_s1 + $0xa8] sm:$0xff] (!%p192_p3)  }
   0xe   : > { %1256 = vmatpush3.bf16.msra.mxu1 %v1342_v7  ;;  %1199 = vmatprep.subr.bf16.mxu0 %v1343_v8  ;;  %s1651_s23 = smov (!%p236_p4, %s234_s23), 25  ;;  %v1359_v24 = vld [vmem:[%s1643_s1 + $0x70] sm:$0xff]   ;;  %v1363_v28 = vld [vmem:[%s1643_s1 + $0x78] sm:$0xff]   ;;  %v1605_v0 = vld [vmem:[%s1644_s2] ss:$0 sm:$0xff] }
   0xf   : > { %1257 = vmatprep.subr.bf16.mxu1 %v1344_v9  ;;  %v1360_v25 = vld [vmem:[%s1643_s1 + $0xf0] sm:$0xff]   ;;  %s1146_s25 = sshll.u32 %s1651_s23, 4  ;;  %v1364_v29 = vld [vmem:[%s1643_s1 + $0xf8] sm:$0xff]   ;;  %s1069_s17 = sshll.u32 %s1651_s23, 2 }
  0x10   : > { %v1361_v26 = vld [vmem:[%s1643_s1 + $0x30] sm:$0xff]   ;;  %s1568_s6 = scalar_lea.vmem %s1642_s0, %s1146_s25  ;;  %v1365_v30 = vld [vmem:[%s1643_s1 + $0x38] sm:$0xff]   ;;  %s1613_s20 = scalar_lea.vmem %s1645_s3, %s1069_s17 }
  0x11   : > { %1200 = vmatpush3.bf16.msra.mxu0 %v1345_v10  ;;  %v1362_v27 = vld [vmem:[%s1643_s1 + $0xb0] sm:$0xff]   ;;  %v1366_v31 = vld [vmem:[%s1643_s1 + $0xb8] sm:$0xff]   ;;  %v292_v54 = vld [vmem:[%s1568_s6 + $0xc0] sm:$0xff] }
  0x12   : > { %1258 = vmatpush3.bf16.msra.mxu1 %v1346_v11  ;;  %1201 = vmatprep.subr.bf16.mxu0 %v1347_v12  ;;  %v1367_v32 = vld [vmem:[%s1568_s6] ss:$16 sps:$4 sm:$0xff]   ;;  %v1369_v33 = vld [vmem:[%s1568_s6 + $0x4] ss:$16 sps:$4 sm:$0xff]   ;;  %v1370_v34 = vld [vmem:[%s1568_s6 + $0x8] ss:$16 sps:$4 sm:$0xff]   ;;  %v1096_v58 = vcombine.high %v292_v54, %v292_v54  ;;  %v1095_v60 = vcombine.low %v292_v54, %v292_v54 }
  0x13   : > { %1259 = vmatprep.subr.bf16.mxu1 %v1348_v13  ;;  %v1372_v35 = vld [vmem:[%s1568_s6 + $0xc] ss:$16 sps:$4 sm:$0xff]   ;;  %723 = vmatprep.mubr.bf16.mxu0 %v1369_v33  ;;  %v1373_v36 = vld [vmem:[%s1568_s6 + $0x24] ss:$16 sps:$4 sm:$0xff]   ;;  %v1377_v38 = vld [vmem:[%s1568_s6 + $0x20] ss:$16 sps:$4 sm:$0xff]  }
  0x14   : > { %811 = vmatprep.mubr.bf16.mxu1 %v1372_v35  ;;  %v1375_v37 = vld [vmem:[%s1568_s6 + $0x2c] ss:$16 sps:$4 sm:$0xff]   ;;  %v1378_v39 = vld [vmem:[%s1568_s6 + $0x28] ss:$16 sps:$4 sm:$0xff]   ;;  %v1379_v40 = vld [vmem:[%s1568_s6 + $0x44] ss:$16 sps:$4 sm:$0xff]  }
  0x15   : > { %1202 = vmatpush3.bf16.msra.mxu0 %v1349_v14  ;;  %v1381_v41 = vld [vmem:[%s1568_s6 + $0x4c] ss:$16 sps:$4 sm:$0xff]   ;;  %v1383_v42 = vld [vmem:[%s1568_s6 + $0x40] ss:$16 sps:$4 sm:$0xff]   ;;  %v1384_v43 = vld [vmem:[%s1568_s6 + $0x48] ss:$16 sps:$4 sm:$0xff]  }
  0x16   : > { %1260 = vmatpush3.bf16.msra.mxu1 %v1350_v15  ;;  %1203 = vmatprep.subr.bf16.mxu0 %v1351_v16  ;;  %v1385_v44 = vld [vmem:[%s1568_s6 + $0x64] ss:$16 sps:$4 sm:$0xff]   ;;  %v1387_v45 = vld [vmem:[%s1568_s6 + $0x6c] ss:$16 sps:$4 sm:$0xff]   ;;  %v1389_v46 = vld [vmem:[%s1568_s6 + $0x60] ss:$16 sps:$4 sm:$0xff]  }
  0x17   : > { %1261 = vmatprep.subr.bf16.mxu1 %v1352_v17  ;;  %v1390_v47 = vld [vmem:[%s1568_s6 + $0x68] ss:$16 sps:$4 sm:$0xff]   ;;  %v1391_v48 = vld [vmem:[%s1568_s6 + $0x84] ss:$16 sps:$4 sm:$0xff]   ;;  %v1393_v49 = vld [vmem:[%s1568_s6 + $0x8c] ss:$16 sps:$4 sm:$0xff]  }
  0x18   : > { %v1395_v50 = vld [vmem:[%s1568_s6 + $0x80] ss:$16 sps:$4 sm:$0xff]   ;;  %v1396_v51 = vld [vmem:[%s1568_s6 + $0x88] ss:$16 sps:$4 sm:$0xff]   ;;  %v1397_v52 = vld [vmem:[%s1568_s6 + $0xa4] ss:$16 sps:$4 sm:$0xff]  }
  0x19   : > { %1204 = vmatpush3.bf16.msra.mxu0 %v1353_v18  ;;  %v1399_v53 = vld [vmem:[%s1568_s6 + $0xac] ss:$16 sps:$4 sm:$0xff]   ;;  %v1401_v56 = vld [vmem:[%s1568_s6 + $0xa0] ss:$16 sps:$4 sm:$0xff]   ;;  %v1402_v57 = vld [vmem:[%s1568_s6 + $0xa8] ss:$16 sps:$4 sm:$0xff]  }
  0x1a   : > { %1262 = vmatpush3.bf16.msra.mxu1 %v1354_v19  ;;  %1205 = vmatprep.subr.bf16.mxu0 %v1355_v20  ;;  %v293_v55 = vld [vmem:[%s1568_s6 + $0xc8] sm:$0xff] }
  0x1b   : > { %1263 = vmatprep.subr.bf16.mxu1 %v1356_v21  ;;  %v1098_v59 = vcombine.high %v293_v55, %v293_v55  ;;  %v1097_v61 = vcombine.low %v293_v55, %v293_v55 }
  0x1d   : > { %1206 = vmatpush3.bf16.msra.mxu0 %v1357_v22 }
  0x1e   : > { %1264 = vmatpush3.bf16.msra.mxu1 %v1358_v23  ;;  %1207 = vmatprep.subr.bf16.mxu0 %v1359_v24 }
  0x1f   : > { %1265 = vmatprep.subr.bf16.mxu1 %v1360_v25 }
  0x21   : > { %1208 = vmatpush3.bf16.msra.mxu0 %v1361_v26 }
  0x22   : > { %1266 = vmatpush3.bf16.msra.mxu1 %v1362_v27  ;;  %1209 = vmatprep.subr.bf16.mxu0 %v1363_v28 }
  0x23   : > { %1267 = vmatprep.subr.bf16.mxu1 %v1364_v29 }
  0x25   : > { %1210 = vmatpush3.bf16.msra.mxu0 %v1365_v30 }
  0x26   : > { %1268 = vmatpush3.bf16.msra.mxu1 %v1366_v31 }
  0x28   : > { %724 = vmatmul.mubr.bf16.vlgmr.msra.gmra.mrb[0].mxu0 %v1367_v32 }
  0x29   : > { %812 = vmatmul.mubr.bf16.vlgmr.msra.gmra.mrb[0].mxu1 %v1370_v34  ;;  %731 = vmatprep.mubr.bf16.mxu0 %v1373_v36 }
  0x2a   : > { %819 = vmatprep.mubr.bf16.mxu1 %v1375_v37 }
  0x30   : > { %732 = vmatmul.mubr.bf16.gmra.mrb[4].mxu0 %v1377_v38 }
  0x31   : > { %820 = vmatmul.mubr.bf16.gmra.mrb[4].mxu1 %v1378_v39  ;;  %739 = vmatprep.mubr.bf16.mxu0 %v1379_v40 }
  0x32   : > { %827 = vmatprep.mubr.bf16.mxu1 %v1381_v41 }
  0x38   : > { %740 = vmatmul.mubr.bf16.gmra.mrb[8].mxu0 %v1383_v42 }
  0x39   : > { %828 = vmatmul.mubr.bf16.gmra.mrb[8].mxu1 %v1384_v43  ;;  %747 = vmatprep.mubr.bf16.mxu0 %v1385_v44 }
  0x3a   : > { %835 = vmatprep.mubr.bf16.mxu1 %v1387_v45 }
  0x40   : > { %748 = vmatmul.mubr.bf16.gmra.mrb[12].mxu0 %v1389_v46 }
  0x41   : > { %836 = vmatmul.mubr.bf16.gmra.mrb[12].mxu1 %v1390_v47  ;;  %755 = vmatprep.mubr.bf16.mxu0 %v1391_v48 }
  0x42   : > { %843 = vmatprep.mubr.bf16.mxu1 %v1393_v49 }
  0x48   : > { %756 = vmatmul.mubr.bf16.gmra.mrb[16].mxu0 %v1395_v50 }
  0x49   : > { %844 = vmatmul.mubr.bf16.gmra.mrb[16].mxu1 %v1396_v51  ;;  %763 = vmatprep.mubr.bf16.mxu0 %v1397_v52 }
  0x4a   : > { %851 = vmatprep.mubr.bf16.mxu1 %v1399_v53 }
  0x50   : > { %764 = vmatmul.mubr.bf16.gmra.mrb[20].mxu0 %v1401_v56 }
  0x51   : > { %852 = vmatmul.mubr.bf16.gmra.mrb[20].mxu1 %v1402_v57  ;;  %771 = vmatprep.mubr.bf16.mxu0 %v1096_v58 }
  0x52   : > { %859 = vmatprep.mubr.bf16.mxu1 %v1098_v59 }
  0x58   : > { %772 = vmatmul.mubr.bf16.gmra.mrb[24].mxu0 %v1095_v60 }
  0x59   : > { %860 = vmatmul.mubr.bf16.gmra.mrb[24].mxu1 %v1097_v61 }
  0xfb   : > { %v1211_v62 = vpop.f32.mrb[0].mxu0 }
  0xfc   : > { %v1269_v63 = vpop.f32.mrb[0].mxu1  ;;  %v1212_v1 = vpop.f32.mrb[1].mxu0 }
  0xfd   : > { %v1213_v2 = vadd.f32 %v1212_v1, %v1211_v62  ;;  %v1270_v3 = vpop.f32.mrb[1].mxu1  ;;  %v1214_v4 = vpop.f32.mrb[2].mxu0 }
  0xfe   : > { %v1271_v5 = vadd.f32 %v1270_v3, %v1269_v63  ;;  %v1272_v6 = vpop.f32.mrb[2].mxu1  ;;  %v1215_v7 = vpop.f32.mrb[3].mxu0 }
  0xff   : > { %v726_v8 = vadd.f32 %v1213_v2, %v1605_v0  ;;  %v1216_v9 = vadd.f32 %v1215_v7, %v1214_v4  ;;  %v1273_v10 = vpop.f32.mrb[3].mxu1 }
 0x100   : > { %v1274_v11 = vadd.f32 %v1273_v10, %v1272_v6 }
 0x101   : > { %v814_v12 = vadd.f32 %v1271_v5, %v726_v8  ;;  %v729_v13 = vadd.f32 %v1216_v9, %v1605_v0 }
 0x103   : > { %v817_v14 = vadd.f32 %v1274_v11, %v729_v13  ;;  %v1217_v15 = vpop.f32.mrb[4].mxu0  ;;  %v867_v18 = vmax.f32 %v814_v12, 0.0 }
 0x104   : > { %v1275_v16 = vpop.f32.mrb[4].mxu1  ;;  %v1218_v17 = vpop.f32.mrb[5].mxu0 }
 0x105   : > { %v868_v19 = vmax.f32 %v817_v14, 0.0  ;;  %v1219_v20 = vadd.f32 %v1218_v17, %v1217_v15  ;;  %v1276_v21 = vpop.f32.mrb[5].mxu1  ;;  %v1220_v22 = vpop.f32.mrb[6].mxu0 }
 0x106   : > { %v1277_v23 = vadd.f32 %v1276_v21, %v1275_v16  ;;  %v1278_v24 = vpop.f32.mrb[6].mxu1  ;;  %v1221_v25 = vpop.f32.mrb[7].mxu0 }
 0x107   : > { %v1163_v26 = vpack.c.bf16 %v868_v19, %v867_v18  ;;  %v734_v27 = vadd.f32 %v1219_v20, %v1605_v0  ;;  %v1222_v28 = vadd.f32 %v1221_v25, %v1220_v22  ;;  %v1279_v29 = vpop.f32.mrb[7].mxu1 }
 0x108   : > { %v1280_v30 = vadd.f32 %v1279_v29, %v1278_v24 }
 0x109   : > { %1164 = vst [vmem:[%s1613_s20] sm:$0xff] %v1163_v26   ;;  %v822_v31 = vadd.f32 %v1277_v23, %v734_v27  ;;  %v737_v32 = vadd.f32 %v1222_v28, %v1605_v0 }
 0x10b   : > { %v825_v33 = vadd.f32 %v1280_v30, %v737_v32  ;;  %v1223_v34 = vpop.f32.mrb[8].mxu0  ;;  %v869_v37 = vmax.f32 %v822_v31, 0.0 }
 0x10c   : > { %v1281_v35 = vpop.f32.mrb[8].mxu1  ;;  %v1224_v36 = vpop.f32.mrb[9].mxu0 }
 0x10d   : > { %v870_v38 = vmax.f32 %v825_v33, 0.0  ;;  %v1225_v39 = vadd.f32 %v1224_v36, %v1223_v34  ;;  %v1282_v40 = vpop.f32.mrb[9].mxu1  ;;  %v1226_v41 = vpop.f32.mrb[10].mxu0 }
 0x10e   : > { %v1283_v42 = vadd.f32 %v1282_v40, %v1281_v35  ;;  %v1284_v43 = vpop.f32.mrb[10].mxu1  ;;  %v1227_v44 = vpop.f32.mrb[11].mxu0 }
 0x10f   : > { %v1168_v45 = vpack.c.bf16 %v870_v38, %v869_v37  ;;  %v742_v46 = vadd.f32 %v1225_v39, %v1605_v0  ;;  %v1228_v47 = vadd.f32 %v1227_v44, %v1226_v41  ;;  %v1285_v48 = vpop.f32.mrb[11].mxu1 }
 0x110   : > { %v1286_v49 = vadd.f32 %v1285_v48, %v1284_v43 }
 0x111   : > { %1190 = vst [vmem:[%s1613_s20 + $0x8] sm:$0xff] %v1168_v45   ;;  %v830_v50 = vadd.f32 %v1283_v42, %v742_v46  ;;  %v745_v51 = vadd.f32 %v1228_v47, %v1605_v0 }
 0x113   : > { %v833_v52 = vadd.f32 %v1286_v49, %v745_v51  ;;  %v1229_v53 = vpop.f32.mrb[12].mxu0  ;;  %v871_v56 = vmax.f32 %v830_v50, 0.0 }
 0x114   : > { %v1287_v54 = vpop.f32.mrb[12].mxu1  ;;  %v1230_v55 = vpop.f32.mrb[13].mxu0 }
 0x115   : > { %v872_v57 = vmax.f32 %v833_v52, 0.0  ;;  %v1231_v58 = vadd.f32 %v1230_v55, %v1229_v53  ;;  %v1288_v59 = vpop.f32.mrb[13].mxu1  ;;  %v1232_v60 = vpop.f32.mrb[14].mxu0 }
 0x116   : > { %v1289_v61 = vadd.f32 %v1288_v59, %v1287_v54  ;;  %v1290_v62 = vpop.f32.mrb[14].mxu1  ;;  %v1233_v63 = vpop.f32.mrb[15].mxu0 }
 0x117   : > { %v1173_v1 = vpack.c.bf16 %v872_v57, %v871_v56  ;;  %v750_v2 = vadd.f32 %v1231_v58, %v1605_v0  ;;  %v1234_v3 = vadd.f32 %v1233_v63, %v1232_v60  ;;  %v1291_v4 = vpop.f32.mrb[15].mxu1 }
 0x118   : > { %v1292_v5 = vadd.f32 %v1291_v4, %v1290_v62 }
 0x119   : > { %1191 = vst [vmem:[%s1613_s20 + $0x10] sm:$0xff] %v1173_v1   ;;  %v838_v6 = vadd.f32 %v1289_v61, %v750_v2  ;;  %v753_v7 = vadd.f32 %v1234_v3, %v1605_v0 }
 0x11b   : > { %v841_v8 = vadd.f32 %v1292_v5, %v753_v7  ;;  %v1235_v9 = vpop.f32.mrb[16].mxu0  ;;  %v873_v12 = vmax.f32 %v838_v6, 0.0 }
 0x11c   : > { %v1293_v10 = vpop.f32.mrb[16].mxu1  ;;  %v1236_v11 = vpop.f32.mrb[17].mxu0 }
 0x11d   : > { %v874_v13 = vmax.f32 %v841_v8, 0.0  ;;  %v1237_v14 = vadd.f32 %v1236_v11, %v1235_v9  ;;  %v1294_v15 = vpop.f32.mrb[17].mxu1  ;;  %v1238_v16 = vpop.f32.mrb[18].mxu0 }
 0x11e   : > { %v1295_v17 = vadd.f32 %v1294_v15, %v1293_v10  ;;  %v1296_v18 = vpop.f32.mrb[18].mxu1  ;;  %v1239_v19 = vpop.f32.mrb[19].mxu0 }
 0x11f   : > { %v1178_v20 = vpack.c.bf16 %v874_v13, %v873_v12  ;;  %v758_v21 = vadd.f32 %v1237_v14, %v1605_v0  ;;  %v1240_v22 = vadd.f32 %v1239_v19, %v1238_v16  ;;  %v1297_v23 = vpop.f32.mrb[19].mxu1 }
 0x120   : > { %v1298_v24 = vadd.f32 %v1297_v23, %v1296_v18 }
 0x121   : > { %1192 = vst [vmem:[%s1613_s20 + $0x18] sm:$0xff] %v1178_v20   ;;  %v846_v25 = vadd.f32 %v1295_v17, %v758_v21  ;;  %v761_v26 = vadd.f32 %v1240_v22, %v1605_v0 }
 0x123   : > { %v849_v27 = vadd.f32 %v1298_v24, %v761_v26  ;;  %v1241_v28 = vpop.f32.mrb[20].mxu0  ;;  %v875_v31 = vmax.f32 %v846_v25, 0.0 }
 0x124   : > { %v1299_v29 = vpop.f32.mrb[20].mxu1  ;;  %v1242_v30 = vpop.f32.mrb[21].mxu0 }
 0x125   : > { %v876_v32 = vmax.f32 %v849_v27, 0.0  ;;  %v1243_v33 = vadd.f32 %v1242_v30, %v1241_v28  ;;  %v1300_v34 = vpop.f32.mrb[21].mxu1  ;;  %v1244_v35 = vpop.f32.mrb[22].mxu0 }
 0x126   : > { %v1301_v36 = vadd.f32 %v1300_v34, %v1299_v29  ;;  %v1302_v37 = vpop.f32.mrb[22].mxu1  ;;  %v1245_v38 = vpop.f32.mrb[23].mxu0 }
 0x127   : > { %v1183_v39 = vpack.c.bf16 %v876_v32, %v875_v31  ;;  %v766_v40 = vadd.f32 %v1243_v33, %v1605_v0  ;;  %v1246_v41 = vadd.f32 %v1245_v38, %v1244_v35  ;;  %v1303_v42 = vpop.f32.mrb[23].mxu1 }
 0x128   : > { %v1304_v43 = vadd.f32 %v1303_v42, %v1302_v37 }
 0x129   : > { %1193 = vst [vmem:[%s1613_s20 + $0x20] sm:$0xff] %v1183_v39   ;;  %v854_v44 = vadd.f32 %v1301_v36, %v766_v40  ;;  %v769_v45 = vadd.f32 %v1246_v41, %v1605_v0 }
 0x12b   : > { %v857_v46 = vadd.f32 %v1304_v43, %v769_v45  ;;  %v1247_v47 = vpop.f32.mrb[24].mxu0  ;;  %v877_v50 = vmax.f32 %v854_v44, 0.0 }
 0x12c   : > { %v1305_v48 = vpop.f32.mrb[24].mxu1  ;;  %v1248_v49 = vpop.f32.mrb[25].mxu0 }
 0x12d   : > { %v878_v51 = vmax.f32 %v857_v46, 0.0  ;;  %v1249_v52 = vadd.f32 %v1248_v49, %v1247_v47  ;;  %v1306_v53 = vpop.f32.mrb[25].mxu1  ;;  %v1250_v54 = vpop.f32.mrb[26].mxu0 }
 0x12e   : > { %v1307_v55 = vadd.f32 %v1306_v53, %v1305_v48  ;;  %v1308_v56 = vpop.f32.mrb[26].mxu1  ;;  %v1251_v57 = vpop.f32.mrb[27].mxu0 }
 0x12f   : > { %v1188_v58 = vpack.c.bf16 %v878_v51, %v877_v50  ;;  %v774_v59 = vadd.f32 %v1249_v52, %v1605_v0  ;;  %v1309_v60 = vpop.f32.mrb[27].mxu1 }
 0x131   : > { %1194 = vst [vmem:[%s1613_s20 + $0x28] sm:$0xff] %v1188_v58   ;;  %v862_v61 = vadd.f32 %v1307_v55, %v774_v59 }
 0x133   : > { %v879_v62 = vmax.f32 %v862_v61, 0.0 }
 0x135   : > { %v1159_v63 = vpack.c.bf16 %v879_v62, %v879_v62 }
 0x137   : > { %945 = vst [vmem:[%s1613_s20 + $0x30] sm:$0xf] %v1159_v63 }
 0x138 PF: > { %s13_s14 = sadd.s32 1, %s1429_s14   ;;  %s1646_s12 = smov %s1425_s13 }
 0x139   : > { %p10_p5 = scmp.ge.s32.totalorder %s13_s14, 4   ;;  %s1647_s13 = smov %s1649_s15 }
 0x13b   :  { %12 = sbr.rel (!%p10_p5) target bundleno = 2 (0x2), region = 68 }

// kernel: dqn_forward.6
= control target key start
LH: loop header
LB: loop body
LE: loop exit
PB: predicated region body
PF: predicated region fallthrough
CT: control target
= control target key end

     0   :  { %s1462_s12 = smov 0   ;;  %s1464_s13 = smov 0   ;;  %s1647_s0 = inlined_call_operand.vmem [shape: bf16[128,640], index: 0, kind: input, shape index: {}]   ;;  %s1648_s1 = inlined_call_operand.vmem [shape: bf16[640,128], index: 1, kind: input, shape index: {}]   ;;  %s1649_s2 = inlined_call_operand.vmem [shape: f32[1,128], index: 2, kind: input, shape index: {}]   ;;  %s1650_s3 = inlined_call_operand.vmem [shape: bf16[128,128], index: 3, kind: output, shape index: {}]  }
   0x1   :  { %s1466_s14 = smov 0  }
   0x2 LB: > { %s32_s15 = sadd.s32 1, %s1436_s13  ;;  %p1086_p0 = scmp.ge.s32.totalorder %s1440_s14, 1  ;;  %s1440_s14 = sphi %s1466_s14, %s13_s14   ;;  %s1436_s13 = sphi %s1464_s13, %s1652_s13   ;;  %s1432_s12 = sphi %s1462_s12, %s1651_s12  }
   0x3   : > { %p34_p1 = scmp.ge.s32.totalorder %s32_s15, 2  ;;  %p191_p2 = scmp.lt.s32.totalorder %s1440_s14, 3 }
   0x5   : > { %s1654_s15 = smov (%p34_p1, %s32_s15), 0  ;;  %p192_p3 = pnand %p1086_p0, %p191_p2 }
   0x6   : > { %v1350_v0 = vld [vmem:[%s1648_s1 + $0x40] sm:$0xff] (!%p192_p3)   ;;  %v1354_v4 = vld [vmem:[%s1648_s1 + $0x48] sm:$0xff] (!%p192_p3)   ;;  %v1358_v8 = vld [vmem:[%s1648_s1 + $0x50] sm:$0xff] (!%p192_p3)   ;;  %s1087_s23 = sshll.u32 (!%p192_p3), %s1432_s12, 3 }
   0x7   : > { %195 = sbr.rel (%p192_p3) target bundleno = 296 (0x128), region = 32  ;;  %v1351_v1 = vld [vmem:[%s1648_s1 + $0xc0] sm:$0xff] (!%p192_p3)   ;;  %1193 = vmatprep.subr.bf16.mxu0 (!%p192_p3), %v1350_v0  ;;  %v1355_v5 = vld [vmem:[%s1648_s1 + $0xc8] sm:$0xff] (!%p192_p3)   ;;  %v1359_v9 = vld [vmem:[%s1648_s1 + $0xd0] sm:$0xff] (!%p192_p3)   ;;  %p236_p4 = scmp.lt.s32.totalorder (!%p192_p3), %s1087_s23, 15 }
   0x8   : > { %v1352_v2 = vld [vmem:[%s1648_s1] sm:$0xff] (!%p192_p3)   ;;  %1233 = vmatprep.subr.bf16.mxu1 (!%p192_p3), %v1351_v1  ;;  %v1356_v6 = vld [vmem:[%s1648_s1 + $0x8] sm:$0xff] (!%p192_p3)   ;;  %v1360_v10 = vld [vmem:[%s1648_s1 + $0x10] sm:$0xff] (!%p192_p3)  }
   0x9   : > { %v1353_v3 = vld [vmem:[%s1648_s1 + $0x80] sm:$0xff] (!%p192_p3)   ;;  %1194 = vmatpush3.bf16.msra.mxu0 (!%p192_p3), %v1352_v2  ;;  %v1357_v7 = vld [vmem:[%s1648_s1 + $0x88] sm:$0xff] (!%p192_p3)   ;;  %v1361_v11 = vld [vmem:[%s1648_s1 + $0x90] sm:$0xff] (!%p192_p3)  }
   0xa   : > { %1234 = vmatpush3.bf16.msra.mxu1 (!%p192_p3), %v1353_v3  ;;  %1195 = vmatprep.subr.bf16.mxu0 (!%p192_p3), %v1354_v4  ;;  %v1362_v12 = vld [vmem:[%s1648_s1 + $0x58] sm:$0xff] (!%p192_p3)   ;;  %v1366_v16 = vld [vmem:[%s1648_s1 + $0x60] sm:$0xff] (!%p192_p3)   ;;  %v1370_v20 = vld [vmem:[%s1648_s1 + $0x68] sm:$0xff] (!%p192_p3)  }
   0xb   : > { %1235 = vmatprep.subr.bf16.mxu1 (!%p192_p3), %v1355_v5  ;;  %v1363_v13 = vld [vmem:[%s1648_s1 + $0xd8] sm:$0xff] (!%p192_p3)   ;;  %v1367_v17 = vld [vmem:[%s1648_s1 + $0xe0] sm:$0xff] (!%p192_p3)   ;;  %v1371_v21 = vld [vmem:[%s1648_s1 + $0xe8] sm:$0xff] (!%p192_p3)  }
   0xc   : > { %v1364_v14 = vld [vmem:[%s1648_s1 + $0x18] sm:$0xff] (!%p192_p3)   ;;  %v1368_v18 = vld [vmem:[%s1648_s1 + $0x20] sm:$0xff] (!%p192_p3)   ;;  %v1372_v22 = vld [vmem:[%s1648_s1 + $0x28] sm:$0xff] (!%p192_p3)  }
   0xd   : > { %1196 = vmatpush3.bf16.msra.mxu0 (!%p192_p3), %v1356_v6  ;;  %v1365_v15 = vld [vmem:[%s1648_s1 + $0x98] sm:$0xff] (!%p192_p3)   ;;  %v1369_v19 = vld [vmem:[%s1648_s1 + $0xa0] sm:$0xff] (!%p192_p3)   ;;  %v1373_v23 = vld [vmem:[%s1648_s1 + $0xa8] sm:$0xff] (!%p192_p3)  }
   0xe   : > { %1236 = vmatpush3.bf16.msra.mxu1 %v1357_v7  ;;  %1197 = vmatprep.subr.bf16.mxu0 %v1358_v8  ;;  %s1656_s23 = smov (!%p236_p4, %s1087_s23), 15  ;;  %v1374_v24 = vld [vmem:[%s1648_s1 + $0x70] sm:$0xff]   ;;  %v1378_v28 = vld [vmem:[%s1648_s1 + $0x78] sm:$0xff]   ;;  %v1388_v36 = vld [vmem:[%s1648_s1 + $0x100] sm:$0xff]  }
   0xf   : > { %1237 = vmatprep.subr.bf16.mxu1 %v1359_v9  ;;  %v1375_v25 = vld [vmem:[%s1648_s1 + $0xf0] sm:$0xff]   ;;  %s1325_s22 = smul.u32 20, %s1656_s23  ;;  %v1379_v29 = vld [vmem:[%s1648_s1 + $0xf8] sm:$0xff]   ;;  %v1389_v37 = vld [vmem:[%s1648_s1 + $0x108] sm:$0xff]  }
  0x10   : > { %v1376_v26 = vld [vmem:[%s1648_s1 + $0x30] sm:$0xff]   ;;  %v1380_v30 = vld [vmem:[%s1648_s1 + $0x38] sm:$0xff]   ;;  %v1404_v46 = vld [vmem:[%s1648_s1 + $0x120] sm:$0xff]  }
  0x11   : > { %1198 = vmatpush3.bf16.msra.mxu0 %v1360_v10  ;;  %v1377_v27 = vld [vmem:[%s1648_s1 + $0xb0] sm:$0xff]   ;;  %s1579_s6 = scalar_lea.vmem %s1647_s0, %s1325_s22  ;;  %v1381_v31 = vld [vmem:[%s1648_s1 + $0xb8] sm:$0xff]   ;;  %v1405_v51 = vld [vmem:[%s1648_s1 + $0x128] sm:$0xff]  }
  0x12   : > { %1238 = vmatpush3.bf16.msra.mxu1 %v1361_v11  ;;  %1199 = vmatprep.subr.bf16.mxu0 %v1362_v12  ;;  %v1382_v32 = vld [vmem:[%s1579_s6] ss:$20 sps:$4 sm:$0xff]   ;;  %v1384_v33 = vld [vmem:[%s1579_s6 + $0x4] ss:$20 sps:$4 sm:$0xff]   ;;  %v1385_v34 = vld [vmem:[%s1579_s6 + $0x8] ss:$20 sps:$4 sm:$0xff]  }
  0x13   : > { %1239 = vmatprep.subr.bf16.mxu1 %v1363_v13  ;;  %v1387_v35 = vld [vmem:[%s1579_s6 + $0xc] ss:$20 sps:$4 sm:$0xff]   ;;  %755 = vmatprep.mubr.bf16.mxu0 %v1384_v33  ;;  %v1392_v39 = vld [vmem:[%s1579_s6 + $0x34] ss:$20 sps:$4 sm:$0xff]   ;;  %v1395_v42 = vld [vmem:[%s1579_s6 + $0x30] ss:$20 sps:$4 sm:$0xff]  }
  0x14   : > { %820 = vmatprep.mubr.bf16.mxu1 %v1387_v35  ;;  %v1390_v38 = vld [vmem:[%s1579_s6 + $0x2c] ss:$20 sps:$4 sm:$0xff]   ;;  %v1394_v40 = vld [vmem:[%s1579_s6 + $0x28] ss:$20 sps:$4 sm:$0xff]   ;;  %v1396_v41 = vld [vmem:[%s1648_s1 + $0x110] sm:$0xff]  }
  0x15   : > { %1200 = vmatpush3.bf16.msra.mxu0 %v1364_v14  ;;  %v1398_v43 = vld [vmem:[%s1579_s6 + $0x54] ss:$20 sps:$4 sm:$0xff]   ;;  %v1397_v44 = vld [vmem:[%s1648_s1 + $0x118] sm:$0xff]   ;;  %v1402_v47 = vld [vmem:[%s1579_s6 + $0x50] ss:$20 sps:$4 sm:$0xff]  }
  0x16   : > { %1240 = vmatpush3.bf16.msra.mxu1 %v1365_v15  ;;  %1201 = vmatprep.subr.bf16.mxu0 %v1366_v16  ;;  %v1400_v45 = vld [vmem:[%s1579_s6 + $0x5c] ss:$20 sps:$4 sm:$0xff]   ;;  %v1403_v48 = vld [vmem:[%s1579_s6 + $0x58] ss:$20 sps:$4 sm:$0xff]   ;;  %v1411_v54 = vld [vmem:[%s1579_s6 + $0x80] ss:$20 sps:$4 sm:$0xff]  }
  0x17   : > { %1241 = vmatprep.subr.bf16.mxu1 %v1367_v17  ;;  %v1406_v49 = vld [vmem:[%s1579_s6 + $0x7c] ss:$20 sps:$4 sm:$0xff]   ;;  %v1408_v50 = vld [vmem:[%s1579_s6 + $0x84] ss:$20 sps:$4 sm:$0xff]   ;;  %v1415_v56 = vld [vmem:[%s1579_s6 + $0x60] ss:$20 sps:$4 sm:$0xff]  }
  0x18   : > { %v1412_v52 = vld [vmem:[%s1648_s1 + $0x130] sm:$0xff]   ;;  %v1410_v53 = vld [vmem:[%s1579_s6 + $0x78] ss:$20 sps:$4 sm:$0xff]   ;;  %v1417_v59 = vld [vmem:[%s1579_s6 + $0x88] ss:$20 sps:$4 sm:$0xff]  }
  0x19   : > { %1202 = vmatpush3.bf16.msra.mxu0 %v1368_v18  ;;  %v1414_v55 = vld [vmem:[%s1579_s6 + $0x10] ss:$20 sps:$4 sm:$0xff]   ;;  %v1413_v57 = vld [vmem:[%s1648_s1 + $0x138] sm:$0xff]   ;;  %v1091_v62 = vld [vmem:[%s1649_s2] ss:$0 sm:$0xff] }
  0x1a   : > { %1242 = vmatpush3.bf16.msra.mxu1 %v1369_v19  ;;  %1203 = vmatprep.subr.bf16.mxu0 %v1370_v20  ;;  %v1416_v58 = vld [vmem:[%s1579_s6 + $0x38] ss:$20 sps:$4 sm:$0xff]   ;;  %s1090_s6 = sshll.u32 %s1656_s23, 2 }
  0x1b   : > { %1243 = vmatprep.subr.bf16.mxu1 %v1371_v21  ;;  %s265_s9 = scalar_lea.vmem %s1650_s3, %s1090_s6 }
  0x1d   : > { %1204 = vmatpush3.bf16.msra.mxu0 %v1372_v22 }
  0x1e   : > { %1244 = vmatpush3.bf16.msra.mxu1 %v1373_v23  ;;  %1205 = vmatprep.subr.bf16.mxu0 %v1374_v24 }
  0x1f   : > { %1245 = vmatprep.subr.bf16.mxu1 %v1375_v25 }
  0x21   : > { %1206 = vmatpush3.bf16.msra.mxu0 %v1376_v26 }
  0x22   : > { %1246 = vmatpush3.bf16.msra.mxu1 %v1377_v27  ;;  %1207 = vmatprep.subr.bf16.mxu0 %v1378_v28 }
  0x23   : > { %1247 = vmatprep.subr.bf16.mxu1 %v1379_v29 }
  0x25   : > { %1208 = vmatpush3.bf16.msra.mxu0 %v1380_v30 }
  0x26   : > { %1248 = vmatpush3.bf16.msra.mxu1 %v1381_v31  ;;  %1285 = vmatprep.subr.bf16.mxu0 %v1388_v36 }
  0x27   : > { %1309 = vmatprep.subr.bf16.mxu1 %v1388_v36 }
  0x28   : > { %756 = vmatmul.mubr.bf16.vlgmr.msra.gmra.mrb[0].mxu0 %v1382_v32 }
  0x29   : > { %821 = vmatmul.mubr.bf16.vlgmr.msra.gmra.mrb[0].mxu1 %v1385_v34  ;;  %1286 = vmatpush3.bf16.msra.mxu0 %v1388_v36 }
  0x2a   : > { %1317 = vmatpush3.bf16.msra.mxu1 %v1388_v36  ;;  %1287 = vmatprep.subr.bf16.mxu0 %v1389_v37 }
  0x2b   : > { %1310 = vmatprep.subr.bf16.mxu1 %v1389_v37  ;;  %763 = vmatprep.mubr.bf16.mxu0 %v1390_v38 }
  0x2c   : > { %828 = vmatprep.mubr.bf16.mxu1 %v1392_v39 }
  0x2d   : > { %1288 = vmatpush3.bf16.msra.mxu0 %v1389_v37 }
  0x2e   : > { %1318 = vmatpush3.bf16.msra.mxu1 %v1389_v37  ;;  %1289 = vmatprep.subr.bf16.mxu0 %v1396_v41 }
  0x2f   : > { %1311 = vmatprep.subr.bf16.mxu1 %v1396_v41 }
  0x30   : > { %764 = vmatmul.mubr.bf16.gmra.mrb[4].mxu0 %v1394_v40 }
  0x31   : > { %829 = vmatmul.mubr.bf16.gmra.mrb[4].mxu1 %v1395_v42  ;;  %771 = vmatprep.mubr.bf16.mxu0 %v1398_v43 }
  0x32   : > { %1290 = vmatpush3.bf16.msra.mxu0 %v1396_v41  ;;  %836 = vmatprep.mubr.bf16.mxu1 %v1400_v45 }
  0x33   : > { %1319 = vmatpush3.bf16.msra.mxu1 %v1396_v41  ;;  %1291 = vmatprep.subr.bf16.mxu0 %v1397_v44 }
  0x34   : > { %1312 = vmatprep.subr.bf16.mxu1 %v1397_v44 }
  0x36   : > { %1292 = vmatpush3.bf16.msra.mxu0 %v1397_v44 }
  0x37   : > { %1320 = vmatpush3.bf16.msra.mxu1 %v1397_v44  ;;  %1293 = vmatprep.subr.bf16.mxu0 %v1404_v46 }
  0x38   : > { %772 = vmatmul.mubr.bf16.gmra.mrb[8].mxu0 %v1402_v47  ;;  %1313 = vmatprep.subr.bf16.mxu1 %v1404_v46 }
  0x39   : > { %837 = vmatmul.mubr.bf16.gmra.mrb[8].mxu1 %v1403_v48  ;;  %779 = vmatprep.mubr.bf16.mxu0 %v1406_v49 }
  0x3a   : > { %1294 = vmatpush3.bf16.msra.mxu0 %v1404_v46  ;;  %844 = vmatprep.mubr.bf16.mxu1 %v1408_v50 }
  0x3b   : > { %1321 = vmatpush3.bf16.msra.mxu1 %v1404_v46  ;;  %1295 = vmatprep.subr.bf16.mxu0 %v1405_v51 }
  0x3c   : > { %1314 = vmatprep.subr.bf16.mxu1 %v1405_v51 }
  0x3e   : > { %1296 = vmatpush3.bf16.msra.mxu0 %v1405_v51 }
  0x3f   : > { %1322 = vmatpush3.bf16.msra.mxu1 %v1405_v51  ;;  %1297 = vmatprep.subr.bf16.mxu0 %v1412_v52 }
  0x40   : > { %780 = vmatmul.mubr.bf16.gmra.mrb[12].mxu0 %v1410_v53  ;;  %1315 = vmatprep.subr.bf16.mxu1 %v1412_v52 }
  0x41   : > { %845 = vmatmul.mubr.bf16.gmra.mrb[12].mxu1 %v1411_v54  ;;  %1301 = vmatprep.mubr.bf16.mxu0 %v1414_v55 }
  0x42   : > { %1298 = vmatpush3.bf16.msra.mxu0 %v1412_v52  ;;  %1305 = vmatprep.mubr.bf16.mxu1 %v1415_v56 }
  0x43   : > { %1323 = vmatpush3.bf16.msra.mxu1 %v1412_v52  ;;  %1299 = vmatprep.subr.bf16.mxu0 %v1413_v57 }
  0x44   : > { %1316 = vmatprep.subr.bf16.mxu1 %v1413_v57 }
  0x46   : > { %1300 = vmatpush3.bf16.msra.mxu0 %v1413_v57 }
  0x47   : > { %1324 = vmatpush3.bf16.msra.mxu1 %v1413_v57 }
  0x49   : > { %1302 = vmatmul.mubr.bf16.vlgmr.msra.gmra.mrb[16].mxu0 %v1416_v58 }
  0x4a   : > { %1306 = vmatmul.mubr.bf16.vlgmr.msra.gmra.mrb[16].mxu1 %v1417_v59 }
  0xfb   : > { %v1209_v60 = vpop.f32.mrb[0].mxu0 }
  0xfc   : > { %v1249_v61 = vpop.f32.mrb[0].mxu1  ;;  %v1210_v63 = vpop.f32.mrb[1].mxu0 }
  0xfd   : > { %v1211_v0 = vadd.f32 %v1210_v63, %v1209_v60  ;;  %v1250_v1 = vpop.f32.mrb[1].mxu1  ;;  %v1212_v2 = vpop.f32.mrb[2].mxu0 }
  0xfe   : > { %v1251_v3 = vadd.f32 %v1250_v1, %v1249_v61  ;;  %v1252_v4 = vpop.f32.mrb[2].mxu1  ;;  %v1213_v5 = vpop.f32.mrb[3].mxu0 }
  0xff   : > { %v758_v6 = vadd.f32 %v1211_v0, %v1091_v62  ;;  %v1214_v7 = vadd.f32 %v1213_v5, %v1212_v2  ;;  %v1253_v8 = vpop.f32.mrb[3].mxu1 }
 0x100   : > { %v1254_v9 = vadd.f32 %v1253_v8, %v1252_v4 }
 0x101   : > { %v761_v10 = vadd.f32 %v1214_v7, %v1091_v62  ;;  %v823_v11 = vadd.f32 %v1251_v3, %v758_v6 }
 0x103   : > { %v1215_v12 = vpop.f32.mrb[4].mxu0  ;;  %v826_v13 = vadd.f32 %v1254_v9, %v761_v10 }
 0x104   : > { %v1255_v14 = vpop.f32.mrb[4].mxu1  ;;  %v1216_v15 = vpop.f32.mrb[5].mxu0 }
 0x105   : > { %v1217_v16 = vadd.f32 %v1216_v15, %v1215_v12  ;;  %v1256_v17 = vpop.f32.mrb[5].mxu1  ;;  %v1218_v18 = vpop.f32.mrb[6].mxu0 }
 0x106   : > { %v1257_v19 = vadd.f32 %v1256_v17, %v1255_v14  ;;  %v1258_v20 = vpop.f32.mrb[6].mxu1  ;;  %v1219_v21 = vpop.f32.mrb[7].mxu0 }
 0x107   : > { %v766_v22 = vadd.f32 %v1217_v16, %v1091_v62  ;;  %v1220_v23 = vadd.f32 %v1219_v21, %v1218_v18  ;;  %v1259_v24 = vpop.f32.mrb[7].mxu1 }
 0x108   : > { %v1260_v25 = vadd.f32 %v1259_v24, %v1258_v20 }
 0x109   : > { %v769_v26 = vadd.f32 %v1220_v23, %v1091_v62  ;;  %v831_v27 = vadd.f32 %v1257_v19, %v766_v22 }
 0x10b   : > { %v1221_v28 = vpop.f32.mrb[8].mxu0  ;;  %v834_v29 = vadd.f32 %v1260_v25, %v769_v26 }
 0x10c   : > { %v1261_v30 = vpop.f32.mrb[8].mxu1  ;;  %v1222_v31 = vpop.f32.mrb[9].mxu0 }
 0x10d   : > { %v1223_v32 = vadd.f32 %v1222_v31, %v1221_v28  ;;  %v1262_v33 = vpop.f32.mrb[9].mxu1  ;;  %v1224_v34 = vpop.f32.mrb[10].mxu0 }
 0x10e   : > { %v1263_v35 = vadd.f32 %v1262_v33, %v1261_v30  ;;  %v1264_v36 = vpop.f32.mrb[10].mxu1  ;;  %v1225_v37 = vpop.f32.mrb[11].mxu0 }
 0x10f   : > { %v774_v38 = vadd.f32 %v1223_v32, %v1091_v62  ;;  %v1226_v39 = vadd.f32 %v1225_v37, %v1224_v34  ;;  %v1265_v40 = vpop.f32.mrb[11].mxu1 }
 0x110   : > { %v1266_v41 = vadd.f32 %v1265_v40, %v1264_v36 }
 0x111   : > { %v777_v42 = vadd.f32 %v1226_v39, %v1091_v62  ;;  %v839_v43 = vadd.f32 %v1263_v35, %v774_v38 }
 0x113   : > { %v1227_v44 = vpop.f32.mrb[12].mxu0  ;;  %v842_v45 = vadd.f32 %v1266_v41, %v777_v42 }
 0x114   : > { %v1267_v46 = vpop.f32.mrb[12].mxu1  ;;  %v1228_v47 = vpop.f32.mrb[13].mxu0 }
 0x115   : > { %v1229_v48 = vadd.f32 %v1228_v47, %v1227_v44  ;;  %v1268_v49 = vpop.f32.mrb[13].mxu1  ;;  %v1230_v50 = vpop.f32.mrb[14].mxu0 }
 0x116   : > { %v1269_v51 = vadd.f32 %v1268_v49, %v1267_v46  ;;  %v1270_v52 = vpop.f32.mrb[14].mxu1  ;;  %v1231_v53 = vpop.f32.mrb[15].mxu0 }
 0x117   : > { %v782_v54 = vadd.f32 %v1229_v48, %v1091_v62  ;;  %v1232_v55 = vadd.f32 %v1231_v53, %v1230_v50  ;;  %v1271_v56 = vpop.f32.mrb[15].mxu1 }
 0x118   : > { %v1272_v57 = vadd.f32 %v1271_v56, %v1270_v52 }
 0x119   : > { %v785_v58 = vadd.f32 %v1232_v55, %v1091_v62  ;;  %v847_v59 = vadd.f32 %v1269_v51, %v782_v54 }
 0x11b   : > { %v850_v60 = vadd.f32 %v1272_v57, %v785_v58 }
 0x11c   : > { %v1303_v61 = vpop.f32.mrb[16].mxu0 }
 0x11d   : > { %v896_v63 = vadd.f32 %v1303_v61, %v831_v27  ;;  %v1307_v0 = vpop.f32.mrb[16].mxu1  ;;  %v887_v1 = vpop.f32.mrb[17].mxu0 }
 0x11e   : > { %v912_v2 = vadd.f32 %v1307_v0, %v847_v59  ;;  %v888_v3 = vadd.f32 %v887_v1, %v823_v11  ;;  %v903_v4 = vpop.f32.mrb[17].mxu1  ;;  %v1304_v5 = vpop.f32.mrb[18].mxu0 }
 0x11f   : > { %v904_v6 = vadd.f32 %v903_v4, %v839_v43  ;;  %v899_v7 = vadd.f32 %v1304_v5, %v834_v29  ;;  %v1308_v8 = vpop.f32.mrb[18].mxu1  ;;  %v890_v9 = vpop.f32.mrb[19].mxu0  ;;  %v920_v15 = vmax.f32 %v896_v63, 0.0 }
 0x120   : > { %v915_v10 = vadd.f32 %v1308_v8, %v850_v60  ;;  %v891_v12 = vadd.f32 %v890_v9, %v826_v13  ;;  %v906_v14 = vpop.f32.mrb[19].mxu1  ;;  %v924_v17 = vmax.f32 %v912_v2, 0.0  ;;  %v918_v18 = vmax.f32 %v888_v3, 0.0 }
 0x121   : > { %v921_v62 = vmax.f32 %v899_v7, 0.0  ;;  %v907_v16 = vadd.f32 %v906_v14, %v842_v45  ;;  %v922_v20 = vmax.f32 %v904_v6, 0.0 }
 0x122   : > { %v925_v11 = vmax.f32 %v915_v10, 0.0  ;;  %v919_v19 = vmax.f32 %v891_v12, 0.0 }
 0x123   : > { %v1178_v21 = vpack.c.bf16 %v921_v62, %v920_v15  ;;  %v923_v22 = vmax.f32 %v907_v16, 0.0 }
 0x124   : > { %v1188_v23 = vpack.c.bf16 %v925_v11, %v924_v17  ;;  %v1173_v24 = vpack.c.bf16 %v919_v19, %v918_v18 }
 0x125   : > { %1190 = vst [vmem:[%s265_s9 + $0x8] sm:$0xff] %v1178_v21   ;;  %v1183_v25 = vpack.c.bf16 %v923_v22, %v922_v20 }
 0x126   : > { %1192 = vst [vmem:[%s265_s9 + $0x18] sm:$0xff] %v1188_v23   ;;  %1174 = vst [vmem:[%s265_s9] sm:$0xff] %v1173_v24  }
 0x127   : > { %1191 = vst [vmem:[%s265_s9 + $0x10] sm:$0xff] %v1183_v25  }
 0x128 PF: > { %s13_s14 = sadd.s32 1, %s1440_s14   ;;  %s1651_s12 = smov %s1436_s13 }
 0x129   : > { %p10_p5 = scmp.ge.s32.totalorder %s13_s14, 4   ;;  %s1652_s13 = smov %s1654_s15 }
 0x12b   :  { %12 = sbr.rel (!%p10_p5) target bundleno = 2 (0x2), region = 68 }

// kernel: dqn_forward.7
= control target key start
LH: loop header
LB: loop body
LE: loop exit
PB: predicated region body
PF: predicated region fallthrough
CT: control target
= control target key end

     0   :  { %s14185_s1 = inlined_call_operand.vmem [shape: bf16[4096,512], index: 1, kind: input, shape index: {}]   ;;  %s14186_s0 = inlined_call_operand.vmem [shape: bf16[8,4096], index: 0, kind: input, shape index: {}]   ;;  %s14187_s3 = inlined_call_operand.vmem [shape: bf16[512,128], index: 3, kind: input, shape index: {}]   ;;  %s14188_s2 = inlined_call_operand.vmem [shape: f32[1,512], index: 2, kind: input, shape index: {}]   ;;  %s14189_s4 = inlined_call_operand.vmem [shape: f32[1,128], index: 4, kind: input, shape index: {}]   ;;  %s14190_s5 = inlined_call_operand.vmem [shape: f32[8,128], index: 5, kind: output, shape index: {}]  }
   0x1   :  { %v9240_v0 = vld [vmem:[%s14185_s1 + $0x4] ss:$16 sps:$4 sm:$0xff]   ;;  %v9242_v1 = vld [vmem:[%s14185_s1 + $0xc] ss:$16 sps:$4 sm:$0xff]   ;;  %v9244_v2 = vld [vmem:[%s14185_s1] ss:$16 sps:$4 sm:$0xff]  }
   0x2   :  { %6315 = vmatprep.subr.bf16.mxu0 %v9240_v0  ;;  %v9245_v3 = vld [vmem:[%s14185_s1 + $0x8] ss:$16 sps:$4 sm:$0xff]   ;;  %6971 = vmatprep.subr.bf16.mxu1 %v9242_v1  ;;  %v9246_v4 = vld [vmem:[%s14185_s1 + $0x24] ss:$16 sps:$4 sm:$0xff]   ;;  %v9248_v5 = vld [vmem:[%s14185_s1 + $0x2c] ss:$16 sps:$4 sm:$0xff]  }
   0x3   :  { %6316 = vmatpush1.bf16.msra.mxu0 %v9244_v2  ;;  %6972 = vmatpush1.bf16.msra.mxu1 %v9245_v3  ;;  %v9250_v6 = vld [vmem:[%s14185_s1 + $0x20] ss:$16 sps:$4 sm:$0xff]   ;;  %v9251_v7 = vld [vmem:[%s14185_s1 + $0x28] ss:$16 sps:$4 sm:$0xff]   ;;  %v9252_v8 = vld [vmem:[%s14185_s1 + $0x44] ss:$16 sps:$4 sm:$0xff]  }
   0x4   :  { %6317 = vmatprep.subr.bf16.mxu0 %v9246_v4  ;;  %6973 = vmatprep.subr.bf16.mxu1 %v9248_v5  ;;  %v9254_v9 = vld [vmem:[%s14185_s1 + $0x4c] ss:$16 sps:$4 sm:$0xff]   ;;  %v9256_v10 = vld [vmem:[%s14185_s1 + $0x40] ss:$16 sps:$4 sm:$0xff]   ;;  %v9257_v11 = vld [vmem:[%s14185_s1 + $0x48] ss:$16 sps:$4 sm:$0xff]  }
   0x5   :  { %v9258_v12 = vld [vmem:[%s14185_s1 + $0x64] ss:$16 sps:$4 sm:$0xff]   ;;  %v9260_v13 = vld [vmem:[%s14185_s1 + $0x6c] ss:$16 sps:$4 sm:$0xff]   ;;  %v9262_v14 = vld [vmem:[%s14185_s1 + $0x60] ss:$16 sps:$4 sm:$0xff]  }
   0x6   :  { %v9263_v15 = vld [vmem:[%s14185_s1 + $0x68] ss:$16 sps:$4 sm:$0xff]   ;;  %v9264_v16 = vld [vmem:[%s14185_s1 + $0x84] ss:$16 sps:$4 sm:$0xff]   ;;  %v9266_v17 = vld [vmem:[%s14185_s1 + $0x8c] ss:$16 sps:$4 sm:$0xff]  }
   0x7   :  { %6318 = vmatpush1.bf16.msra.mxu0 %v9250_v6  ;;  %6974 = vmatpush1.bf16.msra.mxu1 %v9251_v7  ;;  %v9268_v18 = vld [vmem:[%s14185_s1 + $0x80] ss:$16 sps:$4 sm:$0xff]   ;;  %v9269_v19 = vld [vmem:[%s14185_s1 + $0x88] ss:$16 sps:$4 sm:$0xff]   ;;  %v9270_v20 = vld [vmem:[%s14185_s1 + $0xa4] ss:$16 sps:$4 sm:$0xff]  }
   0x8   :  { %6319 = vmatprep.subr.bf16.mxu0 %v9252_v8  ;;  %6975 = vmatprep.subr.bf16.mxu1 %v9254_v9  ;;  %v9272_v21 = vld [vmem:[%s14185_s1 + $0xac] ss:$16 sps:$4 sm:$0xff]   ;;  %v9274_v22 = vld [vmem:[%s14185_s1 + $0xa0] ss:$16 sps:$4 sm:$0xff]   ;;  %v9275_v23 = vld [vmem:[%s14185_s1 + $0xa8] ss:$16 sps:$4 sm:$0xff]  }
   0x9   :  { %v9276_v24 = vld [vmem:[%s14185_s1 + $0xc4] ss:$16 sps:$4 sm:$0xff]   ;;  %v9278_v25 = vld [vmem:[%s14185_s1 + $0xcc] ss:$16 sps:$4 sm:$0xff]   ;;  %v9280_v26 = vld [vmem:[%s14185_s1 + $0xc0] ss:$16 sps:$4 sm:$0xff]  }
   0xa   :  { %v9281_v27 = vld [vmem:[%s14185_s1 + $0xc8] ss:$16 sps:$4 sm:$0xff]   ;;  %v9282_v28 = vld [vmem:[%s14185_s1 + $0xe4] ss:$16 sps:$4 sm:$0xff]   ;;  %v9284_v29 = vld [vmem:[%s14185_s1 + $0xec] ss:$16 sps:$4 sm:$0xff]  }
   0xb   :  { %6320 = vmatpush1.bf16.msra.mxu0 %v9256_v10  ;;  %6976 = vmatpush1.bf16.msra.mxu1 %v9257_v11  ;;  %v9286_v30 = vld [vmem:[%s14185_s1 + $0xe0] ss:$16 sps:$4 sm:$0xff]   ;;  %v9287_v31 = vld [vmem:[%s14185_s1 + $0xe8] ss:$16 sps:$4 sm:$0xff]   ;;  %v9288_v32 = vld [vmem:[%s14185_s1 + $0x104] ss:$16 sps:$4 sm:$0xff]  }
   0xc   :  { %6321 = vmatprep.subr.bf16.mxu0 %v9258_v12  ;;  %6977 = vmatprep.subr.bf16.mxu1 %v9260_v13  ;;  %v9290_v33 = vld [vmem:[%s14185_s1 + $0x10c] ss:$16 sps:$4 sm:$0xff]   ;;  %v9292_v34 = vld [vmem:[%s14185_s1 + $0x100] ss:$16 sps:$4 sm:$0xff]   ;;  %v9293_v35 = vld [vmem:[%s14185_s1 + $0x108] ss:$16 sps:$4 sm:$0xff]  }
   0xd   :  { %v9294_v36 = vld [vmem:[%s14185_s1 + $0x124] ss:$16 sps:$4 sm:$0xff]   ;;  %v9296_v37 = vld [vmem:[%s14185_s1 + $0x12c] ss:$16 sps:$4 sm:$0xff]   ;;  %v9298_v38 = vld [vmem:[%s14185_s1 + $0x120] ss:$16 sps:$4 sm:$0xff]  }
   0xe   :  { %v9299_v39 = vld [vmem:[%s14185_s1 + $0x128] ss:$16 sps:$4 sm:$0xff]   ;;  %v9300_v40 = vld [vmem:[%s14185_s1 + $0x144] ss:$16 sps:$4 sm:$0xff]   ;;  %v9302_v41 = vld [vmem:[%s14185_s1 + $0x14c] ss:$16 sps:$4 sm:$0xff]  }
   0xf   :  { %6322 = vmatpush1.bf16.msra.mxu0 %v9262_v14  ;;  %6978 = vmatpush1.bf16.msra.mxu1 %v9263_v15  ;;  %v9304_v42 = vld [vmem:[%s14185_s1 + $0x140] ss:$16 sps:$4 sm:$0xff]   ;;  %v9305_v43 = vld [vmem:[%s14185_s1 + $0x148] ss:$16 sps:$4 sm:$0xff]   ;;  %v9306_v44 = vld [vmem:[%s14185_s1 + $0x164] ss:$16 sps:$4 sm:$0xff]  }
  0x10   :  { %6323 = vmatprep.subr.bf16.mxu0 %v9264_v16  ;;  %6979 = vmatprep.subr.bf16.mxu1 %v9266_v17  ;;  %v9308_v45 = vld [vmem:[%s14185_s1 + $0x16c] ss:$16 sps:$4 sm:$0xff]   ;;  %v21_v46 = vld [vmem:[%s14186_s0] sm:$0xff]  ;;  %v9311_v49 = vld [vmem:[%s14185_s1 + $0x168] ss:$16 sps:$4 sm:$0xff]  }
  0x11   :  { %v9310_v47 = vld [vmem:[%s14185_s1 + $0x160] ss:$16 sps:$4 sm:$0xff]   ;;  %v7984_v48 = vcombine.high %v21_v46, %v21_v46  ;;  %v9312_v50 = vld [vmem:[%s14185_s1 + $0x184] ss:$16 sps:$4 sm:$0xff]   ;;  %v9314_v51 = vld [vmem:[%s14185_s1 + $0x18c] ss:$16 sps:$4 sm:$0xff]   ;;  %v7983_v4 = vcombine.low %v21_v46, %v21_v46 }
  0x12   :  { %v9316_v52 = vld [vmem:[%s14185_s1 + $0x180] ss:$16 sps:$4 sm:$0xff]   ;;  %v9317_v53 = vld [vmem:[%s14185_s1 + $0x188] ss:$16 sps:$4 sm:$0xff]   ;;  %v9318_v54 = vld [vmem:[%s14185_s1 + $0x1a4] ss:$16 sps:$4 sm:$0xff]  }
  0x13   :  { %6324 = vmatpush1.bf16.msra.mxu0 %v9268_v18  ;;  %6980 = vmatpush1.bf16.msra.mxu1 %v9269_v19  ;;  %v9320_v55 = vld [vmem:[%s14185_s1 + $0x1ac] ss:$16 sps:$4 sm:$0xff]   ;;  %v9322_v56 = vld [vmem:[%s14185_s1 + $0x1a0] ss:$16 sps:$4 sm:$0xff]   ;;  %v9323_v57 = vld [vmem:[%s14185_s1 + $0x1a8] ss:$16 sps:$4 sm:$0xff]  }
  0x14   :  { %6325 = vmatprep.subr.bf16.mxu0 %v9270_v20  ;;  %6981 = vmatprep.subr.bf16.mxu1 %v9272_v21  ;;  %v9324_v58 = vld [vmem:[%s14185_s1 + $0x1c4] ss:$16 sps:$4 sm:$0xff]   ;;  %v9326_v59 = vld [vmem:[%s14185_s1 + $0x1cc] ss:$16 sps:$4 sm:$0xff]   ;;  %v9328_v60 = vld [vmem:[%s14185_s1 + $0x1c0] ss:$16 sps:$4 sm:$0xff]  }
  0x15   :  { %6347 = vmatprep.mubr.bf16.mxu0 %v7984_v48  ;;  %7003 = vmatprep.mubr.bf16.mxu1 %v7984_v48  ;;  %v9329_v61 = vld [vmem:[%s14185_s1 + $0x1c8] ss:$16 sps:$4 sm:$0xff]   ;;  %v9330_v62 = vld [vmem:[%s14185_s1 + $0x1e4] ss:$16 sps:$4 sm:$0xff]   ;;  %v9332_v63 = vld [vmem:[%s14185_s1 + $0x1ec] ss:$16 sps:$4 sm:$0xff]  }
  0x16   :  { %v9334_v0 = vld [vmem:[%s14185_s1 + $0x1e0] ss:$16 sps:$4 sm:$0xff]   ;;  %v9335_v1 = vld [vmem:[%s14185_s1 + $0x1e8] ss:$16 sps:$4 sm:$0xff]   ;;  %v9340_v2 = vld [vmem:[%s14185_s1 + $0x204] ss:$16 sps:$4 sm:$0xff]  }
  0x17   :  { %6326 = vmatpush1.bf16.msra.mxu0 %v9274_v22  ;;  %6982 = vmatpush1.bf16.msra.mxu1 %v9275_v23  ;;  %v9343_v3 = vld [vmem:[%s14185_s1 + $0x20c] ss:$16 sps:$4 sm:$0xff]   ;;  %v9338_v5 = vld [vmem:[%s14185_s1 + $0x200] ss:$16 sps:$4 sm:$0xff]   ;;  %v9341_v6 = vld [vmem:[%s14185_s1 + $0x208] ss:$16 sps:$4 sm:$0xff]  }
  0x18   :  { %6327 = vmatprep.subr.bf16.mxu0 %v9276_v24  ;;  %6983 = vmatprep.subr.bf16.mxu1 %v9278_v25  ;;  %v9346_v7 = vld [vmem:[%s14185_s1 + $0x224] ss:$16 sps:$4 sm:$0xff]   ;;  %v9349_v8 = vld [vmem:[%s14185_s1 + $0x22c] ss:$16 sps:$4 sm:$0xff]   ;;  %v9344_v9 = vld [vmem:[%s14185_s1 + $0x220] ss:$16 sps:$4 sm:$0xff]  }
  0x19   :  { %v9347_v10 = vld [vmem:[%s14185_s1 + $0x228] ss:$16 sps:$4 sm:$0xff]   ;;  %v9352_v11 = vld [vmem:[%s14185_s1 + $0x244] ss:$16 sps:$4 sm:$0xff]   ;;  %v9355_v12 = vld [vmem:[%s14185_s1 + $0x24c] ss:$16 sps:$4 sm:$0xff]  }
  0x1a   :  { %v9350_v13 = vld [vmem:[%s14185_s1 + $0x240] ss:$16 sps:$4 sm:$0xff]   ;;  %v9353_v14 = vld [vmem:[%s14185_s1 + $0x248] ss:$16 sps:$4 sm:$0xff]   ;;  %v9358_v15 = vld [vmem:[%s14185_s1 + $0x264] ss:$16 sps:$4 sm:$0xff]  }
  0x1b   :  { %6328 = vmatpush1.bf16.msra.mxu0 %v9280_v26  ;;  %6984 = vmatpush1.bf16.msra.mxu1 %v9281_v27  ;;  %v9361_v16 = vld [vmem:[%s14185_s1 + $0x26c] ss:$16 sps:$4 sm:$0xff]   ;;  %v9356_v17 = vld [vmem:[%s14185_s1 + $0x260] ss:$16 sps:$4 sm:$0xff]   ;;  %v9359_v18 = vld [vmem:[%s14185_s1 + $0x268] ss:$16 sps:$4 sm:$0xff]  }
  0x1c   :  { %6329 = vmatprep.subr.bf16.mxu0 %v9282_v28  ;;  %6985 = vmatprep.subr.bf16.mxu1 %v9284_v29  ;;  %v9364_v19 = vld [vmem:[%s14185_s1 + $0x284] ss:$16 sps:$4 sm:$0xff]   ;;  %v9367_v20 = vld [vmem:[%s14185_s1 + $0x28c] ss:$16 sps:$4 sm:$0xff]   ;;  %v9362_v21 = vld [vmem:[%s14185_s1 + $0x280] ss:$16 sps:$4 sm:$0xff]  }
  0x1d   :  { %v9365_v22 = vld [vmem:[%s14185_s1 + $0x288] ss:$16 sps:$4 sm:$0xff]   ;;  %v9370_v23 = vld [vmem:[%s14185_s1 + $0x2a4] ss:$16 sps:$4 sm:$0xff]   ;;  %v9373_v24 = vld [vmem:[%s14185_s1 + $0x2ac] ss:$16 sps:$4 sm:$0xff]  }
  0x1e   :  { %v9368_v25 = vld [vmem:[%s14185_s1 + $0x2a0] ss:$16 sps:$4 sm:$0xff]   ;;  %v9371_v26 = vld [vmem:[%s14185_s1 + $0x2a8] ss:$16 sps:$4 sm:$0xff]   ;;  %v9376_v27 = vld [vmem:[%s14185_s1 + $0x2c4] ss:$16 sps:$4 sm:$0xff]  }
  0x1f   :  { %6330 = vmatpush1.bf16.msra.mxu0 %v9286_v30  ;;  %6986 = vmatpush1.bf16.msra.mxu1 %v9287_v31  ;;  %v9379_v28 = vld [vmem:[%s14185_s1 + $0x2cc] ss:$16 sps:$4 sm:$0xff]   ;;  %v9374_v31 = vld [vmem:[%s14185_s1 + $0x2c0] ss:$16 sps:$4 sm:$0xff]   ;;  %v9401_v48 = vld [vmem:[%s14185_s1 + $0x348] ss:$16 sps:$4 sm:$0xff]  }
  0x20   :  { %6331 = vmatprep.subr.bf16.mxu0 %v9288_v32  ;;  %6987 = vmatprep.subr.bf16.mxu1 %v9290_v33  ;;  %v11146_v29 = vld [vmem:[%s14186_s0 + $0x8] sm:$0xff]  ;;  %v9382_v33 = vld [vmem:[%s14185_s1 + $0x2e4] ss:$16 sps:$4 sm:$0xff]  }
  0x21   :  { %v7986_v30 = vcombine.high %v11146_v29, %v11146_v29  ;;  %v9377_v32 = vld [vmem:[%s14185_s1 + $0x2c8] ss:$16 sps:$4 sm:$0xff]   ;;  %v9403_v46 = vld [vmem:[%s14185_s1 + $0x34c] ss:$16 sps:$4 sm:$0xff]  }
  0x23   :  { %6332 = vmatpush1.bf16.msra.mxu0 %v9292_v34  ;;  %6988 = vmatpush1.bf16.msra.mxu1 %v9293_v35  ;;  %v9385_v34 = vld [vmem:[%s14185_s1 + $0x2ec] ss:$16 sps:$4 sm:$0xff]   ;;  %v9380_v35 = vld [vmem:[%s14185_s1 + $0x2e0] ss:$16 sps:$4 sm:$0xff]  }
  0x24   :  { %6333 = vmatprep.subr.bf16.mxu0 %v9294_v36  ;;  %6989 = vmatprep.subr.bf16.mxu1 %v9296_v37  ;;  %v9383_v36 = vld [vmem:[%s14185_s1 + $0x2e8] ss:$16 sps:$4 sm:$0xff]   ;;  %v9388_v37 = vld [vmem:[%s14185_s1 + $0x304] ss:$16 sps:$4 sm:$0xff]  }
  0x27   :  { %6334 = vmatpush1.bf16.msra.mxu0 %v9298_v38  ;;  %6990 = vmatpush1.bf16.msra.mxu1 %v9299_v39  ;;  %v9391_v38 = vld [vmem:[%s14185_s1 + $0x30c] ss:$16 sps:$4 sm:$0xff]   ;;  %v9386_v39 = vld [vmem:[%s14185_s1 + $0x300] ss:$16 sps:$4 sm:$0xff]  }
  0x28   :  { %6335 = vmatprep.subr.bf16.mxu0 %v9300_v40  ;;  %6991 = vmatprep.subr.bf16.mxu1 %v9302_v41  ;;  %v9389_v40 = vld [vmem:[%s14185_s1 + $0x308] ss:$16 sps:$4 sm:$0xff]   ;;  %v9394_v41 = vld [vmem:[%s14185_s1 + $0x324] ss:$16 sps:$4 sm:$0xff]  }
  0x2b   :  { %6336 = vmatpush1.bf16.msra.mxu0 %v9304_v42  ;;  %6992 = vmatpush1.bf16.msra.mxu1 %v9305_v43  ;;  %v9397_v42 = vld [vmem:[%s14185_s1 + $0x32c] ss:$16 sps:$4 sm:$0xff]   ;;  %v9392_v43 = vld [vmem:[%s14185_s1 + $0x320] ss:$16 sps:$4 sm:$0xff]  }
  0x2c   :  { %6337 = vmatprep.subr.bf16.mxu0 %v9306_v44  ;;  %6993 = vmatprep.subr.bf16.mxu1 %v9308_v45  ;;  %v9395_v44 = vld [vmem:[%s14185_s1 + $0x328] ss:$16 sps:$4 sm:$0xff]   ;;  %v9400_v45 = vld [vmem:[%s14185_s1 + $0x344] ss:$16 sps:$4 sm:$0xff]  }
  0x2f   :  { %6338 = vmatpush1.bf16.msra.mxu0 %v9310_v47  ;;  %6994 = vmatpush1.bf16.msra.mxu1 %v9311_v49  ;;  %v9398_v47 = vld [vmem:[%s14185_s1 + $0x340] ss:$16 sps:$4 sm:$0xff]   ;;  %v9406_v49 = vld [vmem:[%s14185_s1 + $0x364] ss:$16 sps:$4 sm:$0xff]  }
  0x30   :  { %6339 = vmatprep.subr.bf16.mxu0 %v9312_v50  ;;  %6995 = vmatprep.subr.bf16.mxu1 %v9314_v51  ;;  %v9409_v50 = vld [vmem:[%s14185_s1 + $0x36c] ss:$16 sps:$4 sm:$0xff]   ;;  %v9404_v51 = vld [vmem:[%s14185_s1 + $0x360] ss:$16 sps:$4 sm:$0xff]  }
  0x33   :  { %6340 = vmatpush1.bf16.msra.mxu0 %v9316_v52  ;;  %6996 = vmatpush1.bf16.msra.mxu1 %v9317_v53  ;;  %v9407_v52 = vld [vmem:[%s14185_s1 + $0x368] ss:$16 sps:$4 sm:$0xff]   ;;  %v9412_v53 = vld [vmem:[%s14185_s1 + $0x384] ss:$16 sps:$4 sm:$0xff]  }
  0x34   :  { %6341 = vmatprep.subr.bf16.mxu0 %v9318_v54  ;;  %6997 = vmatprep.subr.bf16.mxu1 %v9320_v55  ;;  %v9415_v54 = vld [vmem:[%s14185_s1 + $0x38c] ss:$16 sps:$4 sm:$0xff]   ;;  %v9410_v55 = vld [vmem:[%s14185_s1 + $0x380] ss:$16 sps:$4 sm:$0xff]  }
  0x37   :  { %6342 = vmatpush1.bf16.msra.mxu0 %v9322_v56  ;;  %6998 = vmatpush1.bf16.msra.mxu1 %v9323_v57  ;;  %v9413_v56 = vld [vmem:[%s14185_s1 + $0x388] ss:$16 sps:$4 sm:$0xff]   ;;  %v9418_v57 = vld [vmem:[%s14185_s1 + $0x3a4] ss:$16 sps:$4 sm:$0xff]  }
  0x38   :  { %6343 = vmatprep.subr.bf16.mxu0 %v9324_v58  ;;  %6999 = vmatprep.subr.bf16.mxu1 %v9326_v59  ;;  %v9421_v58 = vld [vmem:[%s14185_s1 + $0x3ac] ss:$16 sps:$4 sm:$0xff]   ;;  %v9416_v59 = vld [vmem:[%s14185_s1 + $0x3a0] ss:$16 sps:$4 sm:$0xff]  }
  0x3b   :  { %6344 = vmatpush1.bf16.msra.mxu0 %v9328_v60  ;;  %7000 = vmatpush1.bf16.msra.mxu1 %v9329_v61  ;;  %v9419_v60 = vld [vmem:[%s14185_s1 + $0x3a8] ss:$16 sps:$4 sm:$0xff]   ;;  %v9424_v61 = vld [vmem:[%s14185_s1 + $0x3c4] ss:$16 sps:$4 sm:$0xff]  }
  0x3c   :  { %6345 = vmatprep.subr.bf16.mxu0 %v9330_v62  ;;  %7001 = vmatprep.subr.bf16.mxu1 %v9332_v63  ;;  %v9427_v62 = vld [vmem:[%s14185_s1 + $0x3cc] ss:$16 sps:$4 sm:$0xff]   ;;  %v9422_v63 = vld [vmem:[%s14185_s1 + $0x3c0] ss:$16 sps:$4 sm:$0xff]  }
  0x3f   :  { %6346 = vmatpush1.bf16.msra.mxu0 %v9334_v0  ;;  %7002 = vmatpush1.bf16.msra.mxu1 %v9335_v1  ;;  %v9425_v0 = vld [vmem:[%s14185_s1 + $0x3c8] ss:$16 sps:$4 sm:$0xff]   ;;  %v9430_v1 = vld [vmem:[%s14185_s1 + $0x3e4] ss:$16 sps:$4 sm:$0xff]  }
  0x40   :  { %6356 = vmatprep.subr.bf16.mxu0 %v9340_v2  ;;  %7012 = vmatprep.subr.bf16.mxu1 %v9343_v3  ;;  %v9433_v2 = vld [vmem:[%s14185_s1 + $0x3ec] ss:$16 sps:$4 sm:$0xff]   ;;  %v9428_v3 = vld [vmem:[%s14185_s1 + $0x3e0] ss:$16 sps:$4 sm:$0xff]  }
  0x42   :  { %6348 = vmatmul.mubr.bf16.vlgmr.msra.gmra.mrb[0].mxu0 %v7983_v4  ;;  %7004 = vmatmul.mubr.bf16.vlgmr.msra.gmra.mrb[0].mxu1 %v7983_v4  ;;  %v9431_v4 = vld [vmem:[%s14185_s1 + $0x3e8] ss:$16 sps:$4 sm:$0xff]  }
  0x43   :  { %6357 = vmatpush1.bf16.msra.mxu0 %v9338_v5  ;;  %7013 = vmatpush1.bf16.msra.mxu1 %v9341_v6  ;;  %v9438_v5 = vld [vmem:[%s14185_s1 + $0x404] ss:$16 sps:$4 sm:$0xff]   ;;  %v9441_v6 = vld [vmem:[%s14185_s1 + $0x40c] ss:$16 sps:$4 sm:$0xff]  }
  0x44   :  { %6358 = vmatprep.subr.bf16.mxu0 %v9346_v7  ;;  %7014 = vmatprep.subr.bf16.mxu1 %v9349_v8  ;;  %v7985_v7 = vcombine.low %v11146_v29, %v11146_v29  ;;  %v9436_v8 = vld [vmem:[%s14185_s1 + $0x400] ss:$16 sps:$4 sm:$0xff]   ;;  %v9471_v29 = vld [vmem:[%s14185_s1 + $0x4ac] ss:$16 sps:$4 sm:$0xff]  }
  0x45   :  { %6388 = vmatprep.mubr.bf16.mxu0 %v7986_v30  ;;  %7044 = vmatprep.mubr.bf16.mxu1 %v7986_v30  ;;  %v9466_v30 = vld [vmem:[%s14185_s1 + $0x4a0] ss:$16 sps:$4 sm:$0xff]  }
  0x47   :  { %6359 = vmatpush1.bf16.msra.mxu0 %v9344_v9  ;;  %7015 = vmatpush1.bf16.msra.mxu1 %v9347_v10  ;;  %v9439_v9 = vld [vmem:[%s14185_s1 + $0x408] ss:$16 sps:$4 sm:$0xff]   ;;  %v9444_v10 = vld [vmem:[%s14185_s1 + $0x424] ss:$16 sps:$4 sm:$0xff]  }
  0x48   :  { %6360 = vmatprep.subr.bf16.mxu0 %v9352_v11  ;;  %7016 = vmatprep.subr.bf16.mxu1 %v9355_v12  ;;  %v11284_v11 = vld [vmem:[%s14186_s0 + $0x10] sm:$0xff]  ;;  %v9447_v12 = vld [vmem:[%s14185_s1 + $0x42c] ss:$16 sps:$4 sm:$0xff]  }
  0x4b   :  { %6361 = vmatpush1.bf16.msra.mxu0 %v9350_v13  ;;  %7017 = vmatpush1.bf16.msra.mxu1 %v9353_v14  ;;  %v7988_v13 = vcombine.high %v11284_v11, %v11284_v11  ;;  %v9442_v14 = vld [vmem:[%s14185_s1 + $0x420] ss:$16 sps:$4 sm:$0xff]  }
  0x4c   :  { %6362 = vmatprep.subr.bf16.mxu0 %v9358_v15  ;;  %7018 = vmatprep.subr.bf16.mxu1 %v9361_v16  ;;  %v9445_v15 = vld [vmem:[%s14185_s1 + $0x428] ss:$16 sps:$4 sm:$0xff]   ;;  %v9450_v16 = vld [vmem:[%s14185_s1 + $0x444] ss:$16 sps:$4 sm:$0xff]  }
  0x4f   :  { %6363 = vmatpush1.bf16.msra.mxu0 %v9356_v17  ;;  %7019 = vmatpush1.bf16.msra.mxu1 %v9359_v18  ;;  %v9453_v17 = vld [vmem:[%s14185_s1 + $0x44c] ss:$16 sps:$4 sm:$0xff]   ;;  %v9448_v18 = vld [vmem:[%s14185_s1 + $0x440] ss:$16 sps:$4 sm:$0xff]  }
  0x50   :  { %6364 = vmatprep.subr.bf16.mxu0 %v9364_v19  ;;  %7020 = vmatprep.subr.bf16.mxu1 %v9367_v20  ;;  %v9451_v19 = vld [vmem:[%s14185_s1 + $0x448] ss:$16 sps:$4 sm:$0xff]   ;;  %v9456_v20 = vld [vmem:[%s14185_s1 + $0x464] ss:$16 sps:$4 sm:$0xff]  }
  0x53   :  { %6365 = vmatpush1.bf16.msra.mxu0 %v9362_v21  ;;  %7021 = vmatpush1.bf16.msra.mxu1 %v9365_v22  ;;  %v9459_v21 = vld [vmem:[%s14185_s1 + $0x46c] ss:$16 sps:$4 sm:$0xff]   ;;  %v9454_v22 = vld [vmem:[%s14185_s1 + $0x460] ss:$16 sps:$4 sm:$0xff]  }
  0x54   :  { %6366 = vmatprep.subr.bf16.mxu0 %v9370_v23  ;;  %7022 = vmatprep.subr.bf16.mxu1 %v9373_v24  ;;  %v9457_v23 = vld [vmem:[%s14185_s1 + $0x468] ss:$16 sps:$4 sm:$0xff]   ;;  %v9462_v24 = vld [vmem:[%s14185_s1 + $0x484] ss:$16 sps:$4 sm:$0xff]  }
  0x57   :  { %6367 = vmatpush1.bf16.msra.mxu0 %v9368_v25  ;;  %7023 = vmatpush1.bf16.msra.mxu1 %v9371_v26  ;;  %v9465_v25 = vld [vmem:[%s14185_s1 + $0x48c] ss:$16 sps:$4 sm:$0xff]   ;;  %v9460_v26 = vld [vmem:[%s14185_s1 + $0x480] ss:$16 sps:$4 sm:$0xff]  }
  0x58   :  { %6368 = vmatprep.subr.bf16.mxu0 %v9376_v27  ;;  %7024 = vmatprep.subr.bf16.mxu1 %v9379_v28  ;;  %v9463_v27 = vld [vmem:[%s14185_s1 + $0x488] ss:$16 sps:$4 sm:$0xff]   ;;  %v9468_v28 = vld [vmem:[%s14185_s1 + $0x4a4] ss:$16 sps:$4 sm:$0xff]  }
  0x5b   :  { %6369 = vmatpush1.bf16.msra.mxu0 %v9374_v31  ;;  %7025 = vmatpush1.bf16.msra.mxu1 %v9377_v32  ;;  %v9469_v31 = vld [vmem:[%s14185_s1 + $0x4a8] ss:$16 sps:$4 sm:$0xff]   ;;  %v9474_v32 = vld [vmem:[%s14185_s1 + $0x4c4] ss:$16 sps:$4 sm:$0xff]  }
  0x5c   :  { %6370 = vmatprep.subr.bf16.mxu0 %v9382_v33  ;;  %7026 = vmatprep.subr.bf16.mxu1 %v9385_v34  ;;  %v9477_v33 = vld [vmem:[%s14185_s1 + $0x4cc] ss:$16 sps:$4 sm:$0xff]   ;;  %v9472_v34 = vld [vmem:[%s14185_s1 + $0x4c0] ss:$16 sps:$4 sm:$0xff]  }
  0x5f   :  { %6371 = vmatpush1.bf16.msra.mxu0 %v9380_v35  ;;  %7027 = vmatpush1.bf16.msra.mxu1 %v9383_v36  ;;  %v9475_v35 = vld [vmem:[%s14185_s1 + $0x4c8] ss:$16 sps:$4 sm:$0xff]   ;;  %v9480_v36 = vld [vmem:[%s14185_s1 + $0x4e4] ss:$16 sps:$4 sm:$0xff]  }
  0x60   :  { %6372 = vmatprep.subr.bf16.mxu0 %v9388_v37  ;;  %7028 = vmatprep.subr.bf16.mxu1 %v9391_v38  ;;  %v9483_v37 = vld [vmem:[%s14185_s1 + $0x4ec] ss:$16 sps:$4 sm:$0xff]   ;;  %v9478_v38 = vld [vmem:[%s14185_s1 + $0x4e0] ss:$16 sps:$4 sm:$0xff]  }
  0x63   :  { %6373 = vmatpush1.bf16.msra.mxu0 %v9386_v39  ;;  %7029 = vmatpush1.bf16.msra.mxu1 %v9389_v40  ;;  %v9481_v39 = vld [vmem:[%s14185_s1 + $0x4e8] ss:$16 sps:$4 sm:$0xff]   ;;  %v9486_v40 = vld [vmem:[%s14185_s1 + $0x504] ss:$16 sps:$4 sm:$0xff]  }
  0x64   :  { %6374 = vmatprep.subr.bf16.mxu0 %v9394_v41  ;;  %7030 = vmatprep.subr.bf16.mxu1 %v9397_v42  ;;  %v9489_v41 = vld [vmem:[%s14185_s1 + $0x50c] ss:$16 sps:$4 sm:$0xff]   ;;  %v9484_v42 = vld [vmem:[%s14185_s1 + $0x500] ss:$16 sps:$4 sm:$0xff]  }
  0x67   :  { %6375 = vmatpush1.bf16.msra.mxu0 %v9392_v43  ;;  %7031 = vmatpush1.bf16.msra.mxu1 %v9395_v44  ;;  %v9487_v43 = vld [vmem:[%s14185_s1 + $0x508] ss:$16 sps:$4 sm:$0xff]   ;;  %v9492_v44 = vld [vmem:[%s14185_s1 + $0x524] ss:$16 sps:$4 sm:$0xff]  }
  0x68   :  { %6376 = vmatprep.subr.bf16.mxu0 %v9400_v45  ;;  %7032 = vmatprep.subr.bf16.mxu1 %v9403_v46  ;;  %v9495_v45 = vld [vmem:[%s14185_s1 + $0x52c] ss:$16 sps:$4 sm:$0xff]   ;;  %v9490_v46 = vld [vmem:[%s14185_s1 + $0x520] ss:$16 sps:$4 sm:$0xff]  }
  0x6b   :  { %6377 = vmatpush1.bf16.msra.mxu0 %v9398_v47  ;;  %7033 = vmatpush1.bf16.msra.mxu1 %v9401_v48  ;;  %v9493_v47 = vld [vmem:[%s14185_s1 + $0x528] ss:$16 sps:$4 sm:$0xff]   ;;  %v9498_v48 = vld [vmem:[%s14185_s1 + $0x544] ss:$16 sps:$4 sm:$0xff]  }
  0x6c   :  { %6378 = vmatprep.subr.bf16.mxu0 %v9406_v49  ;;  %7034 = vmatprep.subr.bf16.mxu1 %v9409_v50  ;;  %v9501_v49 = vld [vmem:[%s14185_s1 + $0x54c] ss:$16 sps:$4 sm:$0xff]   ;;  %v9496_v50 = vld [vmem:[%s14185_s1 + $0x540] ss:$16 sps:$4 sm:$0xff]  }
  0x6f   :  { %6379 = vmatpush1.bf16.msra.mxu0 %v9404_v51  ;;  %7035 = vmatpush1.bf16.msra.mxu1 %v9407_v52  ;;  %v9499_v51 = vld [vmem:[%s14185_s1 + $0x548] ss:$16 sps:$4 sm:$0xff]   ;;  %v9504_v52 = vld [vmem:[%s14185_s1 + $0x564] ss:$16 sps:$4 sm:$0xff]  }
  0x70   :  { %6380 = vmatprep.subr.bf16.mxu0 %v9412_v53  ;;  %7036 = vmatprep.subr.bf16.mxu1 %v9415_v54  ;;  %v9507_v53 = vld [vmem:[%s14185_s1 + $0x56c] ss:$16 sps:$4 sm:$0xff]   ;;  %v9502_v54 = vld [vmem:[%s14185_s1 + $0x560] ss:$16 sps:$4 sm:$0xff]  }
  0x73   :  { %6381 = vmatpush1.bf16.msra.mxu0 %v9410_v55  ;;  %7037 = vmatpush1.bf16.msra.mxu1 %v9413_v56  ;;  %v9505_v55 = vld [vmem:[%s14185_s1 + $0x568] ss:$16 sps:$4 sm:$0xff]   ;;  %v9510_v56 = vld [vmem:[%s14185_s1 + $0x584] ss:$16 sps:$4 sm:$0xff]  }
  0x74   :  { %6382 = vmatprep.subr.bf16.mxu0 %v9418_v57  ;;  %7038 = vmatprep.subr.bf16.mxu1 %v9421_v58  ;;  %v9513_v57 = vld [vmem:[%s14185_s1 + $0x58c] ss:$16 sps:$4 sm:$0xff]   ;;  %v9508_v58 = vld [vmem:[%s14185_s1 + $0x580] ss:$16 sps:$4 sm:$0xff]  }
  0x77   :  { %6383 = vmatpush1.bf16.msra.mxu0 %v9416_v59  ;;  %7039 = vmatpush1.bf16.msra.mxu1 %v9419_v60  ;;  %v9511_v59 = vld [vmem:[%s14185_s1 + $0x588] ss:$16 sps:$4 sm:$0xff]   ;;  %v9516_v60 = vld [vmem:[%s14185_s1 + $0x5a4] ss:$16 sps:$4 sm:$0xff]  }
  0x78   :  { %6384 = vmatprep.subr.bf16.mxu0 %v9424_v61  ;;  %7040 = vmatprep.subr.bf16.mxu1 %v9427_v62  ;;  %v9519_v61 = vld [vmem:[%s14185_s1 + $0x5ac] ss:$16 sps:$4 sm:$0xff]   ;;  %v9514_v62 = vld [vmem:[%s14185_s1 + $0x5a0] ss:$16 sps:$4 sm:$0xff]  }
  0x7b   :  { %6385 = vmatpush1.bf16.msra.mxu0 %v9422_v63  ;;  %7041 = vmatpush1.bf16.msra.mxu1 %v9425_v0  ;;  %v9517_v63 = vld [vmem:[%s14185_s1 + $0x5a8] ss:$16 sps:$4 sm:$0xff]   ;;  %v9522_v0 = vld [vmem:[%s14185_s1 + $0x5c4] ss:$16 sps:$4 sm:$0xff]  }
  0x7c   :  { %6386 = vmatprep.subr.bf16.mxu0 %v9430_v1  ;;  %7042 = vmatprep.subr.bf16.mxu1 %v9433_v2  ;;  %v9525_v1 = vld [vmem:[%s14185_s1 + $0x5cc] ss:$16 sps:$4 sm:$0xff]   ;;  %v9520_v2 = vld [vmem:[%s14185_s1 + $0x5c0] ss:$16 sps:$4 sm:$0xff]  }
  0x7f   :  { %6387 = vmatpush1.bf16.msra.mxu0 %v9428_v3  ;;  %7043 = vmatpush1.bf16.msra.mxu1 %v9431_v4  ;;  %v9523_v3 = vld [vmem:[%s14185_s1 + $0x5c8] ss:$16 sps:$4 sm:$0xff]   ;;  %v9528_v4 = vld [vmem:[%s14185_s1 + $0x5e4] ss:$16 sps:$4 sm:$0xff]  }
  0x80   :  { %6397 = vmatprep.subr.bf16.mxu0 %v9438_v5  ;;  %7053 = vmatprep.subr.bf16.mxu1 %v9441_v6  ;;  %v9531_v5 = vld [vmem:[%s14185_s1 + $0x5ec] ss:$16 sps:$4 sm:$0xff]   ;;  %v9526_v6 = vld [vmem:[%s14185_s1 + $0x5e0] ss:$16 sps:$4 sm:$0xff]  }
  0x82   :  { %6389 = vmatmul.mubr.bf16.vlgmr.msra.gmra.mrb[0].mxu0 %v7985_v7  ;;  %7045 = vmatmul.mubr.bf16.vlgmr.msra.gmra.mrb[0].mxu1 %v7985_v7  ;;  %v9529_v7 = vld [vmem:[%s14185_s1 + $0x5e8] ss:$16 sps:$4 sm:$0xff]  }
  0x83   :  { %6398 = vmatpush1.bf16.msra.mxu0 %v9436_v8  ;;  %7054 = vmatpush1.bf16.msra.mxu1 %v9439_v9  ;;  %v9536_v8 = vld [vmem:[%s14185_s1 + $0x604] ss:$16 sps:$4 sm:$0xff]   ;;  %v9539_v9 = vld [vmem:[%s14185_s1 + $0x60c] ss:$16 sps:$4 sm:$0xff]  }
  0x84   :  { %6399 = vmatprep.subr.bf16.mxu0 %v9444_v10  ;;  %7055 = vmatprep.subr.bf16.mxu1 %v9447_v12  ;;  %v9534_v10 = vld [vmem:[%s14185_s1 + $0x600] ss:$16 sps:$4 sm:$0xff]   ;;  %v7987_v12 = vcombine.low %v11284_v11, %v11284_v11  ;;  %v9545_v11 = vld [vmem:[%s14185_s1 + $0x62c] ss:$16 sps:$4 sm:$0xff]  }
  0x85   :  { %6429 = vmatprep.mubr.bf16.mxu0 %v7988_v13  ;;  %7085 = vmatprep.mubr.bf16.mxu1 %v7988_v13  ;;  %v9537_v13 = vld [vmem:[%s14185_s1 + $0x608] ss:$16 sps:$4 sm:$0xff]  }
  0x87   :  { %6400 = vmatpush1.bf16.msra.mxu0 %v9442_v14  ;;  %7056 = vmatpush1.bf16.msra.mxu1 %v9445_v15  ;;  %v11482_v14 = vld [vmem:[%s14186_s0 + $0x18] sm:$0xff]  ;;  %v9542_v15 = vld [vmem:[%s14185_s1 + $0x624] ss:$16 sps:$4 sm:$0xff]  }
  0x88   :  { %6401 = vmatprep.subr.bf16.mxu0 %v9450_v16  ;;  %7057 = vmatprep.subr.bf16.mxu1 %v9453_v17  ;;  %v7990_v16 = vcombine.high %v11482_v14, %v11482_v14  ;;  %v9540_v17 = vld [vmem:[%s14185_s1 + $0x620] ss:$16 sps:$4 sm:$0xff]  }
  0x8b   :  { %6402 = vmatpush1.bf16.msra.mxu0 %v9448_v18  ;;  %7058 = vmatpush1.bf16.msra.mxu1 %v9451_v19  ;;  %v9543_v18 = vld [vmem:[%s14185_s1 + $0x628] ss:$16 sps:$4 sm:$0xff]   ;;  %v9548_v19 = vld [vmem:[%s14185_s1 + $0x644] ss:$16 sps:$4 sm:$0xff]  }
  0x8c   :  { %6403 = vmatprep.subr.bf16.mxu0 %v9456_v20  ;;  %7059 = vmatprep.subr.bf16.mxu1 %v9459_v21  ;;  %v9551_v20 = vld [vmem:[%s14185_s1 + $0x64c] ss:$16 sps:$4 sm:$0xff]   ;;  %v9546_v21 = vld [vmem:[%s14185_s1 + $0x640] ss:$16 sps:$4 sm:$0xff]  }
  0x8f   :  { %6404 = vmatpush1.bf16.msra.mxu0 %v9454_v22  ;;  %7060 = vmatpush1.bf16.msra.mxu1 %v9457_v23  ;;  %v9549_v22 = vld [vmem:[%s14185_s1 + $0x648] ss:$16 sps:$4 sm:$0xff]   ;;  %v9554_v23 = vld [vmem:[%s14185_s1 + $0x664] ss:$16 sps:$4 sm:$0xff]  }
  0x90   :  { %6405 = vmatprep.subr.bf16.mxu0 %v9462_v24  ;;  %7061 = vmatprep.subr.bf16.mxu1 %v9465_v25  ;;  %v9557_v24 = vld [vmem:[%s14185_s1 + $0x66c] ss:$16 sps:$4 sm:$0xff]   ;;  %v9552_v25 = vld [vmem:[%s14185_s1 + $0x660] ss:$16 sps:$4 sm:$0xff]  }
  0x93   :  { %6406 = vmatpush1.bf16.msra.mxu0 %v9460_v26  ;;  %7062 = vmatpush1.bf16.msra.mxu1 %v9463_v27  ;;  %v9555_v26 = vld [vmem:[%s14185_s1 + $0x668] ss:$16 sps:$4 sm:$0xff]   ;;  %v9560_v27 = vld [vmem:[%s14185_s1 + $0x684] ss:$16 sps:$4 sm:$0xff]  }
  0x94   :  { %6407 = vmatprep.subr.bf16.mxu0 %v9468_v28  ;;  %7063 = vmatprep.subr.bf16.mxu1 %v9471_v29  ;;  %v9563_v28 = vld [vmem:[%s14185_s1 + $0x68c] ss:$16 sps:$4 sm:$0xff]   ;;  %v9558_v29 = vld [vmem:[%s14185_s1 + $0x680] ss:$16 sps:$4 sm:$0xff]  }
  0x97   :  { %6408 = vmatpush1.bf16.msra.mxu0 %v9466_v30  ;;  %7064 = vmatpush1.bf16.msra.mxu1 %v9469_v31  ;;  %v9561_v30 = vld [vmem:[%s14185_s1 + $0x688] ss:$16 sps:$4 sm:$0xff]   ;;  %v9566_v31 = vld [vmem:[%s14185_s1 + $0x6a4] ss:$16 sps:$4 sm:$0xff]  }
  0x98   :  { %6409 = vmatprep.subr.bf16.mxu0 %v9474_v32  ;;  %7065 = vmatprep.subr.bf16.mxu1 %v9477_v33  ;;  %v9569_v32 = vld [vmem:[%s14185_s1 + $0x6ac] ss:$16 sps:$4 sm:$0xff]   ;;  %v9564_v33 = vld [vmem:[%s14185_s1 + $0x6a0] ss:$16 sps:$4 sm:$0xff]  }
  0x9b   :  { %6410 = vmatpush1.bf16.msra.mxu0 %v9472_v34  ;;  %7066 = vmatpush1.bf16.msra.mxu1 %v9475_v35  ;;  %v9567_v34 = vld [vmem:[%s14185_s1 + $0x6a8] ss:$16 sps:$4 sm:$0xff]   ;;  %v9572_v35 = vld [vmem:[%s14185_s1 + $0x6c4] ss:$16 sps:$4 sm:$0xff]  }
  0x9c   :  { %6411 = vmatprep.subr.bf16.mxu0 %v9480_v36  ;;  %7067 = vmatprep.subr.bf16.mxu1 %v9483_v37  ;;  %v9575_v36 = vld [vmem:[%s14185_s1 + $0x6cc] ss:$16 sps:$4 sm:$0xff]   ;;  %v9570_v37 = vld [vmem:[%s14185_s1 + $0x6c0] ss:$16 sps:$4 sm:$0xff]  }
  0x9f   :  { %6412 = vmatpush1.bf16.msra.mxu0 %v9478_v38  ;;  %7068 = vmatpush1.bf16.msra.mxu1 %v9481_v39  ;;  %v9573_v38 = vld [vmem:[%s14185_s1 + $0x6c8] ss:$16 sps:$4 sm:$0xff]   ;;  %v9578_v39 = vld [vmem:[%s14185_s1 + $0x6e4] ss:$16 sps:$4 sm:$0xff]  }
  0xa0   :  { %6413 = vmatprep.subr.bf16.mxu0 %v9486_v40  ;;  %7069 = vmatprep.subr.bf16.mxu1 %v9489_v41  ;;  %v9581_v40 = vld [vmem:[%s14185_s1 + $0x6ec] ss:$16 sps:$4 sm:$0xff]   ;;  %v9576_v41 = vld [vmem:[%s14185_s1 + $0x6e0] ss:$16 sps:$4 sm:$0xff]  }
  0xa3   :  { %6414 = vmatpush1.bf16.msra.mxu0 %v9484_v42  ;;  %7070 = vmatpush1.bf16.msra.mxu1 %v9487_v43  ;;  %v9579_v42 = vld [vmem:[%s14185_s1 + $0x6e8] ss:$16 sps:$4 sm:$0xff]   ;;  %v9584_v43 = vld [vmem:[%s14185_s1 + $0x704] ss:$16 sps:$4 sm:$0xff]  }
  0xa4   :  { %6415 = vmatprep.subr.bf16.mxu0 %v9492_v44  ;;  %7071 = vmatprep.subr.bf16.mxu1 %v9495_v45  ;;  %v9587_v44 = vld [vmem:[%s14185_s1 + $0x70c] ss:$16 sps:$4 sm:$0xff]   ;;  %v9582_v45 = vld [vmem:[%s14185_s1 + $0x700] ss:$16 sps:$4 sm:$0xff]  }
  0xa7   :  { %6416 = vmatpush1.bf16.msra.mxu0 %v9490_v46  ;;  %7072 = vmatpush1.bf16.msra.mxu1 %v9493_v47  ;;  %v9585_v46 = vld [vmem:[%s14185_s1 + $0x708] ss:$16 sps:$4 sm:$0xff]   ;;  %v9590_v47 = vld [vmem:[%s14185_s1 + $0x724] ss:$16 sps:$4 sm:$0xff]  }
  0xa8   :  { %6417 = vmatprep.subr.bf16.mxu0 %v9498_v48  ;;  %7073 = vmatprep.subr.bf16.mxu1 %v9501_v49  ;;  %v9593_v48 = vld [vmem:[%s14185_s1 + $0x72c] ss:$16 sps:$4 sm:$0xff]   ;;  %v9588_v49 = vld [vmem:[%s14185_s1 + $0x720] ss:$16 sps:$4 sm:$0xff]  }
  0xab   :  { %6418 = vmatpush1.bf16.msra.mxu0 %v9496_v50  ;;  %7074 = vmatpush1.bf16.msra.mxu1 %v9499_v51  ;;  %v9591_v50 = vld [vmem:[%s14185_s1 + $0x728] ss:$16 sps:$4 sm:$0xff]   ;;  %v9596_v51 = vld [vmem:[%s14185_s1 + $0x744] ss:$16 sps:$4 sm:$0xff]  }
  0xac   :  { %6419 = vmatprep.subr.bf16.mxu0 %v9504_v52  ;;  %7075 = vmatprep.subr.bf16.mxu1 %v9507_v53  ;;  %v9599_v52 = vld [vmem:[%s14185_s1 + $0x74c] ss:$16 sps:$4 sm:$0xff]   ;;  %v9594_v53 = vld [vmem:[%s14185_s1 + $0x740] ss:$16 sps:$4 sm:$0xff]  }
  0xaf   :  { %6420 = vmatpush1.bf16.msra.mxu0 %v9502_v54  ;;  %7076 = vmatpush1.bf16.msra.mxu1 %v9505_v55  ;;  %v9597_v54 = vld [vmem:[%s14185_s1 + $0x748] ss:$16 sps:$4 sm:$0xff]   ;;  %v9602_v55 = vld [vmem:[%s14185_s1 + $0x764] ss:$16 sps:$4 sm:$0xff]  }
  0xb0   :  { %6421 = vmatprep.subr.bf16.mxu0 %v9510_v56  ;;  %7077 = vmatprep.subr.bf16.mxu1 %v9513_v57  ;;  %v9605_v56 = vld [vmem:[%s14185_s1 + $0x76c] ss:$16 sps:$4 sm:$0xff]   ;;  %v9600_v57 = vld [vmem:[%s14185_s1 + $0x760] ss:$16 sps:$4 sm:$0xff]  }
  0xb3   :  { %6422 = vmatpush1.bf16.msra.mxu0 %v9508_v58  ;;  %7078 = vmatpush1.bf16.msra.mxu1 %v9511_v59  ;;  %v9603_v58 = vld [vmem:[%s14185_s1 + $0x768] ss:$16 sps:$4 sm:$0xff]   ;;  %v9608_v59 = vld [vmem:[%s14185_s1 + $0x784] ss:$16 sps:$4 sm:$0xff]  }
  0xb4   :  { %6423 = vmatprep.subr.bf16.mxu0 %v9516_v60  ;;  %7079 = vmatprep.subr.bf16.mxu1 %v9519_v61  ;;  %v9611_v60 = vld [vmem:[%s14185_s1 + $0x78c] ss:$16 sps:$4 sm:$0xff]   ;;  %v9606_v61 = vld [vmem:[%s14185_s1 + $0x780] ss:$16 sps:$4 sm:$0xff]  }
  0xb7   :  { %6424 = vmatpush1.bf16.msra.mxu0 %v9514_v62  ;;  %7080 = vmatpush1.bf16.msra.mxu1 %v9517_v63  ;;  %v9609_v62 = vld [vmem:[%s14185_s1 + $0x788] ss:$16 sps:$4 sm:$0xff]   ;;  %v9614_v63 = vld [vmem:[%s14185_s1 + $0x7a4] ss:$16 sps:$4 sm:$0xff]  }
  0xb8   :  { %6425 = vmatprep.subr.bf16.mxu0 %v9522_v0  ;;  %7081 = vmatprep.subr.bf16.mxu1 %v9525_v1  ;;  %v9617_v0 = vld [vmem:[%s14185_s1 + $0x7ac] ss:$16 sps:$4 sm:$0xff]   ;;  %v9612_v1 = vld [vmem:[%s14185_s1 + $0x7a0] ss:$16 sps:$4 sm:$0xff]  }
  0xbb   :  { %6426 = vmatpush1.bf16.msra.mxu0 %v9520_v2  ;;  %7082 = vmatpush1.bf16.msra.mxu1 %v9523_v3  ;;  %v9615_v2 = vld [vmem:[%s14185_s1 + $0x7a8] ss:$16 sps:$4 sm:$0xff]   ;;  %v9620_v3 = vld [vmem:[%s14185_s1 + $0x7c4] ss:$16 sps:$4 sm:$0xff]  }
  0xbc   :  { %6427 = vmatprep.subr.bf16.mxu0 %v9528_v4  ;;  %7083 = vmatprep.subr.bf16.mxu1 %v9531_v5  ;;  %v9623_v4 = vld [vmem:[%s14185_s1 + $0x7cc] ss:$16 sps:$4 sm:$0xff]   ;;  %v9618_v5 = vld [vmem:[%s14185_s1 + $0x7c0] ss:$16 sps:$4 sm:$0xff]  }
  0xbf   :  { %6428 = vmatpush1.bf16.msra.mxu0 %v9526_v6  ;;  %7084 = vmatpush1.bf16.msra.mxu1 %v9529_v7  ;;  %v9621_v6 = vld [vmem:[%s14185_s1 + $0x7c8] ss:$16 sps:$4 sm:$0xff]   ;;  %v9626_v7 = vld [vmem:[%s14185_s1 + $0x7e4] ss:$16 sps:$4 sm:$0xff]  }
  0xc0   :  { %6438 = vmatprep.subr.bf16.mxu0 %v9536_v8  ;;  %7094 = vmatprep.subr.bf16.mxu1 %v9539_v9  ;;  %v9629_v8 = vld [vmem:[%s14185_s1 + $0x7ec] ss:$16 sps:$4 sm:$0xff]   ;;  %v9624_v9 = vld [vmem:[%s14185_s1 + $0x7e0] ss:$16 sps:$4 sm:$0xff]  }
  0xc2   :  { %6430 = vmatmul.mubr.bf16.vlgmr.msra.gmra.mrb[0].mxu0 %v7987_v12  ;;  %7086 = vmatmul.mubr.bf16.vlgmr.msra.gmra.mrb[0].mxu1 %v7987_v12  ;;  %v9634_v12 = vld [vmem:[%s14185_s1 + $0x804] ss:$16 sps:$4 sm:$0xff]  }
  0xc3   :  { %6439 = vmatpush1.bf16.msra.mxu0 %v9534_v10  ;;  %7095 = vmatpush1.bf16.msra.mxu1 %v9537_v13  ;;  %v9627_v10 = vld [vmem:[%s14185_s1 + $0x7e8] ss:$16 sps:$4 sm:$0xff]   ;;  %v9637_v13 = vld [vmem:[%s14185_s1 + $0x80c] ss:$16 sps:$4 sm:$0xff]  }
  0xc4   :  { %6440 = vmatprep.subr.bf16.mxu0 %v9542_v15  ;;  %7096 = vmatprep.subr.bf16.mxu1 %v9545_v11  ;;  %v9632_v15 = vld [vmem:[%s14185_s1 + $0x800] ss:$16 sps:$4 sm:$0xff]   ;;  %v7989_v11 = vcombine.low %v11482_v14, %v11482_v14  ;;  %v9643_v14 = vld [vmem:[%s14185_s1 + $0x82c] ss:$16 sps:$4 sm:$0xff]  }
  0xc5   :  { %6470 = vmatprep.mubr.bf16.mxu0 %v7990_v16  ;;  %7126 = vmatprep.mubr.bf16.mxu1 %v7990_v16  ;;  %v11680_v16 = vld [vmem:[%s14186_s0 + $0x20] sm:$0xff] }
  0xc7   :  { %6441 = vmatpush1.bf16.msra.mxu0 %v9540_v17  ;;  %7097 = vmatpush1.bf16.msra.mxu1 %v9543_v18  ;;  %v9635_v17 = vld [vmem:[%s14185_s1 + $0x808] ss:$16 sps:$4 sm:$0xff]   ;;  %v9640_v18 = vld [vmem:[%s14185_s1 + $0x824] ss:$16 sps:$4 sm:$0xff]  }
  0xc8   :  { %6442 = vmatprep.subr.bf16.mxu0 %v9548_v19  ;;  %7098 = vmatprep.subr.bf16.mxu1 %v9551_v20  ;;  %v7992_v19 = vcombine.high %v11680_v16, %v11680_v16  ;;  %v9638_v20 = vld [vmem:[%s14185_s1 + $0x820] ss:$16 sps:$4 sm:$0xff]  }
  0xcb   :  { %6443 = vmatpush1.bf16.msra.mxu0 %v9546_v21  ;;  %7099 = vmatpush1.bf16.msra.mxu1 %v9549_v22  ;;  %v9641_v21 = vld [vmem:[%s14185_s1 + $0x828] ss:$16 sps:$4 sm:$0xff]   ;;  %v9646_v22 = vld [vmem:[%s14185_s1 + $0x844] ss:$16 sps:$4 sm:$0xff]  }
  0xcc   :  { %6444 = vmatprep.subr.bf16.mxu0 %v9554_v23  ;;  %7100 = vmatprep.subr.bf16.mxu1 %v9557_v24  ;;  %v9649_v23 = vld [vmem:[%s14185_s1 + $0x84c] ss:$16 sps:$4 sm:$0xff]   ;;  %v9644_v24 = vld [vmem:[%s14185_s1 + $0x840] ss:$16 sps:$4 sm:$0xff]  }
  0xcf   :  { %6445 = vmatpush1.bf16.msra.mxu0 %v9552_v25  ;;  %7101 = vmatpush1.bf16.msra.mxu1 %v9555_v26  ;;  %v9647_v25 = vld [vmem:[%s14185_s1 + $0x848] ss:$16 sps:$4 sm:$0xff]   ;;  %v9652_v26 = vld [vmem:[%s14185_s1 + $0x864] ss:$16 sps:$4 sm:$0xff]  }
  0xd0   :  { %6446 = vmatprep.subr.bf16.mxu0 %v9560_v27  ;;  %7102 = vmatprep.subr.bf16.mxu1 %v9563_v28  ;;  %v9655_v27 = vld [vmem:[%s14185_s1 + $0x86c] ss:$16 sps:$4 sm:$0xff]   ;;  %v9650_v28 = vld [vmem:[%s14185_s1 + $0x860] ss:$16 sps:$4 sm:$0xff]  }
  0xd3   :  { %6447 = vmatpush1.bf16.msra.mxu0 %v9558_v29  ;;  %7103 = vmatpush1.bf16.msra.mxu1 %v9561_v30  ;;  %v9653_v29 = vld [vmem:[%s14185_s1 + $0x868] ss:$16 sps:$4 sm:$0xff]   ;;  %v9658_v30 = vld [vmem:[%s14185_s1 + $0x884] ss:$16 sps:$4 sm:$0xff]  }
  0xd4   :  { %6448 = vmatprep.subr.bf16.mxu0 %v9566_v31  ;;  %7104 = vmatprep.subr.bf16.mxu1 %v9569_v32  ;;  %v9661_v31 = vld [vmem:[%s14185_s1 + $0x88c] ss:$16 sps:$4 sm:$0xff]   ;;  %v9656_v32 = vld [vmem:[%s14185_s1 + $0x880] ss:$16 sps:$4 sm:$0xff]  }
  0xd7   :  { %6449 = vmatpush1.bf16.msra.mxu0 %v9564_v33  ;;  %7105 = vmatpush1.bf16.msra.mxu1 %v9567_v34  ;;  %v9659_v33 = vld [vmem:[%s14185_s1 + $0x888] ss:$16 sps:$4 sm:$0xff]   ;;  %v9664_v34 = vld [vmem:[%s14185_s1 + $0x8a4] ss:$16 sps:$4 sm:$0xff]  }
  0xd8   :  { %6450 = vmatprep.subr.bf16.mxu0 %v9572_v35  ;;  %7106 = vmatprep.subr.bf16.mxu1 %v9575_v36  ;;  %v9667_v35 = vld [vmem:[%s14185_s1 + $0x8ac] ss:$16 sps:$4 sm:$0xff]   ;;  %v9662_v36 = vld [vmem:[%s14185_s1 + $0x8a0] ss:$16 sps:$4 sm:$0xff]  }
  0xdb   :  { %6451 = vmatpush1.bf16.msra.mxu0 %v9570_v37  ;;  %7107 = vmatpush1.bf16.msra.mxu1 %v9573_v38  ;;  %v9665_v37 = vld [vmem:[%s14185_s1 + $0x8a8] ss:$16 sps:$4 sm:$0xff]   ;;  %v9670_v38 = vld [vmem:[%s14185_s1 + $0x8c4] ss:$16 sps:$4 sm:$0xff]  }
  0xdc   :  { %6452 = vmatprep.subr.bf16.mxu0 %v9578_v39  ;;  %7108 = vmatprep.subr.bf16.mxu1 %v9581_v40  ;;  %v9673_v39 = vld [vmem:[%s14185_s1 + $0x8cc] ss:$16 sps:$4 sm:$0xff]   ;;  %v9668_v40 = vld [vmem:[%s14185_s1 + $0x8c0] ss:$16 sps:$4 sm:$0xff]  }
  0xdf   :  { %6453 = vmatpush1.bf16.msra.mxu0 %v9576_v41  ;;  %7109 = vmatpush1.bf16.msra.mxu1 %v9579_v42  ;;  %v9671_v41 = vld [vmem:[%s14185_s1 + $0x8c8] ss:$16 sps:$4 sm:$0xff]   ;;  %v9676_v42 = vld [vmem:[%s14185_s1 + $0x8e4] ss:$16 sps:$4 sm:$0xff]  }
  0xe0   :  { %6454 = vmatprep.subr.bf16.mxu0 %v9584_v43  ;;  %7110 = vmatprep.subr.bf16.mxu1 %v9587_v44  ;;  %v9679_v43 = vld [vmem:[%s14185_s1 + $0x8ec] ss:$16 sps:$4 sm:$0xff]   ;;  %v9674_v44 = vld [vmem:[%s14185_s1 + $0x8e0] ss:$16 sps:$4 sm:$0xff]  }
  0xe3   :  { %6455 = vmatpush1.bf16.msra.mxu0 %v9582_v45  ;;  %7111 = vmatpush1.bf16.msra.mxu1 %v9585_v46  ;;  %v9677_v45 = vld [vmem:[%s14185_s1 + $0x8e8] ss:$16 sps:$4 sm:$0xff]   ;;  %v9682_v46 = vld [vmem:[%s14185_s1 + $0x904] ss:$16 sps:$4 sm:$0xff]  }
  0xe4   :  { %6456 = vmatprep.subr.bf16.mxu0 %v9590_v47  ;;  %7112 = vmatprep.subr.bf16.mxu1 %v9593_v48  ;;  %v9685_v47 = vld [vmem:[%s14185_s1 + $0x90c] ss:$16 sps:$4 sm:$0xff]   ;;  %v9680_v48 = vld [vmem:[%s14185_s1 + $0x900] ss:$16 sps:$4 sm:$0xff]  }
  0xe7   :  { %6457 = vmatpush1.bf16.msra.mxu0 %v9588_v49  ;;  %7113 = vmatpush1.bf16.msra.mxu1 %v9591_v50  ;;  %v9683_v49 = vld [vmem:[%s14185_s1 + $0x908] ss:$16 sps:$4 sm:$0xff]   ;;  %v9688_v50 = vld [vmem:[%s14185_s1 + $0x924] ss:$16 sps:$4 sm:$0xff]  }
  0xe8   :  { %6458 = vmatprep.subr.bf16.mxu0 %v9596_v51  ;;  %7114 = vmatprep.subr.bf16.mxu1 %v9599_v52  ;;  %v9691_v51 = vld [vmem:[%s14185_s1 + $0x92c] ss:$16 sps:$4 sm:$0xff]   ;;  %v9686_v52 = vld [vmem:[%s14185_s1 + $0x920] ss:$16 sps:$4 sm:$0xff]  }
  0xeb   :  { %6459 = vmatpush1.bf16.msra.mxu0 %v9594_v53  ;;  %7115 = vmatpush1.bf16.msra.mxu1 %v9597_v54  ;;  %v9689_v53 = vld [vmem:[%s14185_s1 + $0x928] ss:$16 sps:$4 sm:$0xff]   ;;  %v9694_v54 = vld [vmem:[%s14185_s1 + $0x944] ss:$16 sps:$4 sm:$0xff]  }
  0xec   :  { %6460 = vmatprep.subr.bf16.mxu0 %v9602_v55  ;;  %7116 = vmatprep.subr.bf16.mxu1 %v9605_v56  ;;  %v9697_v55 = vld [vmem:[%s14185_s1 + $0x94c] ss:$16 sps:$4 sm:$0xff]   ;;  %v9692_v56 = vld [vmem:[%s14185_s1 + $0x940] ss:$16 sps:$4 sm:$0xff]  }
  0xef   :  { %6461 = vmatpush1.bf16.msra.mxu0 %v9600_v57  ;;  %7117 = vmatpush1.bf16.msra.mxu1 %v9603_v58  ;;  %v9695_v57 = vld [vmem:[%s14185_s1 + $0x948] ss:$16 sps:$4 sm:$0xff]   ;;  %v9700_v58 = vld [vmem:[%s14185_s1 + $0x964] ss:$16 sps:$4 sm:$0xff]  }
  0xf0   :  { %6462 = vmatprep.subr.bf16.mxu0 %v9608_v59  ;;  %7118 = vmatprep.subr.bf16.mxu1 %v9611_v60  ;;  %v9703_v59 = vld [vmem:[%s14185_s1 + $0x96c] ss:$16 sps:$4 sm:$0xff]   ;;  %v9698_v60 = vld [vmem:[%s14185_s1 + $0x960] ss:$16 sps:$4 sm:$0xff]  }
  0xf3   :  { %6463 = vmatpush1.bf16.msra.mxu0 %v9606_v61  ;;  %7119 = vmatpush1.bf16.msra.mxu1 %v9609_v62  ;;  %v9701_v61 = vld [vmem:[%s14185_s1 + $0x968] ss:$16 sps:$4 sm:$0xff]   ;;  %v9706_v62 = vld [vmem:[%s14185_s1 + $0x984] ss:$16 sps:$4 sm:$0xff]  }
  0xf4   :  { %6464 = vmatprep.subr.bf16.mxu0 %v9614_v63  ;;  %7120 = vmatprep.subr.bf16.mxu1 %v9617_v0  ;;  %v9709_v63 = vld [vmem:[%s14185_s1 + $0x98c] ss:$16 sps:$4 sm:$0xff]   ;;  %v9704_v0 = vld [vmem:[%s14185_s1 + $0x980] ss:$16 sps:$4 sm:$0xff]  }
  0xf7   :  { %6465 = vmatpush1.bf16.msra.mxu0 %v9612_v1  ;;  %7121 = vmatpush1.bf16.msra.mxu1 %v9615_v2  ;;  %v9707_v1 = vld [vmem:[%s14185_s1 + $0x988] ss:$16 sps:$4 sm:$0xff]   ;;  %v9712_v2 = vld [vmem:[%s14185_s1 + $0x9a4] ss:$16 sps:$4 sm:$0xff]  }
  0xf8   :  { %6466 = vmatprep.subr.bf16.mxu0 %v9620_v3  ;;  %7122 = vmatprep.subr.bf16.mxu1 %v9623_v4  ;;  %v9715_v3 = vld [vmem:[%s14185_s1 + $0x9ac] ss:$16 sps:$4 sm:$0xff]   ;;  %v9710_v4 = vld [vmem:[%s14185_s1 + $0x9a0] ss:$16 sps:$4 sm:$0xff]  }
  0xfb   :  { %6467 = vmatpush1.bf16.msra.mxu0 %v9618_v5  ;;  %7123 = vmatpush1.bf16.msra.mxu1 %v9621_v6  ;;  %v9713_v5 = vld [vmem:[%s14185_s1 + $0x9a8] ss:$16 sps:$4 sm:$0xff]   ;;  %v9718_v6 = vld [vmem:[%s14185_s1 + $0x9c4] ss:$16 sps:$4 sm:$0xff]  }
  0xfc   :  { %6468 = vmatprep.subr.bf16.mxu0 %v9626_v7  ;;  %7124 = vmatprep.subr.bf16.mxu1 %v9629_v8  ;;  %v9721_v7 = vld [vmem:[%s14185_s1 + $0x9cc] ss:$16 sps:$4 sm:$0xff]   ;;  %v9716_v8 = vld [vmem:[%s14185_s1 + $0x9c0] ss:$16 sps:$4 sm:$0xff]  }
  0xff   :  { %6469 = vmatpush1.bf16.msra.mxu0 %v9624_v9  ;;  %7125 = vmatpush1.bf16.msra.mxu1 %v9627_v10  ;;  %v9719_v9 = vld [vmem:[%s14185_s1 + $0x9c8] ss:$16 sps:$4 sm:$0xff]   ;;  %v9724_v10 = vld [vmem:[%s14185_s1 + $0x9e4] ss:$16 sps:$4 sm:$0xff]  }
 0x100   :  { %6479 = vmatprep.subr.bf16.mxu0 %v9634_v12  ;;  %7135 = vmatprep.subr.bf16.mxu1 %v9637_v13  ;;  %v9727_v12 = vld [vmem:[%s14185_s1 + $0x9ec] ss:$16 sps:$4 sm:$0xff]   ;;  %v9722_v13 = vld [vmem:[%s14185_s1 + $0x9e0] ss:$16 sps:$4 sm:$0xff]  }
 0x102   :  { %6471 = vmatmul.mubr.bf16.vlgmr.msra.gmra.mrb[0].mxu0 %v7989_v11  ;;  %7127 = vmatmul.mubr.bf16.vlgmr.msra.gmra.mrb[0].mxu1 %v7989_v11  ;;  %v9732_v11 = vld [vmem:[%s14185_s1 + $0xa04] ss:$16 sps:$4 sm:$0xff]  }
 0x103   :  { %6480 = vmatpush1.bf16.msra.mxu0 %v9632_v15  ;;  %7136 = vmatpush1.bf16.msra.mxu1 %v9635_v17  ;;  %v9725_v15 = vld [vmem:[%s14185_s1 + $0x9e8] ss:$16 sps:$4 sm:$0xff]   ;;  %v9735_v17 = vld [vmem:[%s14185_s1 + $0xa0c] ss:$16 sps:$4 sm:$0xff]  }
 0x104   :  { %6481 = vmatprep.subr.bf16.mxu0 %v9640_v18  ;;  %7137 = vmatprep.subr.bf16.mxu1 %v9643_v14  ;;  %v11876_v18 = vld [vmem:[%s14186_s0 + $0x28] sm:$0xff]  ;;  %v7991_v14 = vcombine.low %v11680_v16, %v11680_v16 }
 0x105   :  { %6511 = vmatprep.mubr.bf16.mxu0 %v7992_v19  ;;  %7167 = vmatprep.mubr.bf16.mxu1 %v7992_v19  ;;  %v9730_v19 = vld [vmem:[%s14185_s1 + $0xa00] ss:$16 sps:$4 sm:$0xff]   ;;  %v9741_v16 = vld [vmem:[%s14185_s1 + $0xa2c] ss:$16 sps:$4 sm:$0xff]  }
 0x107   :  { %6482 = vmatpush1.bf16.msra.mxu0 %v9638_v20  ;;  %7138 = vmatpush1.bf16.msra.mxu1 %v9641_v21  ;;  %v9733_v20 = vld [vmem:[%s14185_s1 + $0xa08] ss:$16 sps:$4 sm:$0xff]   ;;  %v9738_v21 = vld [vmem:[%s14185_s1 + $0xa24] ss:$16 sps:$4 sm:$0xff]  }
 0x108   :  { %6483 = vmatprep.subr.bf16.mxu0 %v9646_v22  ;;  %7139 = vmatprep.subr.bf16.mxu1 %v9649_v23  ;;  %v7994_v22 = vcombine.high %v11876_v18, %v11876_v18  ;;  %v9736_v23 = vld [vmem:[%s14185_s1 + $0xa20] ss:$16 sps:$4 sm:$0xff]  }
 0x10b   :  { %6484 = vmatpush1.bf16.msra.mxu0 %v9644_v24  ;;  %7140 = vmatpush1.bf16.msra.mxu1 %v9647_v25  ;;  %v9739_v24 = vld [vmem:[%s14185_s1 + $0xa28] ss:$16 sps:$4 sm:$0xff]   ;;  %v9744_v25 = vld [vmem:[%s14185_s1 + $0xa44] ss:$16 sps:$4 sm:$0xff]  }
 0x10c   :  { %6485 = vmatprep.subr.bf16.mxu0 %v9652_v26  ;;  %7141 = vmatprep.subr.bf16.mxu1 %v9655_v27  ;;  %v9747_v26 = vld [vmem:[%s14185_s1 + $0xa4c] ss:$16 sps:$4 sm:$0xff]   ;;  %v9742_v27 = vld [vmem:[%s14185_s1 + $0xa40] ss:$16 sps:$4 sm:$0xff]  }
 0x10f   :  { %6486 = vmatpush1.bf16.msra.mxu0 %v9650_v28  ;;  %7142 = vmatpush1.bf16.msra.mxu1 %v9653_v29  ;;  %v9745_v28 = vld [vmem:[%s14185_s1 + $0xa48] ss:$16 sps:$4 sm:$0xff]   ;;  %v9750_v29 = vld [vmem:[%s14185_s1 + $0xa64] ss:$16 sps:$4 sm:$0xff]  }
 0x110   :  { %6487 = vmatprep.subr.bf16.mxu0 %v9658_v30  ;;  %7143 = vmatprep.subr.bf16.mxu1 %v9661_v31  ;;  %v9753_v30 = vld [vmem:[%s14185_s1 + $0xa6c] ss:$16 sps:$4 sm:$0xff]   ;;  %v9748_v31 = vld [vmem:[%s14185_s1 + $0xa60] ss:$16 sps:$4 sm:$0xff]  }
 0x113   :  { %6488 = vmatpush1.bf16.msra.mxu0 %v9656_v32  ;;  %7144 = vmatpush1.bf16.msra.mxu1 %v9659_v33  ;;  %v9751_v32 = vld [vmem:[%s14185_s1 + $0xa68] ss:$16 sps:$4 sm:$0xff]   ;;  %v9756_v33 = vld [vmem:[%s14185_s1 + $0xa84] ss:$16 sps:$4 sm:$0xff]  }
 0x114   :  { %6489 = vmatprep.subr.bf16.mxu0 %v9664_v34  ;;  %7145 = vmatprep.subr.bf16.mxu1 %v9667_v35  ;;  %v9759_v34 = vld [vmem:[%s14185_s1 + $0xa8c] ss:$16 sps:$4 sm:$0xff]   ;;  %v9754_v35 = vld [vmem:[%s14185_s1 + $0xa80] ss:$16 sps:$4 sm:$0xff]  }
 0x117   :  { %6490 = vmatpush1.bf16.msra.mxu0 %v9662_v36  ;;  %7146 = vmatpush1.bf16.msra.mxu1 %v9665_v37  ;;  %v9757_v36 = vld [vmem:[%s14185_s1 + $0xa88] ss:$16 sps:$4 sm:$0xff]   ;;  %v9762_v37 = vld [vmem:[%s14185_s1 + $0xaa4] ss:$16 sps:$4 sm:$0xff]  }
 0x118   :  { %6491 = vmatprep.subr.bf16.mxu0 %v9670_v38  ;;  %7147 = vmatprep.subr.bf16.mxu1 %v9673_v39  ;;  %v9765_v38 = vld [vmem:[%s14185_s1 + $0xaac] ss:$16 sps:$4 sm:$0xff]   ;;  %v9760_v39 = vld [vmem:[%s14185_s1 + $0xaa0] ss:$16 sps:$4 sm:$0xff]  }
 0x11b   :  { %6492 = vmatpush1.bf16.msra.mxu0 %v9668_v40  ;;  %7148 = vmatpush1.bf16.msra.mxu1 %v9671_v41  ;;  %v9763_v40 = vld [vmem:[%s14185_s1 + $0xaa8] ss:$16 sps:$4 sm:$0xff]   ;;  %v9768_v41 = vld [vmem:[%s14185_s1 + $0xac4] ss:$16 sps:$4 sm:$0xff]  }
 0x11c   :  { %6493 = vmatprep.subr.bf16.mxu0 %v9676_v42  ;;  %7149 = vmatprep.subr.bf16.mxu1 %v9679_v43  ;;  %v9771_v42 = vld [vmem:[%s14185_s1 + $0xacc] ss:$16 sps:$4 sm:$0xff]   ;;  %v9766_v43 = vld [vmem:[%s14185_s1 + $0xac0] ss:$16 sps:$4 sm:$0xff]  }
 0x11f   :  { %6494 = vmatpush1.bf16.msra.mxu0 %v9674_v44  ;;  %7150 = vmatpush1.bf16.msra.mxu1 %v9677_v45  ;;  %v9769_v44 = vld [vmem:[%s14185_s1 + $0xac8] ss:$16 sps:$4 sm:$0xff]   ;;  %v9774_v45 = vld [vmem:[%s14185_s1 + $0xae4] ss:$16 sps:$4 sm:$0xff]  }
 0x120   :  { %6495 = vmatprep.subr.bf16.mxu0 %v9682_v46  ;;  %7151 = vmatprep.subr.bf16.mxu1 %v9685_v47  ;;  %v9777_v46 = vld [vmem:[%s14185_s1 + $0xaec] ss:$16 sps:$4 sm:$0xff]   ;;  %v9772_v47 = vld [vmem:[%s14185_s1 + $0xae0] ss:$16 sps:$4 sm:$0xff]  }
 0x123   :  { %6496 = vmatpush1.bf16.msra.mxu0 %v9680_v48  ;;  %7152 = vmatpush1.bf16.msra.mxu1 %v9683_v49  ;;  %v9775_v48 = vld [vmem:[%s14185_s1 + $0xae8] ss:$16 sps:$4 sm:$0xff]   ;;  %v9780_v49 = vld [vmem:[%s14185_s1 + $0xb04] ss:$16 sps:$4 sm:$0xff]  }
 0x124   :  { %6497 = vmatprep.subr.bf16.mxu0 %v9688_v50  ;;  %7153 = vmatprep.subr.bf16.mxu1 %v9691_v51  ;;  %v9783_v50 = vld [vmem:[%s14185_s1 + $0xb0c] ss:$16 sps:$4 sm:$0xff]   ;;  %v9778_v51 = vld [vmem:[%s14185_s1 + $0xb00] ss:$16 sps:$4 sm:$0xff]  }
 0x127   :  { %6498 = vmatpush1.bf16.msra.mxu0 %v9686_v52  ;;  %7154 = vmatpush1.bf16.msra.mxu1 %v9689_v53  ;;  %v9781_v52 = vld [vmem:[%s14185_s1 + $0xb08] ss:$16 sps:$4 sm:$0xff]   ;;  %v9786_v53 = vld [vmem:[%s14185_s1 + $0xb24] ss:$16 sps:$4 sm:$0xff]  }
 0x128   :  { %6499 = vmatprep.subr.bf16.mxu0 %v9694_v54  ;;  %7155 = vmatprep.subr.bf16.mxu1 %v9697_v55  ;;  %v9789_v54 = vld [vmem:[%s14185_s1 + $0xb2c] ss:$16 sps:$4 sm:$0xff]   ;;  %v9784_v55 = vld [vmem:[%s14185_s1 + $0xb20] ss:$16 sps:$4 sm:$0xff]  }
 0x12b   :  { %6500 = vmatpush1.bf16.msra.mxu0 %v9692_v56  ;;  %7156 = vmatpush1.bf16.msra.mxu1 %v9695_v57  ;;  %v9787_v56 = vld [vmem:[%s14185_s1 + $0xb28] ss:$16 sps:$4 sm:$0xff]   ;;  %v9792_v57 = vld [vmem:[%s14185_s1 + $0xb44] ss:$16 sps:$4 sm:$0xff]  }
 0x12c   :  { %6501 = vmatprep.subr.bf16.mxu0 %v9700_v58  ;;  %7157 = vmatprep.subr.bf16.mxu1 %v9703_v59  ;;  %v9795_v58 = vld [vmem:[%s14185_s1 + $0xb4c] ss:$16 sps:$4 sm:$0xff]   ;;  %v9790_v59 = vld [vmem:[%s14185_s1 + $0xb40] ss:$16 sps:$4 sm:$0xff]  }
 0x12f   :  { %6502 = vmatpush1.bf16.msra.mxu0 %v9698_v60  ;;  %7158 = vmatpush1.bf16.msra.mxu1 %v9701_v61  ;;  %v9793_v60 = vld [vmem:[%s14185_s1 + $0xb48] ss:$16 sps:$4 sm:$0xff]   ;;  %v9798_v61 = vld [vmem:[%s14185_s1 + $0xb64] ss:$16 sps:$4 sm:$0xff]  }
 0x130   :  { %6503 = vmatprep.subr.bf16.mxu0 %v9706_v62  ;;  %7159 = vmatprep.subr.bf16.mxu1 %v9709_v63  ;;  %v9801_v62 = vld [vmem:[%s14185_s1 + $0xb6c] ss:$16 sps:$4 sm:$0xff]   ;;  %v9796_v63 = vld [vmem:[%s14185_s1 + $0xb60] ss:$16 sps:$4 sm:$0xff]  }
 0x133   :  { %6504 = vmatpush1.bf16.msra.mxu0 %v9704_v0  ;;  %7160 = vmatpush1.bf16.msra.mxu1 %v9707_v1  ;;  %v9799_v0 = vld [vmem:[%s14185_s1 + $0xb68] ss:$16 sps:$4 sm:$0xff]   ;;  %v9804_v1 = vld [vmem:[%s14185_s1 + $0xb84] ss:$16 sps:$4 sm:$0xff]  }
 0x134   :  { %6505 = vmatprep.subr.bf16.mxu0 %v9712_v2  ;;  %7161 = vmatprep.subr.bf16.mxu1 %v9715_v3  ;;  %v9807_v2 = vld [vmem:[%s14185_s1 + $0xb8c] ss:$16 sps:$4 sm:$0xff]   ;;  %v9802_v3 = vld [vmem:[%s14185_s1 + $0xb80] ss:$16 sps:$4 sm:$0xff]  }
 0x137   :  { %6506 = vmatpush1.bf16.msra.mxu0 %v9710_v4  ;;  %7162 = vmatpush1.bf16.msra.mxu1 %v9713_v5  ;;  %v9805_v4 = vld [vmem:[%s14185_s1 + $0xb88] ss:$16 sps:$4 sm:$0xff]   ;;  %v9810_v5 = vld [vmem:[%s14185_s1 + $0xba4] ss:$16 sps:$4 sm:$0xff]  }
 0x138   :  { %6507 = vmatprep.subr.bf16.mxu0 %v9718_v6  ;;  %7163 = vmatprep.subr.bf16.mxu1 %v9721_v7  ;;  %v9813_v6 = vld [vmem:[%s14185_s1 + $0xbac] ss:$16 sps:$4 sm:$0xff]   ;;  %v9808_v7 = vld [vmem:[%s14185_s1 + $0xba0] ss:$16 sps:$4 sm:$0xff]  }
 0x13b   :  { %6508 = vmatpush1.bf16.msra.mxu0 %v9716_v8  ;;  %7164 = vmatpush1.bf16.msra.mxu1 %v9719_v9  ;;  %v9811_v8 = vld [vmem:[%s14185_s1 + $0xba8] ss:$16 sps:$4 sm:$0xff]   ;;  %v9816_v9 = vld [vmem:[%s14185_s1 + $0xbc4] ss:$16 sps:$4 sm:$0xff]  }
 0x13c   :  { %6509 = vmatprep.subr.bf16.mxu0 %v9724_v10  ;;  %7165 = vmatprep.subr.bf16.mxu1 %v9727_v12  ;;  %v9819_v10 = vld [vmem:[%s14185_s1 + $0xbcc] ss:$16 sps:$4 sm:$0xff]   ;;  %v9814_v12 = vld [vmem:[%s14185_s1 + $0xbc0] ss:$16 sps:$4 sm:$0xff]  }
 0x13f   :  { %6510 = vmatpush1.bf16.msra.mxu0 %v9722_v13  ;;  %7166 = vmatpush1.bf16.msra.mxu1 %v9725_v15  ;;  %v9817_v13 = vld [vmem:[%s14185_s1 + $0xbc8] ss:$16 sps:$4 sm:$0xff]   ;;  %v9822_v15 = vld [vmem:[%s14185_s1 + $0xbe4] ss:$16 sps:$4 sm:$0xff]  }
 0x140   :  { %6520 = vmatprep.subr.bf16.mxu0 %v9732_v11  ;;  %7176 = vmatprep.subr.bf16.mxu1 %v9735_v17  ;;  %v9825_v11 = vld [vmem:[%s14185_s1 + $0xbec] ss:$16 sps:$4 sm:$0xff]   ;;  %v9820_v17 = vld [vmem:[%s14185_s1 + $0xbe0] ss:$16 sps:$4 sm:$0xff]  }
 0x142   :  { %6512 = vmatmul.mubr.bf16.vlgmr.msra.gmra.mrb[0].mxu0 %v7991_v14  ;;  %7168 = vmatmul.mubr.bf16.vlgmr.msra.gmra.mrb[0].mxu1 %v7991_v14  ;;  %v9823_v14 = vld [vmem:[%s14185_s1 + $0xbe8] ss:$16 sps:$4 sm:$0xff]  }
 0x143   :  { %6521 = vmatpush1.bf16.msra.mxu0 %v9730_v19  ;;  %7177 = vmatpush1.bf16.msra.mxu1 %v9733_v20  ;;  %v9830_v19 = vld [vmem:[%s14185_s1 + $0xc04] ss:$16 sps:$4 sm:$0xff]   ;;  %v9833_v20 = vld [vmem:[%s14185_s1 + $0xc0c] ss:$16 sps:$4 sm:$0xff]  }
 0x144   :  { %6522 = vmatprep.subr.bf16.mxu0 %v9738_v21  ;;  %7178 = vmatprep.subr.bf16.mxu1 %v9741_v16  ;;  %v12077_v21 = vld [vmem:[%s14186_s0 + $0x30] sm:$0xff]  ;;  %v7993_v16 = vcombine.low %v11876_v18, %v11876_v18  ;;  %v9839_v18 = vld [vmem:[%s14185_s1 + $0xc2c] ss:$16 sps:$4 sm:$0xff]  }
 0x145   :  { %6552 = vmatprep.mubr.bf16.mxu0 %v7994_v22  ;;  %7208 = vmatprep.mubr.bf16.mxu1 %v7994_v22  ;;  %v9828_v22 = vld [vmem:[%s14185_s1 + $0xc00] ss:$16 sps:$4 sm:$0xff]  }
 0x147   :  { %6523 = vmatpush1.bf16.msra.mxu0 %v9736_v23  ;;  %7179 = vmatpush1.bf16.msra.mxu1 %v9739_v24  ;;  %v9831_v23 = vld [vmem:[%s14185_s1 + $0xc08] ss:$16 sps:$4 sm:$0xff]   ;;  %v9836_v24 = vld [vmem:[%s14185_s1 + $0xc24] ss:$16 sps:$4 sm:$0xff]  }
 0x148   :  { %6524 = vmatprep.subr.bf16.mxu0 %v9744_v25  ;;  %7180 = vmatprep.subr.bf16.mxu1 %v9747_v26  ;;  %v7996_v25 = vcombine.high %v12077_v21, %v12077_v21  ;;  %v9834_v26 = vld [vmem:[%s14185_s1 + $0xc20] ss:$16 sps:$4 sm:$0xff]  }
 0x14b   :  { %6525 = vmatpush1.bf16.msra.mxu0 %v9742_v27  ;;  %7181 = vmatpush1.bf16.msra.mxu1 %v9745_v28  ;;  %v9837_v27 = vld [vmem:[%s14185_s1 + $0xc28] ss:$16 sps:$4 sm:$0xff]   ;;  %v9842_v28 = vld [vmem:[%s14185_s1 + $0xc44] ss:$16 sps:$4 sm:$0xff]  }
 0x14c   :  { %6526 = vmatprep.subr.bf16.mxu0 %v9750_v29  ;;  %7182 = vmatprep.subr.bf16.mxu1 %v9753_v30  ;;  %v9845_v29 = vld [vmem:[%s14185_s1 + $0xc4c] ss:$16 sps:$4 sm:$0xff]   ;;  %v9840_v30 = vld [vmem:[%s14185_s1 + $0xc40] ss:$16 sps:$4 sm:$0xff]  }
 0x14f   :  { %6527 = vmatpush1.bf16.msra.mxu0 %v9748_v31  ;;  %7183 = vmatpush1.bf16.msra.mxu1 %v9751_v32  ;;  %v9843_v31 = vld [vmem:[%s14185_s1 + $0xc48] ss:$16 sps:$4 sm:$0xff]   ;;  %v9848_v32 = vld [vmem:[%s14185_s1 + $0xc64] ss:$16 sps:$4 sm:$0xff]  }
 0x150   :  { %6528 = vmatprep.subr.bf16.mxu0 %v9756_v33  ;;  %7184 = vmatprep.subr.bf16.mxu1 %v9759_v34  ;;  %v9851_v33 = vld [vmem:[%s14185_s1 + $0xc6c] ss:$16 sps:$4 sm:$0xff]   ;;  %v9846_v34 = vld [vmem:[%s14185_s1 + $0xc60] ss:$16 sps:$4 sm:$0xff]  }
 0x153   :  { %6529 = vmatpush1.bf16.msra.mxu0 %v9754_v35  ;;  %7185 = vmatpush1.bf16.msra.mxu1 %v9757_v36  ;;  %v9849_v35 = vld [vmem:[%s14185_s1 + $0xc68] ss:$16 sps:$4 sm:$0xff]   ;;  %v9854_v36 = vld [vmem:[%s14185_s1 + $0xc84] ss:$16 sps:$4 sm:$0xff]  }
 0x154   :  { %6530 = vmatprep.subr.bf16.mxu0 %v9762_v37  ;;  %7186 = vmatprep.subr.bf16.mxu1 %v9765_v38  ;;  %v9857_v37 = vld [vmem:[%s14185_s1 + $0xc8c] ss:$16 sps:$4 sm:$0xff]   ;;  %v9852_v38 = vld [vmem:[%s14185_s1 + $0xc80] ss:$16 sps:$4 sm:$0xff]  }
 0x157   :  { %6531 = vmatpush1.bf16.msra.mxu0 %v9760_v39  ;;  %7187 = vmatpush1.bf16.msra.mxu1 %v9763_v40  ;;  %v9855_v39 = vld [vmem:[%s14185_s1 + $0xc88] ss:$16 sps:$4 sm:$0xff]   ;;  %v9860_v40 = vld [vmem:[%s14185_s1 + $0xca4] ss:$16 sps:$4 sm:$0xff]  }
 0x158   :  { %6532 = vmatprep.subr.bf16.mxu0 %v9768_v41  ;;  %7188 = vmatprep.subr.bf16.mxu1 %v9771_v42  ;;  %v9863_v41 = vld [vmem:[%s14185_s1 + $0xcac] ss:$16 sps:$4 sm:$0xff]   ;;  %v9858_v42 = vld [vmem:[%s14185_s1 + $0xca0] ss:$16 sps:$4 sm:$0xff]  }
 0x15b   :  { %6533 = vmatpush1.bf16.msra.mxu0 %v9766_v43  ;;  %7189 = vmatpush1.bf16.msra.mxu1 %v9769_v44  ;;  %v9861_v43 = vld [vmem:[%s14185_s1 + $0xca8] ss:$16 sps:$4 sm:$0xff]   ;;  %v9866_v44 = vld [vmem:[%s14185_s1 + $0xcc4] ss:$16 sps:$4 sm:$0xff]  }
 0x15c   :  { %6534 = vmatprep.subr.bf16.mxu0 %v9774_v45  ;;  %7190 = vmatprep.subr.bf16.mxu1 %v9777_v46  ;;  %v9869_v45 = vld [vmem:[%s14185_s1 + $0xccc] ss:$16 sps:$4 sm:$0xff]   ;;  %v9864_v46 = vld [vmem:[%s14185_s1 + $0xcc0] ss:$16 sps:$4 sm:$0xff]  }
 0x15f   :  { %6535 = vmatpush1.bf16.msra.mxu0 %v9772_v47  ;;  %7191 = vmatpush1.bf16.msra.mxu1 %v9775_v48  ;;  %v9867_v47 = vld [vmem:[%s14185_s1 + $0xcc8] ss:$16 sps:$4 sm:$0xff]   ;;  %v9872_v48 = vld [vmem:[%s14185_s1 + $0xce4] ss:$16 sps:$4 sm:$0xff]  }
 0x160   :  { %6536 = vmatprep.subr.bf16.mxu0 %v9780_v49  ;;  %7192 = vmatprep.subr.bf16.mxu1 %v9783_v50  ;;  %v9875_v49 = vld [vmem:[%s14185_s1 + $0xcec] ss:$16 sps:$4 sm:$0xff]   ;;  %v9870_v50 = vld [vmem:[%s14185_s1 + $0xce0] ss:$16 sps:$4 sm:$0xff]  }
 0x163   :  { %6537 = vmatpush1.bf16.msra.mxu0 %v9778_v51  ;;  %7193 = vmatpush1.bf16.msra.mxu1 %v9781_v52  ;;  %v9873_v51 = vld [vmem:[%s14185_s1 + $0xce8] ss:$16 sps:$4 sm:$0xff]   ;;  %v9878_v52 = vld [vmem:[%s14185_s1 + $0xd04] ss:$16 sps:$4 sm:$0xff]  }
 0x164   :  { %6538 = vmatprep.subr.bf16.mxu0 %v9786_v53  ;;  %7194 = vmatprep.subr.bf16.mxu1 %v9789_v54  ;;  %v9881_v53 = vld [vmem:[%s14185_s1 + $0xd0c] ss:$16 sps:$4 sm:$0xff]   ;;  %v9876_v54 = vld [vmem:[%s14185_s1 + $0xd00] ss:$16 sps:$4 sm:$0xff]  }
 0x167   :  { %6539 = vmatpush1.bf16.msra.mxu0 %v9784_v55  ;;  %7195 = vmatpush1.bf16.msra.mxu1 %v9787_v56  ;;  %v9879_v55 = vld [vmem:[%s14185_s1 + $0xd08] ss:$16 sps:$4 sm:$0xff]   ;;  %v9884_v56 = vld [vmem:[%s14185_s1 + $0xd24] ss:$16 sps:$4 sm:$0xff]  }
 0x168   :  { %6540 = vmatprep.subr.bf16.mxu0 %v9792_v57  ;;  %7196 = vmatprep.subr.bf16.mxu1 %v9795_v58  ;;  %v9887_v57 = vld [vmem:[%s14185_s1 + $0xd2c] ss:$16 sps:$4 sm:$0xff]   ;;  %v9882_v58 = vld [vmem:[%s14185_s1 + $0xd20] ss:$16 sps:$4 sm:$0xff]  }
 0x16b   :  { %6541 = vmatpush1.bf16.msra.mxu0 %v9790_v59  ;;  %7197 = vmatpush1.bf16.msra.mxu1 %v9793_v60  ;;  %v9885_v59 = vld [vmem:[%s14185_s1 + $0xd28] ss:$16 sps:$4 sm:$0xff]   ;;  %v9890_v60 = vld [vmem:[%s14185_s1 + $0xd44] ss:$16 sps:$4 sm:$0xff]  }
 0x16c   :  { %6542 = vmatprep.subr.bf16.mxu0 %v9798_v61  ;;  %7198 = vmatprep.subr.bf16.mxu1 %v9801_v62  ;;  %v9893_v61 = vld [vmem:[%s14185_s1 + $0xd4c] ss:$16 sps:$4 sm:$0xff]   ;;  %v9888_v62 = vld [vmem:[%s14185_s1 + $0xd40] ss:$16 sps:$4 sm:$0xff]  }
 0x16f   :  { %6543 = vmatpush1.bf16.msra.mxu0 %v9796_v63  ;;  %7199 = vmatpush1.bf16.msra.mxu1 %v9799_v0  ;;  %v9891_v63 = vld [vmem:[%s14185_s1 + $0xd48] ss:$16 sps:$4 sm:$0xff]   ;;  %v9896_v0 = vld [vmem:[%s14185_s1 + $0xd64] ss:$16 sps:$4 sm:$0xff]  }
 0x170   :  { %6544 = vmatprep.subr.bf16.mxu0 %v9804_v1  ;;  %7200 = vmatprep.subr.bf16.mxu1 %v9807_v2  ;;  %v9899_v1 = vld [vmem:[%s14185_s1 + $0xd6c] ss:$16 sps:$4 sm:$0xff]   ;;  %v9894_v2 = vld [vmem:[%s14185_s1 + $0xd60] ss:$16 sps:$4 sm:$0xff]  }
 0x173   :  { %6545 = vmatpush1.bf16.msra.mxu0 %v9802_v3  ;;  %7201 = vmatpush1.bf16.msra.mxu1 %v9805_v4  ;;  %v9897_v3 = vld [vmem:[%s14185_s1 + $0xd68] ss:$16 sps:$4 sm:$0xff]   ;;  %v9902_v4 = vld [vmem:[%s14185_s1 + $0xd84] ss:$16 sps:$4 sm:$0xff]  }
 0x174   :  { %6546 = vmatprep.subr.bf16.mxu0 %v9810_v5  ;;  %7202 = vmatprep.subr.bf16.mxu1 %v9813_v6  ;;  %v9905_v5 = vld [vmem:[%s14185_s1 + $0xd8c] ss:$16 sps:$4 sm:$0xff]   ;;  %v9900_v6 = vld [vmem:[%s14185_s1 + $0xd80] ss:$16 sps:$4 sm:$0xff]  }
 0x177   :  { %6547 = vmatpush1.bf16.msra.mxu0 %v9808_v7  ;;  %7203 = vmatpush1.bf16.msra.mxu1 %v9811_v8  ;;  %v9903_v7 = vld [vmem:[%s14185_s1 + $0xd88] ss:$16 sps:$4 sm:$0xff]   ;;  %v9908_v8 = vld [vmem:[%s14185_s1 + $0xda4] ss:$16 sps:$4 sm:$0xff]  }
 0x178   :  { %6548 = vmatprep.subr.bf16.mxu0 %v9816_v9  ;;  %7204 = vmatprep.subr.bf16.mxu1 %v9819_v10  ;;  %v9911_v9 = vld [vmem:[%s14185_s1 + $0xdac] ss:$16 sps:$4 sm:$0xff]   ;;  %v9906_v10 = vld [vmem:[%s14185_s1 + $0xda0] ss:$16 sps:$4 sm:$0xff]  }
 0x17b   :  { %6549 = vmatpush1.bf16.msra.mxu0 %v9814_v12  ;;  %7205 = vmatpush1.bf16.msra.mxu1 %v9817_v13  ;;  %v9909_v12 = vld [vmem:[%s14185_s1 + $0xda8] ss:$16 sps:$4 sm:$0xff]   ;;  %v9914_v13 = vld [vmem:[%s14185_s1 + $0xdc4] ss:$16 sps:$4 sm:$0xff]  }
 0x17c   :  { %6550 = vmatprep.subr.bf16.mxu0 %v9822_v15  ;;  %7206 = vmatprep.subr.bf16.mxu1 %v9825_v11  ;;  %v9917_v15 = vld [vmem:[%s14185_s1 + $0xdcc] ss:$16 sps:$4 sm:$0xff]   ;;  %v9912_v11 = vld [vmem:[%s14185_s1 + $0xdc0] ss:$16 sps:$4 sm:$0xff]  }
 0x17f   :  { %6551 = vmatpush1.bf16.msra.mxu0 %v9820_v17  ;;  %7207 = vmatpush1.bf16.msra.mxu1 %v9823_v14  ;;  %v9915_v17 = vld [vmem:[%s14185_s1 + $0xdc8] ss:$16 sps:$4 sm:$0xff]   ;;  %v9920_v14 = vld [vmem:[%s14185_s1 + $0xde4] ss:$16 sps:$4 sm:$0xff]  }
 0x180   :  { %6561 = vmatprep.subr.bf16.mxu0 %v9830_v19  ;;  %7217 = vmatprep.subr.bf16.mxu1 %v9833_v20  ;;  %v9923_v19 = vld [vmem:[%s14185_s1 + $0xdec] ss:$16 sps:$4 sm:$0xff]   ;;  %v9918_v20 = vld [vmem:[%s14185_s1 + $0xde0] ss:$16 sps:$4 sm:$0xff]  }
 0x182   :  { %6553 = vmatmul.mubr.bf16.vlgmr.msra.gmra.mrb[0].mxu0 %v7993_v16  ;;  %7209 = vmatmul.mubr.bf16.vlgmr.msra.gmra.mrb[0].mxu1 %v7993_v16  ;;  %v9921_v16 = vld [vmem:[%s14185_s1 + $0xde8] ss:$16 sps:$4 sm:$0xff]  }
 0x183   :  { %6562 = vmatpush1.bf16.msra.mxu0 %v9828_v22  ;;  %7218 = vmatpush1.bf16.msra.mxu1 %v9831_v23  ;;  %v9928_v22 = vld [vmem:[%s14185_s1 + $0xe04] ss:$16 sps:$4 sm:$0xff]   ;;  %v9931_v23 = vld [vmem:[%s14185_s1 + $0xe0c] ss:$16 sps:$4 sm:$0xff]  }
 0x184   :  { %6563 = vmatprep.subr.bf16.mxu0 %v9836_v24  ;;  %7219 = vmatprep.subr.bf16.mxu1 %v9839_v18  ;;  %v12278_v24 = vld [vmem:[%s14186_s0 + $0x38] sm:$0xff]  ;;  %v7995_v18 = vcombine.low %v12077_v21, %v12077_v21 }
 0x185   :  { %6593 = vmatprep.mubr.bf16.mxu0 %v7996_v25  ;;  %7249 = vmatprep.mubr.bf16.mxu1 %v7996_v25  ;;  %v9926_v25 = vld [vmem:[%s14185_s1 + $0xe00] ss:$16 sps:$4 sm:$0xff]   ;;  %v9937_v21 = vld [vmem:[%s14185_s1 + $0xe2c] ss:$16 sps:$4 sm:$0xff]  }
 0x187   :  { %6564 = vmatpush1.bf16.msra.mxu0 %v9834_v26  ;;  %7220 = vmatpush1.bf16.msra.mxu1 %v9837_v27  ;;  %v9929_v26 = vld [vmem:[%s14185_s1 + $0xe08] ss:$16 sps:$4 sm:$0xff]   ;;  %v9934_v27 = vld [vmem:[%s14185_s1 + $0xe24] ss:$16 sps:$4 sm:$0xff]  }
 0x188   :  { %6565 = vmatprep.subr.bf16.mxu0 %v9842_v28  ;;  %7221 = vmatprep.subr.bf16.mxu1 %v9845_v29  ;;  %v7998_v28 = vcombine.high %v12278_v24, %v12278_v24  ;;  %v9932_v29 = vld [vmem:[%s14185_s1 + $0xe20] ss:$16 sps:$4 sm:$0xff]  }
 0x18b   :  { %6566 = vmatpush1.bf16.msra.mxu0 %v9840_v30  ;;  %7222 = vmatpush1.bf16.msra.mxu1 %v9843_v31  ;;  %v9935_v30 = vld [vmem:[%s14185_s1 + $0xe28] ss:$16 sps:$4 sm:$0xff]   ;;  %v9940_v31 = vld [vmem:[%s14185_s1 + $0xe44] ss:$16 sps:$4 sm:$0xff]  }
 0x18c   :  { %6567 = vmatprep.subr.bf16.mxu0 %v9848_v32  ;;  %7223 = vmatprep.subr.bf16.mxu1 %v9851_v33  ;;  %v9943_v32 = vld [vmem:[%s14185_s1 + $0xe4c] ss:$16 sps:$4 sm:$0xff]   ;;  %v9938_v33 = vld [vmem:[%s14185_s1 + $0xe40] ss:$16 sps:$4 sm:$0xff]  }
 0x18f   :  { %6568 = vmatpush1.bf16.msra.mxu0 %v9846_v34  ;;  %7224 = vmatpush1.bf16.msra.mxu1 %v9849_v35  ;;  %v9941_v34 = vld [vmem:[%s14185_s1 + $0xe48] ss:$16 sps:$4 sm:$0xff]   ;;  %v9946_v35 = vld [vmem:[%s14185_s1 + $0xe64] ss:$16 sps:$4 sm:$0xff]  }
 0x190   :  { %6569 = vmatprep.subr.bf16.mxu0 %v9854_v36  ;;  %7225 = vmatprep.subr.bf16.mxu1 %v9857_v37  ;;  %v9949_v36 = vld [vmem:[%s14185_s1 + $0xe6c] ss:$16 sps:$4 sm:$0xff]   ;;  %v9944_v37 = vld [vmem:[%s14185_s1 + $0xe60] ss:$16 sps:$4 sm:$0xff]  }
 0x193   :  { %6570 = vmatpush1.bf16.msra.mxu0 %v9852_v38  ;;  %7226 = vmatpush1.bf16.msra.mxu1 %v9855_v39  ;;  %v9947_v38 = vld [vmem:[%s14185_s1 + $0xe68] ss:$16 sps:$4 sm:$0xff]   ;;  %v9952_v39 = vld [vmem:[%s14185_s1 + $0xe84] ss:$16 sps:$4 sm:$0xff]  }
 0x194   :  { %6571 = vmatprep.subr.bf16.mxu0 %v9860_v40  ;;  %7227 = vmatprep.subr.bf16.mxu1 %v9863_v41  ;;  %v9955_v40 = vld [vmem:[%s14185_s1 + $0xe8c] ss:$16 sps:$4 sm:$0xff]   ;;  %v9950_v41 = vld [vmem:[%s14185_s1 + $0xe80] ss:$16 sps:$4 sm:$0xff]  }
 0x197   :  { %6572 = vmatpush1.bf16.msra.mxu0 %v9858_v42  ;;  %7228 = vmatpush1.bf16.msra.mxu1 %v9861_v43  ;;  %v9953_v42 = vld [vmem:[%s14185_s1 + $0xe88] ss:$16 sps:$4 sm:$0xff]   ;;  %v9958_v43 = vld [vmem:[%s14185_s1 + $0xea4] ss:$16 sps:$4 sm:$0xff]  }
 0x198   :  { %6573 = vmatprep.subr.bf16.mxu0 %v9866_v44  ;;  %7229 = vmatprep.subr.bf16.mxu1 %v9869_v45  ;;  %v9961_v44 = vld [vmem:[%s14185_s1 + $0xeac] ss:$16 sps:$4 sm:$0xff]   ;;  %v9956_v45 = vld [vmem:[%s14185_s1 + $0xea0] ss:$16 sps:$4 sm:$0xff]  }
 0x19b   :  { %6574 = vmatpush1.bf16.msra.mxu0 %v9864_v46  ;;  %7230 = vmatpush1.bf16.msra.mxu1 %v9867_v47  ;;  %v9959_v46 = vld [vmem:[%s14185_s1 + $0xea8] ss:$16 sps:$4 sm:$0xff]   ;;  %v9964_v47 = vld [vmem:[%s14185_s1 + $0xec4] ss:$16 sps:$4 sm:$0xff]  }
 0x19c   :  { %6575 = vmatprep.subr.bf16.mxu0 %v9872_v48  ;;  %7231 = vmatprep.subr.bf16.mxu1 %v9875_v49  ;;  %v9967_v48 = vld [vmem:[%s14185_s1 + $0xecc] ss:$16 sps:$4 sm:$0xff]   ;;  %v9962_v49 = vld [vmem:[%s14185_s1 + $0xec0] ss:$16 sps:$4 sm:$0xff]  }
 0x19f   :  { %6576 = vmatpush1.bf16.msra.mxu0 %v9870_v50  ;;  %7232 = vmatpush1.bf16.msra.mxu1 %v9873_v51  ;;  %v9965_v50 = vld [vmem:[%s14185_s1 + $0xec8] ss:$16 sps:$4 sm:$0xff]   ;;  %v9970_v51 = vld [vmem:[%s14185_s1 + $0xee4] ss:$16 sps:$4 sm:$0xff]  }
 0x1a0   :  { %6577 = vmatprep.subr.bf16.mxu0 %v9878_v52  ;;  %7233 = vmatprep.subr.bf16.mxu1 %v9881_v53  ;;  %v9973_v52 = vld [vmem:[%s14185_s1 + $0xeec] ss:$16 sps:$4 sm:$0xff]   ;;  %v9968_v53 = vld [vmem:[%s14185_s1 + $0xee0] ss:$16 sps:$4 sm:$0xff]  }
 0x1a3   :  { %6578 = vmatpush1.bf16.msra.mxu0 %v9876_v54  ;;  %7234 = vmatpush1.bf16.msra.mxu1 %v9879_v55  ;;  %v9971_v54 = vld [vmem:[%s14185_s1 + $0xee8] ss:$16 sps:$4 sm:$0xff]   ;;  %v9976_v55 = vld [vmem:[%s14185_s1 + $0xf04] ss:$16 sps:$4 sm:$0xff]  }
 0x1a4   :  { %6579 = vmatprep.subr.bf16.mxu0 %v9884_v56  ;;  %7235 = vmatprep.subr.bf16.mxu1 %v9887_v57  ;;  %v9979_v56 = vld [vmem:[%s14185_s1 + $0xf0c] ss:$16 sps:$4 sm:$0xff]   ;;  %v9974_v57 = vld [vmem:[%s14185_s1 + $0xf00] ss:$16 sps:$4 sm:$0xff]  }
 0x1a7   :  { %6580 = vmatpush1.bf16.msra.mxu0 %v9882_v58  ;;  %7236 = vmatpush1.bf16.msra.mxu1 %v9885_v59  ;;  %v9977_v58 = vld [vmem:[%s14185_s1 + $0xf08] ss:$16 sps:$4 sm:$0xff]   ;;  %v9982_v59 = vld [vmem:[%s14185_s1 + $0xf24] ss:$16 sps:$4 sm:$0xff]  }
 0x1a8   :  { %6581 = vmatprep.subr.bf16.mxu0 %v9890_v60  ;;  %7237 = vmatprep.subr.bf16.mxu1 %v9893_v61  ;;  %v9985_v60 = vld [vmem:[%s14185_s1 + $0xf2c] ss:$16 sps:$4 sm:$0xff]   ;;  %v9980_v61 = vld [vmem:[%s14185_s1 + $0xf20] ss:$16 sps:$4 sm:$0xff]  }
 0x1ab   :  { %6582 = vmatpush1.bf16.msra.mxu0 %v9888_v62  ;;  %7238 = vmatpush1.bf16.msra.mxu1 %v9891_v63  ;;  %v9983_v62 = vld [vmem:[%s14185_s1 + $0xf28] ss:$16 sps:$4 sm:$0xff]   ;;  %v9988_v63 = vld [vmem:[%s14185_s1 + $0xf44] ss:$16 sps:$4 sm:$0xff]  }
 0x1ac   :  { %6583 = vmatprep.subr.bf16.mxu0 %v9896_v0  ;;  %7239 = vmatprep.subr.bf16.mxu1 %v9899_v1  ;;  %v9991_v0 = vld [vmem:[%s14185_s1 + $0xf4c] ss:$16 sps:$4 sm:$0xff]   ;;  %v9986_v1 = vld [vmem:[%s14185_s1 + $0xf40] ss:$16 sps:$4 sm:$0xff]  }
 0x1af   :  { %6584 = vmatpush1.bf16.msra.mxu0 %v9894_v2  ;;  %7240 = vmatpush1.bf16.msra.mxu1 %v9897_v3  ;;  %v9989_v2 = vld [vmem:[%s14185_s1 + $0xf48] ss:$16 sps:$4 sm:$0xff]   ;;  %v9994_v3 = vld [vmem:[%s14185_s1 + $0xf64] ss:$16 sps:$4 sm:$0xff]  }
 0x1b0   :  { %6585 = vmatprep.subr.bf16.mxu0 %v9902_v4  ;;  %7241 = vmatprep.subr.bf16.mxu1 %v9905_v5  ;;  %v9997_v4 = vld [vmem:[%s14185_s1 + $0xf6c] ss:$16 sps:$4 sm:$0xff]   ;;  %v9992_v5 = vld [vmem:[%s14185_s1 + $0xf60] ss:$16 sps:$4 sm:$0xff]  }
 0x1b3   :  { %6586 = vmatpush1.bf16.msra.mxu0 %v9900_v6  ;;  %7242 = vmatpush1.bf16.msra.mxu1 %v9903_v7  ;;  %v9995_v6 = vld [vmem:[%s14185_s1 + $0xf68] ss:$16 sps:$4 sm:$0xff]   ;;  %v10000_v7 = vld [vmem:[%s14185_s1 + $0xf84] ss:$16 sps:$4 sm:$0xff]  }
 0x1b4   :  { %6587 = vmatprep.subr.bf16.mxu0 %v9908_v8  ;;  %7243 = vmatprep.subr.bf16.mxu1 %v9911_v9  ;;  %v10003_v8 = vld [vmem:[%s14185_s1 + $0xf8c] ss:$16 sps:$4 sm:$0xff]   ;;  %v9998_v9 = vld [vmem:[%s14185_s1 + $0xf80] ss:$16 sps:$4 sm:$0xff]  }
 0x1b7   :  { %6588 = vmatpush1.bf16.msra.mxu0 %v9906_v10  ;;  %7244 = vmatpush1.bf16.msra.mxu1 %v9909_v12  ;;  %v10001_v10 = vld [vmem:[%s14185_s1 + $0xf88] ss:$16 sps:$4 sm:$0xff]   ;;  %v10006_v12 = vld [vmem:[%s14185_s1 + $0xfa4] ss:$16 sps:$4 sm:$0xff]  }
 0x1b8   :  { %6589 = vmatprep.subr.bf16.mxu0 %v9914_v13  ;;  %7245 = vmatprep.subr.bf16.mxu1 %v9917_v15  ;;  %v10009_v13 = vld [vmem:[%s14185_s1 + $0xfac] ss:$16 sps:$4 sm:$0xff]   ;;  %v10004_v15 = vld [vmem:[%s14185_s1 + $0xfa0] ss:$16 sps:$4 sm:$0xff]  }
 0x1bb   :  { %6590 = vmatpush1.bf16.msra.mxu0 %v9912_v11  ;;  %7246 = vmatpush1.bf16.msra.mxu1 %v9915_v17  ;;  %v10007_v11 = vld [vmem:[%s14185_s1 + $0xfa8] ss:$16 sps:$4 sm:$0xff]   ;;  %v10012_v17 = vld [vmem:[%s14185_s1 + $0xfc4] ss:$16 sps:$4 sm:$0xff]  }
 0x1bc   :  { %6591 = vmatprep.subr.bf16.mxu0 %v9920_v14  ;;  %7247 = vmatprep.subr.bf16.mxu1 %v9923_v19  ;;  %v10015_v14 = vld [vmem:[%s14185_s1 + $0xfcc] ss:$16 sps:$4 sm:$0xff]   ;;  %v10010_v19 = vld [vmem:[%s14185_s1 + $0xfc0] ss:$16 sps:$4 sm:$0xff]  }
 0x1bf   :  { %6592 = vmatpush1.bf16.msra.mxu0 %v9918_v20  ;;  %7248 = vmatpush1.bf16.msra.mxu1 %v9921_v16  ;;  %v10013_v20 = vld [vmem:[%s14185_s1 + $0xfc8] ss:$16 sps:$4 sm:$0xff]   ;;  %v10018_v16 = vld [vmem:[%s14185_s1 + $0xfe4] ss:$16 sps:$4 sm:$0xff]  }
 0x1c0   :  { %6602 = vmatprep.subr.bf16.mxu0 %v9928_v22  ;;  %7258 = vmatprep.subr.bf16.mxu1 %v9931_v23  ;;  %v10021_v22 = vld [vmem:[%s14185_s1 + $0xfec] ss:$16 sps:$4 sm:$0xff]   ;;  %v10016_v23 = vld [vmem:[%s14185_s1 + $0xfe0] ss:$16 sps:$4 sm:$0xff]  }
 0x1c2   :  { %6594 = vmatmul.mubr.bf16.vlgmr.msra.gmra.mrb[0].mxu0 %v7995_v18  ;;  %7250 = vmatmul.mubr.bf16.vlgmr.msra.gmra.mrb[0].mxu1 %v7995_v18  ;;  %v10019_v18 = vld [vmem:[%s14185_s1 + $0xfe8] ss:$16 sps:$4 sm:$0xff]  }
 0x1c3   :  { %6603 = vmatpush1.bf16.msra.mxu0 %v9926_v25  ;;  %7259 = vmatpush1.bf16.msra.mxu1 %v9929_v26  ;;  %v10026_v25 = vld [vmem:[%s14185_s1 + $0x1004] ss:$16 sps:$4 sm:$0xff]   ;;  %v10029_v26 = vld [vmem:[%s14185_s1 + $0x100c] ss:$16 sps:$4 sm:$0xff]  }
 0x1c4   :  { %6604 = vmatprep.subr.bf16.mxu0 %v9934_v27  ;;  %7260 = vmatprep.subr.bf16.mxu1 %v9937_v21  ;;  %v12479_v27 = vld [vmem:[%s14186_s0 + $0x40] sm:$0xff]  ;;  %v7997_v21 = vcombine.low %v12278_v24, %v12278_v24  ;;  %v10035_v24 = vld [vmem:[%s14185_s1 + $0x102c] ss:$16 sps:$4 sm:$0xff]  }
 0x1c5   :  { %6634 = vmatprep.mubr.bf16.mxu0 %v7998_v28  ;;  %7290 = vmatprep.mubr.bf16.mxu1 %v7998_v28  ;;  %v10024_v28 = vld [vmem:[%s14185_s1 + $0x1000] ss:$16 sps:$4 sm:$0xff]  }
 0x1c7   :  { %6605 = vmatpush1.bf16.msra.mxu0 %v9932_v29  ;;  %7261 = vmatpush1.bf16.msra.mxu1 %v9935_v30  ;;  %v10027_v29 = vld [vmem:[%s14185_s1 + $0x1008] ss:$16 sps:$4 sm:$0xff]   ;;  %v10032_v30 = vld [vmem:[%s14185_s1 + $0x1024] ss:$16 sps:$4 sm:$0xff]  }
 0x1c8   :  { %6606 = vmatprep.subr.bf16.mxu0 %v9940_v31  ;;  %7262 = vmatprep.subr.bf16.mxu1 %v9943_v32  ;;  %v8000_v31 = vcombine.high %v12479_v27, %v12479_v27  ;;  %v10030_v32 = vld [vmem:[%s14185_s1 + $0x1020] ss:$16 sps:$4 sm:$0xff]  }
 0x1cb   :  { %6607 = vmatpush1.bf16.msra.mxu0 %v9938_v33  ;;  %7263 = vmatpush1.bf16.msra.mxu1 %v9941_v34  ;;  %v10033_v33 = vld [vmem:[%s14185_s1 + $0x1028] ss:$16 sps:$4 sm:$0xff]   ;;  %v10038_v34 = vld [vmem:[%s14185_s1 + $0x1044] ss:$16 sps:$4 sm:$0xff]  }
 0x1cc   :  { %6608 = vmatprep.subr.bf16.mxu0 %v9946_v35  ;;  %7264 = vmatprep.subr.bf16.mxu1 %v9949_v36  ;;  %v10041_v35 = vld [vmem:[%s14185_s1 + $0x104c] ss:$16 sps:$4 sm:$0xff]   ;;  %v10036_v36 = vld [vmem:[%s14185_s1 + $0x1040] ss:$16 sps:$4 sm:$0xff]  }
 0x1cf   :  { %6609 = vmatpush1.bf16.msra.mxu0 %v9944_v37  ;;  %7265 = vmatpush1.bf16.msra.mxu1 %v9947_v38  ;;  %v10039_v37 = vld [vmem:[%s14185_s1 + $0x1048] ss:$16 sps:$4 sm:$0xff]   ;;  %v10044_v38 = vld [vmem:[%s14185_s1 + $0x1064] ss:$16 sps:$4 sm:$0xff]  }
 0x1d0   :  { %6610 = vmatprep.subr.bf16.mxu0 %v9952_v39  ;;  %7266 = vmatprep.subr.bf16.mxu1 %v9955_v40  ;;  %v10047_v39 = vld [vmem:[%s14185_s1 + $0x106c] ss:$16 sps:$4 sm:$0xff]   ;;  %v10042_v40 = vld [vmem:[%s14185_s1 + $0x1060] ss:$16 sps:$4 sm:$0xff]  }
 0x1d3   :  { %6611 = vmatpush1.bf16.msra.mxu0 %v9950_v41  ;;  %7267 = vmatpush1.bf16.msra.mxu1 %v9953_v42  ;;  %v10045_v41 = vld [vmem:[%s14185_s1 + $0x1068] ss:$16 sps:$4 sm:$0xff]   ;;  %v10050_v42 = vld [vmem:[%s14185_s1 + $0x1084] ss:$16 sps:$4 sm:$0xff]  }
 0x1d4   :  { %6612 = vmatprep.subr.bf16.mxu0 %v9958_v43  ;;  %7268 = vmatprep.subr.bf16.mxu1 %v9961_v44  ;;  %v10053_v43 = vld [vmem:[%s14185_s1 + $0x108c] ss:$16 sps:$4 sm:$0xff]   ;;  %v10048_v44 = vld [vmem:[%s14185_s1 + $0x1080] ss:$16 sps:$4 sm:$0xff]  }
 0x1d7   :  { %6613 = vmatpush1.bf16.msra.mxu0 %v9956_v45  ;;  %7269 = vmatpush1.bf16.msra.mxu1 %v9959_v46  ;;  %v10051_v45 = vld [vmem:[%s14185_s1 + $0x1088] ss:$16 sps:$4 sm:$0xff]   ;;  %v10056_v46 = vld [vmem:[%s14185_s1 + $0x10a4] ss:$16 sps:$4 sm:$0xff]  }
 0x1d8   :  { %6614 = vmatprep.subr.bf16.mxu0 %v9964_v47  ;;  %7270 = vmatprep.subr.bf16.mxu1 %v9967_v48  ;;  %v10059_v47 = vld [vmem:[%s14185_s1 + $0x10ac] ss:$16 sps:$4 sm:$0xff]   ;;  %v10054_v48 = vld [vmem:[%s14185_s1 + $0x10a0] ss:$16 sps:$4 sm:$0xff]  }
 0x1db   :  { %6615 = vmatpush1.bf16.msra.mxu0 %v9962_v49  ;;  %7271 = vmatpush1.bf16.msra.mxu1 %v9965_v50  ;;  %v10057_v49 = vld [vmem:[%s14185_s1 + $0x10a8] ss:$16 sps:$4 sm:$0xff]   ;;  %v10062_v50 = vld [vmem:[%s14185_s1 + $0x10c4] ss:$16 sps:$4 sm:$0xff]  }
 0x1dc   :  { %6616 = vmatprep.subr.bf16.mxu0 %v9970_v51  ;;  %7272 = vmatprep.subr.bf16.mxu1 %v9973_v52  ;;  %v10065_v51 = vld [vmem:[%s14185_s1 + $0x10cc] ss:$16 sps:$4 sm:$0xff]   ;;  %v10060_v52 = vld [vmem:[%s14185_s1 + $0x10c0] ss:$16 sps:$4 sm:$0xff]  }
 0x1df   :  { %6617 = vmatpush1.bf16.msra.mxu0 %v9968_v53  ;;  %7273 = vmatpush1.bf16.msra.mxu1 %v9971_v54  ;;  %v10063_v53 = vld [vmem:[%s14185_s1 + $0x10c8] ss:$16 sps:$4 sm:$0xff]   ;;  %v10068_v54 = vld [vmem:[%s14185_s1 + $0x10e4] ss:$16 sps:$4 sm:$0xff]  }
 0x1e0   :  { %6618 = vmatprep.subr.bf16.mxu0 %v9976_v55  ;;  %7274 = vmatprep.subr.bf16.mxu1 %v9979_v56  ;;  %v10071_v55 = vld [vmem:[%s14185_s1 + $0x10ec] ss:$16 sps:$4 sm:$0xff]   ;;  %v10066_v56 = vld [vmem:[%s14185_s1 + $0x10e0] ss:$16 sps:$4 sm:$0xff]  }
 0x1e3   :  { %6619 = vmatpush1.bf16.msra.mxu0 %v9974_v57  ;;  %7275 = vmatpush1.bf16.msra.mxu1 %v9977_v58  ;;  %v10069_v57 = vld [vmem:[%s14185_s1 + $0x10e8] ss:$16 sps:$4 sm:$0xff]   ;;  %v10074_v58 = vld [vmem:[%s14185_s1 + $0x1104] ss:$16 sps:$4 sm:$0xff]  }
 0x1e4   :  { %6620 = vmatprep.subr.bf16.mxu0 %v9982_v59  ;;  %7276 = vmatprep.subr.bf16.mxu1 %v9985_v60  ;;  %v10077_v59 = vld [vmem:[%s14185_s1 + $0x110c] ss:$16 sps:$4 sm:$0xff]   ;;  %v10072_v60 = vld [vmem:[%s14185_s1 + $0x1100] ss:$16 sps:$4 sm:$0xff]  }
 0x1e7   :  { %6621 = vmatpush1.bf16.msra.mxu0 %v9980_v61  ;;  %7277 = vmatpush1.bf16.msra.mxu1 %v9983_v62  ;;  %v10075_v61 = vld [vmem:[%s14185_s1 + $0x1108] ss:$16 sps:$4 sm:$0xff]   ;;  %v10080_v62 = vld [vmem:[%s14185_s1 + $0x1124] ss:$16 sps:$4 sm:$0xff]  }
 0x1e8   :  { %6622 = vmatprep.subr.bf16.mxu0 %v9988_v63  ;;  %7278 = vmatprep.subr.bf16.mxu1 %v9991_v0  ;;  %v10083_v63 = vld [vmem:[%s14185_s1 + $0x112c] ss:$16 sps:$4 sm:$0xff]   ;;  %v10078_v0 = vld [vmem:[%s14185_s1 + $0x1120] ss:$16 sps:$4 sm:$0xff]  }
 0x1eb   :  { %6623 = vmatpush1.bf16.msra.mxu0 %v9986_v1  ;;  %7279 = vmatpush1.bf16.msra.mxu1 %v9989_v2  ;;  %v10081_v1 = vld [vmem:[%s14185_s1 + $0x1128] ss:$16 sps:$4 sm:$0xff]   ;;  %v10086_v2 = vld [vmem:[%s14185_s1 + $0x1144] ss:$16 sps:$4 sm:$0xff]  }
 0x1ec   :  { %6624 = vmatprep.subr.bf16.mxu0 %v9994_v3  ;;  %7280 = vmatprep.subr.bf16.mxu1 %v9997_v4  ;;  %v10089_v3 = vld [vmem:[%s14185_s1 + $0x114c] ss:$16 sps:$4 sm:$0xff]   ;;  %v10084_v4 = vld [vmem:[%s14185_s1 + $0x1140] ss:$16 sps:$4 sm:$0xff]  }
 0x1ef   :  { %6625 = vmatpush1.bf16.msra.mxu0 %v9992_v5  ;;  %7281 = vmatpush1.bf16.msra.mxu1 %v9995_v6  ;;  %v10087_v5 = vld [vmem:[%s14185_s1 + $0x1148] ss:$16 sps:$4 sm:$0xff]   ;;  %v10092_v6 = vld [vmem:[%s14185_s1 + $0x1164] ss:$16 sps:$4 sm:$0xff]  }
 0x1f0   :  { %6626 = vmatprep.subr.bf16.mxu0 %v10000_v7  ;;  %7282 = vmatprep.subr.bf16.mxu1 %v10003_v8  ;;  %v10095_v7 = vld [vmem:[%s14185_s1 + $0x116c] ss:$16 sps:$4 sm:$0xff]   ;;  %v10090_v8 = vld [vmem:[%s14185_s1 + $0x1160] ss:$16 sps:$4 sm:$0xff]  }
 0x1f3   :  { %6627 = vmatpush1.bf16.msra.mxu0 %v9998_v9  ;;  %7283 = vmatpush1.bf16.msra.mxu1 %v10001_v10  ;;  %v10093_v9 = vld [vmem:[%s14185_s1 + $0x1168] ss:$16 sps:$4 sm:$0xff]   ;;  %v10098_v10 = vld [vmem:[%s14185_s1 + $0x1184] ss:$16 sps:$4 sm:$0xff]  }
 0x1f4   :  { %6628 = vmatprep.subr.bf16.mxu0 %v10006_v12  ;;  %7284 = vmatprep.subr.bf16.mxu1 %v10009_v13  ;;  %v10101_v12 = vld [vmem:[%s14185_s1 + $0x118c] ss:$16 sps:$4 sm:$0xff]   ;;  %v10096_v13 = vld [vmem:[%s14185_s1 + $0x1180] ss:$16 sps:$4 sm:$0xff]  }
 0x1f7   :  { %6629 = vmatpush1.bf16.msra.mxu0 %v10004_v15  ;;  %7285 = vmatpush1.bf16.msra.mxu1 %v10007_v11  ;;  %v10099_v15 = vld [vmem:[%s14185_s1 + $0x1188] ss:$16 sps:$4 sm:$0xff]   ;;  %v10104_v11 = vld [vmem:[%s14185_s1 + $0x11a4] ss:$16 sps:$4 sm:$0xff]  }
 0x1f8   :  { %6630 = vmatprep.subr.bf16.mxu0 %v10012_v17  ;;  %7286 = vmatprep.subr.bf16.mxu1 %v10015_v14  ;;  %v10107_v17 = vld [vmem:[%s14185_s1 + $0x11ac] ss:$16 sps:$4 sm:$0xff]   ;;  %v10102_v14 = vld [vmem:[%s14185_s1 + $0x11a0] ss:$16 sps:$4 sm:$0xff]  }
 0x1fb   :  { %6631 = vmatpush1.bf16.msra.mxu0 %v10010_v19  ;;  %7287 = vmatpush1.bf16.msra.mxu1 %v10013_v20  ;;  %v10105_v19 = vld [vmem:[%s14185_s1 + $0x11a8] ss:$16 sps:$4 sm:$0xff]   ;;  %v10110_v20 = vld [vmem:[%s14185_s1 + $0x11c4] ss:$16 sps:$4 sm:$0xff]  }
 0x1fc   :  { %6632 = vmatprep.subr.bf16.mxu0 %v10018_v16  ;;  %7288 = vmatprep.subr.bf16.mxu1 %v10021_v22  ;;  %v10113_v16 = vld [vmem:[%s14185_s1 + $0x11cc] ss:$16 sps:$4 sm:$0xff]   ;;  %v10108_v22 = vld [vmem:[%s14185_s1 + $0x11c0] ss:$16 sps:$4 sm:$0xff]  }
 0x1ff   :  { %6633 = vmatpush1.bf16.msra.mxu0 %v10016_v23  ;;  %7289 = vmatpush1.bf16.msra.mxu1 %v10019_v18  ;;  %v10111_v23 = vld [vmem:[%s14185_s1 + $0x11c8] ss:$16 sps:$4 sm:$0xff]   ;;  %v10116_v18 = vld [vmem:[%s14185_s1 + $0x11e4] ss:$16 sps:$4 sm:$0xff]  }
 0x200   :  { %6643 = vmatprep.subr.bf16.mxu0 %v10026_v25  ;;  %7299 = vmatprep.subr.bf16.mxu1 %v10029_v26  ;;  %v10119_v25 = vld [vmem:[%s14185_s1 + $0x11ec] ss:$16 sps:$4 sm:$0xff]   ;;  %v10114_v26 = vld [vmem:[%s14185_s1 + $0x11e0] ss:$16 sps:$4 sm:$0xff]  }
 0x202   :  { %6635 = vmatmul.mubr.bf16.vlgmr.msra.gmra.mrb[0].mxu0 %v7997_v21  ;;  %7291 = vmatmul.mubr.bf16.vlgmr.msra.gmra.mrb[0].mxu1 %v7997_v21  ;;  %v10117_v21 = vld [vmem:[%s14185_s1 + $0x11e8] ss:$16 sps:$4 sm:$0xff]  }
 0x203   :  { %6644 = vmatpush1.bf16.msra.mxu0 %v10024_v28  ;;  %7300 = vmatpush1.bf16.msra.mxu1 %v10027_v29  ;;  %v10124_v28 = vld [vmem:[%s14185_s1 + $0x1204] ss:$16 sps:$4 sm:$0xff]   ;;  %v10127_v29 = vld [vmem:[%s14185_s1 + $0x120c] ss:$16 sps:$4 sm:$0xff]  }
 0x204   :  { %6645 = vmatprep.subr.bf16.mxu0 %v10032_v30  ;;  %7301 = vmatprep.subr.bf16.mxu1 %v10035_v24  ;;  %v12680_v30 = vld [vmem:[%s14186_s0 + $0x48] sm:$0xff]  ;;  %v7999_v24 = vcombine.low %v12479_v27, %v12479_v27 }
 0x205   :  { %6675 = vmatprep.mubr.bf16.mxu0 %v8000_v31  ;;  %7331 = vmatprep.mubr.bf16.mxu1 %v8000_v31  ;;  %v10122_v31 = vld [vmem:[%s14185_s1 + $0x1200] ss:$16 sps:$4 sm:$0xff]   ;;  %v10133_v27 = vld [vmem:[%s14185_s1 + $0x122c] ss:$16 sps:$4 sm:$0xff]  }
 0x207   :  { %6646 = vmatpush1.bf16.msra.mxu0 %v10030_v32  ;;  %7302 = vmatpush1.bf16.msra.mxu1 %v10033_v33  ;;  %v10125_v32 = vld [vmem:[%s14185_s1 + $0x1208] ss:$16 sps:$4 sm:$0xff]   ;;  %v10130_v33 = vld [vmem:[%s14185_s1 + $0x1224] ss:$16 sps:$4 sm:$0xff]  }
 0x208   :  { %6647 = vmatprep.subr.bf16.mxu0 %v10038_v34  ;;  %7303 = vmatprep.subr.bf16.mxu1 %v10041_v35  ;;  %v8002_v34 = vcombine.high %v12680_v30, %v12680_v30  ;;  %v10128_v35 = vld [vmem:[%s14185_s1 + $0x1220] ss:$16 sps:$4 sm:$0xff]  }
 0x20b   :  { %6648 = vmatpush1.bf16.msra.mxu0 %v10036_v36  ;;  %7304 = vmatpush1.bf16.msra.mxu1 %v10039_v37  ;;  %v10131_v36 = vld [vmem:[%s14185_s1 + $0x1228] ss:$16 sps:$4 sm:$0xff]   ;;  %v10136_v37 = vld [vmem:[%s14185_s1 + $0x1244] ss:$16 sps:$4 sm:$0xff]  }
 0x20c   :  { %6649 = vmatprep.subr.bf16.mxu0 %v10044_v38  ;;  %7305 = vmatprep.subr.bf16.mxu1 %v10047_v39  ;;  %v10139_v38 = vld [vmem:[%s14185_s1 + $0x124c] ss:$16 sps:$4 sm:$0xff]   ;;  %v10134_v39 = vld [vmem:[%s14185_s1 + $0x1240] ss:$16 sps:$4 sm:$0xff]  }
 0x20f   :  { %6650 = vmatpush1.bf16.msra.mxu0 %v10042_v40  ;;  %7306 = vmatpush1.bf16.msra.mxu1 %v10045_v41  ;;  %v10137_v40 = vld [vmem:[%s14185_s1 + $0x1248] ss:$16 sps:$4 sm:$0xff]   ;;  %v10142_v41 = vld [vmem:[%s14185_s1 + $0x1264] ss:$16 sps:$4 sm:$0xff]  }
 0x210   :  { %6651 = vmatprep.subr.bf16.mxu0 %v10050_v42  ;;  %7307 = vmatprep.subr.bf16.mxu1 %v10053_v43  ;;  %v10145_v42 = vld [vmem:[%s14185_s1 + $0x126c] ss:$16 sps:$4 sm:$0xff]   ;;  %v10140_v43 = vld [vmem:[%s14185_s1 + $0x1260] ss:$16 sps:$4 sm:$0xff]  }
 0x213   :  { %6652 = vmatpush1.bf16.msra.mxu0 %v10048_v44  ;;  %7308 = vmatpush1.bf16.msra.mxu1 %v10051_v45  ;;  %v10143_v44 = vld [vmem:[%s14185_s1 + $0x1268] ss:$16 sps:$4 sm:$0xff]   ;;  %v10148_v45 = vld [vmem:[%s14185_s1 + $0x1284] ss:$16 sps:$4 sm:$0xff]  }
 0x214   :  { %6653 = vmatprep.subr.bf16.mxu0 %v10056_v46  ;;  %7309 = vmatprep.subr.bf16.mxu1 %v10059_v47  ;;  %v10151_v46 = vld [vmem:[%s14185_s1 + $0x128c] ss:$16 sps:$4 sm:$0xff]   ;;  %v10146_v47 = vld [vmem:[%s14185_s1 + $0x1280] ss:$16 sps:$4 sm:$0xff]  }
 0x217   :  { %6654 = vmatpush1.bf16.msra.mxu0 %v10054_v48  ;;  %7310 = vmatpush1.bf16.msra.mxu1 %v10057_v49  ;;  %v10149_v48 = vld [vmem:[%s14185_s1 + $0x1288] ss:$16 sps:$4 sm:$0xff]   ;;  %v10154_v49 = vld [vmem:[%s14185_s1 + $0x12a4] ss:$16 sps:$4 sm:$0xff]  }
 0x218   :  { %6655 = vmatprep.subr.bf16.mxu0 %v10062_v50  ;;  %7311 = vmatprep.subr.bf16.mxu1 %v10065_v51  ;;  %v10157_v50 = vld [vmem:[%s14185_s1 + $0x12ac] ss:$16 sps:$4 sm:$0xff]   ;;  %v10152_v51 = vld [vmem:[%s14185_s1 + $0x12a0] ss:$16 sps:$4 sm:$0xff]  }
 0x21b   :  { %6656 = vmatpush1.bf16.msra.mxu0 %v10060_v52  ;;  %7312 = vmatpush1.bf16.msra.mxu1 %v10063_v53  ;;  %v10155_v52 = vld [vmem:[%s14185_s1 + $0x12a8] ss:$16 sps:$4 sm:$0xff]   ;;  %v10160_v53 = vld [vmem:[%s14185_s1 + $0x12c4] ss:$16 sps:$4 sm:$0xff]  }
 0x21c   :  { %6657 = vmatprep.subr.bf16.mxu0 %v10068_v54  ;;  %7313 = vmatprep.subr.bf16.mxu1 %v10071_v55  ;;  %v10163_v54 = vld [vmem:[%s14185_s1 + $0x12cc] ss:$16 sps:$4 sm:$0xff]   ;;  %v10158_v55 = vld [vmem:[%s14185_s1 + $0x12c0] ss:$16 sps:$4 sm:$0xff]  }
 0x21f   :  { %6658 = vmatpush1.bf16.msra.mxu0 %v10066_v56  ;;  %7314 = vmatpush1.bf16.msra.mxu1 %v10069_v57  ;;  %v10161_v56 = vld [vmem:[%s14185_s1 + $0x12c8] ss:$16 sps:$4 sm:$0xff]   ;;  %v10166_v57 = vld [vmem:[%s14185_s1 + $0x12e4] ss:$16 sps:$4 sm:$0xff]  }
 0x220   :  { %6659 = vmatprep.subr.bf16.mxu0 %v10074_v58  ;;  %7315 = vmatprep.subr.bf16.mxu1 %v10077_v59  ;;  %v10169_v58 = vld [vmem:[%s14185_s1 + $0x12ec] ss:$16 sps:$4 sm:$0xff]   ;;  %v10164_v59 = vld [vmem:[%s14185_s1 + $0x12e0] ss:$16 sps:$4 sm:$0xff]  }
 0x223   :  { %6660 = vmatpush1.bf16.msra.mxu0 %v10072_v60  ;;  %7316 = vmatpush1.bf16.msra.mxu1 %v10075_v61  ;;  %v10167_v60 = vld [vmem:[%s14185_s1 + $0x12e8] ss:$16 sps:$4 sm:$0xff]   ;;  %v10172_v61 = vld [vmem:[%s14185_s1 + $0x1304] ss:$16 sps:$4 sm:$0xff]  }
 0x224   :  { %6661 = vmatprep.subr.bf16.mxu0 %v10080_v62  ;;  %7317 = vmatprep.subr.bf16.mxu1 %v10083_v63  ;;  %v10175_v62 = vld [vmem:[%s14185_s1 + $0x130c] ss:$16 sps:$4 sm:$0xff]   ;;  %v10170_v63 = vld [vmem:[%s14185_s1 + $0x1300] ss:$16 sps:$4 sm:$0xff]  }
 0x227   :  { %6662 = vmatpush1.bf16.msra.mxu0 %v10078_v0  ;;  %7318 = vmatpush1.bf16.msra.mxu1 %v10081_v1  ;;  %v10173_v0 = vld [vmem:[%s14185_s1 + $0x1308] ss:$16 sps:$4 sm:$0xff]   ;;  %v10178_v1 = vld [vmem:[%s14185_s1 + $0x1324] ss:$16 sps:$4 sm:$0xff]  }
 0x228   :  { %6663 = vmatprep.subr.bf16.mxu0 %v10086_v2  ;;  %7319 = vmatprep.subr.bf16.mxu1 %v10089_v3  ;;  %v10181_v2 = vld [vmem:[%s14185_s1 + $0x132c] ss:$16 sps:$4 sm:$0xff]   ;;  %v10176_v3 = vld [vmem:[%s14185_s1 + $0x1320] ss:$16 sps:$4 sm:$0xff]  }
 0x22b   :  { %6664 = vmatpush1.bf16.msra.mxu0 %v10084_v4  ;;  %7320 = vmatpush1.bf16.msra.mxu1 %v10087_v5  ;;  %v10179_v4 = vld [vmem:[%s14185_s1 + $0x1328] ss:$16 sps:$4 sm:$0xff]   ;;  %v10184_v5 = vld [vmem:[%s14185_s1 + $0x1344] ss:$16 sps:$4 sm:$0xff]  }
 0x22c   :  { %6665 = vmatprep.subr.bf16.mxu0 %v10092_v6  ;;  %7321 = vmatprep.subr.bf16.mxu1 %v10095_v7  ;;  %v10187_v6 = vld [vmem:[%s14185_s1 + $0x134c] ss:$16 sps:$4 sm:$0xff]   ;;  %v10182_v7 = vld [vmem:[%s14185_s1 + $0x1340] ss:$16 sps:$4 sm:$0xff]  }
 0x22f   :  { %6666 = vmatpush1.bf16.msra.mxu0 %v10090_v8  ;;  %7322 = vmatpush1.bf16.msra.mxu1 %v10093_v9  ;;  %v10185_v8 = vld [vmem:[%s14185_s1 + $0x1348] ss:$16 sps:$4 sm:$0xff]   ;;  %v10190_v9 = vld [vmem:[%s14185_s1 + $0x1364] ss:$16 sps:$4 sm:$0xff]  }
 0x230   :  { %6667 = vmatprep.subr.bf16.mxu0 %v10098_v10  ;;  %7323 = vmatprep.subr.bf16.mxu1 %v10101_v12  ;;  %v10193_v10 = vld [vmem:[%s14185_s1 + $0x136c] ss:$16 sps:$4 sm:$0xff]   ;;  %v10188_v12 = vld [vmem:[%s14185_s1 + $0x1360] ss:$16 sps:$4 sm:$0xff]  }
 0x233   :  { %6668 = vmatpush1.bf16.msra.mxu0 %v10096_v13  ;;  %7324 = vmatpush1.bf16.msra.mxu1 %v10099_v15  ;;  %v10191_v13 = vld [vmem:[%s14185_s1 + $0x1368] ss:$16 sps:$4 sm:$0xff]   ;;  %v10196_v15 = vld [vmem:[%s14185_s1 + $0x1384] ss:$16 sps:$4 sm:$0xff]  }
 0x234   :  { %6669 = vmatprep.subr.bf16.mxu0 %v10104_v11  ;;  %7325 = vmatprep.subr.bf16.mxu1 %v10107_v17  ;;  %v10199_v11 = vld [vmem:[%s14185_s1 + $0x138c] ss:$16 sps:$4 sm:$0xff]   ;;  %v10194_v17 = vld [vmem:[%s14185_s1 + $0x1380] ss:$16 sps:$4 sm:$0xff]  }
 0x237   :  { %6670 = vmatpush1.bf16.msra.mxu0 %v10102_v14  ;;  %7326 = vmatpush1.bf16.msra.mxu1 %v10105_v19  ;;  %v10197_v14 = vld [vmem:[%s14185_s1 + $0x1388] ss:$16 sps:$4 sm:$0xff]   ;;  %v10202_v19 = vld [vmem:[%s14185_s1 + $0x13a4] ss:$16 sps:$4 sm:$0xff]  }
 0x238   :  { %6671 = vmatprep.subr.bf16.mxu0 %v10110_v20  ;;  %7327 = vmatprep.subr.bf16.mxu1 %v10113_v16  ;;  %v10205_v20 = vld [vmem:[%s14185_s1 + $0x13ac] ss:$16 sps:$4 sm:$0xff]   ;;  %v10200_v16 = vld [vmem:[%s14185_s1 + $0x13a0] ss:$16 sps:$4 sm:$0xff]  }
 0x23b   :  { %6672 = vmatpush1.bf16.msra.mxu0 %v10108_v22  ;;  %7328 = vmatpush1.bf16.msra.mxu1 %v10111_v23  ;;  %v10203_v22 = vld [vmem:[%s14185_s1 + $0x13a8] ss:$16 sps:$4 sm:$0xff]   ;;  %v10208_v23 = vld [vmem:[%s14185_s1 + $0x13c4] ss:$16 sps:$4 sm:$0xff]  }
 0x23c   :  { %6673 = vmatprep.subr.bf16.mxu0 %v10116_v18  ;;  %7329 = vmatprep.subr.bf16.mxu1 %v10119_v25  ;;  %v10211_v18 = vld [vmem:[%s14185_s1 + $0x13cc] ss:$16 sps:$4 sm:$0xff]   ;;  %v10206_v25 = vld [vmem:[%s14185_s1 + $0x13c0] ss:$16 sps:$4 sm:$0xff]  }
 0x23f   :  { %6674 = vmatpush1.bf16.msra.mxu0 %v10114_v26  ;;  %7330 = vmatpush1.bf16.msra.mxu1 %v10117_v21  ;;  %v10209_v26 = vld [vmem:[%s14185_s1 + $0x13c8] ss:$16 sps:$4 sm:$0xff]   ;;  %v10214_v21 = vld [vmem:[%s14185_s1 + $0x13e4] ss:$16 sps:$4 sm:$0xff]  }
 0x240   :  { %6684 = vmatprep.subr.bf16.mxu0 %v10124_v28  ;;  %7340 = vmatprep.subr.bf16.mxu1 %v10127_v29  ;;  %v10217_v28 = vld [vmem:[%s14185_s1 + $0x13ec] ss:$16 sps:$4 sm:$0xff]   ;;  %v10212_v29 = vld [vmem:[%s14185_s1 + $0x13e0] ss:$16 sps:$4 sm:$0xff]  }
 0x242   :  { %6676 = vmatmul.mubr.bf16.vlgmr.msra.gmra.mrb[0].mxu0 %v7999_v24  ;;  %7332 = vmatmul.mubr.bf16.vlgmr.msra.gmra.mrb[0].mxu1 %v7999_v24  ;;  %v10215_v24 = vld [vmem:[%s14185_s1 + $0x13e8] ss:$16 sps:$4 sm:$0xff]  }
 0x243   :  { %6685 = vmatpush1.bf16.msra.mxu0 %v10122_v31  ;;  %7341 = vmatpush1.bf16.msra.mxu1 %v10125_v32  ;;  %v10222_v31 = vld [vmem:[%s14185_s1 + $0x1404] ss:$16 sps:$4 sm:$0xff]   ;;  %v10225_v32 = vld [vmem:[%s14185_s1 + $0x140c] ss:$16 sps:$4 sm:$0xff]  }
 0x244   :  { %6686 = vmatprep.subr.bf16.mxu0 %v10130_v33  ;;  %7342 = vmatprep.subr.bf16.mxu1 %v10133_v27  ;;  %v8001_v33 = vcombine.low %v12680_v30, %v12680_v30  ;;  %v12883_v27 = vld [vmem:[%s14186_s0 + $0x50] sm:$0xff] }
 0x245   :  { %6716 = vmatprep.mubr.bf16.mxu0 %v8002_v34  ;;  %7372 = vmatprep.mubr.bf16.mxu1 %v8002_v34  ;;  %v10220_v34 = vld [vmem:[%s14185_s1 + $0x1400] ss:$16 sps:$4 sm:$0xff]   ;;  %v10228_v30 = vld [vmem:[%s14185_s1 + $0x1424] ss:$16 sps:$4 sm:$0xff]  }
 0x247   :  { %6687 = vmatpush1.bf16.msra.mxu0 %v10128_v35  ;;  %7343 = vmatpush1.bf16.msra.mxu1 %v10131_v36  ;;  %v10223_v35 = vld [vmem:[%s14185_s1 + $0x1408] ss:$16 sps:$4 sm:$0xff]   ;;  %v10231_v36 = vld [vmem:[%s14185_s1 + $0x142c] ss:$16 sps:$4 sm:$0xff]  }
 0x248   :  { %6688 = vmatprep.subr.bf16.mxu0 %v10136_v37  ;;  %7344 = vmatprep.subr.bf16.mxu1 %v10139_v38  ;;  %v8004_v37 = vcombine.high %v12883_v27, %v12883_v27  ;;  %v10226_v38 = vld [vmem:[%s14185_s1 + $0x1420] ss:$16 sps:$4 sm:$0xff]  }
 0x24b   :  { %6689 = vmatpush1.bf16.msra.mxu0 %v10134_v39  ;;  %7345 = vmatpush1.bf16.msra.mxu1 %v10137_v40  ;;  %v10229_v39 = vld [vmem:[%s14185_s1 + $0x1428] ss:$16 sps:$4 sm:$0xff]   ;;  %v10234_v40 = vld [vmem:[%s14185_s1 + $0x1444] ss:$16 sps:$4 sm:$0xff]  }
 0x24c   :  { %6690 = vmatprep.subr.bf16.mxu0 %v10142_v41  ;;  %7346 = vmatprep.subr.bf16.mxu1 %v10145_v42  ;;  %v10237_v41 = vld [vmem:[%s14185_s1 + $0x144c] ss:$16 sps:$4 sm:$0xff]   ;;  %v10232_v42 = vld [vmem:[%s14185_s1 + $0x1440] ss:$16 sps:$4 sm:$0xff]  }
 0x24f   :  { %6691 = vmatpush1.bf16.msra.mxu0 %v10140_v43  ;;  %7347 = vmatpush1.bf16.msra.mxu1 %v10143_v44  ;;  %v10235_v43 = vld [vmem:[%s14185_s1 + $0x1448] ss:$16 sps:$4 sm:$0xff]   ;;  %v10240_v44 = vld [vmem:[%s14185_s1 + $0x1464] ss:$16 sps:$4 sm:$0xff]  }
 0x250   :  { %6692 = vmatprep.subr.bf16.mxu0 %v10148_v45  ;;  %7348 = vmatprep.subr.bf16.mxu1 %v10151_v46  ;;  %v10243_v45 = vld [vmem:[%s14185_s1 + $0x146c] ss:$16 sps:$4 sm:$0xff]   ;;  %v10238_v46 = vld [vmem:[%s14185_s1 + $0x1460] ss:$16 sps:$4 sm:$0xff]  }
 0x253   :  { %6693 = vmatpush1.bf16.msra.mxu0 %v10146_v47  ;;  %7349 = vmatpush1.bf16.msra.mxu1 %v10149_v48  ;;  %v10241_v47 = vld [vmem:[%s14185_s1 + $0x1468] ss:$16 sps:$4 sm:$0xff]   ;;  %v10246_v48 = vld [vmem:[%s14185_s1 + $0x1484] ss:$16 sps:$4 sm:$0xff]  }
 0x254   :  { %6694 = vmatprep.subr.bf16.mxu0 %v10154_v49  ;;  %7350 = vmatprep.subr.bf16.mxu1 %v10157_v50  ;;  %v10249_v49 = vld [vmem:[%s14185_s1 + $0x148c] ss:$16 sps:$4 sm:$0xff]   ;;  %v10244_v50 = vld [vmem:[%s14185_s1 + $0x1480] ss:$16 sps:$4 sm:$0xff]  }
 0x257   :  { %6695 = vmatpush1.bf16.msra.mxu0 %v10152_v51  ;;  %7351 = vmatpush1.bf16.msra.mxu1 %v10155_v52  ;;  %v10247_v51 = vld [vmem:[%s14185_s1 + $0x1488] ss:$16 sps:$4 sm:$0xff]   ;;  %v10252_v52 = vld [vmem:[%s14185_s1 + $0x14a4] ss:$16 sps:$4 sm:$0xff]  }
 0x258   :  { %6696 = vmatprep.subr.bf16.mxu0 %v10160_v53  ;;  %7352 = vmatprep.subr.bf16.mxu1 %v10163_v54  ;;  %v10255_v53 = vld [vmem:[%s14185_s1 + $0x14ac] ss:$16 sps:$4 sm:$0xff]   ;;  %v10250_v54 = vld [vmem:[%s14185_s1 + $0x14a0] ss:$16 sps:$4 sm:$0xff]  }
 0x25b   :  { %6697 = vmatpush1.bf16.msra.mxu0 %v10158_v55  ;;  %7353 = vmatpush1.bf16.msra.mxu1 %v10161_v56  ;;  %v10253_v55 = vld [vmem:[%s14185_s1 + $0x14a8] ss:$16 sps:$4 sm:$0xff]   ;;  %v10258_v56 = vld [vmem:[%s14185_s1 + $0x14c4] ss:$16 sps:$4 sm:$0xff]  }
 0x25c   :  { %6698 = vmatprep.subr.bf16.mxu0 %v10166_v57  ;;  %7354 = vmatprep.subr.bf16.mxu1 %v10169_v58  ;;  %v10261_v57 = vld [vmem:[%s14185_s1 + $0x14cc] ss:$16 sps:$4 sm:$0xff]   ;;  %v10256_v58 = vld [vmem:[%s14185_s1 + $0x14c0] ss:$16 sps:$4 sm:$0xff]  }
 0x25f   :  { %6699 = vmatpush1.bf16.msra.mxu0 %v10164_v59  ;;  %7355 = vmatpush1.bf16.msra.mxu1 %v10167_v60  ;;  %v10259_v59 = vld [vmem:[%s14185_s1 + $0x14c8] ss:$16 sps:$4 sm:$0xff]   ;;  %v10264_v60 = vld [vmem:[%s14185_s1 + $0x14e4] ss:$16 sps:$4 sm:$0xff]  }
 0x260   :  { %6700 = vmatprep.subr.bf16.mxu0 %v10172_v61  ;;  %7356 = vmatprep.subr.bf16.mxu1 %v10175_v62  ;;  %v10267_v61 = vld [vmem:[%s14185_s1 + $0x14ec] ss:$16 sps:$4 sm:$0xff]   ;;  %v10262_v62 = vld [vmem:[%s14185_s1 + $0x14e0] ss:$16 sps:$4 sm:$0xff]  }
 0x263   :  { %6701 = vmatpush1.bf16.msra.mxu0 %v10170_v63  ;;  %7357 = vmatpush1.bf16.msra.mxu1 %v10173_v0  ;;  %v10265_v63 = vld [vmem:[%s14185_s1 + $0x14e8] ss:$16 sps:$4 sm:$0xff]   ;;  %v10270_v0 = vld [vmem:[%s14185_s1 + $0x1504] ss:$16 sps:$4 sm:$0xff]  }
 0x264   :  { %6702 = vmatprep.subr.bf16.mxu0 %v10178_v1  ;;  %7358 = vmatprep.subr.bf16.mxu1 %v10181_v2  ;;  %v10273_v1 = vld [vmem:[%s14185_s1 + $0x150c] ss:$16 sps:$4 sm:$0xff]   ;;  %v10268_v2 = vld [vmem:[%s14185_s1 + $0x1500] ss:$16 sps:$4 sm:$0xff]  }
 0x267   :  { %6703 = vmatpush1.bf16.msra.mxu0 %v10176_v3  ;;  %7359 = vmatpush1.bf16.msra.mxu1 %v10179_v4  ;;  %v10271_v3 = vld [vmem:[%s14185_s1 + $0x1508] ss:$16 sps:$4 sm:$0xff]   ;;  %v10276_v4 = vld [vmem:[%s14185_s1 + $0x1524] ss:$16 sps:$4 sm:$0xff]  }
 0x268   :  { %6704 = vmatprep.subr.bf16.mxu0 %v10184_v5  ;;  %7360 = vmatprep.subr.bf16.mxu1 %v10187_v6  ;;  %v10279_v5 = vld [vmem:[%s14185_s1 + $0x152c] ss:$16 sps:$4 sm:$0xff]   ;;  %v10274_v6 = vld [vmem:[%s14185_s1 + $0x1520] ss:$16 sps:$4 sm:$0xff]  }
 0x26b   :  { %6705 = vmatpush1.bf16.msra.mxu0 %v10182_v7  ;;  %7361 = vmatpush1.bf16.msra.mxu1 %v10185_v8  ;;  %v10277_v7 = vld [vmem:[%s14185_s1 + $0x1528] ss:$16 sps:$4 sm:$0xff]   ;;  %v10282_v8 = vld [vmem:[%s14185_s1 + $0x1544] ss:$16 sps:$4 sm:$0xff]  }
 0x26c   :  { %6706 = vmatprep.subr.bf16.mxu0 %v10190_v9  ;;  %7362 = vmatprep.subr.bf16.mxu1 %v10193_v10  ;;  %v10285_v9 = vld [vmem:[%s14185_s1 + $0x154c] ss:$16 sps:$4 sm:$0xff]   ;;  %v10280_v10 = vld [vmem:[%s14185_s1 + $0x1540] ss:$16 sps:$4 sm:$0xff]  }
 0x26f   :  { %6707 = vmatpush1.bf16.msra.mxu0 %v10188_v12  ;;  %7363 = vmatpush1.bf16.msra.mxu1 %v10191_v13  ;;  %v10283_v12 = vld [vmem:[%s14185_s1 + $0x1548] ss:$16 sps:$4 sm:$0xff]   ;;  %v10288_v13 = vld [vmem:[%s14185_s1 + $0x1564] ss:$16 sps:$4 sm:$0xff]  }
 0x270   :  { %6708 = vmatprep.subr.bf16.mxu0 %v10196_v15  ;;  %7364 = vmatprep.subr.bf16.mxu1 %v10199_v11  ;;  %v10291_v15 = vld [vmem:[%s14185_s1 + $0x156c] ss:$16 sps:$4 sm:$0xff]   ;;  %v10286_v11 = vld [vmem:[%s14185_s1 + $0x1560] ss:$16 sps:$4 sm:$0xff]  }
 0x273   :  { %6709 = vmatpush1.bf16.msra.mxu0 %v10194_v17  ;;  %7365 = vmatpush1.bf16.msra.mxu1 %v10197_v14  ;;  %v10289_v17 = vld [vmem:[%s14185_s1 + $0x1568] ss:$16 sps:$4 sm:$0xff]   ;;  %v10294_v14 = vld [vmem:[%s14185_s1 + $0x1584] ss:$16 sps:$4 sm:$0xff]  }
 0x274   :  { %6710 = vmatprep.subr.bf16.mxu0 %v10202_v19  ;;  %7366 = vmatprep.subr.bf16.mxu1 %v10205_v20  ;;  %v10297_v19 = vld [vmem:[%s14185_s1 + $0x158c] ss:$16 sps:$4 sm:$0xff]   ;;  %v10292_v20 = vld [vmem:[%s14185_s1 + $0x1580] ss:$16 sps:$4 sm:$0xff]  }
 0x277   :  { %6711 = vmatpush1.bf16.msra.mxu0 %v10200_v16  ;;  %7367 = vmatpush1.bf16.msra.mxu1 %v10203_v22  ;;  %v10295_v16 = vld [vmem:[%s14185_s1 + $0x1588] ss:$16 sps:$4 sm:$0xff]   ;;  %v10300_v22 = vld [vmem:[%s14185_s1 + $0x15a4] ss:$16 sps:$4 sm:$0xff]  }
 0x278   :  { %6712 = vmatprep.subr.bf16.mxu0 %v10208_v23  ;;  %7368 = vmatprep.subr.bf16.mxu1 %v10211_v18  ;;  %v10303_v23 = vld [vmem:[%s14185_s1 + $0x15ac] ss:$16 sps:$4 sm:$0xff]   ;;  %v10298_v18 = vld [vmem:[%s14185_s1 + $0x15a0] ss:$16 sps:$4 sm:$0xff]  }
 0x27b   :  { %6713 = vmatpush1.bf16.msra.mxu0 %v10206_v25  ;;  %7369 = vmatpush1.bf16.msra.mxu1 %v10209_v26  ;;  %v10301_v25 = vld [vmem:[%s14185_s1 + $0x15a8] ss:$16 sps:$4 sm:$0xff]   ;;  %v10306_v26 = vld [vmem:[%s14185_s1 + $0x15c4] ss:$16 sps:$4 sm:$0xff]  }
 0x27c   :  { %6714 = vmatprep.subr.bf16.mxu0 %v10214_v21  ;;  %7370 = vmatprep.subr.bf16.mxu1 %v10217_v28  ;;  %v10309_v21 = vld [vmem:[%s14185_s1 + $0x15cc] ss:$16 sps:$4 sm:$0xff]   ;;  %v10304_v28 = vld [vmem:[%s14185_s1 + $0x15c0] ss:$16 sps:$4 sm:$0xff]  }
 0x27f   :  { %6715 = vmatpush1.bf16.msra.mxu0 %v10212_v29  ;;  %7371 = vmatpush1.bf16.msra.mxu1 %v10215_v24  ;;  %v10307_v29 = vld [vmem:[%s14185_s1 + $0x15c8] ss:$16 sps:$4 sm:$0xff]   ;;  %v10312_v24 = vld [vmem:[%s14185_s1 + $0x15e4] ss:$16 sps:$4 sm:$0xff]  }
 0x280   :  { %6725 = vmatprep.subr.bf16.mxu0 %v10222_v31  ;;  %7381 = vmatprep.subr.bf16.mxu1 %v10225_v32  ;;  %v10315_v31 = vld [vmem:[%s14185_s1 + $0x15ec] ss:$16 sps:$4 sm:$0xff]   ;;  %v10310_v32 = vld [vmem:[%s14185_s1 + $0x15e0] ss:$16 sps:$4 sm:$0xff]  }
 0x282   :  { %6717 = vmatmul.mubr.bf16.vlgmr.msra.gmra.mrb[0].mxu0 %v8001_v33  ;;  %7373 = vmatmul.mubr.bf16.vlgmr.msra.gmra.mrb[0].mxu1 %v8001_v33  ;;  %v10313_v33 = vld [vmem:[%s14185_s1 + $0x15e8] ss:$16 sps:$4 sm:$0xff]  }
 0x283   :  { %6726 = vmatpush1.bf16.msra.mxu0 %v10220_v34  ;;  %7382 = vmatpush1.bf16.msra.mxu1 %v10223_v35  ;;  %v10320_v34 = vld [vmem:[%s14185_s1 + $0x1604] ss:$16 sps:$4 sm:$0xff]   ;;  %v10323_v35 = vld [vmem:[%s14185_s1 + $0x160c] ss:$16 sps:$4 sm:$0xff]  }
 0x284   :  { %6727 = vmatprep.subr.bf16.mxu0 %v10228_v30  ;;  %7383 = vmatprep.subr.bf16.mxu1 %v10231_v36  ;;  %v8003_v30 = vcombine.low %v12883_v27, %v12883_v27  ;;  %v13084_v36 = vld [vmem:[%s14186_s0 + $0x58] sm:$0xff]  ;;  %v10326_v27 = vld [vmem:[%s14185_s1 + $0x1624] ss:$16 sps:$4 sm:$0xff]  }
 0x285   :  { %6757 = vmatprep.mubr.bf16.mxu0 %v8004_v37  ;;  %7413 = vmatprep.mubr.bf16.mxu1 %v8004_v37  ;;  %v10318_v37 = vld [vmem:[%s14185_s1 + $0x1600] ss:$16 sps:$4 sm:$0xff]  }
 0x287   :  { %6728 = vmatpush1.bf16.msra.mxu0 %v10226_v38  ;;  %7384 = vmatpush1.bf16.msra.mxu1 %v10229_v39  ;;  %v10321_v38 = vld [vmem:[%s14185_s1 + $0x1608] ss:$16 sps:$4 sm:$0xff]   ;;  %v10329_v39 = vld [vmem:[%s14185_s1 + $0x162c] ss:$16 sps:$4 sm:$0xff]  }
 0x288   :  { %6729 = vmatprep.subr.bf16.mxu0 %v10234_v40  ;;  %7385 = vmatprep.subr.bf16.mxu1 %v10237_v41  ;;  %v8006_v40 = vcombine.high %v13084_v36, %v13084_v36  ;;  %v10324_v41 = vld [vmem:[%s14185_s1 + $0x1620] ss:$16 sps:$4 sm:$0xff]  }
 0x28b   :  { %6730 = vmatpush1.bf16.msra.mxu0 %v10232_v42  ;;  %7386 = vmatpush1.bf16.msra.mxu1 %v10235_v43  ;;  %v10327_v42 = vld [vmem:[%s14185_s1 + $0x1628] ss:$16 sps:$4 sm:$0xff]   ;;  %v10332_v43 = vld [vmem:[%s14185_s1 + $0x1644] ss:$16 sps:$4 sm:$0xff]  }
 0x28c   :  { %6731 = vmatprep.subr.bf16.mxu0 %v10240_v44  ;;  %7387 = vmatprep.subr.bf16.mxu1 %v10243_v45  ;;  %v10335_v44 = vld [vmem:[%s14185_s1 + $0x164c] ss:$16 sps:$4 sm:$0xff]   ;;  %v10330_v45 = vld [vmem:[%s14185_s1 + $0x1640] ss:$16 sps:$4 sm:$0xff]  }
 0x28f   :  { %6732 = vmatpush1.bf16.msra.mxu0 %v10238_v46  ;;  %7388 = vmatpush1.bf16.msra.mxu1 %v10241_v47  ;;  %v10333_v46 = vld [vmem:[%s14185_s1 + $0x1648] ss:$16 sps:$4 sm:$0xff]   ;;  %v10338_v47 = vld [vmem:[%s14185_s1 + $0x1664] ss:$16 sps:$4 sm:$0xff]  }
 0x290   :  { %6733 = vmatprep.subr.bf16.mxu0 %v10246_v48  ;;  %7389 = vmatprep.subr.bf16.mxu1 %v10249_v49  ;;  %v10341_v48 = vld [vmem:[%s14185_s1 + $0x166c] ss:$16 sps:$4 sm:$0xff]   ;;  %v10336_v49 = vld [vmem:[%s14185_s1 + $0x1660] ss:$16 sps:$4 sm:$0xff]  }
 0x293   :  { %6734 = vmatpush1.bf16.msra.mxu0 %v10244_v50  ;;  %7390 = vmatpush1.bf16.msra.mxu1 %v10247_v51  ;;  %v10339_v50 = vld [vmem:[%s14185_s1 + $0x1668] ss:$16 sps:$4 sm:$0xff]   ;;  %v10344_v51 = vld [vmem:[%s14185_s1 + $0x1684] ss:$16 sps:$4 sm:$0xff]  }
 0x294   :  { %6735 = vmatprep.subr.bf16.mxu0 %v10252_v52  ;;  %7391 = vmatprep.subr.bf16.mxu1 %v10255_v53  ;;  %v10347_v52 = vld [vmem:[%s14185_s1 + $0x168c] ss:$16 sps:$4 sm:$0xff]   ;;  %v10342_v53 = vld [vmem:[%s14185_s1 + $0x1680] ss:$16 sps:$4 sm:$0xff]  }
 0x297   :  { %6736 = vmatpush1.bf16.msra.mxu0 %v10250_v54  ;;  %7392 = vmatpush1.bf16.msra.mxu1 %v10253_v55  ;;  %v10345_v54 = vld [vmem:[%s14185_s1 + $0x1688] ss:$16 sps:$4 sm:$0xff]   ;;  %v10350_v55 = vld [vmem:[%s14185_s1 + $0x16a4] ss:$16 sps:$4 sm:$0xff]  }
 0x298   :  { %6737 = vmatprep.subr.bf16.mxu0 %v10258_v56  ;;  %7393 = vmatprep.subr.bf16.mxu1 %v10261_v57  ;;  %v10353_v56 = vld [vmem:[%s14185_s1 + $0x16ac] ss:$16 sps:$4 sm:$0xff]   ;;  %v10348_v57 = vld [vmem:[%s14185_s1 + $0x16a0] ss:$16 sps:$4 sm:$0xff]  }
 0x29b   :  { %6738 = vmatpush1.bf16.msra.mxu0 %v10256_v58  ;;  %7394 = vmatpush1.bf16.msra.mxu1 %v10259_v59  ;;  %v10351_v58 = vld [vmem:[%s14185_s1 + $0x16a8] ss:$16 sps:$4 sm:$0xff]   ;;  %v10356_v59 = vld [vmem:[%s14185_s1 + $0x16c4] ss:$16 sps:$4 sm:$0xff]  }
 0x29c   :  { %6739 = vmatprep.subr.bf16.mxu0 %v10264_v60  ;;  %7395 = vmatprep.subr.bf16.mxu1 %v10267_v61  ;;  %v10359_v60 = vld [vmem:[%s14185_s1 + $0x16cc] ss:$16 sps:$4 sm:$0xff]   ;;  %v10354_v61 = vld [vmem:[%s14185_s1 + $0x16c0] ss:$16 sps:$4 sm:$0xff]  }
 0x29f   :  { %6740 = vmatpush1.bf16.msra.mxu0 %v10262_v62  ;;  %7396 = vmatpush1.bf16.msra.mxu1 %v10265_v63  ;;  %v10357_v62 = vld [vmem:[%s14185_s1 + $0x16c8] ss:$16 sps:$4 sm:$0xff]   ;;  %v10362_v63 = vld [vmem:[%s14185_s1 + $0x16e4] ss:$16 sps:$4 sm:$0xff]  }
 0x2a0   :  { %6741 = vmatprep.subr.bf16.mxu0 %v10270_v0  ;;  %7397 = vmatprep.subr.bf16.mxu1 %v10273_v1  ;;  %v10365_v0 = vld [vmem:[%s14185_s1 + $0x16ec] ss:$16 sps:$4 sm:$0xff]   ;;  %v10360_v1 = vld [vmem:[%s14185_s1 + $0x16e0] ss:$16 sps:$4 sm:$0xff]  }
 0x2a3   :  { %6742 = vmatpush1.bf16.msra.mxu0 %v10268_v2  ;;  %7398 = vmatpush1.bf16.msra.mxu1 %v10271_v3  ;;  %v10363_v2 = vld [vmem:[%s14185_s1 + $0x16e8] ss:$16 sps:$4 sm:$0xff]   ;;  %v10368_v3 = vld [vmem:[%s14185_s1 + $0x1704] ss:$16 sps:$4 sm:$0xff]  }
 0x2a4   :  { %6743 = vmatprep.subr.bf16.mxu0 %v10276_v4  ;;  %7399 = vmatprep.subr.bf16.mxu1 %v10279_v5  ;;  %v10371_v4 = vld [vmem:[%s14185_s1 + $0x170c] ss:$16 sps:$4 sm:$0xff]   ;;  %v10366_v5 = vld [vmem:[%s14185_s1 + $0x1700] ss:$16 sps:$4 sm:$0xff]  }
 0x2a7   :  { %6744 = vmatpush1.bf16.msra.mxu0 %v10274_v6  ;;  %7400 = vmatpush1.bf16.msra.mxu1 %v10277_v7  ;;  %v10369_v6 = vld [vmem:[%s14185_s1 + $0x1708] ss:$16 sps:$4 sm:$0xff]   ;;  %v10374_v7 = vld [vmem:[%s14185_s1 + $0x1724] ss:$16 sps:$4 sm:$0xff]  }
 0x2a8   :  { %6745 = vmatprep.subr.bf16.mxu0 %v10282_v8  ;;  %7401 = vmatprep.subr.bf16.mxu1 %v10285_v9  ;;  %v10377_v8 = vld [vmem:[%s14185_s1 + $0x172c] ss:$16 sps:$4 sm:$0xff]   ;;  %v10372_v9 = vld [vmem:[%s14185_s1 + $0x1720] ss:$16 sps:$4 sm:$0xff]  }
 0x2ab   :  { %6746 = vmatpush1.bf16.msra.mxu0 %v10280_v10  ;;  %7402 = vmatpush1.bf16.msra.mxu1 %v10283_v12  ;;  %v10375_v10 = vld [vmem:[%s14185_s1 + $0x1728] ss:$16 sps:$4 sm:$0xff]   ;;  %v10380_v12 = vld [vmem:[%s14185_s1 + $0x1744] ss:$16 sps:$4 sm:$0xff]  }
 0x2ac   :  { %6747 = vmatprep.subr.bf16.mxu0 %v10288_v13  ;;  %7403 = vmatprep.subr.bf16.mxu1 %v10291_v15  ;;  %v10383_v13 = vld [vmem:[%s14185_s1 + $0x174c] ss:$16 sps:$4 sm:$0xff]   ;;  %v10378_v15 = vld [vmem:[%s14185_s1 + $0x1740] ss:$16 sps:$4 sm:$0xff]  }
 0x2af   :  { %6748 = vmatpush1.bf16.msra.mxu0 %v10286_v11  ;;  %7404 = vmatpush1.bf16.msra.mxu1 %v10289_v17  ;;  %v10381_v11 = vld [vmem:[%s14185_s1 + $0x1748] ss:$16 sps:$4 sm:$0xff]   ;;  %v10386_v17 = vld [vmem:[%s14185_s1 + $0x1764] ss:$16 sps:$4 sm:$0xff]  }
 0x2b0   :  { %6749 = vmatprep.subr.bf16.mxu0 %v10294_v14  ;;  %7405 = vmatprep.subr.bf16.mxu1 %v10297_v19  ;;  %v10389_v14 = vld [vmem:[%s14185_s1 + $0x176c] ss:$16 sps:$4 sm:$0xff]   ;;  %v10384_v19 = vld [vmem:[%s14185_s1 + $0x1760] ss:$16 sps:$4 sm:$0xff]  }
 0x2b3   :  { %6750 = vmatpush1.bf16.msra.mxu0 %v10292_v20  ;;  %7406 = vmatpush1.bf16.msra.mxu1 %v10295_v16  ;;  %v10387_v20 = vld [vmem:[%s14185_s1 + $0x1768] ss:$16 sps:$4 sm:$0xff]   ;;  %v10392_v16 = vld [vmem:[%s14185_s1 + $0x1784] ss:$16 sps:$4 sm:$0xff]  }
 0x2b4   :  { %6751 = vmatprep.subr.bf16.mxu0 %v10300_v22  ;;  %7407 = vmatprep.subr.bf16.mxu1 %v10303_v23  ;;  %v10395_v22 = vld [vmem:[%s14185_s1 + $0x178c] ss:$16 sps:$4 sm:$0xff]   ;;  %v10390_v23 = vld [vmem:[%s14185_s1 + $0x1780] ss:$16 sps:$4 sm:$0xff]  }
 0x2b7   :  { %6752 = vmatpush1.bf16.msra.mxu0 %v10298_v18  ;;  %7408 = vmatpush1.bf16.msra.mxu1 %v10301_v25  ;;  %v10393_v18 = vld [vmem:[%s14185_s1 + $0x1788] ss:$16 sps:$4 sm:$0xff]   ;;  %v10398_v25 = vld [vmem:[%s14185_s1 + $0x17a4] ss:$16 sps:$4 sm:$0xff]  }
 0x2b8   :  { %6753 = vmatprep.subr.bf16.mxu0 %v10306_v26  ;;  %7409 = vmatprep.subr.bf16.mxu1 %v10309_v21  ;;  %v10401_v26 = vld [vmem:[%s14185_s1 + $0x17ac] ss:$16 sps:$4 sm:$0xff]   ;;  %v10396_v21 = vld [vmem:[%s14185_s1 + $0x17a0] ss:$16 sps:$4 sm:$0xff]  }
 0x2bb   :  { %6754 = vmatpush1.bf16.msra.mxu0 %v10304_v28  ;;  %7410 = vmatpush1.bf16.msra.mxu1 %v10307_v29  ;;  %v10399_v28 = vld [vmem:[%s14185_s1 + $0x17a8] ss:$16 sps:$4 sm:$0xff]   ;;  %v10404_v29 = vld [vmem:[%s14185_s1 + $0x17c4] ss:$16 sps:$4 sm:$0xff]  }
 0x2bc   :  { %6755 = vmatprep.subr.bf16.mxu0 %v10312_v24  ;;  %7411 = vmatprep.subr.bf16.mxu1 %v10315_v31  ;;  %v10407_v24 = vld [vmem:[%s14185_s1 + $0x17cc] ss:$16 sps:$4 sm:$0xff]   ;;  %v10402_v31 = vld [vmem:[%s14185_s1 + $0x17c0] ss:$16 sps:$4 sm:$0xff]  }
 0x2bf   :  { %6756 = vmatpush1.bf16.msra.mxu0 %v10310_v32  ;;  %7412 = vmatpush1.bf16.msra.mxu1 %v10313_v33  ;;  %v10405_v32 = vld [vmem:[%s14185_s1 + $0x17c8] ss:$16 sps:$4 sm:$0xff]   ;;  %v10410_v33 = vld [vmem:[%s14185_s1 + $0x17e4] ss:$16 sps:$4 sm:$0xff]  }
 0x2c0   :  { %6766 = vmatprep.subr.bf16.mxu0 %v10320_v34  ;;  %7422 = vmatprep.subr.bf16.mxu1 %v10323_v35  ;;  %v10413_v34 = vld [vmem:[%s14185_s1 + $0x17ec] ss:$16 sps:$4 sm:$0xff]   ;;  %v10408_v35 = vld [vmem:[%s14185_s1 + $0x17e0] ss:$16 sps:$4 sm:$0xff]  }
 0x2c2   :  { %6758 = vmatmul.mubr.bf16.vlgmr.msra.gmra.mrb[0].mxu0 %v8003_v30  ;;  %7414 = vmatmul.mubr.bf16.vlgmr.msra.gmra.mrb[0].mxu1 %v8003_v30  ;;  %v10411_v30 = vld [vmem:[%s14185_s1 + $0x17e8] ss:$16 sps:$4 sm:$0xff]  }
 0x2c3   :  { %6767 = vmatpush1.bf16.msra.mxu0 %v10318_v37  ;;  %7423 = vmatpush1.bf16.msra.mxu1 %v10321_v38  ;;  %v10418_v37 = vld [vmem:[%s14185_s1 + $0x1804] ss:$16 sps:$4 sm:$0xff]   ;;  %v10421_v38 = vld [vmem:[%s14185_s1 + $0x180c] ss:$16 sps:$4 sm:$0xff]  }
 0x2c4   :  { %6768 = vmatprep.subr.bf16.mxu0 %v10326_v27  ;;  %7424 = vmatprep.subr.bf16.mxu1 %v10329_v39  ;;  %v8005_v27 = vcombine.low %v13084_v36, %v13084_v36  ;;  %v13285_v39 = vld [vmem:[%s14186_s0 + $0x60] sm:$0xff] }
 0x2c5   :  { %6798 = vmatprep.mubr.bf16.mxu0 %v8006_v40  ;;  %7454 = vmatprep.mubr.bf16.mxu1 %v8006_v40  ;;  %v10416_v40 = vld [vmem:[%s14185_s1 + $0x1800] ss:$16 sps:$4 sm:$0xff]   ;;  %v10424_v36 = vld [vmem:[%s14185_s1 + $0x1824] ss:$16 sps:$4 sm:$0xff]  }
 0x2c7   :  { %6769 = vmatpush1.bf16.msra.mxu0 %v10324_v41  ;;  %7425 = vmatpush1.bf16.msra.mxu1 %v10327_v42  ;;  %v10419_v41 = vld [vmem:[%s14185_s1 + $0x1808] ss:$16 sps:$4 sm:$0xff]   ;;  %v10427_v42 = vld [vmem:[%s14185_s1 + $0x182c] ss:$16 sps:$4 sm:$0xff]  }
 0x2c8   :  { %6770 = vmatprep.subr.bf16.mxu0 %v10332_v43  ;;  %7426 = vmatprep.subr.bf16.mxu1 %v10335_v44  ;;  %v8008_v43 = vcombine.high %v13285_v39, %v13285_v39  ;;  %v10422_v44 = vld [vmem:[%s14185_s1 + $0x1820] ss:$16 sps:$4 sm:$0xff]  }
 0x2cb   :  { %6771 = vmatpush1.bf16.msra.mxu0 %v10330_v45  ;;  %7427 = vmatpush1.bf16.msra.mxu1 %v10333_v46  ;;  %v10425_v45 = vld [vmem:[%s14185_s1 + $0x1828] ss:$16 sps:$4 sm:$0xff]   ;;  %v10430_v46 = vld [vmem:[%s14185_s1 + $0x1844] ss:$16 sps:$4 sm:$0xff]  }
 0x2cc   :  { %6772 = vmatprep.subr.bf16.mxu0 %v10338_v47  ;;  %7428 = vmatprep.subr.bf16.mxu1 %v10341_v48  ;;  %v10433_v47 = vld [vmem:[%s14185_s1 + $0x184c] ss:$16 sps:$4 sm:$0xff]   ;;  %v10428_v48 = vld [vmem:[%s14185_s1 + $0x1840] ss:$16 sps:$4 sm:$0xff]  }
 0x2cf   :  { %6773 = vmatpush1.bf16.msra.mxu0 %v10336_v49  ;;  %7429 = vmatpush1.bf16.msra.mxu1 %v10339_v50  ;;  %v10431_v49 = vld [vmem:[%s14185_s1 + $0x1848] ss:$16 sps:$4 sm:$0xff]   ;;  %v10436_v50 = vld [vmem:[%s14185_s1 + $0x1864] ss:$16 sps:$4 sm:$0xff]  }
 0x2d0   :  { %6774 = vmatprep.subr.bf16.mxu0 %v10344_v51  ;;  %7430 = vmatprep.subr.bf16.mxu1 %v10347_v52  ;;  %v10439_v51 = vld [vmem:[%s14185_s1 + $0x186c] ss:$16 sps:$4 sm:$0xff]   ;;  %v10434_v52 = vld [vmem:[%s14185_s1 + $0x1860] ss:$16 sps:$4 sm:$0xff]  }
 0x2d3   :  { %6775 = vmatpush1.bf16.msra.mxu0 %v10342_v53  ;;  %7431 = vmatpush1.bf16.msra.mxu1 %v10345_v54  ;;  %v10437_v53 = vld [vmem:[%s14185_s1 + $0x1868] ss:$16 sps:$4 sm:$0xff]   ;;  %v10442_v54 = vld [vmem:[%s14185_s1 + $0x1884] ss:$16 sps:$4 sm:$0xff]  }
 0x2d4   :  { %6776 = vmatprep.subr.bf16.mxu0 %v10350_v55  ;;  %7432 = vmatprep.subr.bf16.mxu1 %v10353_v56  ;;  %v10445_v55 = vld [vmem:[%s14185_s1 + $0x188c] ss:$16 sps:$4 sm:$0xff]   ;;  %v10440_v56 = vld [vmem:[%s14185_s1 + $0x1880] ss:$16 sps:$4 sm:$0xff]  }
 0x2d7   :  { %6777 = vmatpush1.bf16.msra.mxu0 %v10348_v57  ;;  %7433 = vmatpush1.bf16.msra.mxu1 %v10351_v58  ;;  %v10443_v57 = vld [vmem:[%s14185_s1 + $0x1888] ss:$16 sps:$4 sm:$0xff]   ;;  %v10448_v58 = vld [vmem:[%s14185_s1 + $0x18a4] ss:$16 sps:$4 sm:$0xff]  }
 0x2d8   :  { %6778 = vmatprep.subr.bf16.mxu0 %v10356_v59  ;;  %7434 = vmatprep.subr.bf16.mxu1 %v10359_v60  ;;  %v10451_v59 = vld [vmem:[%s14185_s1 + $0x18ac] ss:$16 sps:$4 sm:$0xff]   ;;  %v10446_v60 = vld [vmem:[%s14185_s1 + $0x18a0] ss:$16 sps:$4 sm:$0xff]  }
 0x2db   :  { %6779 = vmatpush1.bf16.msra.mxu0 %v10354_v61  ;;  %7435 = vmatpush1.bf16.msra.mxu1 %v10357_v62  ;;  %v10449_v61 = vld [vmem:[%s14185_s1 + $0x18a8] ss:$16 sps:$4 sm:$0xff]   ;;  %v10454_v62 = vld [vmem:[%s14185_s1 + $0x18c4] ss:$16 sps:$4 sm:$0xff]  }
 0x2dc   :  { %6780 = vmatprep.subr.bf16.mxu0 %v10362_v63  ;;  %7436 = vmatprep.subr.bf16.mxu1 %v10365_v0  ;;  %v10457_v63 = vld [vmem:[%s14185_s1 + $0x18cc] ss:$16 sps:$4 sm:$0xff]   ;;  %v10452_v0 = vld [vmem:[%s14185_s1 + $0x18c0] ss:$16 sps:$4 sm:$0xff]  }
 0x2df   :  { %6781 = vmatpush1.bf16.msra.mxu0 %v10360_v1  ;;  %7437 = vmatpush1.bf16.msra.mxu1 %v10363_v2  ;;  %v10455_v1 = vld [vmem:[%s14185_s1 + $0x18c8] ss:$16 sps:$4 sm:$0xff]   ;;  %v10460_v2 = vld [vmem:[%s14185_s1 + $0x18e4] ss:$16 sps:$4 sm:$0xff]  }
 0x2e0   :  { %6782 = vmatprep.subr.bf16.mxu0 %v10368_v3  ;;  %7438 = vmatprep.subr.bf16.mxu1 %v10371_v4  ;;  %v10463_v3 = vld [vmem:[%s14185_s1 + $0x18ec] ss:$16 sps:$4 sm:$0xff]   ;;  %v10458_v4 = vld [vmem:[%s14185_s1 + $0x18e0] ss:$16 sps:$4 sm:$0xff]  }
 0x2e3   :  { %6783 = vmatpush1.bf16.msra.mxu0 %v10366_v5  ;;  %7439 = vmatpush1.bf16.msra.mxu1 %v10369_v6  ;;  %v10461_v5 = vld [vmem:[%s14185_s1 + $0x18e8] ss:$16 sps:$4 sm:$0xff]   ;;  %v10466_v6 = vld [vmem:[%s14185_s1 + $0x1904] ss:$16 sps:$4 sm:$0xff]  }
 0x2e4   :  { %6784 = vmatprep.subr.bf16.mxu0 %v10374_v7  ;;  %7440 = vmatprep.subr.bf16.mxu1 %v10377_v8  ;;  %v10469_v7 = vld [vmem:[%s14185_s1 + $0x190c] ss:$16 sps:$4 sm:$0xff]   ;;  %v10464_v8 = vld [vmem:[%s14185_s1 + $0x1900] ss:$16 sps:$4 sm:$0xff]  }
 0x2e7   :  { %6785 = vmatpush1.bf16.msra.mxu0 %v10372_v9  ;;  %7441 = vmatpush1.bf16.msra.mxu1 %v10375_v10  ;;  %v10467_v9 = vld [vmem:[%s14185_s1 + $0x1908] ss:$16 sps:$4 sm:$0xff]   ;;  %v10472_v10 = vld [vmem:[%s14185_s1 + $0x1924] ss:$16 sps:$4 sm:$0xff]  }
 0x2e8   :  { %6786 = vmatprep.subr.bf16.mxu0 %v10380_v12  ;;  %7442 = vmatprep.subr.bf16.mxu1 %v10383_v13  ;;  %v10475_v12 = vld [vmem:[%s14185_s1 + $0x192c] ss:$16 sps:$4 sm:$0xff]   ;;  %v10470_v13 = vld [vmem:[%s14185_s1 + $0x1920] ss:$16 sps:$4 sm:$0xff]  }
 0x2eb   :  { %6787 = vmatpush1.bf16.msra.mxu0 %v10378_v15  ;;  %7443 = vmatpush1.bf16.msra.mxu1 %v10381_v11  ;;  %v10473_v15 = vld [vmem:[%s14185_s1 + $0x1928] ss:$16 sps:$4 sm:$0xff]   ;;  %v10478_v11 = vld [vmem:[%s14185_s1 + $0x1944] ss:$16 sps:$4 sm:$0xff]  }
 0x2ec   :  { %6788 = vmatprep.subr.bf16.mxu0 %v10386_v17  ;;  %7444 = vmatprep.subr.bf16.mxu1 %v10389_v14  ;;  %v10481_v17 = vld [vmem:[%s14185_s1 + $0x194c] ss:$16 sps:$4 sm:$0xff]   ;;  %v10476_v14 = vld [vmem:[%s14185_s1 + $0x1940] ss:$16 sps:$4 sm:$0xff]  }
 0x2ef   :  { %6789 = vmatpush1.bf16.msra.mxu0 %v10384_v19  ;;  %7445 = vmatpush1.bf16.msra.mxu1 %v10387_v20  ;;  %v10479_v19 = vld [vmem:[%s14185_s1 + $0x1948] ss:$16 sps:$4 sm:$0xff]   ;;  %v10484_v20 = vld [vmem:[%s14185_s1 + $0x1964] ss:$16 sps:$4 sm:$0xff]  }
 0x2f0   :  { %6790 = vmatprep.subr.bf16.mxu0 %v10392_v16  ;;  %7446 = vmatprep.subr.bf16.mxu1 %v10395_v22  ;;  %v10487_v16 = vld [vmem:[%s14185_s1 + $0x196c] ss:$16 sps:$4 sm:$0xff]   ;;  %v10482_v22 = vld [vmem:[%s14185_s1 + $0x1960] ss:$16 sps:$4 sm:$0xff]  }
 0x2f3   :  { %6791 = vmatpush1.bf16.msra.mxu0 %v10390_v23  ;;  %7447 = vmatpush1.bf16.msra.mxu1 %v10393_v18  ;;  %v10485_v23 = vld [vmem:[%s14185_s1 + $0x1968] ss:$16 sps:$4 sm:$0xff]   ;;  %v10490_v18 = vld [vmem:[%s14185_s1 + $0x1984] ss:$16 sps:$4 sm:$0xff]  }
 0x2f4   :  { %6792 = vmatprep.subr.bf16.mxu0 %v10398_v25  ;;  %7448 = vmatprep.subr.bf16.mxu1 %v10401_v26  ;;  %v10493_v25 = vld [vmem:[%s14185_s1 + $0x198c] ss:$16 sps:$4 sm:$0xff]   ;;  %v10488_v26 = vld [vmem:[%s14185_s1 + $0x1980] ss:$16 sps:$4 sm:$0xff]  }
 0x2f7   :  { %6793 = vmatpush1.bf16.msra.mxu0 %v10396_v21  ;;  %7449 = vmatpush1.bf16.msra.mxu1 %v10399_v28  ;;  %v10491_v21 = vld [vmem:[%s14185_s1 + $0x1988] ss:$16 sps:$4 sm:$0xff]   ;;  %v10496_v28 = vld [vmem:[%s14185_s1 + $0x19a4] ss:$16 sps:$4 sm:$0xff]  }
 0x2f8   :  { %6794 = vmatprep.subr.bf16.mxu0 %v10404_v29  ;;  %7450 = vmatprep.subr.bf16.mxu1 %v10407_v24  ;;  %v10499_v29 = vld [vmem:[%s14185_s1 + $0x19ac] ss:$16 sps:$4 sm:$0xff]   ;;  %v10494_v24 = vld [vmem:[%s14185_s1 + $0x19a0] ss:$16 sps:$4 sm:$0xff]  }
 0x2fb   :  { %6795 = vmatpush1.bf16.msra.mxu0 %v10402_v31  ;;  %7451 = vmatpush1.bf16.msra.mxu1 %v10405_v32  ;;  %v10497_v31 = vld [vmem:[%s14185_s1 + $0x19a8] ss:$16 sps:$4 sm:$0xff]   ;;  %v10502_v32 = vld [vmem:[%s14185_s1 + $0x19c4] ss:$16 sps:$4 sm:$0xff]  }
 0x2fc   :  { %6796 = vmatprep.subr.bf16.mxu0 %v10410_v33  ;;  %7452 = vmatprep.subr.bf16.mxu1 %v10413_v34  ;;  %v10505_v33 = vld [vmem:[%s14185_s1 + $0x19cc] ss:$16 sps:$4 sm:$0xff]   ;;  %v10500_v34 = vld [vmem:[%s14185_s1 + $0x19c0] ss:$16 sps:$4 sm:$0xff]  }
 0x2ff   :  { %6797 = vmatpush1.bf16.msra.mxu0 %v10408_v35  ;;  %7453 = vmatpush1.bf16.msra.mxu1 %v10411_v30  ;;  %v10503_v35 = vld [vmem:[%s14185_s1 + $0x19c8] ss:$16 sps:$4 sm:$0xff]   ;;  %v10508_v30 = vld [vmem:[%s14185_s1 + $0x19e4] ss:$16 sps:$4 sm:$0xff]  }
 0x300   :  { %6807 = vmatprep.subr.bf16.mxu0 %v10418_v37  ;;  %7463 = vmatprep.subr.bf16.mxu1 %v10421_v38  ;;  %v10511_v37 = vld [vmem:[%s14185_s1 + $0x19ec] ss:$16 sps:$4 sm:$0xff]   ;;  %v10506_v38 = vld [vmem:[%s14185_s1 + $0x19e0] ss:$16 sps:$4 sm:$0xff]  }
 0x302   :  { %6799 = vmatmul.mubr.bf16.vlgmr.msra.gmra.mrb[0].mxu0 %v8005_v27  ;;  %7455 = vmatmul.mubr.bf16.vlgmr.msra.gmra.mrb[0].mxu1 %v8005_v27  ;;  %v10509_v27 = vld [vmem:[%s14185_s1 + $0x19e8] ss:$16 sps:$4 sm:$0xff]  }
 0x303   :  { %6808 = vmatpush1.bf16.msra.mxu0 %v10416_v40  ;;  %7464 = vmatpush1.bf16.msra.mxu1 %v10419_v41  ;;  %v10516_v40 = vld [vmem:[%s14185_s1 + $0x1a04] ss:$16 sps:$4 sm:$0xff]   ;;  %v10519_v41 = vld [vmem:[%s14185_s1 + $0x1a0c] ss:$16 sps:$4 sm:$0xff]  }
 0x304   :  { %6809 = vmatprep.subr.bf16.mxu0 %v10424_v36  ;;  %7465 = vmatprep.subr.bf16.mxu1 %v10427_v42  ;;  %v8007_v36 = vcombine.low %v13285_v39, %v13285_v39  ;;  %v13486_v42 = vld [vmem:[%s14186_s0 + $0x68] sm:$0xff]  ;;  %v10522_v39 = vld [vmem:[%s14185_s1 + $0x1a24] ss:$16 sps:$4 sm:$0xff]  }
 0x305   :  { %6839 = vmatprep.mubr.bf16.mxu0 %v8008_v43  ;;  %7495 = vmatprep.mubr.bf16.mxu1 %v8008_v43  ;;  %v10514_v43 = vld [vmem:[%s14185_s1 + $0x1a00] ss:$16 sps:$4 sm:$0xff]  }
 0x307   :  { %6810 = vmatpush1.bf16.msra.mxu0 %v10422_v44  ;;  %7466 = vmatpush1.bf16.msra.mxu1 %v10425_v45  ;;  %v10517_v44 = vld [vmem:[%s14185_s1 + $0x1a08] ss:$16 sps:$4 sm:$0xff]   ;;  %v10525_v45 = vld [vmem:[%s14185_s1 + $0x1a2c] ss:$16 sps:$4 sm:$0xff]  }
 0x308   :  { %6811 = vmatprep.subr.bf16.mxu0 %v10430_v46  ;;  %7467 = vmatprep.subr.bf16.mxu1 %v10433_v47  ;;  %v8010_v46 = vcombine.high %v13486_v42, %v13486_v42  ;;  %v10520_v47 = vld [vmem:[%s14185_s1 + $0x1a20] ss:$16 sps:$4 sm:$0xff]  }
 0x30b   :  { %6812 = vmatpush1.bf16.msra.mxu0 %v10428_v48  ;;  %7468 = vmatpush1.bf16.msra.mxu1 %v10431_v49  ;;  %v10523_v48 = vld [vmem:[%s14185_s1 + $0x1a28] ss:$16 sps:$4 sm:$0xff]   ;;  %v10528_v49 = vld [vmem:[%s14185_s1 + $0x1a44] ss:$16 sps:$4 sm:$0xff]  }
 0x30c   :  { %6813 = vmatprep.subr.bf16.mxu0 %v10436_v50  ;;  %7469 = vmatprep.subr.bf16.mxu1 %v10439_v51  ;;  %v10531_v50 = vld [vmem:[%s14185_s1 + $0x1a4c] ss:$16 sps:$4 sm:$0xff]   ;;  %v10526_v51 = vld [vmem:[%s14185_s1 + $0x1a40] ss:$16 sps:$4 sm:$0xff]  }
 0x30f   :  { %6814 = vmatpush1.bf16.msra.mxu0 %v10434_v52  ;;  %7470 = vmatpush1.bf16.msra.mxu1 %v10437_v53  ;;  %v10529_v52 = vld [vmem:[%s14185_s1 + $0x1a48] ss:$16 sps:$4 sm:$0xff]   ;;  %v10534_v53 = vld [vmem:[%s14185_s1 + $0x1a64] ss:$16 sps:$4 sm:$0xff]  }
 0x310   :  { %6815 = vmatprep.subr.bf16.mxu0 %v10442_v54  ;;  %7471 = vmatprep.subr.bf16.mxu1 %v10445_v55  ;;  %v10537_v54 = vld [vmem:[%s14185_s1 + $0x1a6c] ss:$16 sps:$4 sm:$0xff]   ;;  %v10532_v55 = vld [vmem:[%s14185_s1 + $0x1a60] ss:$16 sps:$4 sm:$0xff]  }
 0x313   :  { %6816 = vmatpush1.bf16.msra.mxu0 %v10440_v56  ;;  %7472 = vmatpush1.bf16.msra.mxu1 %v10443_v57  ;;  %v10535_v56 = vld [vmem:[%s14185_s1 + $0x1a68] ss:$16 sps:$4 sm:$0xff]   ;;  %v10540_v57 = vld [vmem:[%s14185_s1 + $0x1a84] ss:$16 sps:$4 sm:$0xff]  }
 0x314   :  { %6817 = vmatprep.subr.bf16.mxu0 %v10448_v58  ;;  %7473 = vmatprep.subr.bf16.mxu1 %v10451_v59  ;;  %v10543_v58 = vld [vmem:[%s14185_s1 + $0x1a8c] ss:$16 sps:$4 sm:$0xff]   ;;  %v10538_v59 = vld [vmem:[%s14185_s1 + $0x1a80] ss:$16 sps:$4 sm:$0xff]  }
 0x317   :  { %6818 = vmatpush1.bf16.msra.mxu0 %v10446_v60  ;;  %7474 = vmatpush1.bf16.msra.mxu1 %v10449_v61  ;;  %v10541_v60 = vld [vmem:[%s14185_s1 + $0x1a88] ss:$16 sps:$4 sm:$0xff]   ;;  %v10546_v61 = vld [vmem:[%s14185_s1 + $0x1aa4] ss:$16 sps:$4 sm:$0xff]  }
 0x318   :  { %6819 = vmatprep.subr.bf16.mxu0 %v10454_v62  ;;  %7475 = vmatprep.subr.bf16.mxu1 %v10457_v63  ;;  %v10549_v62 = vld [vmem:[%s14185_s1 + $0x1aac] ss:$16 sps:$4 sm:$0xff]   ;;  %v10544_v63 = vld [vmem:[%s14185_s1 + $0x1aa0] ss:$16 sps:$4 sm:$0xff]  }
 0x31b   :  { %6820 = vmatpush1.bf16.msra.mxu0 %v10452_v0  ;;  %7476 = vmatpush1.bf16.msra.mxu1 %v10455_v1  ;;  %v10547_v0 = vld [vmem:[%s14185_s1 + $0x1aa8] ss:$16 sps:$4 sm:$0xff]   ;;  %v10552_v1 = vld [vmem:[%s14185_s1 + $0x1ac4] ss:$16 sps:$4 sm:$0xff]  }
 0x31c   :  { %6821 = vmatprep.subr.bf16.mxu0 %v10460_v2  ;;  %7477 = vmatprep.subr.bf16.mxu1 %v10463_v3  ;;  %v10555_v2 = vld [vmem:[%s14185_s1 + $0x1acc] ss:$16 sps:$4 sm:$0xff]   ;;  %v10550_v3 = vld [vmem:[%s14185_s1 + $0x1ac0] ss:$16 sps:$4 sm:$0xff]  }
 0x31f   :  { %6822 = vmatpush1.bf16.msra.mxu0 %v10458_v4  ;;  %7478 = vmatpush1.bf16.msra.mxu1 %v10461_v5  ;;  %v10553_v4 = vld [vmem:[%s14185_s1 + $0x1ac8] ss:$16 sps:$4 sm:$0xff]   ;;  %v10558_v5 = vld [vmem:[%s14185_s1 + $0x1ae4] ss:$16 sps:$4 sm:$0xff]  }
 0x320   :  { %6823 = vmatprep.subr.bf16.mxu0 %v10466_v6  ;;  %7479 = vmatprep.subr.bf16.mxu1 %v10469_v7  ;;  %v10561_v6 = vld [vmem:[%s14185_s1 + $0x1aec] ss:$16 sps:$4 sm:$0xff]   ;;  %v10556_v7 = vld [vmem:[%s14185_s1 + $0x1ae0] ss:$16 sps:$4 sm:$0xff]  }
 0x323   :  { %6824 = vmatpush1.bf16.msra.mxu0 %v10464_v8  ;;  %7480 = vmatpush1.bf16.msra.mxu1 %v10467_v9  ;;  %v10559_v8 = vld [vmem:[%s14185_s1 + $0x1ae8] ss:$16 sps:$4 sm:$0xff]   ;;  %v10564_v9 = vld [vmem:[%s14185_s1 + $0x1b04] ss:$16 sps:$4 sm:$0xff]  }
 0x324   :  { %6825 = vmatprep.subr.bf16.mxu0 %v10472_v10  ;;  %7481 = vmatprep.subr.bf16.mxu1 %v10475_v12  ;;  %v10567_v10 = vld [vmem:[%s14185_s1 + $0x1b0c] ss:$16 sps:$4 sm:$0xff]   ;;  %v10562_v12 = vld [vmem:[%s14185_s1 + $0x1b00] ss:$16 sps:$4 sm:$0xff]  }
 0x327   :  { %6826 = vmatpush1.bf16.msra.mxu0 %v10470_v13  ;;  %7482 = vmatpush1.bf16.msra.mxu1 %v10473_v15  ;;  %v10565_v13 = vld [vmem:[%s14185_s1 + $0x1b08] ss:$16 sps:$4 sm:$0xff]   ;;  %v10570_v15 = vld [vmem:[%s14185_s1 + $0x1b24] ss:$16 sps:$4 sm:$0xff]  }
 0x328   :  { %6827 = vmatprep.subr.bf16.mxu0 %v10478_v11  ;;  %7483 = vmatprep.subr.bf16.mxu1 %v10481_v17  ;;  %v10573_v11 = vld [vmem:[%s14185_s1 + $0x1b2c] ss:$16 sps:$4 sm:$0xff]   ;;  %v10568_v17 = vld [vmem:[%s14185_s1 + $0x1b20] ss:$16 sps:$4 sm:$0xff]  }
 0x32b   :  { %6828 = vmatpush1.bf16.msra.mxu0 %v10476_v14  ;;  %7484 = vmatpush1.bf16.msra.mxu1 %v10479_v19  ;;  %v10571_v14 = vld [vmem:[%s14185_s1 + $0x1b28] ss:$16 sps:$4 sm:$0xff]   ;;  %v10576_v19 = vld [vmem:[%s14185_s1 + $0x1b44] ss:$16 sps:$4 sm:$0xff]  }
 0x32c   :  { %6829 = vmatprep.subr.bf16.mxu0 %v10484_v20  ;;  %7485 = vmatprep.subr.bf16.mxu1 %v10487_v16  ;;  %v10579_v20 = vld [vmem:[%s14185_s1 + $0x1b4c] ss:$16 sps:$4 sm:$0xff]   ;;  %v10574_v16 = vld [vmem:[%s14185_s1 + $0x1b40] ss:$16 sps:$4 sm:$0xff]  }
 0x32f   :  { %6830 = vmatpush1.bf16.msra.mxu0 %v10482_v22  ;;  %7486 = vmatpush1.bf16.msra.mxu1 %v10485_v23  ;;  %v10577_v22 = vld [vmem:[%s14185_s1 + $0x1b48] ss:$16 sps:$4 sm:$0xff]   ;;  %v10582_v23 = vld [vmem:[%s14185_s1 + $0x1b64] ss:$16 sps:$4 sm:$0xff]  }
 0x330   :  { %6831 = vmatprep.subr.bf16.mxu0 %v10490_v18  ;;  %7487 = vmatprep.subr.bf16.mxu1 %v10493_v25  ;;  %v10585_v18 = vld [vmem:[%s14185_s1 + $0x1b6c] ss:$16 sps:$4 sm:$0xff]   ;;  %v10580_v25 = vld [vmem:[%s14185_s1 + $0x1b60] ss:$16 sps:$4 sm:$0xff]  }
 0x333   :  { %6832 = vmatpush1.bf16.msra.mxu0 %v10488_v26  ;;  %7488 = vmatpush1.bf16.msra.mxu1 %v10491_v21  ;;  %v10583_v26 = vld [vmem:[%s14185_s1 + $0x1b68] ss:$16 sps:$4 sm:$0xff]   ;;  %v10588_v21 = vld [vmem:[%s14185_s1 + $0x1b84] ss:$16 sps:$4 sm:$0xff]  }
 0x334   :  { %6833 = vmatprep.subr.bf16.mxu0 %v10496_v28  ;;  %7489 = vmatprep.subr.bf16.mxu1 %v10499_v29  ;;  %v10591_v28 = vld [vmem:[%s14185_s1 + $0x1b8c] ss:$16 sps:$4 sm:$0xff]   ;;  %v10586_v29 = vld [vmem:[%s14185_s1 + $0x1b80] ss:$16 sps:$4 sm:$0xff]  }
 0x337   :  { %6834 = vmatpush1.bf16.msra.mxu0 %v10494_v24  ;;  %7490 = vmatpush1.bf16.msra.mxu1 %v10497_v31  ;;  %v10589_v24 = vld [vmem:[%s14185_s1 + $0x1b88] ss:$16 sps:$4 sm:$0xff]   ;;  %v10594_v31 = vld [vmem:[%s14185_s1 + $0x1ba4] ss:$16 sps:$4 sm:$0xff]  }
 0x338   :  { %6835 = vmatprep.subr.bf16.mxu0 %v10502_v32  ;;  %7491 = vmatprep.subr.bf16.mxu1 %v10505_v33  ;;  %v10597_v32 = vld [vmem:[%s14185_s1 + $0x1bac] ss:$16 sps:$4 sm:$0xff]   ;;  %v10592_v33 = vld [vmem:[%s14185_s1 + $0x1ba0] ss:$16 sps:$4 sm:$0xff]  }
 0x33b   :  { %6836 = vmatpush1.bf16.msra.mxu0 %v10500_v34  ;;  %7492 = vmatpush1.bf16.msra.mxu1 %v10503_v35  ;;  %v10595_v34 = vld [vmem:[%s14185_s1 + $0x1ba8] ss:$16 sps:$4 sm:$0xff]   ;;  %v10600_v35 = vld [vmem:[%s14185_s1 + $0x1bc4] ss:$16 sps:$4 sm:$0xff]  }
 0x33c   :  { %6837 = vmatprep.subr.bf16.mxu0 %v10508_v30  ;;  %7493 = vmatprep.subr.bf16.mxu1 %v10511_v37  ;;  %v10603_v30 = vld [vmem:[%s14185_s1 + $0x1bcc] ss:$16 sps:$4 sm:$0xff]   ;;  %v10598_v37 = vld [vmem:[%s14185_s1 + $0x1bc0] ss:$16 sps:$4 sm:$0xff]  }
 0x33f   :  { %6838 = vmatpush1.bf16.msra.mxu0 %v10506_v38  ;;  %7494 = vmatpush1.bf16.msra.mxu1 %v10509_v27  ;;  %v10601_v38 = vld [vmem:[%s14185_s1 + $0x1bc8] ss:$16 sps:$4 sm:$0xff]   ;;  %v10606_v27 = vld [vmem:[%s14185_s1 + $0x1be4] ss:$16 sps:$4 sm:$0xff]  }
 0x340   :  { %6848 = vmatprep.subr.bf16.mxu0 %v10516_v40  ;;  %7504 = vmatprep.subr.bf16.mxu1 %v10519_v41  ;;  %v10609_v40 = vld [vmem:[%s14185_s1 + $0x1bec] ss:$16 sps:$4 sm:$0xff]   ;;  %v10604_v41 = vld [vmem:[%s14185_s1 + $0x1be0] ss:$16 sps:$4 sm:$0xff]  }
 0x342   :  { %6840 = vmatmul.mubr.bf16.vlgmr.msra.gmra.mrb[0].mxu0 %v8007_v36  ;;  %7496 = vmatmul.mubr.bf16.vlgmr.msra.gmra.mrb[0].mxu1 %v8007_v36  ;;  %v10607_v36 = vld [vmem:[%s14185_s1 + $0x1be8] ss:$16 sps:$4 sm:$0xff]  }
 0x343   :  { %6849 = vmatpush1.bf16.msra.mxu0 %v10514_v43  ;;  %7505 = vmatpush1.bf16.msra.mxu1 %v10517_v44  ;;  %v10614_v43 = vld [vmem:[%s14185_s1 + $0x1c04] ss:$16 sps:$4 sm:$0xff]   ;;  %v10617_v44 = vld [vmem:[%s14185_s1 + $0x1c0c] ss:$16 sps:$4 sm:$0xff]  }
 0x344   :  { %6850 = vmatprep.subr.bf16.mxu0 %v10522_v39  ;;  %7506 = vmatprep.subr.bf16.mxu1 %v10525_v45  ;;  %v8009_v39 = vcombine.low %v13486_v42, %v13486_v42  ;;  %v13687_v45 = vld [vmem:[%s14186_s0 + $0x70] sm:$0xff] }
 0x345   :  { %6880 = vmatprep.mubr.bf16.mxu0 %v8010_v46  ;;  %7536 = vmatprep.mubr.bf16.mxu1 %v8010_v46  ;;  %v10612_v46 = vld [vmem:[%s14185_s1 + $0x1c00] ss:$16 sps:$4 sm:$0xff]   ;;  %v10620_v42 = vld [vmem:[%s14185_s1 + $0x1c24] ss:$16 sps:$4 sm:$0xff]  }
 0x347   :  { %6851 = vmatpush1.bf16.msra.mxu0 %v10520_v47  ;;  %7507 = vmatpush1.bf16.msra.mxu1 %v10523_v48  ;;  %v10615_v47 = vld [vmem:[%s14185_s1 + $0x1c08] ss:$16 sps:$4 sm:$0xff]   ;;  %v10623_v48 = vld [vmem:[%s14185_s1 + $0x1c2c] ss:$16 sps:$4 sm:$0xff]  }
 0x348   :  { %6852 = vmatprep.subr.bf16.mxu0 %v10528_v49  ;;  %7508 = vmatprep.subr.bf16.mxu1 %v10531_v50  ;;  %v8012_v49 = vcombine.high %v13687_v45, %v13687_v45  ;;  %v10618_v50 = vld [vmem:[%s14185_s1 + $0x1c20] ss:$16 sps:$4 sm:$0xff]  }
 0x34b   :  { %6853 = vmatpush1.bf16.msra.mxu0 %v10526_v51  ;;  %7509 = vmatpush1.bf16.msra.mxu1 %v10529_v52  ;;  %v10621_v51 = vld [vmem:[%s14185_s1 + $0x1c28] ss:$16 sps:$4 sm:$0xff]   ;;  %v10626_v52 = vld [vmem:[%s14185_s1 + $0x1c44] ss:$16 sps:$4 sm:$0xff]  }
 0x34c   :  { %6854 = vmatprep.subr.bf16.mxu0 %v10534_v53  ;;  %7510 = vmatprep.subr.bf16.mxu1 %v10537_v54  ;;  %v10629_v53 = vld [vmem:[%s14185_s1 + $0x1c4c] ss:$16 sps:$4 sm:$0xff]   ;;  %v10624_v54 = vld [vmem:[%s14185_s1 + $0x1c40] ss:$16 sps:$4 sm:$0xff]  }
 0x34f   :  { %6855 = vmatpush1.bf16.msra.mxu0 %v10532_v55  ;;  %7511 = vmatpush1.bf16.msra.mxu1 %v10535_v56  ;;  %v10627_v55 = vld [vmem:[%s14185_s1 + $0x1c48] ss:$16 sps:$4 sm:$0xff]   ;;  %v10632_v56 = vld [vmem:[%s14185_s1 + $0x1c64] ss:$16 sps:$4 sm:$0xff]  }
 0x350   :  { %6856 = vmatprep.subr.bf16.mxu0 %v10540_v57  ;;  %7512 = vmatprep.subr.bf16.mxu1 %v10543_v58  ;;  %v10635_v57 = vld [vmem:[%s14185_s1 + $0x1c6c] ss:$16 sps:$4 sm:$0xff]   ;;  %v10630_v58 = vld [vmem:[%s14185_s1 + $0x1c60] ss:$16 sps:$4 sm:$0xff]  }
 0x353   :  { %6857 = vmatpush1.bf16.msra.mxu0 %v10538_v59  ;;  %7513 = vmatpush1.bf16.msra.mxu1 %v10541_v60  ;;  %v10633_v59 = vld [vmem:[%s14185_s1 + $0x1c68] ss:$16 sps:$4 sm:$0xff]   ;;  %v10638_v60 = vld [vmem:[%s14185_s1 + $0x1c84] ss:$16 sps:$4 sm:$0xff]  }
 0x354   :  { %6858 = vmatprep.subr.bf16.mxu0 %v10546_v61  ;;  %7514 = vmatprep.subr.bf16.mxu1 %v10549_v62  ;;  %v10641_v61 = vld [vmem:[%s14185_s1 + $0x1c8c] ss:$16 sps:$4 sm:$0xff]   ;;  %v10636_v62 = vld [vmem:[%s14185_s1 + $0x1c80] ss:$16 sps:$4 sm:$0xff]  }
 0x357   :  { %6859 = vmatpush1.bf16.msra.mxu0 %v10544_v63  ;;  %7515 = vmatpush1.bf16.msra.mxu1 %v10547_v0  ;;  %v10639_v63 = vld [vmem:[%s14185_s1 + $0x1c88] ss:$16 sps:$4 sm:$0xff]   ;;  %v10644_v0 = vld [vmem:[%s14185_s1 + $0x1ca4] ss:$16 sps:$4 sm:$0xff]  }
 0x358   :  { %6860 = vmatprep.subr.bf16.mxu0 %v10552_v1  ;;  %7516 = vmatprep.subr.bf16.mxu1 %v10555_v2  ;;  %v10647_v1 = vld [vmem:[%s14185_s1 + $0x1cac] ss:$16 sps:$4 sm:$0xff]   ;;  %v10642_v2 = vld [vmem:[%s14185_s1 + $0x1ca0] ss:$16 sps:$4 sm:$0xff]  }
 0x35b   :  { %6861 = vmatpush1.bf16.msra.mxu0 %v10550_v3  ;;  %7517 = vmatpush1.bf16.msra.mxu1 %v10553_v4  ;;  %v10645_v3 = vld [vmem:[%s14185_s1 + $0x1ca8] ss:$16 sps:$4 sm:$0xff]   ;;  %v10650_v4 = vld [vmem:[%s14185_s1 + $0x1cc4] ss:$16 sps:$4 sm:$0xff]  }
 0x35c   :  { %6862 = vmatprep.subr.bf16.mxu0 %v10558_v5  ;;  %7518 = vmatprep.subr.bf16.mxu1 %v10561_v6  ;;  %v10653_v5 = vld [vmem:[%s14185_s1 + $0x1ccc] ss:$16 sps:$4 sm:$0xff]   ;;  %v10648_v6 = vld [vmem:[%s14185_s1 + $0x1cc0] ss:$16 sps:$4 sm:$0xff]  }
 0x35f   :  { %6863 = vmatpush1.bf16.msra.mxu0 %v10556_v7  ;;  %7519 = vmatpush1.bf16.msra.mxu1 %v10559_v8  ;;  %v10651_v7 = vld [vmem:[%s14185_s1 + $0x1cc8] ss:$16 sps:$4 sm:$0xff]   ;;  %v10656_v8 = vld [vmem:[%s14185_s1 + $0x1ce4] ss:$16 sps:$4 sm:$0xff]  }
 0x360   :  { %6864 = vmatprep.subr.bf16.mxu0 %v10564_v9  ;;  %7520 = vmatprep.subr.bf16.mxu1 %v10567_v10  ;;  %v10659_v9 = vld [vmem:[%s14185_s1 + $0x1cec] ss:$16 sps:$4 sm:$0xff]   ;;  %v10654_v10 = vld [vmem:[%s14185_s1 + $0x1ce0] ss:$16 sps:$4 sm:$0xff]  }
 0x363   :  { %6865 = vmatpush1.bf16.msra.mxu0 %v10562_v12  ;;  %7521 = vmatpush1.bf16.msra.mxu1 %v10565_v13  ;;  %v10657_v12 = vld [vmem:[%s14185_s1 + $0x1ce8] ss:$16 sps:$4 sm:$0xff]   ;;  %v10662_v13 = vld [vmem:[%s14185_s1 + $0x1d04] ss:$16 sps:$4 sm:$0xff]  }
 0x364   :  { %6866 = vmatprep.subr.bf16.mxu0 %v10570_v15  ;;  %7522 = vmatprep.subr.bf16.mxu1 %v10573_v11  ;;  %v10665_v15 = vld [vmem:[%s14185_s1 + $0x1d0c] ss:$16 sps:$4 sm:$0xff]   ;;  %v10660_v11 = vld [vmem:[%s14185_s1 + $0x1d00] ss:$16 sps:$4 sm:$0xff]  }
 0x367   :  { %6867 = vmatpush1.bf16.msra.mxu0 %v10568_v17  ;;  %7523 = vmatpush1.bf16.msra.mxu1 %v10571_v14  ;;  %v10663_v17 = vld [vmem:[%s14185_s1 + $0x1d08] ss:$16 sps:$4 sm:$0xff]   ;;  %v10668_v14 = vld [vmem:[%s14185_s1 + $0x1d24] ss:$16 sps:$4 sm:$0xff]  }
 0x368   :  { %6868 = vmatprep.subr.bf16.mxu0 %v10576_v19  ;;  %7524 = vmatprep.subr.bf16.mxu1 %v10579_v20  ;;  %v10671_v19 = vld [vmem:[%s14185_s1 + $0x1d2c] ss:$16 sps:$4 sm:$0xff]   ;;  %v10666_v20 = vld [vmem:[%s14185_s1 + $0x1d20] ss:$16 sps:$4 sm:$0xff]  }
 0x36b   :  { %6869 = vmatpush1.bf16.msra.mxu0 %v10574_v16  ;;  %7525 = vmatpush1.bf16.msra.mxu1 %v10577_v22  ;;  %v10669_v16 = vld [vmem:[%s14185_s1 + $0x1d28] ss:$16 sps:$4 sm:$0xff]   ;;  %v10674_v22 = vld [vmem:[%s14185_s1 + $0x1d44] ss:$16 sps:$4 sm:$0xff]  }
 0x36c   :  { %6870 = vmatprep.subr.bf16.mxu0 %v10582_v23  ;;  %7526 = vmatprep.subr.bf16.mxu1 %v10585_v18  ;;  %v10677_v23 = vld [vmem:[%s14185_s1 + $0x1d4c] ss:$16 sps:$4 sm:$0xff]   ;;  %v10672_v18 = vld [vmem:[%s14185_s1 + $0x1d40] ss:$16 sps:$4 sm:$0xff]  }
 0x36f   :  { %6871 = vmatpush1.bf16.msra.mxu0 %v10580_v25  ;;  %7527 = vmatpush1.bf16.msra.mxu1 %v10583_v26  ;;  %v10675_v25 = vld [vmem:[%s14185_s1 + $0x1d48] ss:$16 sps:$4 sm:$0xff]   ;;  %v10680_v26 = vld [vmem:[%s14185_s1 + $0x1d64] ss:$16 sps:$4 sm:$0xff]  }
 0x370   :  { %6872 = vmatprep.subr.bf16.mxu0 %v10588_v21  ;;  %7528 = vmatprep.subr.bf16.mxu1 %v10591_v28  ;;  %v10683_v21 = vld [vmem:[%s14185_s1 + $0x1d6c] ss:$16 sps:$4 sm:$0xff]   ;;  %v10678_v28 = vld [vmem:[%s14185_s1 + $0x1d60] ss:$16 sps:$4 sm:$0xff]  }
 0x373   :  { %6873 = vmatpush1.bf16.msra.mxu0 %v10586_v29  ;;  %7529 = vmatpush1.bf16.msra.mxu1 %v10589_v24  ;;  %v10681_v29 = vld [vmem:[%s14185_s1 + $0x1d68] ss:$16 sps:$4 sm:$0xff]   ;;  %v10686_v24 = vld [vmem:[%s14185_s1 + $0x1d84] ss:$16 sps:$4 sm:$0xff]  }
 0x374   :  { %6874 = vmatprep.subr.bf16.mxu0 %v10594_v31  ;;  %7530 = vmatprep.subr.bf16.mxu1 %v10597_v32  ;;  %v10689_v31 = vld [vmem:[%s14185_s1 + $0x1d8c] ss:$16 sps:$4 sm:$0xff]   ;;  %v10684_v32 = vld [vmem:[%s14185_s1 + $0x1d80] ss:$16 sps:$4 sm:$0xff]  }
 0x377   :  { %6875 = vmatpush1.bf16.msra.mxu0 %v10592_v33  ;;  %7531 = vmatpush1.bf16.msra.mxu1 %v10595_v34  ;;  %v10687_v33 = vld [vmem:[%s14185_s1 + $0x1d88] ss:$16 sps:$4 sm:$0xff]   ;;  %v10692_v34 = vld [vmem:[%s14185_s1 + $0x1da4] ss:$16 sps:$4 sm:$0xff]  }
 0x378   :  { %6876 = vmatprep.subr.bf16.mxu0 %v10600_v35  ;;  %7532 = vmatprep.subr.bf16.mxu1 %v10603_v30  ;;  %v10695_v35 = vld [vmem:[%s14185_s1 + $0x1dac] ss:$16 sps:$4 sm:$0xff]   ;;  %v10690_v30 = vld [vmem:[%s14185_s1 + $0x1da0] ss:$16 sps:$4 sm:$0xff]  }
 0x37b   :  { %6877 = vmatpush1.bf16.msra.mxu0 %v10598_v37  ;;  %7533 = vmatpush1.bf16.msra.mxu1 %v10601_v38  ;;  %v10693_v37 = vld [vmem:[%s14185_s1 + $0x1da8] ss:$16 sps:$4 sm:$0xff]   ;;  %v10698_v38 = vld [vmem:[%s14185_s1 + $0x1dc4] ss:$16 sps:$4 sm:$0xff]  }
 0x37c   :  { %6878 = vmatprep.subr.bf16.mxu0 %v10606_v27  ;;  %7534 = vmatprep.subr.bf16.mxu1 %v10609_v40  ;;  %v10701_v27 = vld [vmem:[%s14185_s1 + $0x1dcc] ss:$16 sps:$4 sm:$0xff]   ;;  %v10696_v40 = vld [vmem:[%s14185_s1 + $0x1dc0] ss:$16 sps:$4 sm:$0xff]  }
 0x37f   :  { %6879 = vmatpush1.bf16.msra.mxu0 %v10604_v41  ;;  %7535 = vmatpush1.bf16.msra.mxu1 %v10607_v36  ;;  %v10699_v41 = vld [vmem:[%s14185_s1 + $0x1dc8] ss:$16 sps:$4 sm:$0xff]   ;;  %v10704_v36 = vld [vmem:[%s14185_s1 + $0x1de4] ss:$16 sps:$4 sm:$0xff]  }
 0x380   :  { %6889 = vmatprep.subr.bf16.mxu0 %v10614_v43  ;;  %7545 = vmatprep.subr.bf16.mxu1 %v10617_v44  ;;  %v10707_v43 = vld [vmem:[%s14185_s1 + $0x1dec] ss:$16 sps:$4 sm:$0xff]   ;;  %v10702_v44 = vld [vmem:[%s14185_s1 + $0x1de0] ss:$16 sps:$4 sm:$0xff]  }
 0x382   :  { %6881 = vmatmul.mubr.bf16.vlgmr.msra.gmra.mrb[0].mxu0 %v8009_v39  ;;  %7537 = vmatmul.mubr.bf16.vlgmr.msra.gmra.mrb[0].mxu1 %v8009_v39  ;;  %v10705_v39 = vld [vmem:[%s14185_s1 + $0x1de8] ss:$16 sps:$4 sm:$0xff]  }
 0x383   :  { %6890 = vmatpush1.bf16.msra.mxu0 %v10612_v46  ;;  %7546 = vmatpush1.bf16.msra.mxu1 %v10615_v47  ;;  %v10712_v46 = vld [vmem:[%s14185_s1 + $0x1e04] ss:$16 sps:$4 sm:$0xff]   ;;  %v10715_v47 = vld [vmem:[%s14185_s1 + $0x1e0c] ss:$16 sps:$4 sm:$0xff]  }
 0x384   :  { %6891 = vmatprep.subr.bf16.mxu0 %v10620_v42  ;;  %7547 = vmatprep.subr.bf16.mxu1 %v10623_v48  ;;  %v8011_v42 = vcombine.low %v13687_v45, %v13687_v45  ;;  %v13888_v48 = vld [vmem:[%s14186_s0 + $0x78] sm:$0xff]  ;;  %v10718_v45 = vld [vmem:[%s14185_s1 + $0x1e24] ss:$16 sps:$4 sm:$0xff]  }
 0x385   :  { %6921 = vmatprep.mubr.bf16.mxu0 %v8012_v49  ;;  %7577 = vmatprep.mubr.bf16.mxu1 %v8012_v49  ;;  %v10710_v49 = vld [vmem:[%s14185_s1 + $0x1e00] ss:$16 sps:$4 sm:$0xff]  }
 0x387   :  { %6892 = vmatpush1.bf16.msra.mxu0 %v10618_v50  ;;  %7548 = vmatpush1.bf16.msra.mxu1 %v10621_v51  ;;  %v10713_v50 = vld [vmem:[%s14185_s1 + $0x1e08] ss:$16 sps:$4 sm:$0xff]   ;;  %v10721_v51 = vld [vmem:[%s14185_s1 + $0x1e2c] ss:$16 sps:$4 sm:$0xff]  }
 0x388   :  { %6893 = vmatprep.subr.bf16.mxu0 %v10626_v52  ;;  %7549 = vmatprep.subr.bf16.mxu1 %v10629_v53  ;;  %v8014_v52 = vcombine.high %v13888_v48, %v13888_v48  ;;  %v10716_v53 = vld [vmem:[%s14185_s1 + $0x1e20] ss:$16 sps:$4 sm:$0xff]  }
 0x38b   :  { %6894 = vmatpush1.bf16.msra.mxu0 %v10624_v54  ;;  %7550 = vmatpush1.bf16.msra.mxu1 %v10627_v55  ;;  %v10719_v54 = vld [vmem:[%s14185_s1 + $0x1e28] ss:$16 sps:$4 sm:$0xff]   ;;  %v10724_v55 = vld [vmem:[%s14185_s1 + $0x1e44] ss:$16 sps:$4 sm:$0xff]  }
 0x38c   :  { %6895 = vmatprep.subr.bf16.mxu0 %v10632_v56  ;;  %7551 = vmatprep.subr.bf16.mxu1 %v10635_v57  ;;  %v10727_v56 = vld [vmem:[%s14185_s1 + $0x1e4c] ss:$16 sps:$4 sm:$0xff]   ;;  %v10722_v57 = vld [vmem:[%s14185_s1 + $0x1e40] ss:$16 sps:$4 sm:$0xff]  }
 0x38f   :  { %6896 = vmatpush1.bf16.msra.mxu0 %v10630_v58  ;;  %7552 = vmatpush1.bf16.msra.mxu1 %v10633_v59  ;;  %v10725_v58 = vld [vmem:[%s14185_s1 + $0x1e48] ss:$16 sps:$4 sm:$0xff]   ;;  %v10730_v59 = vld [vmem:[%s14185_s1 + $0x1e64] ss:$16 sps:$4 sm:$0xff]  }
 0x390   :  { %6897 = vmatprep.subr.bf16.mxu0 %v10638_v60  ;;  %7553 = vmatprep.subr.bf16.mxu1 %v10641_v61  ;;  %v10733_v60 = vld [vmem:[%s14185_s1 + $0x1e6c] ss:$16 sps:$4 sm:$0xff]   ;;  %v10728_v61 = vld [vmem:[%s14185_s1 + $0x1e60] ss:$16 sps:$4 sm:$0xff]  }
 0x393   :  { %6898 = vmatpush1.bf16.msra.mxu0 %v10636_v62  ;;  %7554 = vmatpush1.bf16.msra.mxu1 %v10639_v63  ;;  %v10731_v62 = vld [vmem:[%s14185_s1 + $0x1e68] ss:$16 sps:$4 sm:$0xff]   ;;  %v10736_v63 = vld [vmem:[%s14185_s1 + $0x1e84] ss:$16 sps:$4 sm:$0xff]  }
 0x394   :  { %6899 = vmatprep.subr.bf16.mxu0 %v10644_v0  ;;  %7555 = vmatprep.subr.bf16.mxu1 %v10647_v1  ;;  %v10739_v0 = vld [vmem:[%s14185_s1 + $0x1e8c] ss:$16 sps:$4 sm:$0xff]   ;;  %v10734_v1 = vld [vmem:[%s14185_s1 + $0x1e80] ss:$16 sps:$4 sm:$0xff]  }
 0x397   :  { %6900 = vmatpush1.bf16.msra.mxu0 %v10642_v2  ;;  %7556 = vmatpush1.bf16.msra.mxu1 %v10645_v3  ;;  %v10737_v2 = vld [vmem:[%s14185_s1 + $0x1e88] ss:$16 sps:$4 sm:$0xff]   ;;  %v10742_v3 = vld [vmem:[%s14185_s1 + $0x1ea4] ss:$16 sps:$4 sm:$0xff]  }
 0x398   :  { %6901 = vmatprep.subr.bf16.mxu0 %v10650_v4  ;;  %7557 = vmatprep.subr.bf16.mxu1 %v10653_v5  ;;  %v10745_v4 = vld [vmem:[%s14185_s1 + $0x1eac] ss:$16 sps:$4 sm:$0xff]   ;;  %v10740_v5 = vld [vmem:[%s14185_s1 + $0x1ea0] ss:$16 sps:$4 sm:$0xff]  }
 0x39b   :  { %6902 = vmatpush1.bf16.msra.mxu0 %v10648_v6  ;;  %7558 = vmatpush1.bf16.msra.mxu1 %v10651_v7  ;;  %v10743_v6 = vld [vmem:[%s14185_s1 + $0x1ea8] ss:$16 sps:$4 sm:$0xff]   ;;  %v10748_v7 = vld [vmem:[%s14185_s1 + $0x1ec4] ss:$16 sps:$4 sm:$0xff]  }
 0x39c   :  { %6903 = vmatprep.subr.bf16.mxu0 %v10656_v8  ;;  %7559 = vmatprep.subr.bf16.mxu1 %v10659_v9  ;;  %v10751_v8 = vld [vmem:[%s14185_s1 + $0x1ecc] ss:$16 sps:$4 sm:$0xff]   ;;  %v10746_v9 = vld [vmem:[%s14185_s1 + $0x1ec0] ss:$16 sps:$4 sm:$0xff]  }
 0x39f   :  { %6904 = vmatpush1.bf16.msra.mxu0 %v10654_v10  ;;  %7560 = vmatpush1.bf16.msra.mxu1 %v10657_v12  ;;  %v10749_v10 = vld [vmem:[%s14185_s1 + $0x1ec8] ss:$16 sps:$4 sm:$0xff]   ;;  %v10754_v12 = vld [vmem:[%s14185_s1 + $0x1ee4] ss:$16 sps:$4 sm:$0xff]  }
 0x3a0   :  { %6905 = vmatprep.subr.bf16.mxu0 %v10662_v13  ;;  %7561 = vmatprep.subr.bf16.mxu1 %v10665_v15  ;;  %v10757_v13 = vld [vmem:[%s14185_s1 + $0x1eec] ss:$16 sps:$4 sm:$0xff]   ;;  %v10752_v15 = vld [vmem:[%s14185_s1 + $0x1ee0] ss:$16 sps:$4 sm:$0xff]  }
 0x3a3   :  { %6906 = vmatpush1.bf16.msra.mxu0 %v10660_v11  ;;  %7562 = vmatpush1.bf16.msra.mxu1 %v10663_v17  ;;  %v10755_v11 = vld [vmem:[%s14185_s1 + $0x1ee8] ss:$16 sps:$4 sm:$0xff]   ;;  %v10760_v17 = vld [vmem:[%s14185_s1 + $0x1f04] ss:$16 sps:$4 sm:$0xff]  }
 0x3a4   :  { %6907 = vmatprep.subr.bf16.mxu0 %v10668_v14  ;;  %7563 = vmatprep.subr.bf16.mxu1 %v10671_v19  ;;  %v10763_v14 = vld [vmem:[%s14185_s1 + $0x1f0c] ss:$16 sps:$4 sm:$0xff]   ;;  %v10758_v19 = vld [vmem:[%s14185_s1 + $0x1f00] ss:$16 sps:$4 sm:$0xff]  }
 0x3a7   :  { %6908 = vmatpush1.bf16.msra.mxu0 %v10666_v20  ;;  %7564 = vmatpush1.bf16.msra.mxu1 %v10669_v16  ;;  %v10761_v20 = vld [vmem:[%s14185_s1 + $0x1f08] ss:$16 sps:$4 sm:$0xff]   ;;  %v10766_v16 = vld [vmem:[%s14185_s1 + $0x1f24] ss:$16 sps:$4 sm:$0xff]  }
 0x3a8   :  { %6909 = vmatprep.subr.bf16.mxu0 %v10674_v22  ;;  %7565 = vmatprep.subr.bf16.mxu1 %v10677_v23  ;;  %v10769_v22 = vld [vmem:[%s14185_s1 + $0x1f2c] ss:$16 sps:$4 sm:$0xff]   ;;  %v10764_v23 = vld [vmem:[%s14185_s1 + $0x1f20] ss:$16 sps:$4 sm:$0xff]  }
 0x3ab   :  { %6910 = vmatpush1.bf16.msra.mxu0 %v10672_v18  ;;  %7566 = vmatpush1.bf16.msra.mxu1 %v10675_v25  ;;  %v10767_v18 = vld [vmem:[%s14185_s1 + $0x1f28] ss:$16 sps:$4 sm:$0xff]   ;;  %v10772_v25 = vld [vmem:[%s14185_s1 + $0x1f44] ss:$16 sps:$4 sm:$0xff]  }
 0x3ac   :  { %6911 = vmatprep.subr.bf16.mxu0 %v10680_v26  ;;  %7567 = vmatprep.subr.bf16.mxu1 %v10683_v21  ;;  %v10775_v26 = vld [vmem:[%s14185_s1 + $0x1f4c] ss:$16 sps:$4 sm:$0xff]   ;;  %v10770_v21 = vld [vmem:[%s14185_s1 + $0x1f40] ss:$16 sps:$4 sm:$0xff]  }
 0x3af   :  { %6912 = vmatpush1.bf16.msra.mxu0 %v10678_v28  ;;  %7568 = vmatpush1.bf16.msra.mxu1 %v10681_v29  ;;  %v10773_v28 = vld [vmem:[%s14185_s1 + $0x1f48] ss:$16 sps:$4 sm:$0xff]   ;;  %v10778_v29 = vld [vmem:[%s14185_s1 + $0x1f64] ss:$16 sps:$4 sm:$0xff]  }
 0x3b0   :  { %6913 = vmatprep.subr.bf16.mxu0 %v10686_v24  ;;  %7569 = vmatprep.subr.bf16.mxu1 %v10689_v31  ;;  %v10781_v24 = vld [vmem:[%s14185_s1 + $0x1f6c] ss:$16 sps:$4 sm:$0xff]   ;;  %v10776_v31 = vld [vmem:[%s14185_s1 + $0x1f60] ss:$16 sps:$4 sm:$0xff]  }
 0x3b3   :  { %6914 = vmatpush1.bf16.msra.mxu0 %v10684_v32  ;;  %7570 = vmatpush1.bf16.msra.mxu1 %v10687_v33  ;;  %v10779_v32 = vld [vmem:[%s14185_s1 + $0x1f68] ss:$16 sps:$4 sm:$0xff]   ;;  %v10784_v33 = vld [vmem:[%s14185_s1 + $0x1f84] ss:$16 sps:$4 sm:$0xff]  }
 0x3b4   :  { %6915 = vmatprep.subr.bf16.mxu0 %v10692_v34  ;;  %7571 = vmatprep.subr.bf16.mxu1 %v10695_v35  ;;  %v10787_v34 = vld [vmem:[%s14185_s1 + $0x1f8c] ss:$16 sps:$4 sm:$0xff]   ;;  %v10782_v35 = vld [vmem:[%s14185_s1 + $0x1f80] ss:$16 sps:$4 sm:$0xff]  }
 0x3b7   :  { %6916 = vmatpush1.bf16.msra.mxu0 %v10690_v30  ;;  %7572 = vmatpush1.bf16.msra.mxu1 %v10693_v37  ;;  %v10785_v30 = vld [vmem:[%s14185_s1 + $0x1f88] ss:$16 sps:$4 sm:$0xff]   ;;  %v10790_v37 = vld [vmem:[%s14185_s1 + $0x1fa4] ss:$16 sps:$4 sm:$0xff]  }
 0x3b8   :  { %6917 = vmatprep.subr.bf16.mxu0 %v10698_v38  ;;  %7573 = vmatprep.subr.bf16.mxu1 %v10701_v27  ;;  %v10793_v38 = vld [vmem:[%s14185_s1 + $0x1fac] ss:$16 sps:$4 sm:$0xff]   ;;  %v10788_v27 = vld [vmem:[%s14185_s1 + $0x1fa0] ss:$16 sps:$4 sm:$0xff]  }
 0x3bb   :  { %6918 = vmatpush1.bf16.msra.mxu0 %v10696_v40  ;;  %7574 = vmatpush1.bf16.msra.mxu1 %v10699_v41  ;;  %v10791_v40 = vld [vmem:[%s14185_s1 + $0x1fa8] ss:$16 sps:$4 sm:$0xff]   ;;  %v10796_v41 = vld [vmem:[%s14185_s1 + $0x1fc4] ss:$16 sps:$4 sm:$0xff]  }
 0x3bc   :  { %6919 = vmatprep.subr.bf16.mxu0 %v10704_v36  ;;  %7575 = vmatprep.subr.bf16.mxu1 %v10707_v43  ;;  %v10799_v36 = vld [vmem:[%s14185_s1 + $0x1fcc] ss:$16 sps:$4 sm:$0xff]   ;;  %v10794_v43 = vld [vmem:[%s14185_s1 + $0x1fc0] ss:$16 sps:$4 sm:$0xff]  }
 0x3bf   :  { %6920 = vmatpush1.bf16.msra.mxu0 %v10702_v44  ;;  %7576 = vmatpush1.bf16.msra.mxu1 %v10705_v39  ;;  %v10797_v44 = vld [vmem:[%s14185_s1 + $0x1fc8] ss:$16 sps:$4 sm:$0xff]   ;;  %v10802_v39 = vld [vmem:[%s14185_s1 + $0x1fe4] ss:$16 sps:$4 sm:$0xff]  }
 0x3c0   :  { %6930 = vmatprep.subr.bf16.mxu0 %v10712_v46  ;;  %7586 = vmatprep.subr.bf16.mxu1 %v10715_v47  ;;  %v10805_v46 = vld [vmem:[%s14185_s1 + $0x1fec] ss:$16 sps:$4 sm:$0xff]   ;;  %v10800_v47 = vld [vmem:[%s14185_s1 + $0x1fe0] ss:$16 sps:$4 sm:$0xff]  }
 0x3c2   :  { %6922 = vmatmul.mubr.bf16.vlgmr.msra.gmra.mrb[0].mxu0 %v8011_v42  ;;  %7578 = vmatmul.mubr.bf16.vlgmr.msra.gmra.mrb[0].mxu1 %v8011_v42  ;;  %v10803_v42 = vld [vmem:[%s14185_s1 + $0x1fe8] ss:$16 sps:$4 sm:$0xff]  }
 0x3c3   :  { %6931 = vmatpush1.bf16.msra.mxu0 %v10710_v49  ;;  %7587 = vmatpush1.bf16.msra.mxu1 %v10713_v50  ;;  %v10808_v49 = vld [vmem:[%s14187_s3 + $0x40] sm:$0xff]  }
 0x3c4   :  { %6932 = vmatprep.subr.bf16.mxu0 %v10718_v45  ;;  %7588 = vmatprep.subr.bf16.mxu1 %v10721_v51  ;;  %v10809_v50 = vld [vmem:[%s14187_s3 + $0xc0] sm:$0xff]   ;;  %v8013_v45 = vcombine.low %v13888_v48, %v13888_v48  ;;  %v10813_v48 = vld [vmem:[%s14187_s3 + $0xc8] sm:$0xff]  }
 0x3c5   :  { %6962 = vmatprep.mubr.bf16.mxu0 %v8014_v52  ;;  %7618 = vmatprep.mubr.bf16.mxu1 %v8014_v52  ;;  %v10810_v51 = vld [vmem:[%s14187_s3] sm:$0xff]  }
 0x3c6   :  { %v10811_v52 = vld [vmem:[%s14187_s3 + $0x80] sm:$0xff]  }
 0x3c7   :  { %6933 = vmatpush1.bf16.msra.mxu0 %v10716_v53  ;;  %7589 = vmatpush1.bf16.msra.mxu1 %v10719_v54  ;;  %v10812_v53 = vld [vmem:[%s14187_s3 + $0x48] sm:$0xff]  }
 0x3c8   :  { %6934 = vmatprep.subr.bf16.mxu0 %v10724_v55  ;;  %7590 = vmatprep.subr.bf16.mxu1 %v10727_v56  ;;  %v10814_v54 = vld [vmem:[%s14187_s3 + $0x8] sm:$0xff]   ;;  %v10816_v56 = vld [vmem:[%s14187_s3 + $0x50] sm:$0xff]  }
 0x3c9   :  { %v10815_v55 = vld [vmem:[%s14187_s3 + $0x88] sm:$0xff]  }
 0x3cb   :  { %6935 = vmatpush1.bf16.msra.mxu0 %v10722_v57  ;;  %7591 = vmatpush1.bf16.msra.mxu1 %v10725_v58  ;;  %v10817_v57 = vld [vmem:[%s14187_s3 + $0xd0] sm:$0xff]  }
 0x3cc   :  { %6936 = vmatprep.subr.bf16.mxu0 %v10730_v59  ;;  %7592 = vmatprep.subr.bf16.mxu1 %v10733_v60  ;;  %v10818_v58 = vld [vmem:[%s14187_s3 + $0x10] sm:$0xff]   ;;  %v10820_v60 = vld [vmem:[%s14187_s3 + $0x58] sm:$0xff]  }
 0x3cd   :  { %v10819_v59 = vld [vmem:[%s14187_s3 + $0x90] sm:$0xff]  }
 0x3cf   :  { %6937 = vmatpush1.bf16.msra.mxu0 %v10728_v61  ;;  %7593 = vmatpush1.bf16.msra.mxu1 %v10731_v62  ;;  %v10821_v61 = vld [vmem:[%s14187_s3 + $0xd8] sm:$0xff]  }
 0x3d0   :  { %6938 = vmatprep.subr.bf16.mxu0 %v10736_v63  ;;  %7594 = vmatprep.subr.bf16.mxu1 %v10739_v0  ;;  %v10822_v62 = vld [vmem:[%s14187_s3 + $0x18] sm:$0xff]   ;;  %v10824_v0 = vld [vmem:[%s14187_s3 + $0x60] sm:$0xff]  }
 0x3d1   :  { %v10823_v63 = vld [vmem:[%s14187_s3 + $0x98] sm:$0xff]  }
 0x3d3   :  { %6939 = vmatpush1.bf16.msra.mxu0 %v10734_v1  ;;  %7595 = vmatpush1.bf16.msra.mxu1 %v10737_v2  ;;  %v10825_v1 = vld [vmem:[%s14187_s3 + $0xe0] sm:$0xff]  }
 0x3d4   :  { %6940 = vmatprep.subr.bf16.mxu0 %v10742_v3  ;;  %7596 = vmatprep.subr.bf16.mxu1 %v10745_v4  ;;  %v10826_v2 = vld [vmem:[%s14187_s3 + $0x20] sm:$0xff]   ;;  %v10828_v4 = vld [vmem:[%s14187_s3 + $0x68] sm:$0xff]  }
 0x3d5   :  { %v10827_v3 = vld [vmem:[%s14187_s3 + $0xa0] sm:$0xff]  }
 0x3d7   :  { %6941 = vmatpush1.bf16.msra.mxu0 %v10740_v5  ;;  %7597 = vmatpush1.bf16.msra.mxu1 %v10743_v6  ;;  %v10829_v5 = vld [vmem:[%s14187_s3 + $0xe8] sm:$0xff]  }
 0x3d8   :  { %6942 = vmatprep.subr.bf16.mxu0 %v10748_v7  ;;  %7598 = vmatprep.subr.bf16.mxu1 %v10751_v8  ;;  %v10830_v6 = vld [vmem:[%s14187_s3 + $0x28] sm:$0xff]   ;;  %v10832_v8 = vld [vmem:[%s14187_s3 + $0x70] sm:$0xff]  }
 0x3d9   :  { %v10831_v7 = vld [vmem:[%s14187_s3 + $0xa8] sm:$0xff]  }
 0x3db   :  { %6943 = vmatpush1.bf16.msra.mxu0 %v10746_v9  ;;  %7599 = vmatpush1.bf16.msra.mxu1 %v10749_v10  ;;  %v10833_v9 = vld [vmem:[%s14187_s3 + $0xf0] sm:$0xff]  }
 0x3dc   :  { %6944 = vmatprep.subr.bf16.mxu0 %v10754_v12  ;;  %7600 = vmatprep.subr.bf16.mxu1 %v10757_v13  ;;  %v10834_v10 = vld [vmem:[%s14187_s3 + $0x30] sm:$0xff]   ;;  %v10836_v13 = vld [vmem:[%s14187_s3 + $0x78] sm:$0xff]  }
 0x3dd   :  { %v10835_v12 = vld [vmem:[%s14187_s3 + $0xb0] sm:$0xff]  }
 0x3df   :  { %6945 = vmatpush1.bf16.msra.mxu0 %v10752_v15  ;;  %7601 = vmatpush1.bf16.msra.mxu1 %v10755_v11  ;;  %v10837_v15 = vld [vmem:[%s14187_s3 + $0xf8] sm:$0xff]  }
 0x3e0   :  { %6946 = vmatprep.subr.bf16.mxu0 %v10760_v17  ;;  %7602 = vmatprep.subr.bf16.mxu1 %v10763_v14  ;;  %v10838_v11 = vld [vmem:[%s14187_s3 + $0x38] sm:$0xff]   ;;  %v1063_v14 = vlaneseq }
 0x3e1   :  { %v10839_v17 = vld [vmem:[%s14187_s3 + $0xb8] sm:$0xff]  }
 0x3e3   :  { %6947 = vmatpush1.bf16.msra.mxu0 %v10758_v19  ;;  %7603 = vmatpush1.bf16.msra.mxu1 %v10761_v20  ;;  %v1064_v19 = vshrl.u32 %v1063_v14, 7 }
 0x3e4   :  { %6948 = vmatprep.subr.bf16.mxu0 %v10766_v16  ;;  %7604 = vmatprep.subr.bf16.mxu1 %v10769_v22  ;;  %v1061_v22 = vld [vmem:[%s14188_s2] sm:$0xf] }
 0x3e5   :  { %v1065_v20 = vsub.s32 0, %v1064_v19  ;;  %v1073_v16 = vsub.s32 2, %v1064_v19 }
 0x3e7   :  { %6949 = vmatpush1.bf16.msra.mxu0 %v10764_v23  ;;  %7605 = vmatpush1.bf16.msra.mxu1 %v10767_v18  ;;  %v1069_v23 = vsub.s32 1, %v1064_v19  ;;  %v1077_v18 = vsub.s32 3, %v1064_v19 }
 0x3e8   :  { %6950 = vmatprep.subr.bf16.mxu0 %v10772_v25  ;;  %7606 = vmatprep.subr.bf16.mxu1 %v10775_v26  ;;  %v1066_v25 = vrot.slane %v1061_v22, %v1065_v20  ;;  %v1074_v26 = vrot.slane %v1061_v22, %v1073_v16 }
 0x3eb   :  { %6951 = vmatpush1.bf16.msra.mxu0 %v10770_v21  ;;  %7607 = vmatpush1.bf16.msra.mxu1 %v10773_v28  ;;  %v1070_v21 = vrot.slane %v1061_v22, %v1069_v23  ;;  %v1078_v28 = vrot.slane %v1061_v22, %v1077_v18 }
 0x3ec   :  { %6952 = vmatprep.subr.bf16.mxu0 %v10778_v29  ;;  %7608 = vmatprep.subr.bf16.mxu1 %v10781_v24 }
 0x3ef   :  { %6953 = vmatpush1.bf16.msra.mxu0 %v10776_v31  ;;  %7609 = vmatpush1.bf16.msra.mxu1 %v10779_v32 }
 0x3f0   :  { %6954 = vmatprep.subr.bf16.mxu0 %v10784_v33  ;;  %7610 = vmatprep.subr.bf16.mxu1 %v10787_v34 }
 0x3f3   :  { %6955 = vmatpush1.bf16.msra.mxu0 %v10782_v35  ;;  %7611 = vmatpush1.bf16.msra.mxu1 %v10785_v30 }
 0x3f4   :  { %6956 = vmatprep.subr.bf16.mxu0 %v10790_v37  ;;  %7612 = vmatprep.subr.bf16.mxu1 %v10793_v38 }
 0x3f7   :  { %6957 = vmatpush1.bf16.msra.mxu0 %v10788_v27  ;;  %7613 = vmatpush1.bf16.msra.mxu1 %v10791_v40 }
 0x3f8   :  { %6958 = vmatprep.subr.bf16.mxu0 %v10796_v41  ;;  %7614 = vmatprep.subr.bf16.mxu1 %v10799_v36 }
 0x3fb   :  { %6959 = vmatpush1.bf16.msra.mxu0 %v10794_v43  ;;  %7615 = vmatpush1.bf16.msra.mxu1 %v10797_v44 }
 0x3fc   :  { %6960 = vmatprep.subr.bf16.mxu0 %v10802_v39  ;;  %7616 = vmatprep.subr.bf16.mxu1 %v10805_v46 }
 0x3ff   :  { %6961 = vmatpush1.bf16.msra.mxu0 %v10800_v47  ;;  %7617 = vmatpush1.bf16.msra.mxu1 %v10803_v42 }
 0x400   :  { %9072 = vmatprep.subr.bf16.mxu0 %v10808_v49  ;;  %9094 = vmatprep.subr.bf16.mxu1 %v10809_v50 }
 0x402   :  { %6963 = vmatmul.mubr.bf16.vlgmr.msra.gmra.mrb[0].mxu0 %v8013_v45  ;;  %7619 = vmatmul.mubr.bf16.vlgmr.msra.gmra.mrb[0].mxu1 %v8013_v45  ;;  %v9039_v45 = vld [vmem:[%s14189_s4] ss:$0 sm:$0xff] }
 0x403   :  { %9073 = vmatpush3.bf16.msra.mxu0 %v10810_v51  ;;  %9095 = vmatpush3.bf16.msra.mxu1 %v10811_v52 }
 0x404   :  { %9074 = vmatprep.subr.bf16.mxu0 %v10812_v53  ;;  %9096 = vmatprep.subr.bf16.mxu1 %v10813_v48 }
 0x407   :  { %9075 = vmatpush3.bf16.msra.mxu0 %v10814_v54  ;;  %9097 = vmatpush3.bf16.msra.mxu1 %v10815_v55 }
 0x408   :  { %9076 = vmatprep.subr.bf16.mxu0 %v10816_v56  ;;  %9098 = vmatprep.subr.bf16.mxu1 %v10817_v57 }
 0x40b   :  { %9077 = vmatpush3.bf16.msra.mxu0 %v10818_v58  ;;  %9099 = vmatpush3.bf16.msra.mxu1 %v10819_v59 }
 0x40c   :  { %9078 = vmatprep.subr.bf16.mxu0 %v10820_v60  ;;  %9100 = vmatprep.subr.bf16.mxu1 %v10821_v61 }
 0x40f   :  { %9079 = vmatpush3.bf16.msra.mxu0 %v10822_v62  ;;  %9101 = vmatpush3.bf16.msra.mxu1 %v10823_v63 }
 0x410   :  { %9080 = vmatprep.subr.bf16.mxu0 %v10824_v0  ;;  %9102 = vmatprep.subr.bf16.mxu1 %v10825_v1 }
 0x413   :  { %9081 = vmatpush3.bf16.msra.mxu0 %v10826_v2  ;;  %9103 = vmatpush3.bf16.msra.mxu1 %v10827_v3 }
 0x414   :  { %9082 = vmatprep.subr.bf16.mxu0 %v10828_v4  ;;  %9104 = vmatprep.subr.bf16.mxu1 %v10829_v5 }
 0x417   :  { %9083 = vmatpush3.bf16.msra.mxu0 %v10830_v6  ;;  %9105 = vmatpush3.bf16.msra.mxu1 %v10831_v7 }
 0x418   :  { %9084 = vmatprep.subr.bf16.mxu0 %v10832_v8  ;;  %9106 = vmatprep.subr.bf16.mxu1 %v10833_v9 }
 0x41b   :  { %9085 = vmatpush3.bf16.msra.mxu0 %v10834_v10  ;;  %9107 = vmatpush3.bf16.msra.mxu1 %v10835_v12 }
 0x41c   :  { %9086 = vmatprep.subr.bf16.mxu0 %v10836_v13  ;;  %9108 = vmatprep.subr.bf16.mxu1 %v10837_v15 }
 0x41f   :  { %9087 = vmatpush3.bf16.msra.mxu0 %v10838_v11  ;;  %9109 = vmatpush3.bf16.msra.mxu1 %v10839_v17 }
 0x4d5   :  { %v6964_v29 = vpop.f32.mrb[0].mxu0  ;;  %v7620_v24 = vpop.f32.mrb[0].mxu1 }
 0x4d6   :  { %v9116_v31 = vadd.f32 %v6964_v29, %v1066_v25  ;;  %v9118_v32 = vadd.f32 %v7620_v24, %v1074_v26  ;;  %v6966_v33 = vpop.f32.mrb[1].mxu0  ;;  %v7622_v34 = vpop.f32.mrb[1].mxu1 }
 0x4d7   :  { %v9117_v35 = vadd.f32 %v6966_v33, %v1070_v21  ;;  %v9119_v30 = vadd.f32 %v7622_v34, %v1078_v28  ;;  %v6968_v37 = vpop.f32.mrb[2].mxu0  ;;  %v7624_v38 = vpop.f32.mrb[2].mxu1 }
 0x4d8   :  { %v7627_v27 = vmax.f32 %v9116_v31, 0.0  ;;  %v7629_v40 = vmax.f32 %v9118_v32, 0.0  ;;  %v6969_v41 = vpop.f32.mrb[3].mxu0  ;;  %v7625_v36 = vpop.f32.mrb[3].mxu1 }
 0x4d9   :  { %v7628_v43 = vmax.f32 %v9117_v35, 0.0  ;;  %v7630_v44 = vmax.f32 %v9119_v30, 0.0 }
 0x4da   :  { %v7631_v47 = vpack.c.bf16 %v7627_v27, %v7627_v27  ;;  %v7633_v42 = vpack.c.bf16 %v7629_v40, %v7629_v40 }
 0x4db   :  { %v7632_v39 = vpack.c.bf16 %v7628_v43, %v7628_v43  ;;  %v7634_v46 = vpack.c.bf16 %v7630_v44, %v7630_v44 }
 0x4dd   :  { %7930 = vmatprep.mubr.bf16.mxu0 %v7632_v39  ;;  %7970 = vmatprep.mubr.bf16.mxu1 %v7634_v46 }
 0x4de   :  { %7931 = vmatmul.mubr.bf16.vlgmr.msra.gmra.mrb[4].mxu0 %v7631_v47  ;;  %7971 = vmatmul.mubr.bf16.vlgmr.msra.gmra.mrb[4].mxu1 %v7633_v42 }
 0x5b1   :  { %v9088_v49 = vpop.f32.mrb[4].mxu0  ;;  %v9110_v50 = vpop.f32.mrb[4].mxu1 }
 0x5b2   :  { %v9089_v51 = vpop.f32.mrb[5].mxu0  ;;  %v9111_v52 = vpop.f32.mrb[5].mxu1 }
 0x5b3   :  { %v9090_v53 = vadd.f32 %v9089_v51, %v9088_v49  ;;  %v9112_v48 = vadd.f32 %v9111_v52, %v9110_v50  ;;  %v9091_v54 = vpop.f32.mrb[6].mxu0  ;;  %v9113_v55 = vpop.f32.mrb[6].mxu1 }
 0x5b4   :  { %v9092_v56 = vpop.f32.mrb[7].mxu0  ;;  %v9114_v57 = vpop.f32.mrb[7].mxu1 }
 0x5b5   :  { %v7933_v58 = vadd.f32 %v9090_v53, %v9039_v45 }
 0x5b7   :  { %v7973_v59 = vadd.f32 %v9112_v48, %v7933_v58 }
 0x5b9   :  { %7978 = vst [vmem:[%s14190_s5] sm:$0xff] %v7973_v59 }

</bundles_post_ra>
